<compile_context>
chip_gen: v7x
topology: tpu7x:2x2x1
jax: 0.10.0
libtpu: 0.0.40
codegen_flags: <defaults>
</compile_context>

<pallas_src>
import jax
import jax.numpy as jnp
import numpy as np
from jax.experimental import pallas as pl
from jax.experimental.pallas import tpu as pltpu


def _round_up(x, m):
    return ((x + m - 1) // m) * m


# ----------------------------------------------------------------------------
# Fused kernel: conv1 -> conv2 -> fc -> merged actor/critic heads.
# Four lane-dense matmuls; intermediates never leave VMEM/vregs.
# ----------------------------------------------------------------------------
def _fused_forward_kernel(x_ref, w1_ref, b1_ref, w2_ref, b2_ref,
                          fcw_ref, fcb_ref, hw_ref, hb_ref, o_ref):
    f32 = jnp.float32
    wdt = w1_ref.dtype  # bf16 (production) or f32; casts below are no-ops for f32

    # conv1 (block-Toeplitz folded weight): (TB, Cin*H*W) @ (Cin*H*W, N1P)
    h = jnp.dot(x_ref[...], w1_ref[...], preferred_element_type=f32)
    h = jnp.maximum(h + b1_ref[...], 0.0)

    # conv2 + flatten(1) folded: (TB, N1P) @ (N1P, N2P)
    h = jnp.dot(h.astype(wdt), w2_ref[...], preferred_element_type=f32)
    h = jnp.maximum(h + b2_ref[...], 0.0)

    # fc + ReLU: (TB, N2P) @ (N2P, 256)
    h = jnp.dot(h.astype(wdt), fcw_ref[...], preferred_element_type=f32)
    h = jnp.maximum(h + fcb_ref[...], 0.0)

    # merged actor/critic heads, zero-padded to 128 lanes -> one full
    # unmasked (TB, 128) f32 store.
    out = jnp.dot(h.astype(wdt), hw_ref[...], preferred_element_type=f32)
    o_ref[...] = (out + hb_ref[...]).astype(o_ref.dtype)


def _call_fused(x_flat, fused, tb):
    b_pad, k_in = x_flat.shape
    nout = fused["head_w"].shape[1]

    def pinned(shape):
        # Weight blocks: same block index for every grid step -> loaded once,
        # VMEM-resident across the whole batch grid.
        return pl.BlockSpec(shape, lambda i: (0, 0))

    return pl.pallas_call(
        _fused_forward_kernel,
        out_shape=jax.ShapeDtypeStruct((b_pad, nout), jnp.float32),
        grid=(b_pad // tb,),
        in_specs=[
            pl.BlockSpec((tb, k_in), lambda i: (i, 0)),      # batch tile of x
            pinned(fused["w1"].shape), pinned(fused["b1"].shape),
            pinned(fused["w2"].shape), pinned(fused["b2"].shape),
            pinned(fused["fc_w"].shape), pinned(fused["fc_b"].shape),
            pinned(fused["head_w"].shape), pinned(fused["head_b"].shape),
        ],
        out_specs=pl.BlockSpec((tb, nout), lambda i: (i, 0)),
        compiler_params=pltpu.CompilerParams(
            dimension_semantics=("parallel",),
            vmem_limit_bytes=48 * 1024 * 1024,   # covers f32 weight mode too
        ),
    )(x_flat, fused["w1"], fused["b1"], fused["w2"], fused["b2"],
      fused["fc_w"], fused["fc_b"], fused["head_w"], fused["head_b"])


# ----------------------------------------------------------------------------
# Host-side (one-time) folding of conv layers into dense, lane-padded
# operators.  Batch-invariant: independent of the rollout batch size.
# ----------------------------------------------------------------------------
def prepare_fused_params(params, *, input_channels, image_shape, n_actions,
                         weight_dtype=jnp.bfloat16):
    H, W = image_shape
    k1, st1 = 8, 4
    k2, st2 = 4, 2
    c1 = params["conv1_w"].shape[0]            # 16
    c2 = params["conv2_w"].shape[0]            # 32
    nfc = params["fc_w"].shape[0]              # 256

    H1, W1 = (H - k1) // st1 + 1, (W - k1) // st1 + 1
    H2, W2 = (H1 - k2) // st2 + 1, (W1 - k2) // st2 + 1
    assert H1 > 0 and W1 > 0 and H2 > 0 and W2 > 0, "image too small for convs"
    n_pos1, n_pos2 = H1 * W1, H2 * W2
    flat2 = c2 * n_pos2
    assert params["fc_w"].shape[1] == flat2

    K_in = input_channels * H * W
    KP = _round_up(K_in, 128)                  # contraction dim, lane-padded
    N1 = n_pos1 * c1
    N1P = _round_up(N1, 128)                   # conv1 output width, lane-padded
    N2P = _round_up(flat2, 128)                # conv2/flatten width, lane-padded
    NFCP = _round_up(nfc, 128)
    NOUT = 128                                 # merged-head width (>= 2*n_actions)
    assert 2 * n_actions <= NOUT

    w1_np = np.asarray(params["conv1_w"], np.float32)   # (c1, Cin, 8, 8)
    w2_np = np.asarray(params["conv2_w"], np.float32)   # (c2, c1, 4, 4)

    # conv1 as block-Toeplitz: row = NCHW flat index of the input pixel,
    # column = (conv1 position p1, out-channel).  ~6% dense; MXU FLOPs are
    # free at these shapes, and it removes the whole host-side im2col.
    W1t = np.zeros((KP, N1P), np.float32)
    for hh in range(H1):
        for ww in range(W1):
            col0 = (hh * W1 + ww) * c1
            for c in range(input_channels):
                for ki in range(k1):
                    row0 = c * H * W + (hh * st1 + ki) * W + ww * st1
                    # rows row0 .. row0+k1-1 are the k1 contiguous pixels kj
                    W1t[row0:row0 + k1, col0:col0 + c1] = w1_np[:, c, ki, :].T
    b1_row = np.zeros((1, N1P), np.float32)
    b1_row[0, :N1] = np.tile(np.asarray(params["conv1_b"], np.float32), n_pos1)

    # conv2 + channel-major flatten(1) as one dense operator:
    # row = (conv1 position p1, channel c1), column = c2 * n_pos2 + p2
    # (exactly PyTorch's flatten order, so fc needs no permutation).
    W2c = np.zeros((N1P, N2P), np.float32)
    for hh2 in range(H2):
        for ww2 in range(W2):
            p2 = hh2 * W2 + ww2
            cols = np.arange(c2) * n_pos2 + p2
            for ki in range(k2):
                for kj in range(k2):
                    p1 = (hh2 * st2 + ki) * W1 + (ww2 * st2 + kj)
                    W2c[p1 * c1:(p1 + 1) * c1, cols] = w2_np[:, :, ki, kj].T
    b2_row = np.zeros((1, N2P), np.float32)
    b2_row[0, :flat2] = np.repeat(np.asarray(params["conv2_b"], np.float32), n_pos2)

    # fc: PyTorch (out, in) -> (in, out), zero-padded rows/cols.
    fc_mat = np.zeros((N2P, NFCP), np.float32)
    fc_mat[:flat2, :nfc] = np.asarray(params["fc_w"], np.float32).T
    fcb_row = np.zeros((1, NFCP), np.float32)
    fcb_row[0, :nfc] = np.asarray(params["fc_b"], np.float32)

    # merged actor/critic heads, zero-padded to NOUT lanes.
    head_w = np.zeros((NFCP, NOUT), np.float32)
    head_w[:nfc, :n_actions] = np.asarray(params["actor_w"], np.float32).T
    head_w[:nfc, n_actions:2 * n_actions] = np.asarray(params["critic_w"], np.float32).T
    head_b = np.zeros((1, NOUT), np.float32)
    head_b[0, :n_actions] = np.asarray(params["actor_b"], np.float32)
    head_b[0, n_actions:2 * n_actions] = np.asarray(params["critic_b"], np.float32)

    wdt = weight_dtype
    return dict(
        w1=jnp.asarray(W1t, wdt), b1=jnp.asarray(b1_row, jnp.float32),
        w2=jnp.asarray(W2c, wdt), b2=jnp.asarray(b2_row, jnp.float32),
        fc_w=jnp.asarray(fc_mat, wdt), fc_b=jnp.asarray(fcb_row, jnp.float32),
        head_w=jnp.asarray(head_w, wdt), head_b=jnp.asarray(head_b, jnp.float32),
        k_in=K_in, k_in_pad=KP, n_actions=n_actions,
        input_channels=input_channels, image_shape=(H, W),
    )


# ----------------------------------------------------------------------------
# Forward.  Host-side preprocessing is a single reshape (+ optional pad);
# batch is tiled over the kernel grid, so any batch size works.
# ----------------------------------------------------------------------------
def conv_actor_critic_forward(x, fused, compute_policy=True, compute_value=True):
    """x: (B, Cin, H, W) float32 (PyTorch NCHW). Returns (value, policy_logits)."""
    B = x.shape[0]
    assert x.shape[1] * x.shape[2] * x.shape[3] == fused["k_in"]
    na = fused["n_actions"]

    tb = min(128, _round_up(B, 8))
    b_pad = _round_up(B, tb)
    kp = fused["k_in_pad"]

    x_flat = x.reshape(B, -1).astype(fused["w1"].dtype)
    if b_pad != B or kp != fused["k_in"]:
        x_flat = jnp.pad(x_flat, ((0, b_pad - B), (0, kp - fused["k_in"])))

    out = _call_fused(x_flat, fused, tb)                  # (b_pad, 128) f32
    policy_logits = out[:B, :na] if compute_policy else None
    value = out[:B, na:2 * na] if compute_value else None
    return value, policy_logits


# ----------------------------------------------------------------------------
# Deterministic parameter construction (PyTorch Conv2d/Linear weight shapes)
# ----------------------------------------------------------------------------
def make_params(key, input_channels, image_shape, n_actions):
    H, W = image_shape
    h1 = (H - 8) // 4 + 1
    w1 = (W - 8) // 4 + 1
    h2 = (h1 - 4) // 2 + 1
    w2 = (w1 - 4) // 2 + 1
    flat = 32 * h2 * w2

    ks = jax.random.split(key, 10)

    def init(k, shape, fan_in):
        bound = 1.0 / jnp.sqrt(fan_in)
        return jax.random.uniform(k, shape, jnp.float32, -bound, bound)

    return {
        "conv1_w": init(ks[0], (16, input_channels, 8, 8), input_channels * 64),
        "conv1_b": init(ks[1], (16,), input_channels * 64),
        "conv2_w": init(ks[2], (32, 16, 4, 4), 16 * 16),
        "conv2_b": init(ks[3], (32,), 16 * 16),
        "fc_w":    init(ks[4], (256, flat), flat),
        "fc_b":    init(ks[5], (256,), flat),
        "actor_w": init(ks[6], (n_actions, 256), 256),
        "actor_b": init(ks[7], (n_actions,), 256),
        "critic_w": init(ks[8], (n_actions, 256), 256),
        "critic_b": init(ks[9], (n_actions,), 256),
    }


def _reference_forward(x, params):
    hp = jax.lax.Precision.HIGHEST
    dn = ("NCHW", "OIHW", "NCHW")
    h = jax.lax.conv_general_dilated(x, params["conv1_w"], (4, 4), "VALID",
                                     dimension_numbers=dn, precision=hp)
    h = jax.nn.relu(h + params["conv1_b"][None, :, None, None])
    h = jax.lax.conv_general_dilated(h, params["conv2_w"], (2, 2), "VALID",
                                     dimension_numbers=dn, precision=hp)
    h = jax.nn.relu(h + params["conv2_b"][None, :, None, None])
    h = h.reshape(h.shape[0], -1)
    h = jax.nn.relu(jnp.dot(h, params["fc_w"].T, precision=hp) + params["fc_b"])
    logits = jnp.dot(h, params["actor_w"].T, precision=hp) + params["actor_b"]
    value = jnp.dot(h, params["critic_w"].T, precision=hp) + params["critic_b"]
    return value, logits


if __name__ == "__main__":
    key = jax.random.PRNGKey(0)
    k_params, k_x = jax.random.split(key)

    batch = 2
    input_channels = 4
    image_shape = (32, 32)   # smallest clean size valid for the 8/s4 then 4/s2 convs
    n_actions = 6

    params = make_params(k_params, input_channels, image_shape, n_actions)
    x = jax.random.normal(k_x, (batch, input_channels, *image_shape), jnp.float32)

    # bf16 static operators = the deliberate v6e/v7x fast path (f32 accumulate);
    # pass weight_dtype=jnp.float32 for a bit-exact-style f32 path.
    fused = prepare_fused_params(params, input_channels=input_channels,
                                 image_shape=image_shape, n_actions=n_actions,
                                 weight_dtype=jnp.bfloat16)

    @jax.jit
    def fwd(inp):
        return conv_actor_critic_forward(inp, fused)

    value, policy_logits = fwd(x)
    value = jax.block_until_ready(value)
    policy_logits = jax.block_until_ready(policy_logits)

    assert value.shape == (batch, n_actions)
    assert policy_logits.shape == (batch, n_actions)

    # Numerical check against a plain-XLA reference of the module.  Tolerance
    # 1e-2 bounds the *deliberate* bf16-weight quantization of the folded
    # operators (measured error at these shapes is well below this); with
    # weight_dtype=jnp.float32 the kernel tracks the reference far tighter.
    v_ref, p_ref = _reference_forward(x, params)
    assert jnp.allclose(value, v_ref, atol=1e-2, rtol=1e-2)
    assert jnp.allclose(policy_logits, p_ref, atol=1e-2, rtol=1e-2)

    print("KERNEL_OK")
</pallas_src>

<mosaic_0001>
module attributes {stable_mosaic.version = 11 : i64} {
  func.func @_fused_forward_kernel(%arg0: i32, %arg1: memref<8x4096xbf16, #tpu.memory_space<vmem>>, %arg2: memref<4096x896xbf16, #tpu.memory_space<vmem>>, %arg3: memref<1x896xf32, #tpu.memory_space<vmem>>, %arg4: memref<896x128xbf16, #tpu.memory_space<vmem>>, %arg5: memref<1x128xf32, #tpu.memory_space<vmem>>, %arg6: memref<128x256xbf16, #tpu.memory_space<vmem>>, %arg7: memref<1x256xf32, #tpu.memory_space<vmem>>, %arg8: memref<256x128xbf16, #tpu.memory_space<vmem>>, %arg9: memref<1x128xf32, #tpu.memory_space<vmem>>, %arg10: memref<8x128xf32, #tpu.memory_space<vmem>>) attributes {dimension_semantics = [#tpu.dimension_semantics<parallel>], iteration_bounds = array<i64: 1>, scalar_prefetch = 0 : i64, scratch_operands = 0 : i64, tpu.core_type = #tpu.core_type<tc>, window_params = [{transform_indices = @transform_0, window_bounds = array<i64: 8, 4096>}, {pipeline_mode = #tpu.pipeline_mode<synchronous>, transform_indices = @transform_1, window_bounds = array<i64: 4096, 896>}, {pipeline_mode = #tpu.pipeline_mode<synchronous>, transform_indices = @transform_2, window_bounds = array<i64: 1, 896>}, {pipeline_mode = #tpu.pipeline_mode<synchronous>, transform_indices = @transform_3, window_bounds = array<i64: 896, 128>}, {pipeline_mode = #tpu.pipeline_mode<synchronous>, transform_indices = @transform_4, window_bounds = array<i64: 1, 128>}, {pipeline_mode = #tpu.pipeline_mode<synchronous>, transform_indices = @transform_5, window_bounds = array<i64: 128, 256>}, {pipeline_mode = #tpu.pipeline_mode<synchronous>, transform_indices = @transform_6, window_bounds = array<i64: 1, 256>}, {pipeline_mode = #tpu.pipeline_mode<synchronous>, transform_indices = @transform_7, window_bounds = array<i64: 256, 128>}, {pipeline_mode = #tpu.pipeline_mode<synchronous>, transform_indices = @transform_8, window_bounds = array<i64: 1, 128>}, {transform_indices = @transform_9, window_bounds = array<i64: 8, 128>}]} {
    %c0 = arith.constant 0 : index
    %c0_0 = arith.constant 0 : index
    %0 = vector.load %arg1[%c0, %c0_0] : memref<8x4096xbf16, #tpu.memory_space<vmem>>, vector<8x4096xbf16>
    %c0_1 = arith.constant 0 : index
    %c0_2 = arith.constant 0 : index
    %1 = vector.load %arg2[%c0_1, %c0_2] : memref<4096x896xbf16, #tpu.memory_space<vmem>>, vector<4096x896xbf16>
    %cst = arith.constant dense<0.000000e+00> : vector<8x896xf32>
    %2 = tpu.matmul %0, %1, %cst {dimension_numbers = #tpu.dot_dimension_numbers<[1], [0], [0], [1], [0, 0, 1, 1], [], []>} : vector<8x4096xbf16>, vector<4096x896xbf16>, vector<8x896xf32> -> vector<8x896xf32>
    %c0_3 = arith.constant 0 : index
    %c0_4 = arith.constant 0 : index
    %3 = vector.load %arg3[%c0_3, %c0_4] : memref<1x896xf32, #tpu.memory_space<vmem>>, vector<1x896xf32>
    %4 = vector.broadcast %3 : vector<1x896xf32> to vector<8x896xf32>
    %5 = arith.addf %2, %4 : vector<8x896xf32>
    %cst_5 = arith.constant 0.000000e+00 : f32
    %6 = vector.broadcast %cst_5 : f32 to vector<8x896xf32>
    %7 = arith.maximumf %5, %6 : vector<8x896xf32>
    %8 = arith.truncf %7 : vector<8x896xf32> to vector<8x896xbf16>
    %c0_6 = arith.constant 0 : index
    %c0_7 = arith.constant 0 : index
    %9 = vector.load %arg4[%c0_6, %c0_7] : memref<896x128xbf16, #tpu.memory_space<vmem>>, vector<896x128xbf16>
    %cst_8 = arith.constant dense<0.000000e+00> : vector<8x128xf32>
    %10 = tpu.matmul %8, %9, %cst_8 {dimension_numbers = #tpu.dot_dimension_numbers<[1], [0], [0], [1], [0, 0, 1, 1], [], []>} : vector<8x896xbf16>, vector<896x128xbf16>, vector<8x128xf32> -> vector<8x128xf32>
    %c0_9 = arith.constant 0 : index
    %c0_10 = arith.constant 0 : index
    %11 = vector.load %arg5[%c0_9, %c0_10] : memref<1x128xf32, #tpu.memory_space<vmem>>, vector<1x128xf32>
    %12 = vector.broadcast %11 : vector<1x128xf32> to vector<8x128xf32>
    %13 = arith.addf %10, %12 : vector<8x128xf32>
    %cst_11 = arith.constant 0.000000e+00 : f32
    %14 = vector.broadcast %cst_11 : f32 to vector<8x128xf32>
    %15 = arith.maximumf %13, %14 : vector<8x128xf32>
    %16 = arith.truncf %15 : vector<8x128xf32> to vector<8x128xbf16>
    %c0_12 = arith.constant 0 : index
    %c0_13 = arith.constant 0 : index
    %17 = vector.load %arg6[%c0_12, %c0_13] : memref<128x256xbf16, #tpu.memory_space<vmem>>, vector<128x256xbf16>
    %cst_14 = arith.constant dense<0.000000e+00> : vector<8x256xf32>
    %18 = tpu.matmul %16, %17, %cst_14 {dimension_numbers = #tpu.dot_dimension_numbers<[1], [0], [0], [1], [0, 0, 1, 1], [], []>} : vector<8x128xbf16>, vector<128x256xbf16>, vector<8x256xf32> -> vector<8x256xf32>
    %c0_15 = arith.constant 0 : index
    %c0_16 = arith.constant 0 : index
    %19 = vector.load %arg7[%c0_15, %c0_16] : memref<1x256xf32, #tpu.memory_space<vmem>>, vector<1x256xf32>
    %20 = vector.broadcast %19 : vector<1x256xf32> to vector<8x256xf32>
    %21 = arith.addf %18, %20 : vector<8x256xf32>
    %cst_17 = arith.constant 0.000000e+00 : f32
    %22 = vector.broadcast %cst_17 : f32 to vector<8x256xf32>
    %23 = arith.maximumf %21, %22 : vector<8x256xf32>
    %24 = arith.truncf %23 : vector<8x256xf32> to vector<8x256xbf16>
    %c0_18 = arith.constant 0 : index
    %c0_19 = arith.constant 0 : index
    %25 = vector.load %arg8[%c0_18, %c0_19] : memref<256x128xbf16, #tpu.memory_space<vmem>>, vector<256x128xbf16>
    %cst_20 = arith.constant dense<0.000000e+00> : vector<8x128xf32>
    %26 = tpu.matmul %24, %25, %cst_20 {dimension_numbers = #tpu.dot_dimension_numbers<[1], [0], [0], [1], [0, 0, 1, 1], [], []>} : vector<8x256xbf16>, vector<256x128xbf16>, vector<8x128xf32> -> vector<8x128xf32>
    %c0_21 = arith.constant 0 : index
    %c0_22 = arith.constant 0 : index
    %27 = vector.load %arg9[%c0_21, %c0_22] : memref<1x128xf32, #tpu.memory_space<vmem>>, vector<1x128xf32>
    %28 = vector.broadcast %27 : vector<1x128xf32> to vector<8x128xf32>
    %29 = arith.addf %26, %28 : vector<8x128xf32>
    %c0_23 = arith.constant 0 : index
    %c0_24 = arith.constant 0 : index
    %30 = vector.load %arg10[%c0_23, %c0_24] : memref<8x128xf32, #tpu.memory_space<vmem>>, vector<8x128xf32>
    tpu.vector_store %arg10[%c0_23, %c0_24], %29 {strides = array<i32>} : memref<8x128xf32, #tpu.memory_space<vmem>>, vector<8x128xf32>,
    return
  }
  func.func @transform_0(%arg0: i32) -> (i32, i32) {
    %c0_i32 = arith.constant 0 : i32
    %c0_i32_0 = arith.constant 0 : i32
    return %arg0, %c0_i32 : i32, i32
  }
  func.func @transform_1(%arg0: i32) -> (i32, i32) {
    %c0_i32 = arith.constant 0 : i32
    %c0_i32_0 = arith.constant 0 : i32
    %c0_i32_1 = arith.constant 0 : i32
    return %c0_i32, %c0_i32_0 : i32, i32
  }
  func.func @transform_2(%arg0: i32) -> (i32, i32) {
    %c0_i32 = arith.constant 0 : i32
    %c0_i32_0 = arith.constant 0 : i32
    %c0_i32_1 = arith.constant 0 : i32
    return %c0_i32, %c0_i32_0 : i32, i32
  }
  func.func @transform_3(%arg0: i32) -> (i32, i32) {
    %c0_i32 = arith.constant 0 : i32
    %c0_i32_0 = arith.constant 0 : i32
    %c0_i32_1 = arith.constant 0 : i32
    return %c0_i32, %c0_i32_0 : i32, i32
  }
  func.func @transform_4(%arg0: i32) -> (i32, i32) {
    %c0_i32 = arith.constant 0 : i32
    %c0_i32_0 = arith.constant 0 : i32
    %c0_i32_1 = arith.constant 0 : i32
    return %c0_i32, %c0_i32_0 : i32, i32
  }
  func.func @transform_5(%arg0: i32) -> (i32, i32) {
    %c0_i32 = arith.constant 0 : i32
    %c0_i32_0 = arith.constant 0 : i32
    %c0_i32_1 = arith.constant 0 : i32
    return %c0_i32, %c0_i32_0 : i32, i32
  }
  func.func @transform_6(%arg0: i32) -> (i32, i32) {
    %c0_i32 = arith.constant 0 : i32
    %c0_i32_0 = arith.constant 0 : i32
    %c0_i32_1 = arith.constant 0 : i32
    return %c0_i32, %c0_i32_0 : i32, i32
  }
  func.func @transform_7(%arg0: i32) -> (i32, i32) {
    %c0_i32 = arith.constant 0 : i32
    %c0_i32_0 = arith.constant 0 : i32
    %c0_i32_1 = arith.constant 0 : i32
    return %c0_i32, %c0_i32_0 : i32, i32
  }
  func.func @transform_8(%arg0: i32) -> (i32, i32) {
    %c0_i32 = arith.constant 0 : i32
    %c0_i32_0 = arith.constant 0 : i32
    %c0_i32_1 = arith.constant 0 : i32
    return %c0_i32, %c0_i32_0 : i32, i32
  }
  func.func @transform_9(%arg0: i32) -> (i32, i32) {
    %c0_i32 = arith.constant 0 : i32
    %c0_i32_0 = arith.constant 0 : i32
    return %arg0, %c0_i32 : i32, i32
  }
}

</mosaic_0001>

<bundles_post_ra>
// kernel: fwd.1
= control target key start
LH: loop header
LB: loop body
LE: loop exit
PB: predicated region body
PF: predicated region fallthrough
CT: control target
= control target key end

     0   :  { %vm20295_vm0 = vmmov 0   ;;  %s26397_s1 = inlined_call_operand.vmem [shape: bf16[4096,896], index: 1, kind: input, shape index: {}]   ;;  %s26398_s0 = inlined_call_operand.vmem [shape: bf16[8,4096], index: 0, kind: input, shape index: {}]   ;;  %s26399_s2 = inlined_call_operand.vmem [shape: f32[1,896], index: 2, kind: input, shape index: {}]   ;;  %s26400_s3 = inlined_call_operand.vmem [shape: bf16[896,128], index: 3, kind: input, shape index: {}]   ;;  %s26401_s4 = inlined_call_operand.vmem [shape: f32[1,128], index: 4, kind: input, shape index: {}]   ;;  %s26402_s5 = inlined_call_operand.vmem [shape: bf16[128,256], index: 5, kind: input, shape index: {}]   ;;  %s26403_s7 = inlined_call_operand.vmem [shape: bf16[256,128], index: 7, kind: input, shape index: {}]   ;;  %s26404_s6 = inlined_call_operand.vmem [shape: f32[1,256], index: 6, kind: input, shape index: {}]   ;;  %s26405_s8 = inlined_call_operand.vmem [shape: f32[1,128], index: 8, kind: input, shape index: {}]   ;;  %s26406_s9 = inlined_call_operand.vmem [shape: f32[8,128], index: 9, kind: output, shape index: {}]  }
   0x1   :  { %v17604_v0 = vld [vmem:[%s26397_s1 + $0x4] ss:$28 sps:$4 sm:$0xff]   ;;  %v17610_v4 = vld [vmem:[%s26397_s1 + $0x3c] ss:$28 sps:$4 sm:$0xff]   ;;  %v17616_v8 = vld [vmem:[%s26397_s1 + $0x74] ss:$28 sps:$4 sm:$0xff]  }
   0x2   :  { %v17606_v1 = vld [vmem:[%s26397_s1 + $0x704] ss:$28 sps:$4 sm:$0xff]   ;;  %11462 = vmatprep.subr.bf16.mxu1 %v17604_v0  ;;  %v17612_v5 = vld [vmem:[%s26397_s1 + $0x73c] ss:$28 sps:$4 sm:$0xff]   ;;  %v17618_v9 = vld [vmem:[%s26397_s1 + $0x774] ss:$28 sps:$4 sm:$0xff]  }
   0x3   :  { %v17608_v2 = vld [vmem:[%s26397_s1] ss:$28 sps:$4 sm:$0xff]   ;;  %11544 = vmatprep.subr.bf16.mxu0 %v17606_v1  ;;  %v17614_v6 = vld [vmem:[%s26397_s1 + $0x38] ss:$28 sps:$4 sm:$0xff]   ;;  %v17620_v10 = vld [vmem:[%s26397_s1 + $0x70] ss:$28 sps:$4 sm:$0xff]  }
   0x4   :  { %v17609_v3 = vld [vmem:[%s26397_s1 + $0x700] ss:$28 sps:$4 sm:$0xff]   ;;  %11463 = vmatpush1.bf16.msra.mxu1 %v17608_v2  ;;  %v17615_v7 = vld [vmem:[%s26397_s1 + $0x738] ss:$28 sps:$4 sm:$0xff]   ;;  %v17621_v11 = vld [vmem:[%s26397_s1 + $0x770] ss:$28 sps:$4 sm:$0xff]  }
   0x5   :  { %11545 = vmatpush1.bf16.msra.mxu0 %v17609_v3  ;;  %11464 = vmatprep.subr.bf16.mxu1 %v17610_v4  ;;  %v17622_v12 = vld [vmem:[%s26397_s1 + $0xac] ss:$28 sps:$4 sm:$0xff]   ;;  %v17628_v16 = vld [vmem:[%s26397_s1 + $0xe4] ss:$28 sps:$4 sm:$0xff]   ;;  %v17634_v20 = vld [vmem:[%s26397_s1 + $0x11c] ss:$28 sps:$4 sm:$0xff]  }
   0x6   :  { %11546 = vmatprep.subr.bf16.mxu0 %v17612_v5  ;;  %v17624_v13 = vld [vmem:[%s26397_s1 + $0x7ac] ss:$28 sps:$4 sm:$0xff]   ;;  %v17630_v17 = vld [vmem:[%s26397_s1 + $0x7e4] ss:$28 sps:$4 sm:$0xff]   ;;  %v17636_v21 = vld [vmem:[%s26397_s1 + $0x81c] ss:$28 sps:$4 sm:$0xff]  }
   0x7   :  { %v17626_v14 = vld [vmem:[%s26397_s1 + $0xa8] ss:$28 sps:$4 sm:$0xff]   ;;  %v17632_v18 = vld [vmem:[%s26397_s1 + $0xe0] ss:$28 sps:$4 sm:$0xff]   ;;  %v17638_v22 = vld [vmem:[%s26397_s1 + $0x118] ss:$28 sps:$4 sm:$0xff]  }
   0x8   :  { %11465 = vmatpush1.bf16.msra.mxu1 %v17614_v6  ;;  %v17627_v15 = vld [vmem:[%s26397_s1 + $0x7a8] ss:$28 sps:$4 sm:$0xff]   ;;  %v17633_v19 = vld [vmem:[%s26397_s1 + $0x7e0] ss:$28 sps:$4 sm:$0xff]   ;;  %v17639_v23 = vld [vmem:[%s26397_s1 + $0x818] ss:$28 sps:$4 sm:$0xff]  }
   0x9   :  { %11547 = vmatpush1.bf16.msra.mxu0 %v17615_v7  ;;  %11466 = vmatprep.subr.bf16.mxu1 %v17616_v8  ;;  %v17640_v24 = vld [vmem:[%s26397_s1 + $0x154] ss:$28 sps:$4 sm:$0xff]   ;;  %v17646_v28 = vld [vmem:[%s26397_s1 + $0x18c] ss:$28 sps:$4 sm:$0xff]   ;;  %v17652_v32 = vld [vmem:[%s26397_s1 + $0x1c4] ss:$28 sps:$4 sm:$0xff]  }
   0xa   :  { %11548 = vmatprep.subr.bf16.mxu0 %v17618_v9  ;;  %v17642_v25 = vld [vmem:[%s26397_s1 + $0x854] ss:$28 sps:$4 sm:$0xff]   ;;  %v17648_v29 = vld [vmem:[%s26397_s1 + $0x88c] ss:$28 sps:$4 sm:$0xff]   ;;  %v17654_v33 = vld [vmem:[%s26397_s1 + $0x8c4] ss:$28 sps:$4 sm:$0xff]  }
   0xb   :  { %v17644_v26 = vld [vmem:[%s26397_s1 + $0x150] ss:$28 sps:$4 sm:$0xff]   ;;  %v17650_v30 = vld [vmem:[%s26397_s1 + $0x188] ss:$28 sps:$4 sm:$0xff]   ;;  %v17656_v34 = vld [vmem:[%s26397_s1 + $0x1c0] ss:$28 sps:$4 sm:$0xff]  }
   0xc   :  { %11467 = vmatpush1.bf16.msra.mxu1 %v17620_v10  ;;  %v17645_v27 = vld [vmem:[%s26397_s1 + $0x850] ss:$28 sps:$4 sm:$0xff]   ;;  %v17651_v31 = vld [vmem:[%s26397_s1 + $0x888] ss:$28 sps:$4 sm:$0xff]   ;;  %v17657_v35 = vld [vmem:[%s26397_s1 + $0x8c0] ss:$28 sps:$4 sm:$0xff]  }
   0xd   :  { %11549 = vmatpush1.bf16.msra.mxu0 %v17621_v11  ;;  %11468 = vmatprep.subr.bf16.mxu1 %v17622_v12  ;;  %v17658_v36 = vld [vmem:[%s26397_s1 + $0x1fc] ss:$28 sps:$4 sm:$0xff]   ;;  %v17664_v40 = vld [vmem:[%s26397_s1 + $0x234] ss:$28 sps:$4 sm:$0xff]   ;;  %v17670_v44 = vld [vmem:[%s26397_s1 + $0x26c] ss:$28 sps:$4 sm:$0xff]  }
   0xe   :  { %11550 = vmatprep.subr.bf16.mxu0 %v17624_v13  ;;  %v17660_v37 = vld [vmem:[%s26397_s1 + $0x8fc] ss:$28 sps:$4 sm:$0xff]   ;;  %v17666_v41 = vld [vmem:[%s26397_s1 + $0x934] ss:$28 sps:$4 sm:$0xff]   ;;  %v17672_v45 = vld [vmem:[%s26397_s1 + $0x96c] ss:$28 sps:$4 sm:$0xff]  }
   0xf   :  { %v17662_v38 = vld [vmem:[%s26397_s1 + $0x1f8] ss:$28 sps:$4 sm:$0xff]   ;;  %v17668_v42 = vld [vmem:[%s26397_s1 + $0x230] ss:$28 sps:$4 sm:$0xff]   ;;  %v33_v46 = vld [vmem:[%s26398_s0] sm:$0xff] }
  0x10   :  { %11469 = vmatpush1.bf16.msra.mxu1 %v17626_v14  ;;  %v17663_v39 = vld [vmem:[%s26397_s1 + $0x8f8] ss:$28 sps:$4 sm:$0xff]   ;;  %v17669_v43 = vld [vmem:[%s26397_s1 + $0x930] ss:$28 sps:$4 sm:$0xff]   ;;  %v17674_v47 = vld [vmem:[%s26397_s1 + $0x268] ss:$28 sps:$4 sm:$0xff]   ;;  %v20491_v48 = vcombine.high %v33_v46, %v33_v46  ;;  %v20557_v6 = vcombine.low %v33_v46, %v33_v46 }
  0x11   :  { %11551 = vmatpush1.bf16.msra.mxu0 %v17627_v15  ;;  %11470 = vmatprep.subr.bf16.mxu1 %v17628_v16  ;;  %v17675_v49 = vld [vmem:[%s26397_s1 + $0x968] ss:$28 sps:$4 sm:$0xff]   ;;  %v35_v50 = vld [vmem:[%s26398_s0 + $0x10] sm:$0xff]  ;;  %v17680_v54 = vld [vmem:[%s26397_s1 + $0x2a0] ss:$28 sps:$4 sm:$0xff]  }
  0x12   :  { %11552 = vmatprep.subr.bf16.mxu0 %v17630_v17  ;;  %v17676_v51 = vld [vmem:[%s26397_s1 + $0x2a4] ss:$28 sps:$4 sm:$0xff]   ;;  %v20505_v53 = vcombine.high %v35_v50, %v35_v50  ;;  %11494 = vmatprep.mubr.bf16.mxu1 %v20491_v48  ;;  %v17682_v56 = vld [vmem:[%s26397_s1 + $0x2dc] ss:$28 sps:$4 sm:$0xff]   ;;  %v17688_v60 = vld [vmem:[%s26397_s1 + $0x314] ss:$28 sps:$4 sm:$0xff]   ;;  %v20559_v7 = vcombine.low %v35_v50, %v35_v50 }
  0x13   :  { %v17678_v52 = vld [vmem:[%s26397_s1 + $0x9a4] ss:$28 sps:$4 sm:$0xff]   ;;  %v17684_v57 = vld [vmem:[%s26397_s1 + $0x9dc] ss:$28 sps:$4 sm:$0xff]   ;;  %v17690_v61 = vld [vmem:[%s26397_s1 + $0xa14] ss:$28 sps:$4 sm:$0xff]  }
  0x14   :  { %11471 = vmatpush1.bf16.msra.mxu1 %v17632_v18  ;;  %11576 = vmatprep.mubr.bf16.mxu0 %v20505_v53  ;;  %v17681_v55 = vld [vmem:[%s26397_s1 + $0x9a0] ss:$28 sps:$4 sm:$0xff]   ;;  %v17686_v58 = vld [vmem:[%s26397_s1 + $0x2d8] ss:$28 sps:$4 sm:$0xff]   ;;  %v17692_v62 = vld [vmem:[%s26397_s1 + $0x310] ss:$28 sps:$4 sm:$0xff]  }
  0x15   :  { %11553 = vmatpush1.bf16.msra.mxu0 %v17633_v19  ;;  %11472 = vmatprep.subr.bf16.mxu1 %v17634_v20  ;;  %v17687_v59 = vld [vmem:[%s26397_s1 + $0x9d8] ss:$28 sps:$4 sm:$0xff]   ;;  %v17693_v63 = vld [vmem:[%s26397_s1 + $0xa10] ss:$28 sps:$4 sm:$0xff]   ;;  %v17698_v2 = vld [vmem:[%s26397_s1 + $0x348] ss:$28 sps:$4 sm:$0xff]  }
  0x16   :  { %11554 = vmatprep.subr.bf16.mxu0 %v17636_v21  ;;  %v17694_v0 = vld [vmem:[%s26397_s1 + $0x34c] ss:$28 sps:$4 sm:$0xff]   ;;  %v17703_v4 = vld [vmem:[%s26397_s1 + $0x384] ss:$28 sps:$4 sm:$0xff]   ;;  %v17712_v10 = vld [vmem:[%s26397_s1 + $0x3bc] ss:$28 sps:$4 sm:$0xff]  }
  0x17   :  { %v17696_v1 = vld [vmem:[%s26397_s1 + $0xa4c] ss:$28 sps:$4 sm:$0xff]   ;;  %v17707_v5 = vld [vmem:[%s26397_s1 + $0xa84] ss:$28 sps:$4 sm:$0xff]   ;;  %v17715_v11 = vld [vmem:[%s26397_s1 + $0xabc] ss:$28 sps:$4 sm:$0xff]  }
  0x18   :  { %11473 = vmatpush1.bf16.msra.mxu1 %v17638_v22  ;;  %v17699_v3 = vld [vmem:[%s26397_s1 + $0xa48] ss:$28 sps:$4 sm:$0xff]   ;;  %v17701_v8 = vld [vmem:[%s26397_s1 + $0x380] ss:$28 sps:$4 sm:$0xff]   ;;  %v17710_v12 = vld [vmem:[%s26397_s1 + $0x3b8] ss:$28 sps:$4 sm:$0xff]  }
  0x19   :  { %11555 = vmatpush1.bf16.msra.mxu0 %v17639_v23  ;;  %11474 = vmatprep.subr.bf16.mxu1 %v17640_v24  ;;  %v17705_v9 = vld [vmem:[%s26397_s1 + $0xa80] ss:$28 sps:$4 sm:$0xff]   ;;  %v17713_v13 = vld [vmem:[%s26397_s1 + $0xab8] ss:$28 sps:$4 sm:$0xff]   ;;  %v17716_v16 = vld [vmem:[%s26397_s1 + $0x3f0] ss:$28 sps:$4 sm:$0xff]  }
  0x1a   :  { %11556 = vmatprep.subr.bf16.mxu0 %v17642_v25  ;;  %v17718_v14 = vld [vmem:[%s26397_s1 + $0x3f4] ss:$28 sps:$4 sm:$0xff]   ;;  %v17724_v18 = vld [vmem:[%s26397_s1 + $0x42c] ss:$28 sps:$4 sm:$0xff]   ;;  %v17730_v22 = vld [vmem:[%s26397_s1 + $0x464] ss:$28 sps:$4 sm:$0xff]  }
  0x1b   :  { %v17721_v15 = vld [vmem:[%s26397_s1 + $0xaf4] ss:$28 sps:$4 sm:$0xff]   ;;  %v17727_v19 = vld [vmem:[%s26397_s1 + $0xb2c] ss:$28 sps:$4 sm:$0xff]   ;;  %v17733_v23 = vld [vmem:[%s26397_s1 + $0xb64] ss:$28 sps:$4 sm:$0xff]  }
  0x1c   :  { %11475 = vmatpush1.bf16.msra.mxu1 %v17644_v26  ;;  %v17719_v17 = vld [vmem:[%s26397_s1 + $0xaf0] ss:$28 sps:$4 sm:$0xff]   ;;  %v17722_v20 = vld [vmem:[%s26397_s1 + $0x428] ss:$28 sps:$4 sm:$0xff]   ;;  %v17728_v24 = vld [vmem:[%s26397_s1 + $0x460] ss:$28 sps:$4 sm:$0xff]  }
  0x1d   :  { %11557 = vmatpush1.bf16.msra.mxu0 %v17645_v27  ;;  %11476 = vmatprep.subr.bf16.mxu1 %v17646_v28  ;;  %v17725_v21 = vld [vmem:[%s26397_s1 + $0xb28] ss:$28 sps:$4 sm:$0xff]   ;;  %v17731_v25 = vld [vmem:[%s26397_s1 + $0xb60] ss:$28 sps:$4 sm:$0xff]   ;;  %v17734_v28 = vld [vmem:[%s26397_s1 + $0x498] ss:$28 sps:$4 sm:$0xff]  }
  0x1e   :  { %11558 = vmatprep.subr.bf16.mxu0 %v17648_v29  ;;  %v17736_v26 = vld [vmem:[%s26397_s1 + $0x49c] ss:$28 sps:$4 sm:$0xff]  }
  0x1f   :  { %v17739_v27 = vld [vmem:[%s26397_s1 + $0xb9c] ss:$28 sps:$4 sm:$0xff]  }
  0x20   :  { %11477 = vmatpush1.bf16.msra.mxu1 %v17650_v30  ;;  %v17737_v29 = vld [vmem:[%s26397_s1 + $0xb98] ss:$28 sps:$4 sm:$0xff]  }
  0x21   :  { %11559 = vmatpush1.bf16.msra.mxu0 %v17651_v31  ;;  %11478 = vmatprep.subr.bf16.mxu1 %v17652_v32  ;;  %v17742_v30 = vld [vmem:[%s26397_s1 + $0x4d4] ss:$28 sps:$4 sm:$0xff]   ;;  %v20638_v32 = vld [vmem:[%s26398_s0 + $0x8] sm:$0xff]  ;;  %v17760_v46 = vld [vmem:[%s26397_s1 + $0x57c] ss:$28 sps:$4 sm:$0xff]  }
  0x22   :  { %11560 = vmatprep.subr.bf16.mxu0 %v17654_v33  ;;  %v17745_v31 = vld [vmem:[%s26397_s1 + $0xbd4] ss:$28 sps:$4 sm:$0xff]   ;;  %v20643_v33 = vld [vmem:[%s26398_s0 + $0x18] sm:$0xff] }
  0x23   :  { %v17761_v50 = vld [vmem:[%s26397_s1 + $0xc78] ss:$28 sps:$4 sm:$0xff]  }
  0x24   :  { %11479 = vmatpush1.bf16.msra.mxu1 %v17656_v34  ;;  %v17740_v34 = vld [vmem:[%s26397_s1 + $0x4d0] ss:$28 sps:$4 sm:$0xff]  }
  0x25   :  { %11561 = vmatpush1.bf16.msra.mxu0 %v17657_v35  ;;  %11480 = vmatprep.subr.bf16.mxu1 %v17658_v36  ;;  %v17743_v35 = vld [vmem:[%s26397_s1 + $0xbd0] ss:$28 sps:$4 sm:$0xff]   ;;  %v20653_v36 = vcombine.high %v20638_v32, %v20638_v32 }
  0x26   :  { %11562 = vmatprep.subr.bf16.mxu0 %v17660_v37  ;;  %v20657_v37 = vcombine.high %v20643_v33, %v20643_v33 }
  0x28   :  { %11481 = vmatpush1.bf16.msra.mxu1 %v17662_v38  ;;  %v17748_v38 = vld [vmem:[%s26397_s1 + $0x50c] ss:$28 sps:$4 sm:$0xff]  }
  0x29   :  { %11563 = vmatpush1.bf16.msra.mxu0 %v17663_v39  ;;  %11482 = vmatprep.subr.bf16.mxu1 %v17664_v40  ;;  %v17751_v39 = vld [vmem:[%s26397_s1 + $0xc0c] ss:$28 sps:$4 sm:$0xff]  }
  0x2a   :  { %11564 = vmatprep.subr.bf16.mxu0 %v17666_v41  ;;  %v17746_v40 = vld [vmem:[%s26397_s1 + $0x508] ss:$28 sps:$4 sm:$0xff]  }
  0x2b   :  { %v17749_v41 = vld [vmem:[%s26397_s1 + $0xc08] ss:$28 sps:$4 sm:$0xff]  }
  0x2c   :  { %11483 = vmatpush1.bf16.msra.mxu1 %v17668_v42  ;;  %v17754_v42 = vld [vmem:[%s26397_s1 + $0x544] ss:$28 sps:$4 sm:$0xff]  }
  0x2d   :  { %11565 = vmatpush1.bf16.msra.mxu0 %v17669_v43  ;;  %11484 = vmatprep.subr.bf16.mxu1 %v17670_v44  ;;  %v17757_v43 = vld [vmem:[%s26397_s1 + $0xc44] ss:$28 sps:$4 sm:$0xff]  }
  0x2e   :  { %11566 = vmatprep.subr.bf16.mxu0 %v17672_v45  ;;  %v17752_v44 = vld [vmem:[%s26397_s1 + $0x540] ss:$28 sps:$4 sm:$0xff]  }
  0x2f   :  { %v17755_v45 = vld [vmem:[%s26397_s1 + $0xc40] ss:$28 sps:$4 sm:$0xff]  }
  0x30   :  { %11485 = vmatpush1.bf16.msra.mxu1 %v17674_v47  ;;  %v17763_v47 = vld [vmem:[%s26397_s1 + $0xc7c] ss:$28 sps:$4 sm:$0xff]  }
  0x31   :  { %11567 = vmatpush1.bf16.msra.mxu0 %v17675_v49  ;;  %11486 = vmatprep.subr.bf16.mxu1 %v17676_v51  ;;  %v17758_v49 = vld [vmem:[%s26397_s1 + $0x578] ss:$28 sps:$4 sm:$0xff]  }
  0x32   :  { %11568 = vmatprep.subr.bf16.mxu0 %v17678_v52  ;;  %v17766_v51 = vld [vmem:[%s26397_s1 + $0x5b4] ss:$28 sps:$4 sm:$0xff]  }
  0x33   :  { %v17769_v52 = vld [vmem:[%s26397_s1 + $0xcb4] ss:$28 sps:$4 sm:$0xff]  }
  0x34   :  { %11487 = vmatpush1.bf16.msra.mxu1 %v17680_v54  ;;  %v17764_v54 = vld [vmem:[%s26397_s1 + $0x5b0] ss:$28 sps:$4 sm:$0xff]  }
  0x35   :  { %11569 = vmatpush1.bf16.msra.mxu0 %v17681_v55  ;;  %11488 = vmatprep.subr.bf16.mxu1 %v17682_v56  ;;  %v17767_v55 = vld [vmem:[%s26397_s1 + $0xcb0] ss:$28 sps:$4 sm:$0xff]  }
  0x36   :  { %11570 = vmatprep.subr.bf16.mxu0 %v17684_v57  ;;  %v17772_v56 = vld [vmem:[%s26397_s1 + $0x5ec] ss:$28 sps:$4 sm:$0xff]  }
  0x37   :  { %v17775_v57 = vld [vmem:[%s26397_s1 + $0xcec] ss:$28 sps:$4 sm:$0xff]  }
  0x38   :  { %11489 = vmatpush1.bf16.msra.mxu1 %v17686_v58  ;;  %v17770_v58 = vld [vmem:[%s26397_s1 + $0x5e8] ss:$28 sps:$4 sm:$0xff]  }
  0x39   :  { %11571 = vmatpush1.bf16.msra.mxu0 %v17687_v59  ;;  %11490 = vmatprep.subr.bf16.mxu1 %v17688_v60  ;;  %v17773_v59 = vld [vmem:[%s26397_s1 + $0xce8] ss:$28 sps:$4 sm:$0xff]  }
  0x3a   :  { %11572 = vmatprep.subr.bf16.mxu0 %v17690_v61  ;;  %v17778_v60 = vld [vmem:[%s26397_s1 + $0x624] ss:$28 sps:$4 sm:$0xff]  }
  0x3b   :  { %v17781_v61 = vld [vmem:[%s26397_s1 + $0xd24] ss:$28 sps:$4 sm:$0xff]  }
  0x3c   :  { %11491 = vmatpush1.bf16.msra.mxu1 %v17692_v62  ;;  %v17776_v62 = vld [vmem:[%s26397_s1 + $0x620] ss:$28 sps:$4 sm:$0xff]  }
  0x3d   :  { %11573 = vmatpush1.bf16.msra.mxu0 %v17693_v63  ;;  %11492 = vmatprep.subr.bf16.mxu1 %v17694_v0  ;;  %v17779_v63 = vld [vmem:[%s26397_s1 + $0xd20] ss:$28 sps:$4 sm:$0xff]  }
  0x3e   :  { %11574 = vmatprep.subr.bf16.mxu0 %v17696_v1  ;;  %v17784_v0 = vld [vmem:[%s26397_s1 + $0x65c] ss:$28 sps:$4 sm:$0xff]  }
  0x3f   :  { %v17787_v1 = vld [vmem:[%s26397_s1 + $0xd5c] ss:$28 sps:$4 sm:$0xff]  }
  0x40   :  { %11493 = vmatpush1.bf16.msra.mxu1 %v17698_v2  ;;  %v17782_v2 = vld [vmem:[%s26397_s1 + $0x658] ss:$28 sps:$4 sm:$0xff]  }
  0x41   :  { %11575 = vmatpush1.bf16.msra.mxu0 %v17699_v3  ;;  %11503 = vmatprep.subr.bf16.mxu1 %v17703_v4  ;;  %v17785_v3 = vld [vmem:[%s26397_s1 + $0xd58] ss:$28 sps:$4 sm:$0xff]  }
  0x42   :  { %11585 = vmatprep.subr.bf16.mxu0 %v17707_v5  ;;  %v17790_v4 = vld [vmem:[%s26397_s1 + $0x694] ss:$28 sps:$4 sm:$0xff]  }
  0x43   :  { %11495 = vmatmul.mubr.bf16.vlgmr.msra.gmra.mrb[0].mxu1 %v20557_v6  ;;  %v17793_v5 = vld [vmem:[%s26397_s1 + $0xd94] ss:$28 sps:$4 sm:$0xff]  }
  0x44   :  { %11577 = vmatmul.mubr.bf16.vlgmr.msra.gmra.mrb[0].mxu0 %v20559_v7  ;;  %11504 = vmatpush1.bf16.msra.mxu1 %v17701_v8  ;;  %v17788_v8 = vld [vmem:[%s26397_s1 + $0x690] ss:$28 sps:$4 sm:$0xff]  }
  0x45   :  { %11586 = vmatpush1.bf16.msra.mxu0 %v17705_v9  ;;  %11505 = vmatprep.subr.bf16.mxu1 %v17712_v10  ;;  %v17791_v9 = vld [vmem:[%s26397_s1 + $0xd90] ss:$28 sps:$4 sm:$0xff]  }
  0x46   :  { %11587 = vmatprep.subr.bf16.mxu0 %v17715_v11  ;;  %11535 = vmatprep.mubr.bf16.mxu1 %v20653_v36  ;;  %v17796_v10 = vld [vmem:[%s26397_s1 + $0x6cc] ss:$28 sps:$4 sm:$0xff]  }
  0x47   :  { %11617 = vmatprep.mubr.bf16.mxu0 %v20657_v37  ;;  %v17799_v11 = vld [vmem:[%s26397_s1 + $0xdcc] ss:$28 sps:$4 sm:$0xff]  }
  0x48   :  { %11506 = vmatpush1.bf16.msra.mxu1 %v17710_v12  ;;  %v17794_v12 = vld [vmem:[%s26397_s1 + $0x6c8] ss:$28 sps:$4 sm:$0xff]  }
  0x49   :  { %11588 = vmatpush1.bf16.msra.mxu0 %v17713_v13  ;;  %11507 = vmatprep.subr.bf16.mxu1 %v17718_v14  ;;  %v17797_v13 = vld [vmem:[%s26397_s1 + $0xdc8] ss:$28 sps:$4 sm:$0xff]  }
  0x4a   :  { %11589 = vmatprep.subr.bf16.mxu0 %v17721_v15  ;;  %v17804_v14 = vld [vmem:[%s26397_s1 + $0xe04] ss:$28 sps:$4 sm:$0xff]   ;;  %v17807_v15 = vld [vmem:[%s26397_s1 + $0xc] ss:$28 sps:$4 sm:$0xff]  }
  0x4c   :  { %11508 = vmatpush1.bf16.msra.mxu1 %v17716_v16  ;;  %v17802_v16 = vld [vmem:[%s26397_s1 + $0xe00] ss:$28 sps:$4 sm:$0xff]  }
  0x4d   :  { %11590 = vmatpush1.bf16.msra.mxu0 %v17719_v17  ;;  %11509 = vmatprep.subr.bf16.mxu1 %v17724_v18  ;;  %v17805_v17 = vld [vmem:[%s26397_s1 + $0x8] ss:$28 sps:$4 sm:$0xff]   ;;  %v20783_v18 = vcombine.low %v20638_v32, %v20638_v32 }
  0x4e   :  { %11591 = vmatprep.subr.bf16.mxu0 %v17727_v19  ;;  %v20787_v19 = vcombine.low %v20643_v33, %v20643_v33  ;;  %v17822_v32 = vld [vmem:[%s26397_s1 + $0xea8] ss:$28 sps:$4 sm:$0xff]   ;;  %v17825_v33 = vld [vmem:[%s26397_s1 + $0xb0] ss:$28 sps:$4 sm:$0xff]  }
  0x50   :  { %11510 = vmatpush1.bf16.msra.mxu1 %v17722_v20  ;;  %v17812_v20 = vld [vmem:[%s26397_s1 + $0xe3c] ss:$28 sps:$4 sm:$0xff]  }
  0x51   :  { %11592 = vmatpush1.bf16.msra.mxu0 %v17725_v21  ;;  %11511 = vmatprep.subr.bf16.mxu1 %v17730_v22  ;;  %v17815_v21 = vld [vmem:[%s26397_s1 + $0x44] ss:$28 sps:$4 sm:$0xff]  }
  0x52   :  { %11593 = vmatprep.subr.bf16.mxu0 %v17733_v23  ;;  %v20798_v22 = vld [vmem:[%s26398_s0 + $0x20] sm:$0xff] }
  0x53   :  { %v20802_v23 = vcombine.high %v20798_v22, %v20798_v22 }
  0x54   :  { %11512 = vmatpush1.bf16.msra.mxu1 %v17728_v24  ;;  %v17810_v24 = vld [vmem:[%s26397_s1 + $0xe38] ss:$28 sps:$4 sm:$0xff]  }
  0x55   :  { %11594 = vmatpush1.bf16.msra.mxu0 %v17731_v25  ;;  %11513 = vmatprep.subr.bf16.mxu1 %v17736_v26  ;;  %v17813_v25 = vld [vmem:[%s26397_s1 + $0x40] ss:$28 sps:$4 sm:$0xff]   ;;  %v17818_v26 = vld [vmem:[%s26397_s1 + $0xe74] ss:$28 sps:$4 sm:$0xff]  }
  0x56   :  { %11595 = vmatprep.subr.bf16.mxu0 %v17739_v27  ;;  %v17821_v27 = vld [vmem:[%s26397_s1 + $0x7c] ss:$28 sps:$4 sm:$0xff]  }
  0x58   :  { %11514 = vmatpush1.bf16.msra.mxu1 %v17734_v28  ;;  %v17816_v28 = vld [vmem:[%s26397_s1 + $0xe70] ss:$28 sps:$4 sm:$0xff]  }
  0x59   :  { %11596 = vmatpush1.bf16.msra.mxu0 %v17737_v29  ;;  %11515 = vmatprep.subr.bf16.mxu1 %v17742_v30  ;;  %v17819_v29 = vld [vmem:[%s26397_s1 + $0x78] ss:$28 sps:$4 sm:$0xff]   ;;  %v17824_v30 = vld [vmem:[%s26397_s1 + $0xeac] ss:$28 sps:$4 sm:$0xff]  }
  0x5a   :  { %11597 = vmatprep.subr.bf16.mxu0 %v17745_v31  ;;  %v17827_v31 = vld [vmem:[%s26397_s1 + $0xb4] ss:$28 sps:$4 sm:$0xff]  }
  0x5c   :  { %11516 = vmatpush1.bf16.msra.mxu1 %v17740_v34  ;;  %v17830_v34 = vld [vmem:[%s26397_s1 + $0xee4] ss:$28 sps:$4 sm:$0xff]  }
  0x5d   :  { %11598 = vmatpush1.bf16.msra.mxu0 %v17743_v35  ;;  %11517 = vmatprep.subr.bf16.mxu1 %v17748_v38  ;;  %v17833_v35 = vld [vmem:[%s26397_s1 + $0xec] ss:$28 sps:$4 sm:$0xff]   ;;  %v17828_v38 = vld [vmem:[%s26397_s1 + $0xee0] ss:$28 sps:$4 sm:$0xff]  }
  0x5e   :  { %11599 = vmatprep.subr.bf16.mxu0 %v17751_v39  ;;  %v17831_v39 = vld [vmem:[%s26397_s1 + $0xe8] ss:$28 sps:$4 sm:$0xff]  }
  0x60   :  { %11518 = vmatpush1.bf16.msra.mxu1 %v17746_v40  ;;  %v17836_v40 = vld [vmem:[%s26397_s1 + $0xf1c] ss:$28 sps:$4 sm:$0xff]  }
  0x61   :  { %11600 = vmatpush1.bf16.msra.mxu0 %v17749_v41  ;;  %11519 = vmatprep.subr.bf16.mxu1 %v17754_v42  ;;  %v17839_v41 = vld [vmem:[%s26397_s1 + $0x124] ss:$28 sps:$4 sm:$0xff]   ;;  %v17834_v42 = vld [vmem:[%s26397_s1 + $0xf18] ss:$28 sps:$4 sm:$0xff]  }
  0x62   :  { %11601 = vmatprep.subr.bf16.mxu0 %v17757_v43  ;;  %v17837_v43 = vld [vmem:[%s26397_s1 + $0x120] ss:$28 sps:$4 sm:$0xff]  }
  0x64   :  { %11520 = vmatpush1.bf16.msra.mxu1 %v17752_v44  ;;  %v17842_v44 = vld [vmem:[%s26397_s1 + $0xf54] ss:$28 sps:$4 sm:$0xff]  }
  0x65   :  { %11602 = vmatpush1.bf16.msra.mxu0 %v17755_v45  ;;  %11521 = vmatprep.subr.bf16.mxu1 %v17760_v46  ;;  %v17845_v45 = vld [vmem:[%s26397_s1 + $0x15c] ss:$28 sps:$4 sm:$0xff]   ;;  %v17840_v46 = vld [vmem:[%s26397_s1 + $0xf50] ss:$28 sps:$4 sm:$0xff]  }
  0x66   :  { %11603 = vmatprep.subr.bf16.mxu0 %v17763_v47  ;;  %v17843_v47 = vld [vmem:[%s26397_s1 + $0x158] ss:$28 sps:$4 sm:$0xff]  }
  0x68   :  { %11522 = vmatpush1.bf16.msra.mxu1 %v17758_v49  ;;  %v17848_v49 = vld [vmem:[%s26397_s1 + $0xf8c] ss:$28 sps:$4 sm:$0xff]  }
  0x69   :  { %11604 = vmatpush1.bf16.msra.mxu0 %v17761_v50  ;;  %11523 = vmatprep.subr.bf16.mxu1 %v17766_v51  ;;  %v17851_v50 = vld [vmem:[%s26397_s1 + $0x194] ss:$28 sps:$4 sm:$0xff]   ;;  %v17846_v51 = vld [vmem:[%s26397_s1 + $0xf88] ss:$28 sps:$4 sm:$0xff]  }
  0x6a   :  { %11605 = vmatprep.subr.bf16.mxu0 %v17769_v52  ;;  %v17849_v52 = vld [vmem:[%s26397_s1 + $0x190] ss:$28 sps:$4 sm:$0xff]  }
  0x6c   :  { %11524 = vmatpush1.bf16.msra.mxu1 %v17764_v54  ;;  %v17854_v54 = vld [vmem:[%s26397_s1 + $0xfc4] ss:$28 sps:$4 sm:$0xff]  }
  0x6d   :  { %11606 = vmatpush1.bf16.msra.mxu0 %v17767_v55  ;;  %11525 = vmatprep.subr.bf16.mxu1 %v17772_v56  ;;  %v17857_v55 = vld [vmem:[%s26397_s1 + $0x1cc] ss:$28 sps:$4 sm:$0xff]   ;;  %v17852_v56 = vld [vmem:[%s26397_s1 + $0xfc0] ss:$28 sps:$4 sm:$0xff]  }
  0x6e   :  { %11607 = vmatprep.subr.bf16.mxu0 %v17775_v57  ;;  %v17855_v57 = vld [vmem:[%s26397_s1 + $0x1c8] ss:$28 sps:$4 sm:$0xff]  }
  0x70   :  { %11526 = vmatpush1.bf16.msra.mxu1 %v17770_v58  ;;  %v17860_v58 = vld [vmem:[%s26397_s1 + $0xffc] ss:$28 sps:$4 sm:$0xff]  }
  0x71   :  { %11608 = vmatpush1.bf16.msra.mxu0 %v17773_v59  ;;  %11527 = vmatprep.subr.bf16.mxu1 %v17778_v60  ;;  %v17863_v59 = vld [vmem:[%s26397_s1 + $0x204] ss:$28 sps:$4 sm:$0xff]   ;;  %v17858_v60 = vld [vmem:[%s26397_s1 + $0xff8] ss:$28 sps:$4 sm:$0xff]  }
  0x72   :  { %11609 = vmatprep.subr.bf16.mxu0 %v17781_v61  ;;  %v17861_v61 = vld [vmem:[%s26397_s1 + $0x200] ss:$28 sps:$4 sm:$0xff]  }
  0x74   :  { %11528 = vmatpush1.bf16.msra.mxu1 %v17776_v62  ;;  %v17866_v62 = vld [vmem:[%s26397_s1 + $0x1034] ss:$28 sps:$4 sm:$0xff]  }
  0x75   :  { %11610 = vmatpush1.bf16.msra.mxu0 %v17779_v63  ;;  %11529 = vmatprep.subr.bf16.mxu1 %v17784_v0  ;;  %v17869_v63 = vld [vmem:[%s26397_s1 + $0x23c] ss:$28 sps:$4 sm:$0xff]   ;;  %v17864_v0 = vld [vmem:[%s26397_s1 + $0x1030] ss:$28 sps:$4 sm:$0xff]  }
  0x76   :  { %11611 = vmatprep.subr.bf16.mxu0 %v17787_v1  ;;  %v17867_v1 = vld [vmem:[%s26397_s1 + $0x238] ss:$28 sps:$4 sm:$0xff]  }
  0x78   :  { %11530 = vmatpush1.bf16.msra.mxu1 %v17782_v2  ;;  %v17872_v2 = vld [vmem:[%s26397_s1 + $0x106c] ss:$28 sps:$4 sm:$0xff]  }
  0x79   :  { %11612 = vmatpush1.bf16.msra.mxu0 %v17785_v3  ;;  %11531 = vmatprep.subr.bf16.mxu1 %v17790_v4  ;;  %v17875_v3 = vld [vmem:[%s26397_s1 + $0x274] ss:$28 sps:$4 sm:$0xff]   ;;  %v17870_v4 = vld [vmem:[%s26397_s1 + $0x1068] ss:$28 sps:$4 sm:$0xff]  }
  0x7a   :  { %11613 = vmatprep.subr.bf16.mxu0 %v17793_v5  ;;  %v17873_v5 = vld [vmem:[%s26397_s1 + $0x270] ss:$28 sps:$4 sm:$0xff]  }
  0x7c   :  { %11532 = vmatpush1.bf16.msra.mxu1 %v17788_v8  ;;  %v17878_v8 = vld [vmem:[%s26397_s1 + $0x10a4] ss:$28 sps:$4 sm:$0xff]  }
  0x7d   :  { %11614 = vmatpush1.bf16.msra.mxu0 %v17791_v9  ;;  %11533 = vmatprep.subr.bf16.mxu1 %v17796_v10  ;;  %v17881_v9 = vld [vmem:[%s26397_s1 + $0x2ac] ss:$28 sps:$4 sm:$0xff]   ;;  %v17876_v10 = vld [vmem:[%s26397_s1 + $0x10a0] ss:$28 sps:$4 sm:$0xff]  }
  0x7e   :  { %11615 = vmatprep.subr.bf16.mxu0 %v17799_v11  ;;  %v17879_v11 = vld [vmem:[%s26397_s1 + $0x2a8] ss:$28 sps:$4 sm:$0xff]  }
  0x80   :  { %11534 = vmatpush1.bf16.msra.mxu1 %v17794_v12  ;;  %v17884_v12 = vld [vmem:[%s26397_s1 + $0x10dc] ss:$28 sps:$4 sm:$0xff]  }
  0x81   :  { %11616 = vmatpush1.bf16.msra.mxu0 %v17797_v13  ;;  %12118 = vmatprep.subr.bf16.mxu1 %v17807_v15  ;;  %v17887_v13 = vld [vmem:[%s26397_s1 + $0x2e4] ss:$28 sps:$4 sm:$0xff]  }
  0x82   :  { %11626 = vmatprep.subr.bf16.mxu0 %v17804_v14  ;;  %v17882_v14 = vld [vmem:[%s26397_s1 + $0x10d8] ss:$28 sps:$4 sm:$0xff]   ;;  %v17885_v15 = vld [vmem:[%s26397_s1 + $0x2e0] ss:$28 sps:$4 sm:$0xff]  }
  0x83   :  { %11536 = vmatmul.mubr.bf16.vlgmr.msra.gmra.mrb[0].mxu1 %v20783_v18 }
  0x84   :  { %11618 = vmatmul.mubr.bf16.vlgmr.msra.gmra.mrb[0].mxu0 %v20787_v19  ;;  %12119 = vmatpush1.bf16.msra.mxu1 %v17805_v17  ;;  %v17893_v17 = vld [vmem:[%s26397_s1 + $0x31c] ss:$28 sps:$4 sm:$0xff]  }
  0x85   :  { %11627 = vmatpush1.bf16.msra.mxu0 %v17802_v16  ;;  %12120 = vmatprep.subr.bf16.mxu1 %v17815_v21  ;;  %v17890_v16 = vld [vmem:[%s26397_s1 + $0x1114] ss:$28 sps:$4 sm:$0xff]  }
  0x86   :  { %11628 = vmatprep.subr.bf16.mxu0 %v17812_v20  ;;  %11658 = vmatprep.mubr.bf16.mxu0 %v20802_v23  ;;  %v17888_v20 = vld [vmem:[%s26397_s1 + $0x1110] ss:$28 sps:$4 sm:$0xff]   ;;  %v17891_v21 = vld [vmem:[%s26397_s1 + $0x318] ss:$28 sps:$4 sm:$0xff]  }
  0x87   :  { %12150 = vmatprep.mubr.bf16.mxu1 %v20491_v48 }
  0x88   :  { %12121 = vmatpush1.bf16.msra.mxu1 %v17813_v25  ;;  %v17899_v25 = vld [vmem:[%s26397_s1 + $0x354] ss:$28 sps:$4 sm:$0xff]  }
  0x89   :  { %11629 = vmatpush1.bf16.msra.mxu0 %v17810_v24  ;;  %12122 = vmatprep.subr.bf16.mxu1 %v17821_v27  ;;  %v17896_v24 = vld [vmem:[%s26397_s1 + $0x114c] ss:$28 sps:$4 sm:$0xff]  }
  0x8a   :  { %11630 = vmatprep.subr.bf16.mxu0 %v17818_v26  ;;  %v17894_v26 = vld [vmem:[%s26397_s1 + $0x1148] ss:$28 sps:$4 sm:$0xff]   ;;  %v17897_v27 = vld [vmem:[%s26397_s1 + $0x350] ss:$28 sps:$4 sm:$0xff]  }
  0x8c   :  { %12123 = vmatpush1.bf16.msra.mxu1 %v17819_v29  ;;  %v17906_v29 = vld [vmem:[%s26397_s1 + $0x38c] ss:$28 sps:$4 sm:$0xff]  }
  0x8d   :  { %11631 = vmatpush1.bf16.msra.mxu0 %v17816_v28  ;;  %12124 = vmatprep.subr.bf16.mxu1 %v17827_v31  ;;  %v17903_v28 = vld [vmem:[%s26397_s1 + $0x1184] ss:$28 sps:$4 sm:$0xff]   ;;  %v20995_v31 = vld [vmem:[%s26398_s0 + $0x28] sm:$0xff] }
  0x8e   :  { %11632 = vmatprep.subr.bf16.mxu0 %v17824_v30  ;;  %v20990_v30 = vcombine.low %v20798_v22, %v20798_v22  ;;  %v17910_v22 = vld [vmem:[%s26397_s1 + $0x11bc] ss:$28 sps:$4 sm:$0xff]  }
  0x90   :  { %12125 = vmatpush1.bf16.msra.mxu1 %v17825_v33  ;;  %v17904_v33 = vld [vmem:[%s26397_s1 + $0x388] ss:$28 sps:$4 sm:$0xff]  }
  0x91   :  { %11633 = vmatpush1.bf16.msra.mxu0 %v17822_v32  ;;  %12126 = vmatprep.subr.bf16.mxu1 %v17833_v35  ;;  %v17901_v32 = vld [vmem:[%s26397_s1 + $0x1180] ss:$28 sps:$4 sm:$0xff]   ;;  %v21011_v35 = vcombine.high %v20995_v31, %v20995_v31 }
  0x92   :  { %11634 = vmatprep.subr.bf16.mxu0 %v17830_v34  ;;  %v17913_v34 = vld [vmem:[%s26397_s1 + $0x3c4] ss:$28 sps:$4 sm:$0xff]  }
  0x94   :  { %12127 = vmatpush1.bf16.msra.mxu1 %v17831_v39  ;;  %v17911_v39 = vld [vmem:[%s26397_s1 + $0x3c0] ss:$28 sps:$4 sm:$0xff]  }
  0x95   :  { %11635 = vmatpush1.bf16.msra.mxu0 %v17828_v38  ;;  %12128 = vmatprep.subr.bf16.mxu1 %v17839_v41  ;;  %v17908_v38 = vld [vmem:[%s26397_s1 + $0x11b8] ss:$28 sps:$4 sm:$0xff]  }
  0x96   :  { %11636 = vmatprep.subr.bf16.mxu0 %v17836_v40  ;;  %v17916_v40 = vld [vmem:[%s26397_s1 + $0x11f4] ss:$28 sps:$4 sm:$0xff]   ;;  %v17919_v41 = vld [vmem:[%s26397_s1 + $0x3fc] ss:$28 sps:$4 sm:$0xff]  }
  0x98   :  { %12129 = vmatpush1.bf16.msra.mxu1 %v17837_v43  ;;  %v17917_v43 = vld [vmem:[%s26397_s1 + $0x3f8] ss:$28 sps:$4 sm:$0xff]  }
  0x99   :  { %11637 = vmatpush1.bf16.msra.mxu0 %v17834_v42  ;;  %12130 = vmatprep.subr.bf16.mxu1 %v17845_v45  ;;  %v17914_v42 = vld [vmem:[%s26397_s1 + $0x11f0] ss:$28 sps:$4 sm:$0xff]  }
  0x9a   :  { %11638 = vmatprep.subr.bf16.mxu0 %v17842_v44  ;;  %v17922_v44 = vld [vmem:[%s26397_s1 + $0x122c] ss:$28 sps:$4 sm:$0xff]   ;;  %v17925_v45 = vld [vmem:[%s26397_s1 + $0x434] ss:$28 sps:$4 sm:$0xff]  }
  0x9c   :  { %12131 = vmatpush1.bf16.msra.mxu1 %v17843_v47  ;;  %v17923_v47 = vld [vmem:[%s26397_s1 + $0x430] ss:$28 sps:$4 sm:$0xff]  }
  0x9d   :  { %11639 = vmatpush1.bf16.msra.mxu0 %v17840_v46  ;;  %12132 = vmatprep.subr.bf16.mxu1 %v17851_v50  ;;  %v17920_v46 = vld [vmem:[%s26397_s1 + $0x1228] ss:$28 sps:$4 sm:$0xff]  }
  0x9e   :  { %11640 = vmatprep.subr.bf16.mxu0 %v17848_v49  ;;  %v17928_v49 = vld [vmem:[%s26397_s1 + $0x1264] ss:$28 sps:$4 sm:$0xff]   ;;  %v17931_v50 = vld [vmem:[%s26397_s1 + $0x46c] ss:$28 sps:$4 sm:$0xff]  }
  0xa0   :  { %12133 = vmatpush1.bf16.msra.mxu1 %v17849_v52  ;;  %v17929_v52 = vld [vmem:[%s26397_s1 + $0x468] ss:$28 sps:$4 sm:$0xff]  }
  0xa1   :  { %11641 = vmatpush1.bf16.msra.mxu0 %v17846_v51  ;;  %12134 = vmatprep.subr.bf16.mxu1 %v17857_v55  ;;  %v17926_v51 = vld [vmem:[%s26397_s1 + $0x1260] ss:$28 sps:$4 sm:$0xff]  }
  0xa2   :  { %11642 = vmatprep.subr.bf16.mxu0 %v17854_v54  ;;  %v17934_v54 = vld [vmem:[%s26397_s1 + $0x129c] ss:$28 sps:$4 sm:$0xff]   ;;  %v17937_v55 = vld [vmem:[%s26397_s1 + $0x4a4] ss:$28 sps:$4 sm:$0xff]  }
  0xa4   :  { %12135 = vmatpush1.bf16.msra.mxu1 %v17855_v57  ;;  %v17935_v57 = vld [vmem:[%s26397_s1 + $0x4a0] ss:$28 sps:$4 sm:$0xff]  }
  0xa5   :  { %11643 = vmatpush1.bf16.msra.mxu0 %v17852_v56  ;;  %12136 = vmatprep.subr.bf16.mxu1 %v17863_v59  ;;  %v17932_v56 = vld [vmem:[%s26397_s1 + $0x1298] ss:$28 sps:$4 sm:$0xff]  }
  0xa6   :  { %11644 = vmatprep.subr.bf16.mxu0 %v17860_v58  ;;  %v17940_v58 = vld [vmem:[%s26397_s1 + $0x12d4] ss:$28 sps:$4 sm:$0xff]   ;;  %v17943_v59 = vld [vmem:[%s26397_s1 + $0x4dc] ss:$28 sps:$4 sm:$0xff]  }
  0xa8   :  { %12137 = vmatpush1.bf16.msra.mxu1 %v17861_v61  ;;  %v17941_v61 = vld [vmem:[%s26397_s1 + $0x4d8] ss:$28 sps:$4 sm:$0xff]  }
  0xa9   :  { %11645 = vmatpush1.bf16.msra.mxu0 %v17858_v60  ;;  %12138 = vmatprep.subr.bf16.mxu1 %v17869_v63  ;;  %v17938_v60 = vld [vmem:[%s26397_s1 + $0x12d0] ss:$28 sps:$4 sm:$0xff]  }
  0xaa   :  { %11646 = vmatprep.subr.bf16.mxu0 %v17866_v62  ;;  %v17946_v62 = vld [vmem:[%s26397_s1 + $0x130c] ss:$28 sps:$4 sm:$0xff]   ;;  %v17949_v63 = vld [vmem:[%s26397_s1 + $0x514] ss:$28 sps:$4 sm:$0xff]  }
  0xac   :  { %12139 = vmatpush1.bf16.msra.mxu1 %v17867_v1  ;;  %v17947_v1 = vld [vmem:[%s26397_s1 + $0x510] ss:$28 sps:$4 sm:$0xff]  }
  0xad   :  { %11647 = vmatpush1.bf16.msra.mxu0 %v17864_v0  ;;  %12140 = vmatprep.subr.bf16.mxu1 %v17875_v3  ;;  %v17944_v0 = vld [vmem:[%s26397_s1 + $0x1308] ss:$28 sps:$4 sm:$0xff]  }
  0xae   :  { %11648 = vmatprep.subr.bf16.mxu0 %v17872_v2  ;;  %v17952_v2 = vld [vmem:[%s26397_s1 + $0x1344] ss:$28 sps:$4 sm:$0xff]   ;;  %v17955_v3 = vld [vmem:[%s26397_s1 + $0x54c] ss:$28 sps:$4 sm:$0xff]  }
  0xb0   :  { %12141 = vmatpush1.bf16.msra.mxu1 %v17873_v5  ;;  %v17953_v5 = vld [vmem:[%s26397_s1 + $0x548] ss:$28 sps:$4 sm:$0xff]  }
  0xb1   :  { %11649 = vmatpush1.bf16.msra.mxu0 %v17870_v4  ;;  %12142 = vmatprep.subr.bf16.mxu1 %v17881_v9  ;;  %v17950_v4 = vld [vmem:[%s26397_s1 + $0x1340] ss:$28 sps:$4 sm:$0xff]  }
  0xb2   :  { %11650 = vmatprep.subr.bf16.mxu0 %v17878_v8  ;;  %v17958_v8 = vld [vmem:[%s26397_s1 + $0x137c] ss:$28 sps:$4 sm:$0xff]   ;;  %v17961_v9 = vld [vmem:[%s26397_s1 + $0x584] ss:$28 sps:$4 sm:$0xff]  }
  0xb4   :  { %12143 = vmatpush1.bf16.msra.mxu1 %v17879_v11  ;;  %v17959_v11 = vld [vmem:[%s26397_s1 + $0x580] ss:$28 sps:$4 sm:$0xff]  }
  0xb5   :  { %11651 = vmatpush1.bf16.msra.mxu0 %v17876_v10  ;;  %12144 = vmatprep.subr.bf16.mxu1 %v17887_v13  ;;  %v17956_v10 = vld [vmem:[%s26397_s1 + $0x1378] ss:$28 sps:$4 sm:$0xff]  }
  0xb6   :  { %11652 = vmatprep.subr.bf16.mxu0 %v17884_v12  ;;  %v17964_v12 = vld [vmem:[%s26397_s1 + $0x13b4] ss:$28 sps:$4 sm:$0xff]   ;;  %v17967_v13 = vld [vmem:[%s26397_s1 + $0x5bc] ss:$28 sps:$4 sm:$0xff]  }
  0xb8   :  { %12145 = vmatpush1.bf16.msra.mxu1 %v17885_v15  ;;  %v17965_v15 = vld [vmem:[%s26397_s1 + $0x5b8] ss:$28 sps:$4 sm:$0xff]  }
  0xb9   :  { %11653 = vmatpush1.bf16.msra.mxu0 %v17882_v14  ;;  %12146 = vmatprep.subr.bf16.mxu1 %v17893_v17  ;;  %v17962_v14 = vld [vmem:[%s26397_s1 + $0x13b0] ss:$28 sps:$4 sm:$0xff]  }
  0xba   :  { %11654 = vmatprep.subr.bf16.mxu0 %v17890_v16  ;;  %v17970_v16 = vld [vmem:[%s26397_s1 + $0x13ec] ss:$28 sps:$4 sm:$0xff]   ;;  %v17973_v17 = vld [vmem:[%s26397_s1 + $0x5f4] ss:$28 sps:$4 sm:$0xff]  }
  0xbc   :  { %12147 = vmatpush1.bf16.msra.mxu1 %v17891_v21  ;;  %v17971_v21 = vld [vmem:[%s26397_s1 + $0x5f0] ss:$28 sps:$4 sm:$0xff]  }
  0xbd   :  { %11655 = vmatpush1.bf16.msra.mxu0 %v17888_v20  ;;  %12148 = vmatprep.subr.bf16.mxu1 %v17899_v25  ;;  %v17968_v20 = vld [vmem:[%s26397_s1 + $0x13e8] ss:$28 sps:$4 sm:$0xff]  }
  0xbe   :  { %11656 = vmatprep.subr.bf16.mxu0 %v17896_v24  ;;  %v17976_v24 = vld [vmem:[%s26397_s1 + $0x1424] ss:$28 sps:$4 sm:$0xff]   ;;  %v17979_v25 = vld [vmem:[%s26397_s1 + $0x62c] ss:$28 sps:$4 sm:$0xff]  }
  0xc0   :  { %12149 = vmatpush1.bf16.msra.mxu1 %v17897_v27  ;;  %v17977_v27 = vld [vmem:[%s26397_s1 + $0x628] ss:$28 sps:$4 sm:$0xff]  }
  0xc1   :  { %11657 = vmatpush1.bf16.msra.mxu0 %v17894_v26  ;;  %12159 = vmatprep.subr.bf16.mxu1 %v17906_v29  ;;  %v17974_v26 = vld [vmem:[%s26397_s1 + $0x1420] ss:$28 sps:$4 sm:$0xff]  }
  0xc2   :  { %11667 = vmatprep.subr.bf16.mxu0 %v17903_v28  ;;  %v17982_v28 = vld [vmem:[%s26397_s1 + $0x145c] ss:$28 sps:$4 sm:$0xff]   ;;  %v17985_v29 = vld [vmem:[%s26397_s1 + $0x664] ss:$28 sps:$4 sm:$0xff]  }
  0xc3   :  { %12151 = vmatmul.mubr.bf16.vlgmr.msra.gmra.mrb[4].mxu1 %v20557_v6 }
  0xc4   :  { %11659 = vmatmul.mubr.bf16.vlgmr.msra.gmra.mrb[0].mxu0 %v20990_v30  ;;  %12160 = vmatpush1.bf16.msra.mxu1 %v17904_v33  ;;  %v17983_v33 = vld [vmem:[%s26397_s1 + $0x660] ss:$28 sps:$4 sm:$0xff]  }
  0xc5   :  { %11668 = vmatpush1.bf16.msra.mxu0 %v17901_v32  ;;  %12161 = vmatprep.subr.bf16.mxu1 %v17913_v34  ;;  %v17980_v32 = vld [vmem:[%s26397_s1 + $0x1458] ss:$28 sps:$4 sm:$0xff]  }
  0xc6   :  { %11669 = vmatprep.subr.bf16.mxu0 %v17910_v22  ;;  %11699 = vmatprep.mubr.bf16.mxu0 %v21011_v35  ;;  %v17988_v22 = vld [vmem:[%s26397_s1 + $0x1494] ss:$28 sps:$4 sm:$0xff]   ;;  %v17991_v34 = vld [vmem:[%s26397_s1 + $0x69c] ss:$28 sps:$4 sm:$0xff]  }
  0xc7   :  { %12191 = vmatprep.mubr.bf16.mxu1 %v20653_v36 }
  0xc8   :  { %12162 = vmatpush1.bf16.msra.mxu1 %v17911_v39  ;;  %v17989_v39 = vld [vmem:[%s26397_s1 + $0x698] ss:$28 sps:$4 sm:$0xff]  }
  0xc9   :  { %11670 = vmatpush1.bf16.msra.mxu0 %v17908_v38  ;;  %12163 = vmatprep.subr.bf16.mxu1 %v17919_v41  ;;  %v17986_v38 = vld [vmem:[%s26397_s1 + $0x1490] ss:$28 sps:$4 sm:$0xff]  }
  0xca   :  { %11671 = vmatprep.subr.bf16.mxu0 %v17916_v40  ;;  %v17994_v40 = vld [vmem:[%s26397_s1 + $0x14cc] ss:$28 sps:$4 sm:$0xff]   ;;  %v17997_v41 = vld [vmem:[%s26397_s1 + $0x6d4] ss:$28 sps:$4 sm:$0xff]  }
  0xcc   :  { %12164 = vmatpush1.bf16.msra.mxu1 %v17917_v43  ;;  %v17995_v43 = vld [vmem:[%s26397_s1 + $0x6d0] ss:$28 sps:$4 sm:$0xff]  }
  0xcd   :  { %11672 = vmatpush1.bf16.msra.mxu0 %v17914_v42  ;;  %12165 = vmatprep.subr.bf16.mxu1 %v17925_v45  ;;  %v17992_v42 = vld [vmem:[%s26397_s1 + $0x14c8] ss:$28 sps:$4 sm:$0xff]  }
  0xce   :  { %11673 = vmatprep.subr.bf16.mxu0 %v17922_v44  ;;  %v18001_v44 = vld [vmem:[%s26397_s1 + $0x1504] ss:$28 sps:$4 sm:$0xff]   ;;  %v18004_v45 = vld [vmem:[%s26397_s1 + $0x70c] ss:$28 sps:$4 sm:$0xff]  }
  0xd0   :  { %12166 = vmatpush1.bf16.msra.mxu1 %v17923_v47  ;;  %v21202_v47 = vcombine.low %v20995_v31, %v20995_v31  ;;  %v18011_v31 = vld [vmem:[%s26397_s1 + $0x744] ss:$28 sps:$4 sm:$0xff]  }
  0xd1   :  { %11674 = vmatpush1.bf16.msra.mxu0 %v17920_v46  ;;  %12167 = vmatprep.subr.bf16.mxu1 %v17931_v50  ;;  %v17999_v46 = vld [vmem:[%s26397_s1 + $0x1500] ss:$28 sps:$4 sm:$0xff]   ;;  %v18002_v50 = vld [vmem:[%s26397_s1 + $0x708] ss:$28 sps:$4 sm:$0xff]  }
  0xd2   :  { %11675 = vmatprep.subr.bf16.mxu0 %v17928_v49  ;;  %v21207_v49 = vld [vmem:[%s26398_s0 + $0x30] sm:$0xff] }
  0xd4   :  { %12168 = vmatpush1.bf16.msra.mxu1 %v17929_v52  ;;  %v21220_v52 = vcombine.high %v21207_v49, %v21207_v49 }
  0xd5   :  { %11676 = vmatpush1.bf16.msra.mxu0 %v17926_v51  ;;  %12169 = vmatprep.subr.bf16.mxu1 %v17937_v55  ;;  %v18008_v51 = vld [vmem:[%s26397_s1 + $0x153c] ss:$28 sps:$4 sm:$0xff]  }
  0xd6   :  { %11677 = vmatprep.subr.bf16.mxu0 %v17934_v54  ;;  %v18006_v54 = vld [vmem:[%s26397_s1 + $0x1538] ss:$28 sps:$4 sm:$0xff]   ;;  %v18009_v55 = vld [vmem:[%s26397_s1 + $0x740] ss:$28 sps:$4 sm:$0xff]  }
  0xd8   :  { %12170 = vmatpush1.bf16.msra.mxu1 %v17935_v57  ;;  %v18017_v57 = vld [vmem:[%s26397_s1 + $0x77c] ss:$28 sps:$4 sm:$0xff]  }
  0xd9   :  { %11678 = vmatpush1.bf16.msra.mxu0 %v17932_v56  ;;  %12171 = vmatprep.subr.bf16.mxu1 %v17943_v59  ;;  %v18014_v56 = vld [vmem:[%s26397_s1 + $0x1574] ss:$28 sps:$4 sm:$0xff]  }
  0xda   :  { %11679 = vmatprep.subr.bf16.mxu0 %v17940_v58  ;;  %v18012_v58 = vld [vmem:[%s26397_s1 + $0x1570] ss:$28 sps:$4 sm:$0xff]   ;;  %v18015_v59 = vld [vmem:[%s26397_s1 + $0x778] ss:$28 sps:$4 sm:$0xff]  }
  0xdc   :  { %12172 = vmatpush1.bf16.msra.mxu1 %v17941_v61  ;;  %v18023_v61 = vld [vmem:[%s26397_s1 + $0x7b4] ss:$28 sps:$4 sm:$0xff]  }
  0xdd   :  { %11680 = vmatpush1.bf16.msra.mxu0 %v17938_v60  ;;  %12173 = vmatprep.subr.bf16.mxu1 %v17949_v63  ;;  %v18020_v60 = vld [vmem:[%s26397_s1 + $0x15ac] ss:$28 sps:$4 sm:$0xff]  }
  0xde   :  { %11681 = vmatprep.subr.bf16.mxu0 %v17946_v62  ;;  %v18018_v62 = vld [vmem:[%s26397_s1 + $0x15a8] ss:$28 sps:$4 sm:$0xff]   ;;  %v18021_v63 = vld [vmem:[%s26397_s1 + $0x7b0] ss:$28 sps:$4 sm:$0xff]  }
  0xe0   :  { %12174 = vmatpush1.bf16.msra.mxu1 %v17947_v1  ;;  %v18029_v1 = vld [vmem:[%s26397_s1 + $0x7ec] ss:$28 sps:$4 sm:$0xff]  }
  0xe1   :  { %11682 = vmatpush1.bf16.msra.mxu0 %v17944_v0  ;;  %12175 = vmatprep.subr.bf16.mxu1 %v17955_v3  ;;  %v18026_v0 = vld [vmem:[%s26397_s1 + $0x15e4] ss:$28 sps:$4 sm:$0xff]  }
  0xe2   :  { %11683 = vmatprep.subr.bf16.mxu0 %v17952_v2  ;;  %v18024_v2 = vld [vmem:[%s26397_s1 + $0x15e0] ss:$28 sps:$4 sm:$0xff]   ;;  %v18027_v3 = vld [vmem:[%s26397_s1 + $0x7e8] ss:$28 sps:$4 sm:$0xff]  }
  0xe4   :  { %12176 = vmatpush1.bf16.msra.mxu1 %v17953_v5  ;;  %v18035_v5 = vld [vmem:[%s26397_s1 + $0x824] ss:$28 sps:$4 sm:$0xff]  }
  0xe5   :  { %11684 = vmatpush1.bf16.msra.mxu0 %v17950_v4  ;;  %12177 = vmatprep.subr.bf16.mxu1 %v17961_v9  ;;  %v18032_v4 = vld [vmem:[%s26397_s1 + $0x161c] ss:$28 sps:$4 sm:$0xff]  }
  0xe6   :  { %11685 = vmatprep.subr.bf16.mxu0 %v17958_v8  ;;  %v18030_v8 = vld [vmem:[%s26397_s1 + $0x1618] ss:$28 sps:$4 sm:$0xff]   ;;  %v18033_v9 = vld [vmem:[%s26397_s1 + $0x820] ss:$28 sps:$4 sm:$0xff]  }
  0xe8   :  { %12178 = vmatpush1.bf16.msra.mxu1 %v17959_v11  ;;  %v18041_v11 = vld [vmem:[%s26397_s1 + $0x85c] ss:$28 sps:$4 sm:$0xff]  }
  0xe9   :  { %11686 = vmatpush1.bf16.msra.mxu0 %v17956_v10  ;;  %12179 = vmatprep.subr.bf16.mxu1 %v17967_v13  ;;  %v18038_v10 = vld [vmem:[%s26397_s1 + $0x1654] ss:$28 sps:$4 sm:$0xff]  }
  0xea   :  { %11687 = vmatprep.subr.bf16.mxu0 %v17964_v12  ;;  %v18036_v12 = vld [vmem:[%s26397_s1 + $0x1650] ss:$28 sps:$4 sm:$0xff]   ;;  %v18039_v13 = vld [vmem:[%s26397_s1 + $0x858] ss:$28 sps:$4 sm:$0xff]  }
  0xec   :  { %12180 = vmatpush1.bf16.msra.mxu1 %v17965_v15  ;;  %v18047_v15 = vld [vmem:[%s26397_s1 + $0x894] ss:$28 sps:$4 sm:$0xff]  }
  0xed   :  { %11688 = vmatpush1.bf16.msra.mxu0 %v17962_v14  ;;  %12181 = vmatprep.subr.bf16.mxu1 %v17973_v17  ;;  %v18044_v14 = vld [vmem:[%s26397_s1 + $0x168c] ss:$28 sps:$4 sm:$0xff]  }
  0xee   :  { %11689 = vmatprep.subr.bf16.mxu0 %v17970_v16  ;;  %v18042_v16 = vld [vmem:[%s26397_s1 + $0x1688] ss:$28 sps:$4 sm:$0xff]   ;;  %v18045_v17 = vld [vmem:[%s26397_s1 + $0x890] ss:$28 sps:$4 sm:$0xff]  }
  0xf0   :  { %12182 = vmatpush1.bf16.msra.mxu1 %v17971_v21  ;;  %v18053_v21 = vld [vmem:[%s26397_s1 + $0x8cc] ss:$28 sps:$4 sm:$0xff]  }
  0xf1   :  { %11690 = vmatpush1.bf16.msra.mxu0 %v17968_v20  ;;  %12183 = vmatprep.subr.bf16.mxu1 %v17979_v25  ;;  %v18050_v20 = vld [vmem:[%s26397_s1 + $0x16c4] ss:$28 sps:$4 sm:$0xff]  }
  0xf2   :  { %11691 = vmatprep.subr.bf16.mxu0 %v17976_v24  ;;  %v18048_v24 = vld [vmem:[%s26397_s1 + $0x16c0] ss:$28 sps:$4 sm:$0xff]   ;;  %v18051_v25 = vld [vmem:[%s26397_s1 + $0x8c8] ss:$28 sps:$4 sm:$0xff]  }
  0xf4   :  { %12184 = vmatpush1.bf16.msra.mxu1 %v17977_v27  ;;  %v18059_v27 = vld [vmem:[%s26397_s1 + $0x904] ss:$28 sps:$4 sm:$0xff]  }
  0xf5   :  { %11692 = vmatpush1.bf16.msra.mxu0 %v17974_v26  ;;  %12185 = vmatprep.subr.bf16.mxu1 %v17985_v29  ;;  %v18056_v26 = vld [vmem:[%s26397_s1 + $0x16fc] ss:$28 sps:$4 sm:$0xff]  }
  0xf6   :  { %11693 = vmatprep.subr.bf16.mxu0 %v17982_v28  ;;  %v18054_v28 = vld [vmem:[%s26397_s1 + $0x16f8] ss:$28 sps:$4 sm:$0xff]   ;;  %v18057_v29 = vld [vmem:[%s26397_s1 + $0x900] ss:$28 sps:$4 sm:$0xff]  }
  0xf8   :  { %12186 = vmatpush1.bf16.msra.mxu1 %v17983_v33  ;;  %v18065_v33 = vld [vmem:[%s26397_s1 + $0x93c] ss:$28 sps:$4 sm:$0xff]  }
  0xf9   :  { %11694 = vmatpush1.bf16.msra.mxu0 %v17980_v32  ;;  %12187 = vmatprep.subr.bf16.mxu1 %v17991_v34  ;;  %v18062_v32 = vld [vmem:[%s26397_s1 + $0x1734] ss:$28 sps:$4 sm:$0xff]  }
  0xfa   :  { %11695 = vmatprep.subr.bf16.mxu0 %v17988_v22  ;;  %v18060_v22 = vld [vmem:[%s26397_s1 + $0x1730] ss:$28 sps:$4 sm:$0xff]   ;;  %v18063_v34 = vld [vmem:[%s26397_s1 + $0x938] ss:$28 sps:$4 sm:$0xff]  }
  0xfc   :  { %12188 = vmatpush1.bf16.msra.mxu1 %v17989_v39  ;;  %v18071_v39 = vld [vmem:[%s26397_s1 + $0x974] ss:$28 sps:$4 sm:$0xff]  }
  0xfd   :  { %11696 = vmatpush1.bf16.msra.mxu0 %v17986_v38  ;;  %12189 = vmatprep.subr.bf16.mxu1 %v17997_v41  ;;  %v18068_v38 = vld [vmem:[%s26397_s1 + $0x176c] ss:$28 sps:$4 sm:$0xff]  }
  0xfe   :  { %11697 = vmatprep.subr.bf16.mxu0 %v17994_v40  ;;  %v18066_v40 = vld [vmem:[%s26397_s1 + $0x1768] ss:$28 sps:$4 sm:$0xff]   ;;  %v18069_v41 = vld [vmem:[%s26397_s1 + $0x970] ss:$28 sps:$4 sm:$0xff]  }
 0x100   :  { %12190 = vmatpush1.bf16.msra.mxu1 %v17995_v43  ;;  %v18077_v43 = vld [vmem:[%s26397_s1 + $0x9ac] ss:$28 sps:$4 sm:$0xff]  }
 0x101   :  { %11698 = vmatpush1.bf16.msra.mxu0 %v17992_v42  ;;  %12200 = vmatprep.subr.bf16.mxu1 %v18004_v45  ;;  %v18074_v42 = vld [vmem:[%s26397_s1 + $0x17a4] ss:$28 sps:$4 sm:$0xff]  }
 0x102   :  { %11708 = vmatprep.subr.bf16.mxu0 %v18001_v44  ;;  %v18072_v44 = vld [vmem:[%s26397_s1 + $0x17a0] ss:$28 sps:$4 sm:$0xff]   ;;  %v18075_v45 = vld [vmem:[%s26397_s1 + $0x9a8] ss:$28 sps:$4 sm:$0xff]  }
 0x103   :  { %12192 = vmatmul.mubr.bf16.vlgmr.msra.gmra.mrb[4].mxu1 %v20783_v18 }
 0x104   :  { %11700 = vmatmul.mubr.bf16.vlgmr.msra.gmra.mrb[0].mxu0 %v21202_v47  ;;  %12201 = vmatpush1.bf16.msra.mxu1 %v18002_v50  ;;  %v18083_v50 = vld [vmem:[%s26397_s1 + $0x9e4] ss:$28 sps:$4 sm:$0xff]  }
 0x105   :  { %11709 = vmatpush1.bf16.msra.mxu0 %v17999_v46  ;;  %12202 = vmatprep.subr.bf16.mxu1 %v18011_v31  ;;  %v18080_v46 = vld [vmem:[%s26397_s1 + $0x17dc] ss:$28 sps:$4 sm:$0xff]  }
 0x106   :  { %11710 = vmatprep.subr.bf16.mxu0 %v18008_v51  ;;  %11740 = vmatprep.mubr.bf16.mxu0 %v21220_v52  ;;  %v18078_v51 = vld [vmem:[%s26397_s1 + $0x17d8] ss:$28 sps:$4 sm:$0xff]   ;;  %v18081_v31 = vld [vmem:[%s26397_s1 + $0x9e0] ss:$28 sps:$4 sm:$0xff]  }
 0x107   :  { %12232 = vmatprep.mubr.bf16.mxu1 %v20505_v53 }
 0x108   :  { %12203 = vmatpush1.bf16.msra.mxu1 %v18009_v55  ;;  %v18089_v55 = vld [vmem:[%s26397_s1 + $0xa1c] ss:$28 sps:$4 sm:$0xff]  }
 0x109   :  { %11711 = vmatpush1.bf16.msra.mxu0 %v18006_v54  ;;  %12204 = vmatprep.subr.bf16.mxu1 %v18017_v57  ;;  %v18086_v54 = vld [vmem:[%s26397_s1 + $0x1814] ss:$28 sps:$4 sm:$0xff]  }
 0x10a   :  { %11712 = vmatprep.subr.bf16.mxu0 %v18014_v56  ;;  %v18084_v56 = vld [vmem:[%s26397_s1 + $0x1810] ss:$28 sps:$4 sm:$0xff]   ;;  %v18087_v57 = vld [vmem:[%s26397_s1 + $0xa18] ss:$28 sps:$4 sm:$0xff]  }
 0x10c   :  { %12205 = vmatpush1.bf16.msra.mxu1 %v18015_v59  ;;  %v18095_v59 = vld [vmem:[%s26397_s1 + $0xa54] ss:$28 sps:$4 sm:$0xff]  }
 0x10d   :  { %11713 = vmatpush1.bf16.msra.mxu0 %v18012_v58  ;;  %12206 = vmatprep.subr.bf16.mxu1 %v18023_v61  ;;  %v18092_v58 = vld [vmem:[%s26397_s1 + $0x184c] ss:$28 sps:$4 sm:$0xff]  }
 0x10e   :  { %11714 = vmatprep.subr.bf16.mxu0 %v18020_v60  ;;  %v18090_v60 = vld [vmem:[%s26397_s1 + $0x1848] ss:$28 sps:$4 sm:$0xff]   ;;  %v18093_v61 = vld [vmem:[%s26397_s1 + $0xa50] ss:$28 sps:$4 sm:$0xff]  }
 0x110   :  { %12207 = vmatpush1.bf16.msra.mxu1 %v18021_v63  ;;  %v18102_v63 = vld [vmem:[%s26397_s1 + $0xa8c] ss:$28 sps:$4 sm:$0xff]  }
 0x111   :  { %11715 = vmatpush1.bf16.msra.mxu0 %v18018_v62  ;;  %12208 = vmatprep.subr.bf16.mxu1 %v18029_v1  ;;  %v18099_v62 = vld [vmem:[%s26397_s1 + $0x1884] ss:$28 sps:$4 sm:$0xff]   ;;  %v21413_v1 = vcombine.low %v21207_v49, %v21207_v49 }
 0x112   :  { %11716 = vmatprep.subr.bf16.mxu0 %v18026_v0  ;;  %v21409_v0 = vld [vmem:[%s26398_s0 + $0x38] sm:$0xff]  ;;  %v18109_v49 = vld [vmem:[%s26397_s1 + $0xac4] ss:$28 sps:$4 sm:$0xff]  }
 0x114   :  { %12209 = vmatpush1.bf16.msra.mxu1 %v18027_v3  ;;  %v18100_v3 = vld [vmem:[%s26397_s1 + $0xa88] ss:$28 sps:$4 sm:$0xff]  }
 0x115   :  { %11717 = vmatpush1.bf16.msra.mxu0 %v18024_v2  ;;  %12210 = vmatprep.subr.bf16.mxu1 %v18035_v5  ;;  %v18097_v2 = vld [vmem:[%s26397_s1 + $0x1880] ss:$28 sps:$4 sm:$0xff]   ;;  %v21429_v5 = vcombine.high %v21409_v0, %v21409_v0 }
 0x116   :  { %11718 = vmatprep.subr.bf16.mxu0 %v18032_v4  ;;  %v18106_v4 = vld [vmem:[%s26397_s1 + $0x18bc] ss:$28 sps:$4 sm:$0xff]  }
 0x118   :  { %12211 = vmatpush1.bf16.msra.mxu1 %v18033_v9  ;;  %v18107_v9 = vld [vmem:[%s26397_s1 + $0xac0] ss:$28 sps:$4 sm:$0xff]  }
 0x119   :  { %11719 = vmatpush1.bf16.msra.mxu0 %v18030_v8  ;;  %12212 = vmatprep.subr.bf16.mxu1 %v18041_v11  ;;  %v18104_v8 = vld [vmem:[%s26397_s1 + $0x18b8] ss:$28 sps:$4 sm:$0xff]  }
 0x11a   :  { %11720 = vmatprep.subr.bf16.mxu0 %v18038_v10  ;;  %v18112_v10 = vld [vmem:[%s26397_s1 + $0x18f4] ss:$28 sps:$4 sm:$0xff]   ;;  %v18115_v11 = vld [vmem:[%s26397_s1 + $0xafc] ss:$28 sps:$4 sm:$0xff]  }
 0x11c   :  { %12213 = vmatpush1.bf16.msra.mxu1 %v18039_v13  ;;  %v18113_v13 = vld [vmem:[%s26397_s1 + $0xaf8] ss:$28 sps:$4 sm:$0xff]  }
 0x11d   :  { %11721 = vmatpush1.bf16.msra.mxu0 %v18036_v12  ;;  %12214 = vmatprep.subr.bf16.mxu1 %v18047_v15  ;;  %v18110_v12 = vld [vmem:[%s26397_s1 + $0x18f0] ss:$28 sps:$4 sm:$0xff]  }
 0x11e   :  { %11722 = vmatprep.subr.bf16.mxu0 %v18044_v14  ;;  %v18118_v14 = vld [vmem:[%s26397_s1 + $0x192c] ss:$28 sps:$4 sm:$0xff]   ;;  %v18121_v15 = vld [vmem:[%s26397_s1 + $0xb34] ss:$28 sps:$4 sm:$0xff]  }
 0x120   :  { %12215 = vmatpush1.bf16.msra.mxu1 %v18045_v17  ;;  %v18119_v17 = vld [vmem:[%s26397_s1 + $0xb30] ss:$28 sps:$4 sm:$0xff]  }
 0x121   :  { %11723 = vmatpush1.bf16.msra.mxu0 %v18042_v16  ;;  %12216 = vmatprep.subr.bf16.mxu1 %v18053_v21  ;;  %v18116_v16 = vld [vmem:[%s26397_s1 + $0x1928] ss:$28 sps:$4 sm:$0xff]  }
 0x122   :  { %11724 = vmatprep.subr.bf16.mxu0 %v18050_v20  ;;  %v18124_v20 = vld [vmem:[%s26397_s1 + $0x1964] ss:$28 sps:$4 sm:$0xff]   ;;  %v18127_v21 = vld [vmem:[%s26397_s1 + $0xb6c] ss:$28 sps:$4 sm:$0xff]  }
 0x124   :  { %12217 = vmatpush1.bf16.msra.mxu1 %v18051_v25  ;;  %v18125_v25 = vld [vmem:[%s26397_s1 + $0xb68] ss:$28 sps:$4 sm:$0xff]  }
 0x125   :  { %11725 = vmatpush1.bf16.msra.mxu0 %v18048_v24  ;;  %12218 = vmatprep.subr.bf16.mxu1 %v18059_v27  ;;  %v18122_v24 = vld [vmem:[%s26397_s1 + $0x1960] ss:$28 sps:$4 sm:$0xff]  }
 0x126   :  { %11726 = vmatprep.subr.bf16.mxu0 %v18056_v26  ;;  %v18130_v26 = vld [vmem:[%s26397_s1 + $0x199c] ss:$28 sps:$4 sm:$0xff]   ;;  %v18133_v27 = vld [vmem:[%s26397_s1 + $0xba4] ss:$28 sps:$4 sm:$0xff]  }
 0x128   :  { %12219 = vmatpush1.bf16.msra.mxu1 %v18057_v29  ;;  %v18131_v29 = vld [vmem:[%s26397_s1 + $0xba0] ss:$28 sps:$4 sm:$0xff]  }
 0x129   :  { %11727 = vmatpush1.bf16.msra.mxu0 %v18054_v28  ;;  %12220 = vmatprep.subr.bf16.mxu1 %v18065_v33  ;;  %v18128_v28 = vld [vmem:[%s26397_s1 + $0x1998] ss:$28 sps:$4 sm:$0xff]  }
 0x12a   :  { %11728 = vmatprep.subr.bf16.mxu0 %v18062_v32  ;;  %v18136_v32 = vld [vmem:[%s26397_s1 + $0x19d4] ss:$28 sps:$4 sm:$0xff]   ;;  %v18139_v33 = vld [vmem:[%s26397_s1 + $0xbdc] ss:$28 sps:$4 sm:$0xff]  }
 0x12c   :  { %12221 = vmatpush1.bf16.msra.mxu1 %v18063_v34  ;;  %v18137_v34 = vld [vmem:[%s26397_s1 + $0xbd8] ss:$28 sps:$4 sm:$0xff]  }
 0x12d   :  { %11729 = vmatpush1.bf16.msra.mxu0 %v18060_v22  ;;  %12222 = vmatprep.subr.bf16.mxu1 %v18071_v39  ;;  %v18134_v22 = vld [vmem:[%s26397_s1 + $0x19d0] ss:$28 sps:$4 sm:$0xff]  }
 0x12e   :  { %11730 = vmatprep.subr.bf16.mxu0 %v18068_v38  ;;  %v18142_v38 = vld [vmem:[%s26397_s1 + $0x1a0c] ss:$28 sps:$4 sm:$0xff]   ;;  %v18145_v39 = vld [vmem:[%s26397_s1 + $0xc14] ss:$28 sps:$4 sm:$0xff]  }
 0x130   :  { %12223 = vmatpush1.bf16.msra.mxu1 %v18069_v41  ;;  %v18143_v41 = vld [vmem:[%s26397_s1 + $0xc10] ss:$28 sps:$4 sm:$0xff]  }
 0x131   :  { %11731 = vmatpush1.bf16.msra.mxu0 %v18066_v40  ;;  %12224 = vmatprep.subr.bf16.mxu1 %v18077_v43  ;;  %v18140_v40 = vld [vmem:[%s26397_s1 + $0x1a08] ss:$28 sps:$4 sm:$0xff]  }
 0x132   :  { %11732 = vmatprep.subr.bf16.mxu0 %v18074_v42  ;;  %v18148_v42 = vld [vmem:[%s26397_s1 + $0x1a44] ss:$28 sps:$4 sm:$0xff]   ;;  %v18151_v43 = vld [vmem:[%s26397_s1 + $0xc4c] ss:$28 sps:$4 sm:$0xff]  }
 0x134   :  { %12225 = vmatpush1.bf16.msra.mxu1 %v18075_v45  ;;  %v18149_v45 = vld [vmem:[%s26397_s1 + $0xc48] ss:$28 sps:$4 sm:$0xff]  }
 0x135   :  { %11733 = vmatpush1.bf16.msra.mxu0 %v18072_v44  ;;  %12226 = vmatprep.subr.bf16.mxu1 %v18083_v50  ;;  %v18146_v44 = vld [vmem:[%s26397_s1 + $0x1a40] ss:$28 sps:$4 sm:$0xff]  }
 0x136   :  { %11734 = vmatprep.subr.bf16.mxu0 %v18080_v46  ;;  %v18154_v46 = vld [vmem:[%s26397_s1 + $0x1a7c] ss:$28 sps:$4 sm:$0xff]   ;;  %v18157_v50 = vld [vmem:[%s26397_s1 + $0xc84] ss:$28 sps:$4 sm:$0xff]  }
 0x138   :  { %12227 = vmatpush1.bf16.msra.mxu1 %v18081_v31  ;;  %v18155_v31 = vld [vmem:[%s26397_s1 + $0xc80] ss:$28 sps:$4 sm:$0xff]  }
 0x139   :  { %11735 = vmatpush1.bf16.msra.mxu0 %v18078_v51  ;;  %12228 = vmatprep.subr.bf16.mxu1 %v18089_v55  ;;  %v18152_v51 = vld [vmem:[%s26397_s1 + $0x1a78] ss:$28 sps:$4 sm:$0xff]  }
 0x13a   :  { %11736 = vmatprep.subr.bf16.mxu0 %v18086_v54  ;;  %v18160_v54 = vld [vmem:[%s26397_s1 + $0x1ab4] ss:$28 sps:$4 sm:$0xff]   ;;  %v18163_v55 = vld [vmem:[%s26397_s1 + $0xcbc] ss:$28 sps:$4 sm:$0xff]  }
 0x13c   :  { %12229 = vmatpush1.bf16.msra.mxu1 %v18087_v57  ;;  %v18161_v57 = vld [vmem:[%s26397_s1 + $0xcb8] ss:$28 sps:$4 sm:$0xff]  }
 0x13d   :  { %11737 = vmatpush1.bf16.msra.mxu0 %v18084_v56  ;;  %12230 = vmatprep.subr.bf16.mxu1 %v18095_v59  ;;  %v18158_v56 = vld [vmem:[%s26397_s1 + $0x1ab0] ss:$28 sps:$4 sm:$0xff]  }
 0x13e   :  { %11738 = vmatprep.subr.bf16.mxu0 %v18092_v58  ;;  %v18166_v58 = vld [vmem:[%s26397_s1 + $0x1aec] ss:$28 sps:$4 sm:$0xff]   ;;  %v18169_v59 = vld [vmem:[%s26397_s1 + $0xcf4] ss:$28 sps:$4 sm:$0xff]  }
 0x140   :  { %12231 = vmatpush1.bf16.msra.mxu1 %v18093_v61  ;;  %v18167_v61 = vld [vmem:[%s26397_s1 + $0xcf0] ss:$28 sps:$4 sm:$0xff]  }
 0x141   :  { %11739 = vmatpush1.bf16.msra.mxu0 %v18090_v60  ;;  %12241 = vmatprep.subr.bf16.mxu1 %v18102_v63  ;;  %v18164_v60 = vld [vmem:[%s26397_s1 + $0x1ae8] ss:$28 sps:$4 sm:$0xff]  }
 0x142   :  { %11749 = vmatprep.subr.bf16.mxu0 %v18099_v62  ;;  %v18172_v62 = vld [vmem:[%s26397_s1 + $0x1b24] ss:$28 sps:$4 sm:$0xff]   ;;  %v18175_v63 = vld [vmem:[%s26397_s1 + $0xd2c] ss:$28 sps:$4 sm:$0xff]  }
 0x143   :  { %12233 = vmatmul.mubr.bf16.vlgmr.msra.gmra.mrb[4].mxu1 %v20559_v7 }
 0x144   :  { %11741 = vmatmul.mubr.bf16.vlgmr.msra.gmra.mrb[0].mxu0 %v21413_v1  ;;  %12242 = vmatpush1.bf16.msra.mxu1 %v18100_v3  ;;  %v18173_v3 = vld [vmem:[%s26397_s1 + $0xd28] ss:$28 sps:$4 sm:$0xff]  }
 0x145   :  { %11750 = vmatpush1.bf16.msra.mxu0 %v18097_v2  ;;  %12243 = vmatprep.subr.bf16.mxu1 %v18109_v49  ;;  %v18170_v2 = vld [vmem:[%s26397_s1 + $0x1b20] ss:$28 sps:$4 sm:$0xff]  }
 0x146   :  { %11751 = vmatprep.subr.bf16.mxu0 %v18106_v4  ;;  %11781 = vmatprep.mubr.bf16.mxu0 %v21429_v5  ;;  %v18178_v4 = vld [vmem:[%s26397_s1 + $0x1b5c] ss:$28 sps:$4 sm:$0xff]   ;;  %v18181_v49 = vld [vmem:[%s26397_s1 + $0xd64] ss:$28 sps:$4 sm:$0xff]  }
 0x147   :  { %12273 = vmatprep.mubr.bf16.mxu1 %v20657_v37 }
 0x148   :  { %12244 = vmatpush1.bf16.msra.mxu1 %v18107_v9  ;;  %v18179_v9 = vld [vmem:[%s26397_s1 + $0xd60] ss:$28 sps:$4 sm:$0xff]  }
 0x149   :  { %11752 = vmatpush1.bf16.msra.mxu0 %v18104_v8  ;;  %12245 = vmatprep.subr.bf16.mxu1 %v18115_v11  ;;  %v18176_v8 = vld [vmem:[%s26397_s1 + $0x1b58] ss:$28 sps:$4 sm:$0xff]  }
 0x14a   :  { %11753 = vmatprep.subr.bf16.mxu0 %v18112_v10  ;;  %v18184_v10 = vld [vmem:[%s26397_s1 + $0x1b94] ss:$28 sps:$4 sm:$0xff]   ;;  %v18187_v11 = vld [vmem:[%s26397_s1 + $0xd9c] ss:$28 sps:$4 sm:$0xff]  }
 0x14c   :  { %12246 = vmatpush1.bf16.msra.mxu1 %v18113_v13  ;;  %v18185_v13 = vld [vmem:[%s26397_s1 + $0xd98] ss:$28 sps:$4 sm:$0xff]  }
 0x14d   :  { %11754 = vmatpush1.bf16.msra.mxu0 %v18110_v12  ;;  %12247 = vmatprep.subr.bf16.mxu1 %v18121_v15  ;;  %v18182_v12 = vld [vmem:[%s26397_s1 + $0x1b90] ss:$28 sps:$4 sm:$0xff]  }
 0x14e   :  { %11755 = vmatprep.subr.bf16.mxu0 %v18118_v14  ;;  %v18190_v14 = vld [vmem:[%s26397_s1 + $0x1bcc] ss:$28 sps:$4 sm:$0xff]   ;;  %v18193_v15 = vld [vmem:[%s26397_s1 + $0xdd4] ss:$28 sps:$4 sm:$0xff]  }
 0x150   :  { %12248 = vmatpush1.bf16.msra.mxu1 %v18119_v17  ;;  %v18191_v17 = vld [vmem:[%s26397_s1 + $0xdd0] ss:$28 sps:$4 sm:$0xff]  }
 0x151   :  { %11756 = vmatpush1.bf16.msra.mxu0 %v18116_v16  ;;  %12249 = vmatprep.subr.bf16.mxu1 %v18127_v21  ;;  %v18188_v16 = vld [vmem:[%s26397_s1 + $0x1bc8] ss:$28 sps:$4 sm:$0xff]  }
 0x152   :  { %11757 = vmatprep.subr.bf16.mxu0 %v18124_v20  ;;  %v18197_v20 = vld [vmem:[%s26397_s1 + $0x1c04] ss:$28 sps:$4 sm:$0xff]   ;;  %v18200_v21 = vld [vmem:[%s26397_s1 + $0xe0c] ss:$28 sps:$4 sm:$0xff]  }
 0x154   :  { %12250 = vmatpush1.bf16.msra.mxu1 %v18125_v25  ;;  %v21622_v25 = vcombine.low %v21409_v0, %v21409_v0  ;;  %v18207_v0 = vld [vmem:[%s26397_s1 + $0xe44] ss:$28 sps:$4 sm:$0xff]  }
 0x155   :  { %11758 = vmatpush1.bf16.msra.mxu0 %v18122_v24  ;;  %12251 = vmatprep.subr.bf16.mxu1 %v18133_v27  ;;  %v21618_v24 = vld [vmem:[%s26398_s0 + $0x40] sm:$0xff] }
 0x156   :  { %11759 = vmatprep.subr.bf16.mxu0 %v18130_v26  ;;  %v18195_v26 = vld [vmem:[%s26397_s1 + $0x1c00] ss:$28 sps:$4 sm:$0xff]   ;;  %v18198_v27 = vld [vmem:[%s26397_s1 + $0xe08] ss:$28 sps:$4 sm:$0xff]  }
 0x158   :  { %12252 = vmatpush1.bf16.msra.mxu1 %v18131_v29  ;;  %v21638_v29 = vcombine.high %v21618_v24, %v21618_v24 }
 0x159   :  { %11760 = vmatpush1.bf16.msra.mxu0 %v18128_v28  ;;  %12253 = vmatprep.subr.bf16.mxu1 %v18139_v33  ;;  %v18204_v28 = vld [vmem:[%s26397_s1 + $0x1c3c] ss:$28 sps:$4 sm:$0xff]  }
 0x15a   :  { %11761 = vmatprep.subr.bf16.mxu0 %v18136_v32  ;;  %v18202_v32 = vld [vmem:[%s26397_s1 + $0x1c38] ss:$28 sps:$4 sm:$0xff]   ;;  %v18205_v33 = vld [vmem:[%s26397_s1 + $0xe40] ss:$28 sps:$4 sm:$0xff]  }
 0x15c   :  { %12254 = vmatpush1.bf16.msra.mxu1 %v18137_v34  ;;  %v18213_v34 = vld [vmem:[%s26397_s1 + $0xe7c] ss:$28 sps:$4 sm:$0xff]  }
 0x15d   :  { %11762 = vmatpush1.bf16.msra.mxu0 %v18134_v22  ;;  %12255 = vmatprep.subr.bf16.mxu1 %v18145_v39  ;;  %v18210_v22 = vld [vmem:[%s26397_s1 + $0x1c74] ss:$28 sps:$4 sm:$0xff]  }
 0x15e   :  { %11763 = vmatprep.subr.bf16.mxu0 %v18142_v38  ;;  %v18208_v38 = vld [vmem:[%s26397_s1 + $0x1c70] ss:$28 sps:$4 sm:$0xff]   ;;  %v18211_v39 = vld [vmem:[%s26397_s1 + $0xe78] ss:$28 sps:$4 sm:$0xff]  }
 0x160   :  { %12256 = vmatpush1.bf16.msra.mxu1 %v18143_v41  ;;  %v18219_v41 = vld [vmem:[%s26397_s1 + $0xeb4] ss:$28 sps:$4 sm:$0xff]  }
 0x161   :  { %11764 = vmatpush1.bf16.msra.mxu0 %v18140_v40  ;;  %12257 = vmatprep.subr.bf16.mxu1 %v18151_v43  ;;  %v18216_v40 = vld [vmem:[%s26397_s1 + $0x1cac] ss:$28 sps:$4 sm:$0xff]  }
 0x162   :  { %11765 = vmatprep.subr.bf16.mxu0 %v18148_v42  ;;  %v18214_v42 = vld [vmem:[%s26397_s1 + $0x1ca8] ss:$28 sps:$4 sm:$0xff]   ;;  %v18217_v43 = vld [vmem:[%s26397_s1 + $0xeb0] ss:$28 sps:$4 sm:$0xff]  }
 0x164   :  { %12258 = vmatpush1.bf16.msra.mxu1 %v18149_v45  ;;  %v18225_v45 = vld [vmem:[%s26397_s1 + $0xeec] ss:$28 sps:$4 sm:$0xff]  }
 0x165   :  { %11766 = vmatpush1.bf16.msra.mxu0 %v18146_v44  ;;  %12259 = vmatprep.subr.bf16.mxu1 %v18157_v50  ;;  %v18222_v44 = vld [vmem:[%s26397_s1 + $0x1ce4] ss:$28 sps:$4 sm:$0xff]  }
 0x166   :  { %11767 = vmatprep.subr.bf16.mxu0 %v18154_v46  ;;  %v18220_v46 = vld [vmem:[%s26397_s1 + $0x1ce0] ss:$28 sps:$4 sm:$0xff]   ;;  %v18223_v50 = vld [vmem:[%s26397_s1 + $0xee8] ss:$28 sps:$4 sm:$0xff]  }
 0x168   :  { %12260 = vmatpush1.bf16.msra.mxu1 %v18155_v31  ;;  %v18231_v31 = vld [vmem:[%s26397_s1 + $0xf24] ss:$28 sps:$4 sm:$0xff]  }
 0x169   :  { %11768 = vmatpush1.bf16.msra.mxu0 %v18152_v51  ;;  %12261 = vmatprep.subr.bf16.mxu1 %v18163_v55  ;;  %v18228_v51 = vld [vmem:[%s26397_s1 + $0x1d1c] ss:$28 sps:$4 sm:$0xff]  }
 0x16a   :  { %11769 = vmatprep.subr.bf16.mxu0 %v18160_v54  ;;  %v18226_v54 = vld [vmem:[%s26397_s1 + $0x1d18] ss:$28 sps:$4 sm:$0xff]   ;;  %v18229_v55 = vld [vmem:[%s26397_s1 + $0xf20] ss:$28 sps:$4 sm:$0xff]  }
 0x16c   :  { %12262 = vmatpush1.bf16.msra.mxu1 %v18161_v57  ;;  %v18237_v57 = vld [vmem:[%s26397_s1 + $0xf5c] ss:$28 sps:$4 sm:$0xff]  }
 0x16d   :  { %11770 = vmatpush1.bf16.msra.mxu0 %v18158_v56  ;;  %12263 = vmatprep.subr.bf16.mxu1 %v18169_v59  ;;  %v18234_v56 = vld [vmem:[%s26397_s1 + $0x1d54] ss:$28 sps:$4 sm:$0xff]  }
 0x16e   :  { %11771 = vmatprep.subr.bf16.mxu0 %v18166_v58  ;;  %v18232_v58 = vld [vmem:[%s26397_s1 + $0x1d50] ss:$28 sps:$4 sm:$0xff]   ;;  %v18235_v59 = vld [vmem:[%s26397_s1 + $0xf58] ss:$28 sps:$4 sm:$0xff]  }
 0x170   :  { %12264 = vmatpush1.bf16.msra.mxu1 %v18167_v61  ;;  %v18243_v61 = vld [vmem:[%s26397_s1 + $0xf94] ss:$28 sps:$4 sm:$0xff]  }
 0x171   :  { %11772 = vmatpush1.bf16.msra.mxu0 %v18164_v60  ;;  %12265 = vmatprep.subr.bf16.mxu1 %v18175_v63  ;;  %v18240_v60 = vld [vmem:[%s26397_s1 + $0x1d8c] ss:$28 sps:$4 sm:$0xff]  }
 0x172   :  { %11773 = vmatprep.subr.bf16.mxu0 %v18172_v62  ;;  %v18238_v62 = vld [vmem:[%s26397_s1 + $0x1d88] ss:$28 sps:$4 sm:$0xff]   ;;  %v18241_v63 = vld [vmem:[%s26397_s1 + $0xf90] ss:$28 sps:$4 sm:$0xff]  }
 0x174   :  { %12266 = vmatpush1.bf16.msra.mxu1 %v18173_v3  ;;  %v18249_v3 = vld [vmem:[%s26397_s1 + $0xfcc] ss:$28 sps:$4 sm:$0xff]  }
 0x175   :  { %11774 = vmatpush1.bf16.msra.mxu0 %v18170_v2  ;;  %12267 = vmatprep.subr.bf16.mxu1 %v18181_v49  ;;  %v18246_v2 = vld [vmem:[%s26397_s1 + $0x1dc4] ss:$28 sps:$4 sm:$0xff]  }
 0x176   :  { %11775 = vmatprep.subr.bf16.mxu0 %v18178_v4  ;;  %v18244_v4 = vld [vmem:[%s26397_s1 + $0x1dc0] ss:$28 sps:$4 sm:$0xff]   ;;  %v18247_v49 = vld [vmem:[%s26397_s1 + $0xfc8] ss:$28 sps:$4 sm:$0xff]  }
 0x178   :  { %12268 = vmatpush1.bf16.msra.mxu1 %v18179_v9  ;;  %v18255_v9 = vld [vmem:[%s26397_s1 + $0x1004] ss:$28 sps:$4 sm:$0xff]  }
 0x179   :  { %11776 = vmatpush1.bf16.msra.mxu0 %v18176_v8  ;;  %12269 = vmatprep.subr.bf16.mxu1 %v18187_v11  ;;  %v18252_v8 = vld [vmem:[%s26397_s1 + $0x1dfc] ss:$28 sps:$4 sm:$0xff]  }
 0x17a   :  { %11777 = vmatprep.subr.bf16.mxu0 %v18184_v10  ;;  %v18250_v10 = vld [vmem:[%s26397_s1 + $0x1df8] ss:$28 sps:$4 sm:$0xff]   ;;  %v18253_v11 = vld [vmem:[%s26397_s1 + $0x1000] ss:$28 sps:$4 sm:$0xff]  }
 0x17c   :  { %12270 = vmatpush1.bf16.msra.mxu1 %v18185_v13  ;;  %v18261_v13 = vld [vmem:[%s26397_s1 + $0x103c] ss:$28 sps:$4 sm:$0xff]  }
 0x17d   :  { %11778 = vmatpush1.bf16.msra.mxu0 %v18182_v12  ;;  %12271 = vmatprep.subr.bf16.mxu1 %v18193_v15  ;;  %v18258_v12 = vld [vmem:[%s26397_s1 + $0x1e34] ss:$28 sps:$4 sm:$0xff]  }
 0x17e   :  { %11779 = vmatprep.subr.bf16.mxu0 %v18190_v14  ;;  %v18256_v14 = vld [vmem:[%s26397_s1 + $0x1e30] ss:$28 sps:$4 sm:$0xff]   ;;  %v18259_v15 = vld [vmem:[%s26397_s1 + $0x1038] ss:$28 sps:$4 sm:$0xff]  }
 0x180   :  { %12272 = vmatpush1.bf16.msra.mxu1 %v18191_v17  ;;  %v18267_v17 = vld [vmem:[%s26397_s1 + $0x1074] ss:$28 sps:$4 sm:$0xff]  }
 0x181   :  { %11780 = vmatpush1.bf16.msra.mxu0 %v18188_v16  ;;  %12282 = vmatprep.subr.bf16.mxu1 %v18200_v21  ;;  %v18264_v16 = vld [vmem:[%s26397_s1 + $0x1e6c] ss:$28 sps:$4 sm:$0xff]  }
 0x182   :  { %11790 = vmatprep.subr.bf16.mxu0 %v18197_v20  ;;  %v18262_v20 = vld [vmem:[%s26397_s1 + $0x1e68] ss:$28 sps:$4 sm:$0xff]   ;;  %v18265_v21 = vld [vmem:[%s26397_s1 + $0x1070] ss:$28 sps:$4 sm:$0xff]  }
 0x183   :  { %12274 = vmatmul.mubr.bf16.vlgmr.msra.gmra.mrb[4].mxu1 %v20787_v19 }
 0x184   :  { %11782 = vmatmul.mubr.bf16.vlgmr.msra.gmra.mrb[0].mxu0 %v21622_v25  ;;  %12283 = vmatpush1.bf16.msra.mxu1 %v18198_v27  ;;  %v18273_v27 = vld [vmem:[%s26397_s1 + $0x10ac] ss:$28 sps:$4 sm:$0xff]  }
 0x185   :  { %11791 = vmatpush1.bf16.msra.mxu0 %v18195_v26  ;;  %12284 = vmatprep.subr.bf16.mxu1 %v18207_v0  ;;  %v18270_v26 = vld [vmem:[%s26397_s1 + $0x1ea4] ss:$28 sps:$4 sm:$0xff]  }
 0x186   :  { %11792 = vmatprep.subr.bf16.mxu0 %v18204_v28  ;;  %11822 = vmatprep.mubr.bf16.mxu0 %v21638_v29  ;;  %v18268_v28 = vld [vmem:[%s26397_s1 + $0x1ea0] ss:$28 sps:$4 sm:$0xff]   ;;  %v18271_v0 = vld [vmem:[%s26397_s1 + $0x10a8] ss:$28 sps:$4 sm:$0xff]  }
 0x187   :  { %12314 = vmatprep.mubr.bf16.mxu1 %v20802_v23 }
 0x188   :  { %12285 = vmatpush1.bf16.msra.mxu1 %v18205_v33  ;;  %v18276_v33 = vld [vmem:[%s26397_s1 + $0x1edc] ss:$28 sps:$4 sm:$0xff]  }
 0x189   :  { %11793 = vmatpush1.bf16.msra.mxu0 %v18202_v32  ;;  %12286 = vmatprep.subr.bf16.mxu1 %v18213_v34  ;;  %v21782_v32 = vpop.f32.mrb[0].mxu1 }
 0x18a   :  { %11794 = vmatprep.subr.bf16.mxu0 %v18210_v22  ;;  %v18279_v22 = vld [vmem:[%s26397_s1 + $0x10e4] ss:$28 sps:$4 sm:$0xff]   ;;  %v21790_v34 = vpop.f32.mrb[1].mxu1 }
 0x18c   :  { %12287 = vmatpush1.bf16.msra.mxu1 %v18211_v39 }
 0x18d   :  { %11795 = vmatpush1.bf16.msra.mxu0 %v18208_v38  ;;  %12288 = vmatprep.subr.bf16.mxu1 %v18219_v41  ;;  %v11541_v38 = vpop.f32.mrb[2].mxu1  ;;  %v18277_v41 = vld [vmem:[%s26397_s1 + $0x10e0] ss:$28 sps:$4 sm:$0xff]  }
 0x18e   :  { %11796 = vmatprep.subr.bf16.mxu0 %v18216_v40  ;;  %v11542_v39 = vpop.f32.mrb[3].mxu1  ;;  %v18274_v40 = vld [vmem:[%s26397_s1 + $0x1ed8] ss:$28 sps:$4 sm:$0xff]   ;;  %v18336_v38 = vld [vmem:[%s26397_s1 + $0x2108] ss:$28 sps:$4 sm:$0xff]  }
 0x18f   :  { %v18339_v39 = vld [vmem:[%s26397_s1 + $0x1310] ss:$28 sps:$4 sm:$0xff]  }
 0x190   :  { %12289 = vmatpush1.bf16.msra.mxu1 %v18217_v43  ;;  %v18285_v43 = vld [vmem:[%s26397_s1 + $0x111c] ss:$28 sps:$4 sm:$0xff]  }
 0x191   :  { %11797 = vmatpush1.bf16.msra.mxu0 %v18214_v42  ;;  %12290 = vmatprep.subr.bf16.mxu1 %v18225_v45  ;;  %v18282_v42 = vld [vmem:[%s26397_s1 + $0x1f14] ss:$28 sps:$4 sm:$0xff]  }
 0x192   :  { %11798 = vmatprep.subr.bf16.mxu0 %v18222_v44  ;;  %v18280_v44 = vld [vmem:[%s26397_s1 + $0x1f10] ss:$28 sps:$4 sm:$0xff]   ;;  %v18283_v45 = vld [vmem:[%s26397_s1 + $0x1118] ss:$28 sps:$4 sm:$0xff]  }
 0x194   :  { %12291 = vmatpush1.bf16.msra.mxu1 %v18223_v50  ;;  %v18291_v50 = vld [vmem:[%s26397_s1 + $0x1154] ss:$28 sps:$4 sm:$0xff]  }
 0x195   :  { %11799 = vmatpush1.bf16.msra.mxu0 %v18220_v46  ;;  %12292 = vmatprep.subr.bf16.mxu1 %v18231_v31  ;;  %v18288_v46 = vld [vmem:[%s26397_s1 + $0x1f4c] ss:$28 sps:$4 sm:$0xff]  }
 0x196   :  { %11800 = vmatprep.subr.bf16.mxu0 %v18228_v51  ;;  %v18286_v51 = vld [vmem:[%s26397_s1 + $0x1f48] ss:$28 sps:$4 sm:$0xff]   ;;  %v18289_v31 = vld [vmem:[%s26397_s1 + $0x1150] ss:$28 sps:$4 sm:$0xff]  }
 0x198   :  { %12293 = vmatpush1.bf16.msra.mxu1 %v18229_v55  ;;  %v18298_v55 = vld [vmem:[%s26397_s1 + $0x118c] ss:$28 sps:$4 sm:$0xff]  }
 0x199   :  { %11801 = vmatpush1.bf16.msra.mxu0 %v18226_v54  ;;  %12294 = vmatprep.subr.bf16.mxu1 %v18237_v57  ;;  %v18295_v54 = vld [vmem:[%s26397_s1 + $0x1f84] ss:$28 sps:$4 sm:$0xff]   ;;  %v21835_v57 = vcombine.low %v21618_v24, %v21618_v24 }
 0x19a   :  { %11802 = vmatprep.subr.bf16.mxu0 %v18234_v56  ;;  %v21831_v56 = vld [vmem:[%s26398_s0 + $0x48] sm:$0xff]  ;;  %v18305_v24 = vld [vmem:[%s26397_s1 + $0x11c4] ss:$28 sps:$4 sm:$0xff]  }
 0x19c   :  { %12295 = vmatpush1.bf16.msra.mxu1 %v18235_v59  ;;  %v18296_v59 = vld [vmem:[%s26397_s1 + $0x1188] ss:$28 sps:$4 sm:$0xff]  }
 0x19d   :  { %11803 = vmatpush1.bf16.msra.mxu0 %v18232_v58  ;;  %12296 = vmatprep.subr.bf16.mxu1 %v18243_v61  ;;  %v18293_v58 = vld [vmem:[%s26397_s1 + $0x1f80] ss:$28 sps:$4 sm:$0xff]   ;;  %v21851_v61 = vcombine.high %v21831_v56, %v21831_v56 }
 0x19e   :  { %11804 = vmatprep.subr.bf16.mxu0 %v18240_v60  ;;  %v18302_v60 = vld [vmem:[%s26397_s1 + $0x1fbc] ss:$28 sps:$4 sm:$0xff]  }
 0x1a0   :  { %12297 = vmatpush1.bf16.msra.mxu1 %v18241_v63  ;;  %v18303_v63 = vld [vmem:[%s26397_s1 + $0x11c0] ss:$28 sps:$4 sm:$0xff]  }
 0x1a1   :  { %11805 = vmatpush1.bf16.msra.mxu0 %v18238_v62  ;;  %12298 = vmatprep.subr.bf16.mxu1 %v18249_v3  ;;  %v18300_v62 = vld [vmem:[%s26397_s1 + $0x1fb8] ss:$28 sps:$4 sm:$0xff]  }
 0x1a2   :  { %11806 = vmatprep.subr.bf16.mxu0 %v18246_v2  ;;  %v18308_v2 = vld [vmem:[%s26397_s1 + $0x1ff4] ss:$28 sps:$4 sm:$0xff]   ;;  %v18311_v3 = vld [vmem:[%s26397_s1 + $0x11fc] ss:$28 sps:$4 sm:$0xff]  }
 0x1a4   :  { %12299 = vmatpush1.bf16.msra.mxu1 %v18247_v49  ;;  %v18309_v49 = vld [vmem:[%s26397_s1 + $0x11f8] ss:$28 sps:$4 sm:$0xff]  }
 0x1a5   :  { %11807 = vmatpush1.bf16.msra.mxu0 %v18244_v4  ;;  %12300 = vmatprep.subr.bf16.mxu1 %v18255_v9  ;;  %v18306_v4 = vld [vmem:[%s26397_s1 + $0x1ff0] ss:$28 sps:$4 sm:$0xff]  }
 0x1a6   :  { %11808 = vmatprep.subr.bf16.mxu0 %v18252_v8  ;;  %v18314_v8 = vld [vmem:[%s26397_s1 + $0x202c] ss:$28 sps:$4 sm:$0xff]   ;;  %v18317_v9 = vld [vmem:[%s26397_s1 + $0x1234] ss:$28 sps:$4 sm:$0xff]  }
 0x1a8   :  { %12301 = vmatpush1.bf16.msra.mxu1 %v18253_v11  ;;  %v18315_v11 = vld [vmem:[%s26397_s1 + $0x1230] ss:$28 sps:$4 sm:$0xff]  }
 0x1a9   :  { %11809 = vmatpush1.bf16.msra.mxu0 %v18250_v10  ;;  %12302 = vmatprep.subr.bf16.mxu1 %v18261_v13  ;;  %v18312_v10 = vld [vmem:[%s26397_s1 + $0x2028] ss:$28 sps:$4 sm:$0xff]  }
 0x1aa   :  { %11810 = vmatprep.subr.bf16.mxu0 %v18258_v12  ;;  %v18320_v12 = vld [vmem:[%s26397_s1 + $0x2064] ss:$28 sps:$4 sm:$0xff]   ;;  %v18323_v13 = vld [vmem:[%s26397_s1 + $0x126c] ss:$28 sps:$4 sm:$0xff]  }
 0x1ac   :  { %12303 = vmatpush1.bf16.msra.mxu1 %v18259_v15  ;;  %v18321_v15 = vld [vmem:[%s26397_s1 + $0x1268] ss:$28 sps:$4 sm:$0xff]  }
 0x1ad   :  { %11811 = vmatpush1.bf16.msra.mxu0 %v18256_v14  ;;  %12304 = vmatprep.subr.bf16.mxu1 %v18267_v17  ;;  %v18318_v14 = vld [vmem:[%s26397_s1 + $0x2060] ss:$28 sps:$4 sm:$0xff]  }
 0x1ae   :  { %11812 = vmatprep.subr.bf16.mxu0 %v18264_v16  ;;  %v18326_v16 = vld [vmem:[%s26397_s1 + $0x209c] ss:$28 sps:$4 sm:$0xff]   ;;  %v18329_v17 = vld [vmem:[%s26397_s1 + $0x12a4] ss:$28 sps:$4 sm:$0xff]  }
 0x1b0   :  { %12305 = vmatpush1.bf16.msra.mxu1 %v18265_v21  ;;  %v18327_v21 = vld [vmem:[%s26397_s1 + $0x12a0] ss:$28 sps:$4 sm:$0xff]  }
 0x1b1   :  { %11813 = vmatpush1.bf16.msra.mxu0 %v18262_v20  ;;  %12306 = vmatprep.subr.bf16.mxu1 %v18273_v27  ;;  %v18324_v20 = vld [vmem:[%s26397_s1 + $0x2098] ss:$28 sps:$4 sm:$0xff]  }
 0x1b2   :  { %11814 = vmatprep.subr.bf16.mxu0 %v18270_v26  ;;  %v18332_v26 = vld [vmem:[%s26397_s1 + $0x20d4] ss:$28 sps:$4 sm:$0xff]   ;;  %v18335_v27 = vld [vmem:[%s26397_s1 + $0x12dc] ss:$28 sps:$4 sm:$0xff]  }
 0x1b4   :  { %12307 = vmatpush1.bf16.msra.mxu1 %v18271_v0  ;;  %v18333_v0 = vld [vmem:[%s26397_s1 + $0x12d8] ss:$28 sps:$4 sm:$0xff]  }
 0x1b5   :  { %11815 = vmatpush1.bf16.msra.mxu0 %v18268_v28  ;;  %12308 = vmatprep.subr.bf16.mxu1 %v18279_v22  ;;  %v18330_v28 = vld [vmem:[%s26397_s1 + $0x20d0] ss:$28 sps:$4 sm:$0xff]  }
 0x1b6   :  { %11816 = vmatprep.subr.bf16.mxu0 %v18276_v33  ;;  %v18338_v33 = vld [vmem:[%s26397_s1 + $0x210c] ss:$28 sps:$4 sm:$0xff]   ;;  %v18341_v22 = vld [vmem:[%s26397_s1 + $0x1314] ss:$28 sps:$4 sm:$0xff]  }
 0x1b8   :  { %12309 = vmatpush1.bf16.msra.mxu1 %v18277_v41  ;;  %v18347_v41 = vld [vmem:[%s26397_s1 + $0x134c] ss:$28 sps:$4 sm:$0xff]  }
 0x1b9   :  { %11817 = vmatpush1.bf16.msra.mxu0 %v18274_v40  ;;  %12310 = vmatprep.subr.bf16.mxu1 %v18285_v43  ;;  %v18344_v40 = vld [vmem:[%s26397_s1 + $0x2144] ss:$28 sps:$4 sm:$0xff]  }
 0x1ba   :  { %11818 = vmatprep.subr.bf16.mxu0 %v18282_v42  ;;  %v18342_v42 = vld [vmem:[%s26397_s1 + $0x2140] ss:$28 sps:$4 sm:$0xff]   ;;  %v18345_v43 = vld [vmem:[%s26397_s1 + $0x1348] ss:$28 sps:$4 sm:$0xff]  }
 0x1bc   :  { %12311 = vmatpush1.bf16.msra.mxu1 %v18283_v45  ;;  %v18353_v45 = vld [vmem:[%s26397_s1 + $0x1384] ss:$28 sps:$4 sm:$0xff]  }
 0x1bd   :  { %11819 = vmatpush1.bf16.msra.mxu0 %v18280_v44  ;;  %12312 = vmatprep.subr.bf16.mxu1 %v18291_v50  ;;  %v18350_v44 = vld [vmem:[%s26397_s1 + $0x217c] ss:$28 sps:$4 sm:$0xff]  }
 0x1be   :  { %11820 = vmatprep.subr.bf16.mxu0 %v18288_v46  ;;  %v18348_v46 = vld [vmem:[%s26397_s1 + $0x2178] ss:$28 sps:$4 sm:$0xff]   ;;  %v18351_v50 = vld [vmem:[%s26397_s1 + $0x1380] ss:$28 sps:$4 sm:$0xff]  }
 0x1c0   :  { %12313 = vmatpush1.bf16.msra.mxu1 %v18289_v31  ;;  %v18359_v31 = vld [vmem:[%s26397_s1 + $0x13bc] ss:$28 sps:$4 sm:$0xff]  }
 0x1c1   :  { %11821 = vmatpush1.bf16.msra.mxu0 %v18286_v51  ;;  %12323 = vmatprep.subr.bf16.mxu1 %v18298_v55  ;;  %v18356_v51 = vld [vmem:[%s26397_s1 + $0x21b4] ss:$28 sps:$4 sm:$0xff]  }
 0x1c2   :  { %11831 = vmatprep.subr.bf16.mxu0 %v18295_v54  ;;  %v18354_v54 = vld [vmem:[%s26397_s1 + $0x21b0] ss:$28 sps:$4 sm:$0xff]   ;;  %v18357_v55 = vld [vmem:[%s26397_s1 + $0x13b8] ss:$28 sps:$4 sm:$0xff]  }
 0x1c3   :  { %12315 = vmatmul.mubr.bf16.vlgmr.msra.gmra.mrb[4].mxu1 %v20990_v30 }
 0x1c4   :  { %11823 = vmatmul.mubr.bf16.vlgmr.msra.gmra.mrb[0].mxu0 %v21835_v57  ;;  %12324 = vmatpush1.bf16.msra.mxu1 %v18296_v59  ;;  %v18365_v59 = vld [vmem:[%s26397_s1 + $0x13f4] ss:$28 sps:$4 sm:$0xff]  }
 0x1c5   :  { %11832 = vmatpush1.bf16.msra.mxu0 %v18293_v58  ;;  %12325 = vmatprep.subr.bf16.mxu1 %v18305_v24  ;;  %v18362_v58 = vld [vmem:[%s26397_s1 + $0x21ec] ss:$28 sps:$4 sm:$0xff]  }
 0x1c6   :  { %11833 = vmatprep.subr.bf16.mxu0 %v18302_v60  ;;  %11863 = vmatprep.mubr.bf16.mxu0 %v21851_v61  ;;  %v18360_v60 = vld [vmem:[%s26397_s1 + $0x21e8] ss:$28 sps:$4 sm:$0xff]   ;;  %v18363_v24 = vld [vmem:[%s26397_s1 + $0x13f0] ss:$28 sps:$4 sm:$0xff]  }
 0x1c7   :  { %12355 = vmatprep.mubr.bf16.mxu1 %v21011_v35 }
 0x1c8   :  { %12326 = vmatpush1.bf16.msra.mxu1 %v18303_v63  ;;  %v18371_v63 = vld [vmem:[%s26397_s1 + $0x142c] ss:$28 sps:$4 sm:$0xff]  }
 0x1c9   :  { %11834 = vmatpush1.bf16.msra.mxu0 %v18300_v62  ;;  %12327 = vmatprep.subr.bf16.mxu1 %v18311_v3  ;;  %v18368_v62 = vld [vmem:[%s26397_s1 + $0x2224] ss:$28 sps:$4 sm:$0xff]  }
 0x1ca   :  { %11835 = vmatprep.subr.bf16.mxu0 %v18308_v2  ;;  %v18366_v2 = vld [vmem:[%s26397_s1 + $0x2220] ss:$28 sps:$4 sm:$0xff]   ;;  %v18369_v3 = vld [vmem:[%s26397_s1 + $0x1428] ss:$28 sps:$4 sm:$0xff]  }
 0x1cc   :  { %12328 = vmatpush1.bf16.msra.mxu1 %v18309_v49  ;;  %v18377_v49 = vld [vmem:[%s26397_s1 + $0x1464] ss:$28 sps:$4 sm:$0xff]  }
 0x1cd   :  { %11836 = vmatpush1.bf16.msra.mxu0 %v18306_v4  ;;  %12329 = vmatprep.subr.bf16.mxu1 %v18317_v9  ;;  %v18374_v4 = vld [vmem:[%s26397_s1 + $0x225c] ss:$28 sps:$4 sm:$0xff]  }
 0x1ce   :  { %11837 = vmatprep.subr.bf16.mxu0 %v18314_v8  ;;  %v18372_v8 = vld [vmem:[%s26397_s1 + $0x2258] ss:$28 sps:$4 sm:$0xff]   ;;  %v18375_v9 = vld [vmem:[%s26397_s1 + $0x1460] ss:$28 sps:$4 sm:$0xff]  }
 0x1d0   :  { %12330 = vmatpush1.bf16.msra.mxu1 %v18315_v11  ;;  %v18383_v11 = vld [vmem:[%s26397_s1 + $0x149c] ss:$28 sps:$4 sm:$0xff]  }
 0x1d1   :  { %11838 = vmatpush1.bf16.msra.mxu0 %v18312_v10  ;;  %12331 = vmatprep.subr.bf16.mxu1 %v18323_v13  ;;  %v18380_v10 = vld [vmem:[%s26397_s1 + $0x2294] ss:$28 sps:$4 sm:$0xff]  }
 0x1d2   :  { %11839 = vmatprep.subr.bf16.mxu0 %v18320_v12  ;;  %v18378_v12 = vld [vmem:[%s26397_s1 + $0x2290] ss:$28 sps:$4 sm:$0xff]   ;;  %v18381_v13 = vld [vmem:[%s26397_s1 + $0x1498] ss:$28 sps:$4 sm:$0xff]  }
 0x1d4   :  { %12332 = vmatpush1.bf16.msra.mxu1 %v18321_v15  ;;  %v18389_v15 = vld [vmem:[%s26397_s1 + $0x14d4] ss:$28 sps:$4 sm:$0xff]  }
 0x1d5   :  { %11840 = vmatpush1.bf16.msra.mxu0 %v18318_v14  ;;  %12333 = vmatprep.subr.bf16.mxu1 %v18329_v17  ;;  %v18386_v14 = vld [vmem:[%s26397_s1 + $0x22cc] ss:$28 sps:$4 sm:$0xff]  }
 0x1d6   :  { %11841 = vmatprep.subr.bf16.mxu0 %v18326_v16  ;;  %v18384_v16 = vld [vmem:[%s26397_s1 + $0x22c8] ss:$28 sps:$4 sm:$0xff]   ;;  %v18387_v17 = vld [vmem:[%s26397_s1 + $0x14d0] ss:$28 sps:$4 sm:$0xff]  }
 0x1d8   :  { %12334 = vmatpush1.bf16.msra.mxu1 %v18327_v21  ;;  %v18396_v21 = vld [vmem:[%s26397_s1 + $0x150c] ss:$28 sps:$4 sm:$0xff]  }
 0x1d9   :  { %11842 = vmatpush1.bf16.msra.mxu0 %v18324_v20  ;;  %12335 = vmatprep.subr.bf16.mxu1 %v18335_v27  ;;  %v18393_v20 = vld [vmem:[%s26397_s1 + $0x2304] ss:$28 sps:$4 sm:$0xff]   ;;  %v22044_v27 = vcombine.low %v21831_v56, %v21831_v56 }
 0x1da   :  { %11843 = vmatprep.subr.bf16.mxu0 %v18332_v26  ;;  %v22040_v26 = vld [vmem:[%s26398_s0 + $0x50] sm:$0xff]  ;;  %v18403_v56 = vld [vmem:[%s26397_s1 + $0x1544] ss:$28 sps:$4 sm:$0xff]  }
 0x1dc   :  { %12336 = vmatpush1.bf16.msra.mxu1 %v18333_v0  ;;  %v18394_v0 = vld [vmem:[%s26397_s1 + $0x1508] ss:$28 sps:$4 sm:$0xff]  }
 0x1dd   :  { %11844 = vmatpush1.bf16.msra.mxu0 %v18330_v28  ;;  %12337 = vmatprep.subr.bf16.mxu1 %v18341_v22  ;;  %v18391_v28 = vld [vmem:[%s26397_s1 + $0x2300] ss:$28 sps:$4 sm:$0xff]   ;;  %v22060_v22 = vcombine.high %v22040_v26, %v22040_v26 }
 0x1de   :  { %11845 = vmatprep.subr.bf16.mxu0 %v18338_v33  ;;  %v18400_v33 = vld [vmem:[%s26397_s1 + $0x233c] ss:$28 sps:$4 sm:$0xff]  }
 0x1e0   :  { %12338 = vmatpush1.bf16.msra.mxu1 %v18339_v39  ;;  %v18401_v39 = vld [vmem:[%s26397_s1 + $0x1540] ss:$28 sps:$4 sm:$0xff]  }
 0x1e1   :  { %11846 = vmatpush1.bf16.msra.mxu0 %v18336_v38  ;;  %12339 = vmatprep.subr.bf16.mxu1 %v18347_v41  ;;  %v18398_v38 = vld [vmem:[%s26397_s1 + $0x2338] ss:$28 sps:$4 sm:$0xff]  }
 0x1e2   :  { %11847 = vmatprep.subr.bf16.mxu0 %v18344_v40  ;;  %v18406_v40 = vld [vmem:[%s26397_s1 + $0x2374] ss:$28 sps:$4 sm:$0xff]   ;;  %v18409_v41 = vld [vmem:[%s26397_s1 + $0x157c] ss:$28 sps:$4 sm:$0xff]  }
 0x1e4   :  { %12340 = vmatpush1.bf16.msra.mxu1 %v18345_v43  ;;  %v18407_v43 = vld [vmem:[%s26397_s1 + $0x1578] ss:$28 sps:$4 sm:$0xff]  }
 0x1e5   :  { %11848 = vmatpush1.bf16.msra.mxu0 %v18342_v42  ;;  %12341 = vmatprep.subr.bf16.mxu1 %v18353_v45  ;;  %v18404_v42 = vld [vmem:[%s26397_s1 + $0x2370] ss:$28 sps:$4 sm:$0xff]  }
 0x1e6   :  { %11849 = vmatprep.subr.bf16.mxu0 %v18350_v44  ;;  %v18412_v44 = vld [vmem:[%s26397_s1 + $0x23ac] ss:$28 sps:$4 sm:$0xff]   ;;  %v18415_v45 = vld [vmem:[%s26397_s1 + $0x15b4] ss:$28 sps:$4 sm:$0xff]  }
 0x1e8   :  { %12342 = vmatpush1.bf16.msra.mxu1 %v18351_v50  ;;  %v18413_v50 = vld [vmem:[%s26397_s1 + $0x15b0] ss:$28 sps:$4 sm:$0xff]  }
 0x1e9   :  { %11850 = vmatpush1.bf16.msra.mxu0 %v18348_v46  ;;  %12343 = vmatprep.subr.bf16.mxu1 %v18359_v31  ;;  %v18410_v46 = vld [vmem:[%s26397_s1 + $0x23a8] ss:$28 sps:$4 sm:$0xff]  }
 0x1ea   :  { %11851 = vmatprep.subr.bf16.mxu0 %v18356_v51  ;;  %v18418_v51 = vld [vmem:[%s26397_s1 + $0x23e4] ss:$28 sps:$4 sm:$0xff]   ;;  %v18421_v31 = vld [vmem:[%s26397_s1 + $0x15ec] ss:$28 sps:$4 sm:$0xff]  }
 0x1ec   :  { %12344 = vmatpush1.bf16.msra.mxu1 %v18357_v55  ;;  %v18419_v55 = vld [vmem:[%s26397_s1 + $0x15e8] ss:$28 sps:$4 sm:$0xff]  }
 0x1ed   :  { %11852 = vmatpush1.bf16.msra.mxu0 %v18354_v54  ;;  %12345 = vmatprep.subr.bf16.mxu1 %v18365_v59  ;;  %v18416_v54 = vld [vmem:[%s26397_s1 + $0x23e0] ss:$28 sps:$4 sm:$0xff]  }
 0x1ee   :  { %11853 = vmatprep.subr.bf16.mxu0 %v18362_v58  ;;  %v18424_v58 = vld [vmem:[%s26397_s1 + $0x241c] ss:$28 sps:$4 sm:$0xff]   ;;  %v18427_v59 = vld [vmem:[%s26397_s1 + $0x1624] ss:$28 sps:$4 sm:$0xff]  }
 0x1f0   :  { %12346 = vmatpush1.bf16.msra.mxu1 %v18363_v24  ;;  %v18425_v24 = vld [vmem:[%s26397_s1 + $0x1620] ss:$28 sps:$4 sm:$0xff]  }
 0x1f1   :  { %11854 = vmatpush1.bf16.msra.mxu0 %v18360_v60  ;;  %12347 = vmatprep.subr.bf16.mxu1 %v18371_v63  ;;  %v18422_v60 = vld [vmem:[%s26397_s1 + $0x2418] ss:$28 sps:$4 sm:$0xff]  }
 0x1f2   :  { %11855 = vmatprep.subr.bf16.mxu0 %v18368_v62  ;;  %v18430_v62 = vld [vmem:[%s26397_s1 + $0x2454] ss:$28 sps:$4 sm:$0xff]   ;;  %v18433_v63 = vld [vmem:[%s26397_s1 + $0x165c] ss:$28 sps:$4 sm:$0xff]  }
 0x1f4   :  { %12348 = vmatpush1.bf16.msra.mxu1 %v18369_v3  ;;  %v18431_v3 = vld [vmem:[%s26397_s1 + $0x1658] ss:$28 sps:$4 sm:$0xff]  }
 0x1f5   :  { %11856 = vmatpush1.bf16.msra.mxu0 %v18366_v2  ;;  %12349 = vmatprep.subr.bf16.mxu1 %v18377_v49  ;;  %v18428_v2 = vld [vmem:[%s26397_s1 + $0x2450] ss:$28 sps:$4 sm:$0xff]  }
 0x1f6   :  { %11857 = vmatprep.subr.bf16.mxu0 %v18374_v4  ;;  %v18436_v4 = vld [vmem:[%s26397_s1 + $0x248c] ss:$28 sps:$4 sm:$0xff]   ;;  %v18439_v49 = vld [vmem:[%s26397_s1 + $0x1694] ss:$28 sps:$4 sm:$0xff]  }
 0x1f8   :  { %12350 = vmatpush1.bf16.msra.mxu1 %v18375_v9  ;;  %v18437_v9 = vld [vmem:[%s26397_s1 + $0x1690] ss:$28 sps:$4 sm:$0xff]  }
 0x1f9   :  { %11858 = vmatpush1.bf16.msra.mxu0 %v18372_v8  ;;  %12351 = vmatprep.subr.bf16.mxu1 %v18383_v11  ;;  %v18434_v8 = vld [vmem:[%s26397_s1 + $0x2488] ss:$28 sps:$4 sm:$0xff]  }
 0x1fa   :  { %11859 = vmatprep.subr.bf16.mxu0 %v18380_v10  ;;  %v18442_v10 = vld [vmem:[%s26397_s1 + $0x24c4] ss:$28 sps:$4 sm:$0xff]   ;;  %v18445_v11 = vld [vmem:[%s26397_s1 + $0x16cc] ss:$28 sps:$4 sm:$0xff]  }
 0x1fc   :  { %12352 = vmatpush1.bf16.msra.mxu1 %v18381_v13  ;;  %v18443_v13 = vld [vmem:[%s26397_s1 + $0x16c8] ss:$28 sps:$4 sm:$0xff]  }
 0x1fd   :  { %11860 = vmatpush1.bf16.msra.mxu0 %v18378_v12  ;;  %12353 = vmatprep.subr.bf16.mxu1 %v18389_v15  ;;  %v18440_v12 = vld [vmem:[%s26397_s1 + $0x24c0] ss:$28 sps:$4 sm:$0xff]  }
 0x1fe   :  { %11861 = vmatprep.subr.bf16.mxu0 %v18386_v14  ;;  %v18448_v14 = vld [vmem:[%s26397_s1 + $0x24fc] ss:$28 sps:$4 sm:$0xff]   ;;  %v18451_v15 = vld [vmem:[%s26397_s1 + $0x1704] ss:$28 sps:$4 sm:$0xff]  }
 0x200   :  { %12354 = vmatpush1.bf16.msra.mxu1 %v18387_v17  ;;  %v18449_v17 = vld [vmem:[%s26397_s1 + $0x1700] ss:$28 sps:$4 sm:$0xff]  }
 0x201   :  { %11862 = vmatpush1.bf16.msra.mxu0 %v18384_v16  ;;  %12364 = vmatprep.subr.bf16.mxu1 %v18396_v21  ;;  %v18446_v16 = vld [vmem:[%s26397_s1 + $0x24f8] ss:$28 sps:$4 sm:$0xff]  }
 0x202   :  { %11872 = vmatprep.subr.bf16.mxu0 %v18393_v20  ;;  %v18454_v20 = vld [vmem:[%s26397_s1 + $0x2534] ss:$28 sps:$4 sm:$0xff]   ;;  %v18457_v21 = vld [vmem:[%s26397_s1 + $0x173c] ss:$28 sps:$4 sm:$0xff]  }
 0x203   :  { %12356 = vmatmul.mubr.bf16.vlgmr.msra.gmra.mrb[4].mxu1 %v21202_v47 }
 0x204   :  { %11864 = vmatmul.mubr.bf16.vlgmr.msra.gmra.mrb[0].mxu0 %v22044_v27  ;;  %12365 = vmatpush1.bf16.msra.mxu1 %v18394_v0  ;;  %v18455_v0 = vld [vmem:[%s26397_s1 + $0x1738] ss:$28 sps:$4 sm:$0xff]  }
 0x205   :  { %11873 = vmatpush1.bf16.msra.mxu0 %v18391_v28  ;;  %12366 = vmatprep.subr.bf16.mxu1 %v18403_v56  ;;  %v18452_v28 = vld [vmem:[%s26397_s1 + $0x2530] ss:$28 sps:$4 sm:$0xff]  }
 0x206   :  { %11874 = vmatprep.subr.bf16.mxu0 %v18400_v33  ;;  %11904 = vmatprep.mubr.bf16.mxu0 %v22060_v22  ;;  %v18460_v33 = vld [vmem:[%s26397_s1 + $0x256c] ss:$28 sps:$4 sm:$0xff]   ;;  %v18463_v56 = vld [vmem:[%s26397_s1 + $0x1774] ss:$28 sps:$4 sm:$0xff]  }
 0x207   :  { %12396 = vmatprep.mubr.bf16.mxu1 %v21220_v52 }
 0x208   :  { %12367 = vmatpush1.bf16.msra.mxu1 %v18401_v39  ;;  %v18461_v39 = vld [vmem:[%s26397_s1 + $0x1770] ss:$28 sps:$4 sm:$0xff]  }
 0x209   :  { %11875 = vmatpush1.bf16.msra.mxu0 %v18398_v38  ;;  %12368 = vmatprep.subr.bf16.mxu1 %v18409_v41  ;;  %v18458_v38 = vld [vmem:[%s26397_s1 + $0x2568] ss:$28 sps:$4 sm:$0xff]  }
 0x20a   :  { %11876 = vmatprep.subr.bf16.mxu0 %v18406_v40  ;;  %v18466_v40 = vld [vmem:[%s26397_s1 + $0x25a4] ss:$28 sps:$4 sm:$0xff]   ;;  %v18469_v41 = vld [vmem:[%s26397_s1 + $0x17ac] ss:$28 sps:$4 sm:$0xff]  }
 0x20c   :  { %12369 = vmatpush1.bf16.msra.mxu1 %v18407_v43  ;;  %v18467_v43 = vld [vmem:[%s26397_s1 + $0x17a8] ss:$28 sps:$4 sm:$0xff]  }
 0x20d   :  { %11877 = vmatpush1.bf16.msra.mxu0 %v18404_v42  ;;  %12370 = vmatprep.subr.bf16.mxu1 %v18415_v45  ;;  %v18464_v42 = vld [vmem:[%s26397_s1 + $0x25a0] ss:$28 sps:$4 sm:$0xff]  }
 0x20e   :  { %11878 = vmatprep.subr.bf16.mxu0 %v18412_v44  ;;  %v18472_v44 = vld [vmem:[%s26397_s1 + $0x25dc] ss:$28 sps:$4 sm:$0xff]   ;;  %v18475_v45 = vld [vmem:[%s26397_s1 + $0x17e4] ss:$28 sps:$4 sm:$0xff]  }
 0x210   :  { %12371 = vmatpush1.bf16.msra.mxu1 %v18413_v50  ;;  %v18473_v50 = vld [vmem:[%s26397_s1 + $0x17e0] ss:$28 sps:$4 sm:$0xff]  }
 0x211   :  { %11879 = vmatpush1.bf16.msra.mxu0 %v18410_v46  ;;  %12372 = vmatprep.subr.bf16.mxu1 %v18421_v31  ;;  %v18470_v46 = vld [vmem:[%s26397_s1 + $0x25d8] ss:$28 sps:$4 sm:$0xff]  }
 0x212   :  { %11880 = vmatprep.subr.bf16.mxu0 %v18418_v51  ;;  %v18478_v51 = vld [vmem:[%s26397_s1 + $0x2614] ss:$28 sps:$4 sm:$0xff]   ;;  %v18481_v31 = vld [vmem:[%s26397_s1 + $0x181c] ss:$28 sps:$4 sm:$0xff]  }
 0x214   :  { %12373 = vmatpush1.bf16.msra.mxu1 %v18419_v55  ;;  %v18479_v55 = vld [vmem:[%s26397_s1 + $0x1818] ss:$28 sps:$4 sm:$0xff]  }
 0x215   :  { %11881 = vmatpush1.bf16.msra.mxu0 %v18416_v54  ;;  %12374 = vmatprep.subr.bf16.mxu1 %v18427_v59  ;;  %v18476_v54 = vld [vmem:[%s26397_s1 + $0x2610] ss:$28 sps:$4 sm:$0xff]  }
 0x216   :  { %11882 = vmatprep.subr.bf16.mxu0 %v18424_v58  ;;  %v18484_v58 = vld [vmem:[%s26397_s1 + $0x264c] ss:$28 sps:$4 sm:$0xff]   ;;  %v18487_v59 = vld [vmem:[%s26397_s1 + $0x1854] ss:$28 sps:$4 sm:$0xff]  }
 0x218   :  { %12375 = vmatpush1.bf16.msra.mxu1 %v18425_v24  ;;  %v18485_v24 = vld [vmem:[%s26397_s1 + $0x1850] ss:$28 sps:$4 sm:$0xff]  }
 0x219   :  { %11883 = vmatpush1.bf16.msra.mxu0 %v18422_v60  ;;  %12376 = vmatprep.subr.bf16.mxu1 %v18433_v63  ;;  %v18482_v60 = vld [vmem:[%s26397_s1 + $0x2648] ss:$28 sps:$4 sm:$0xff]  }
 0x21a   :  { %11884 = vmatprep.subr.bf16.mxu0 %v18430_v62  ;;  %v18491_v62 = vld [vmem:[%s26397_s1 + $0x2684] ss:$28 sps:$4 sm:$0xff]   ;;  %v18494_v63 = vld [vmem:[%s26397_s1 + $0x188c] ss:$28 sps:$4 sm:$0xff]  }
 0x21c   :  { %12377 = vmatpush1.bf16.msra.mxu1 %v18431_v3  ;;  %v22253_v3 = vcombine.low %v22040_v26, %v22040_v26  ;;  %v18501_v26 = vld [vmem:[%s26397_s1 + $0x18c4] ss:$28 sps:$4 sm:$0xff]  }
 0x21d   :  { %11885 = vmatpush1.bf16.msra.mxu0 %v18428_v2  ;;  %12378 = vmatprep.subr.bf16.mxu1 %v18439_v49  ;;  %v22249_v2 = vld [vmem:[%s26398_s0 + $0x58] sm:$0xff]  ;;  %v18492_v49 = vld [vmem:[%s26397_s1 + $0x1888] ss:$28 sps:$4 sm:$0xff]  }
 0x21e   :  { %11886 = vmatprep.subr.bf16.mxu0 %v18436_v4  ;;  %v18489_v4 = vld [vmem:[%s26397_s1 + $0x2680] ss:$28 sps:$4 sm:$0xff]  }
 0x220   :  { %12379 = vmatpush1.bf16.msra.mxu1 %v18437_v9  ;;  %v22269_v9 = vcombine.high %v22249_v2, %v22249_v2 }
 0x221   :  { %11887 = vmatpush1.bf16.msra.mxu0 %v18434_v8  ;;  %12380 = vmatprep.subr.bf16.mxu1 %v18445_v11  ;;  %v18498_v8 = vld [vmem:[%s26397_s1 + $0x26bc] ss:$28 sps:$4 sm:$0xff]  }
 0x222   :  { %11888 = vmatprep.subr.bf16.mxu0 %v18442_v10  ;;  %v18496_v10 = vld [vmem:[%s26397_s1 + $0x26b8] ss:$28 sps:$4 sm:$0xff]   ;;  %v18499_v11 = vld [vmem:[%s26397_s1 + $0x18c0] ss:$28 sps:$4 sm:$0xff]  }
 0x224   :  { %12381 = vmatpush1.bf16.msra.mxu1 %v18443_v13  ;;  %v18507_v13 = vld [vmem:[%s26397_s1 + $0x18fc] ss:$28 sps:$4 sm:$0xff]  }
 0x225   :  { %11889 = vmatpush1.bf16.msra.mxu0 %v18440_v12  ;;  %12382 = vmatprep.subr.bf16.mxu1 %v18451_v15  ;;  %v18504_v12 = vld [vmem:[%s26397_s1 + $0x26f4] ss:$28 sps:$4 sm:$0xff]  }
 0x226   :  { %11890 = vmatprep.subr.bf16.mxu0 %v18448_v14  ;;  %v18502_v14 = vld [vmem:[%s26397_s1 + $0x26f0] ss:$28 sps:$4 sm:$0xff]   ;;  %v18505_v15 = vld [vmem:[%s26397_s1 + $0x18f8] ss:$28 sps:$4 sm:$0xff]  }
 0x228   :  { %12383 = vmatpush1.bf16.msra.mxu1 %v18449_v17  ;;  %v18513_v17 = vld [vmem:[%s26397_s1 + $0x1934] ss:$28 sps:$4 sm:$0xff]  }
 0x229   :  { %11891 = vmatpush1.bf16.msra.mxu0 %v18446_v16  ;;  %12384 = vmatprep.subr.bf16.mxu1 %v18457_v21  ;;  %v18510_v16 = vld [vmem:[%s26397_s1 + $0x272c] ss:$28 sps:$4 sm:$0xff]  }
 0x22a   :  { %11892 = vmatprep.subr.bf16.mxu0 %v18454_v20  ;;  %v18508_v20 = vld [vmem:[%s26397_s1 + $0x2728] ss:$28 sps:$4 sm:$0xff]   ;;  %v18511_v21 = vld [vmem:[%s26397_s1 + $0x1930] ss:$28 sps:$4 sm:$0xff]  }
 0x22c   :  { %12385 = vmatpush1.bf16.msra.mxu1 %v18455_v0  ;;  %v18519_v0 = vld [vmem:[%s26397_s1 + $0x196c] ss:$28 sps:$4 sm:$0xff]  }
 0x22d   :  { %11893 = vmatpush1.bf16.msra.mxu0 %v18452_v28  ;;  %12386 = vmatprep.subr.bf16.mxu1 %v18463_v56  ;;  %v18516_v28 = vld [vmem:[%s26397_s1 + $0x2764] ss:$28 sps:$4 sm:$0xff]  }
 0x22e   :  { %11894 = vmatprep.subr.bf16.mxu0 %v18460_v33  ;;  %v18514_v33 = vld [vmem:[%s26397_s1 + $0x2760] ss:$28 sps:$4 sm:$0xff]   ;;  %v18517_v56 = vld [vmem:[%s26397_s1 + $0x1968] ss:$28 sps:$4 sm:$0xff]  }
 0x230   :  { %12387 = vmatpush1.bf16.msra.mxu1 %v18461_v39  ;;  %v18525_v39 = vld [vmem:[%s26397_s1 + $0x19a4] ss:$28 sps:$4 sm:$0xff]  }
 0x231   :  { %11895 = vmatpush1.bf16.msra.mxu0 %v18458_v38  ;;  %12388 = vmatprep.subr.bf16.mxu1 %v18469_v41  ;;  %v18522_v38 = vld [vmem:[%s26397_s1 + $0x279c] ss:$28 sps:$4 sm:$0xff]  }
 0x232   :  { %11896 = vmatprep.subr.bf16.mxu0 %v18466_v40  ;;  %v18520_v40 = vld [vmem:[%s26397_s1 + $0x2798] ss:$28 sps:$4 sm:$0xff]   ;;  %v18523_v41 = vld [vmem:[%s26397_s1 + $0x19a0] ss:$28 sps:$4 sm:$0xff]  }
 0x234   :  { %12389 = vmatpush1.bf16.msra.mxu1 %v18467_v43  ;;  %v18531_v43 = vld [vmem:[%s26397_s1 + $0x19dc] ss:$28 sps:$4 sm:$0xff]  }
 0x235   :  { %11897 = vmatpush1.bf16.msra.mxu0 %v18464_v42  ;;  %12390 = vmatprep.subr.bf16.mxu1 %v18475_v45  ;;  %v18528_v42 = vld [vmem:[%s26397_s1 + $0x27d4] ss:$28 sps:$4 sm:$0xff]  }
 0x236   :  { %11898 = vmatprep.subr.bf16.mxu0 %v18472_v44  ;;  %v18526_v44 = vld [vmem:[%s26397_s1 + $0x27d0] ss:$28 sps:$4 sm:$0xff]   ;;  %v18529_v45 = vld [vmem:[%s26397_s1 + $0x19d8] ss:$28 sps:$4 sm:$0xff]  }
 0x238   :  { %12391 = vmatpush1.bf16.msra.mxu1 %v18473_v50  ;;  %v18537_v50 = vld [vmem:[%s26397_s1 + $0x1a14] ss:$28 sps:$4 sm:$0xff]  }
 0x239   :  { %11899 = vmatpush1.bf16.msra.mxu0 %v18470_v46  ;;  %12392 = vmatprep.subr.bf16.mxu1 %v18481_v31  ;;  %v18534_v46 = vld [vmem:[%s26397_s1 + $0x280c] ss:$28 sps:$4 sm:$0xff]  }
 0x23a   :  { %11900 = vmatprep.subr.bf16.mxu0 %v18478_v51  ;;  %v18532_v51 = vld [vmem:[%s26397_s1 + $0x2808] ss:$28 sps:$4 sm:$0xff]   ;;  %v18535_v31 = vld [vmem:[%s26397_s1 + $0x1a10] ss:$28 sps:$4 sm:$0xff]  }
 0x23c   :  { %12393 = vmatpush1.bf16.msra.mxu1 %v18479_v55  ;;  %v18543_v55 = vld [vmem:[%s26397_s1 + $0x1a4c] ss:$28 sps:$4 sm:$0xff]  }
 0x23d   :  { %11901 = vmatpush1.bf16.msra.mxu0 %v18476_v54  ;;  %12394 = vmatprep.subr.bf16.mxu1 %v18487_v59  ;;  %v18540_v54 = vld [vmem:[%s26397_s1 + $0x2844] ss:$28 sps:$4 sm:$0xff]  }
 0x23e   :  { %11902 = vmatprep.subr.bf16.mxu0 %v18484_v58  ;;  %v18538_v58 = vld [vmem:[%s26397_s1 + $0x2840] ss:$28 sps:$4 sm:$0xff]   ;;  %v18541_v59 = vld [vmem:[%s26397_s1 + $0x1a48] ss:$28 sps:$4 sm:$0xff]  }
 0x240   :  { %12395 = vmatpush1.bf16.msra.mxu1 %v18485_v24  ;;  %v18549_v24 = vld [vmem:[%s26397_s1 + $0x1a84] ss:$28 sps:$4 sm:$0xff]  }
 0x241   :  { %11903 = vmatpush1.bf16.msra.mxu0 %v18482_v60  ;;  %12405 = vmatprep.subr.bf16.mxu1 %v18494_v63  ;;  %v18546_v60 = vld [vmem:[%s26397_s1 + $0x287c] ss:$28 sps:$4 sm:$0xff]  }
 0x242   :  { %11913 = vmatprep.subr.bf16.mxu0 %v18491_v62  ;;  %v18544_v62 = vld [vmem:[%s26397_s1 + $0x2878] ss:$28 sps:$4 sm:$0xff]   ;;  %v18547_v63 = vld [vmem:[%s26397_s1 + $0x1a80] ss:$28 sps:$4 sm:$0xff]  }
 0x243   :  { %12397 = vmatmul.mubr.bf16.vlgmr.msra.gmra.mrb[4].mxu1 %v21413_v1 }
 0x244   :  { %11905 = vmatmul.mubr.bf16.vlgmr.msra.gmra.mrb[0].mxu0 %v22253_v3  ;;  %12406 = vmatpush1.bf16.msra.mxu1 %v18492_v49  ;;  %v18555_v49 = vld [vmem:[%s26397_s1 + $0x1abc] ss:$28 sps:$4 sm:$0xff]  }
 0x245   :  { %11914 = vmatpush1.bf16.msra.mxu0 %v18489_v4  ;;  %12407 = vmatprep.subr.bf16.mxu1 %v18501_v26  ;;  %v18552_v4 = vld [vmem:[%s26397_s1 + $0x28b4] ss:$28 sps:$4 sm:$0xff]  }
 0x246   :  { %11915 = vmatprep.subr.bf16.mxu0 %v18498_v8  ;;  %11945 = vmatprep.mubr.bf16.mxu0 %v22269_v9  ;;  %v18550_v8 = vld [vmem:[%s26397_s1 + $0x28b0] ss:$28 sps:$4 sm:$0xff]   ;;  %v18553_v26 = vld [vmem:[%s26397_s1 + $0x1ab8] ss:$28 sps:$4 sm:$0xff]  }
 0x247   :  { %12437 = vmatprep.mubr.bf16.mxu1 %v21429_v5 }
 0x248   :  { %12408 = vmatpush1.bf16.msra.mxu1 %v18499_v11  ;;  %v18561_v11 = vld [vmem:[%s26397_s1 + $0x1af4] ss:$28 sps:$4 sm:$0xff]  }
 0x249   :  { %11916 = vmatpush1.bf16.msra.mxu0 %v18496_v10  ;;  %12409 = vmatprep.subr.bf16.mxu1 %v18507_v13  ;;  %v18558_v10 = vld [vmem:[%s26397_s1 + $0x28ec] ss:$28 sps:$4 sm:$0xff]  }
 0x24a   :  { %11917 = vmatprep.subr.bf16.mxu0 %v18504_v12  ;;  %v18556_v12 = vld [vmem:[%s26397_s1 + $0x28e8] ss:$28 sps:$4 sm:$0xff]   ;;  %v18559_v13 = vld [vmem:[%s26397_s1 + $0x1af0] ss:$28 sps:$4 sm:$0xff]  }
 0x24c   :  { %12410 = vmatpush1.bf16.msra.mxu1 %v18505_v15  ;;  %v18567_v15 = vld [vmem:[%s26397_s1 + $0x1b2c] ss:$28 sps:$4 sm:$0xff]  }
 0x24d   :  { %11918 = vmatpush1.bf16.msra.mxu0 %v18502_v14  ;;  %12411 = vmatprep.subr.bf16.mxu1 %v18513_v17  ;;  %v18564_v14 = vld [vmem:[%s26397_s1 + $0x2924] ss:$28 sps:$4 sm:$0xff]  }
 0x24e   :  { %11919 = vmatprep.subr.bf16.mxu0 %v18510_v16  ;;  %v18562_v16 = vld [vmem:[%s26397_s1 + $0x2920] ss:$28 sps:$4 sm:$0xff]   ;;  %v18565_v17 = vld [vmem:[%s26397_s1 + $0x1b28] ss:$28 sps:$4 sm:$0xff]  }
 0x250   :  { %12412 = vmatpush1.bf16.msra.mxu1 %v18511_v21  ;;  %v18573_v21 = vld [vmem:[%s26397_s1 + $0x1b64] ss:$28 sps:$4 sm:$0xff]  }
 0x251   :  { %11920 = vmatpush1.bf16.msra.mxu0 %v18508_v20  ;;  %12413 = vmatprep.subr.bf16.mxu1 %v18519_v0  ;;  %v18570_v20 = vld [vmem:[%s26397_s1 + $0x295c] ss:$28 sps:$4 sm:$0xff]  }
 0x252   :  { %11921 = vmatprep.subr.bf16.mxu0 %v18516_v28  ;;  %v18568_v28 = vld [vmem:[%s26397_s1 + $0x2958] ss:$28 sps:$4 sm:$0xff]   ;;  %v18571_v0 = vld [vmem:[%s26397_s1 + $0x1b60] ss:$28 sps:$4 sm:$0xff]  }
 0x254   :  { %12414 = vmatpush1.bf16.msra.mxu1 %v18517_v56  ;;  %v18579_v56 = vld [vmem:[%s26397_s1 + $0x1b9c] ss:$28 sps:$4 sm:$0xff]  }
 0x255   :  { %11922 = vmatpush1.bf16.msra.mxu0 %v18514_v33  ;;  %12415 = vmatprep.subr.bf16.mxu1 %v18525_v39  ;;  %v18576_v33 = vld [vmem:[%s26397_s1 + $0x2994] ss:$28 sps:$4 sm:$0xff]  }
 0x256   :  { %11923 = vmatprep.subr.bf16.mxu0 %v18522_v38  ;;  %v18574_v38 = vld [vmem:[%s26397_s1 + $0x2990] ss:$28 sps:$4 sm:$0xff]   ;;  %v18577_v39 = vld [vmem:[%s26397_s1 + $0x1b98] ss:$28 sps:$4 sm:$0xff]  }
 0x258   :  { %12416 = vmatpush1.bf16.msra.mxu1 %v18523_v41  ;;  %v18585_v41 = vld [vmem:[%s26397_s1 + $0x1bd4] ss:$28 sps:$4 sm:$0xff]  }
 0x259   :  { %11924 = vmatpush1.bf16.msra.mxu0 %v18520_v40  ;;  %12417 = vmatprep.subr.bf16.mxu1 %v18531_v43  ;;  %v18582_v40 = vld [vmem:[%s26397_s1 + $0x29cc] ss:$28 sps:$4 sm:$0xff]  }
 0x25a   :  { %11925 = vmatprep.subr.bf16.mxu0 %v18528_v42  ;;  %v18580_v42 = vld [vmem:[%s26397_s1 + $0x29c8] ss:$28 sps:$4 sm:$0xff]   ;;  %v18583_v43 = vld [vmem:[%s26397_s1 + $0x1bd0] ss:$28 sps:$4 sm:$0xff]  }
 0x25c   :  { %12418 = vmatpush1.bf16.msra.mxu1 %v18529_v45  ;;  %v18592_v45 = vld [vmem:[%s26397_s1 + $0x1c0c] ss:$28 sps:$4 sm:$0xff]  }
 0x25d   :  { %11926 = vmatpush1.bf16.msra.mxu0 %v18526_v44  ;;  %12419 = vmatprep.subr.bf16.mxu1 %v18537_v50  ;;  %v18589_v44 = vld [vmem:[%s26397_s1 + $0x2a04] ss:$28 sps:$4 sm:$0xff]   ;;  %v22462_v50 = vcombine.low %v22249_v2, %v22249_v2 }
 0x25e   :  { %11927 = vmatprep.subr.bf16.mxu0 %v18534_v46  ;;  %v22458_v46 = vld [vmem:[%s26398_s0 + $0x60] sm:$0xff] }
 0x25f   :  { %v18599_v2 = vld [vmem:[%s26397_s1 + $0x1c44] ss:$28 sps:$4 sm:$0xff]  }
 0x260   :  { %12420 = vmatpush1.bf16.msra.mxu1 %v18535_v31  ;;  %v18590_v31 = vld [vmem:[%s26397_s1 + $0x1c08] ss:$28 sps:$4 sm:$0xff]  }
 0x261   :  { %11928 = vmatpush1.bf16.msra.mxu0 %v18532_v51  ;;  %12421 = vmatprep.subr.bf16.mxu1 %v18543_v55  ;;  %v18587_v51 = vld [vmem:[%s26397_s1 + $0x2a00] ss:$28 sps:$4 sm:$0xff]   ;;  %v22478_v55 = vcombine.high %v22458_v46, %v22458_v46 }
 0x262   :  { %11929 = vmatprep.subr.bf16.mxu0 %v18540_v54  ;;  %v18596_v54 = vld [vmem:[%s26397_s1 + $0x2a3c] ss:$28 sps:$4 sm:$0xff]  }
 0x264   :  { %12422 = vmatpush1.bf16.msra.mxu1 %v18541_v59  ;;  %v18597_v59 = vld [vmem:[%s26397_s1 + $0x1c40] ss:$28 sps:$4 sm:$0xff]  }
 0x265   :  { %11930 = vmatpush1.bf16.msra.mxu0 %v18538_v58  ;;  %12423 = vmatprep.subr.bf16.mxu1 %v18549_v24  ;;  %v18594_v58 = vld [vmem:[%s26397_s1 + $0x2a38] ss:$28 sps:$4 sm:$0xff]  }
 0x266   :  { %11931 = vmatprep.subr.bf16.mxu0 %v18546_v60  ;;  %v18602_v60 = vld [vmem:[%s26397_s1 + $0x2a74] ss:$28 sps:$4 sm:$0xff]   ;;  %v18605_v24 = vld [vmem:[%s26397_s1 + $0x1c7c] ss:$28 sps:$4 sm:$0xff]  }
 0x268   :  { %12424 = vmatpush1.bf16.msra.mxu1 %v18547_v63  ;;  %v18603_v63 = vld [vmem:[%s26397_s1 + $0x1c78] ss:$28 sps:$4 sm:$0xff]  }
 0x269   :  { %11932 = vmatpush1.bf16.msra.mxu0 %v18544_v62  ;;  %12425 = vmatprep.subr.bf16.mxu1 %v18555_v49  ;;  %v18600_v62 = vld [vmem:[%s26397_s1 + $0x2a70] ss:$28 sps:$4 sm:$0xff]  }
 0x26a   :  { %11933 = vmatprep.subr.bf16.mxu0 %v18552_v4  ;;  %v18608_v4 = vld [vmem:[%s26397_s1 + $0x2aac] ss:$28 sps:$4 sm:$0xff]   ;;  %v18611_v49 = vld [vmem:[%s26397_s1 + $0x1cb4] ss:$28 sps:$4 sm:$0xff]  }
 0x26c   :  { %12426 = vmatpush1.bf16.msra.mxu1 %v18553_v26  ;;  %v18609_v26 = vld [vmem:[%s26397_s1 + $0x1cb0] ss:$28 sps:$4 sm:$0xff]  }
 0x26d   :  { %11934 = vmatpush1.bf16.msra.mxu0 %v18550_v8  ;;  %12427 = vmatprep.subr.bf16.mxu1 %v18561_v11  ;;  %v18606_v8 = vld [vmem:[%s26397_s1 + $0x2aa8] ss:$28 sps:$4 sm:$0xff]  }
 0x26e   :  { %11935 = vmatprep.subr.bf16.mxu0 %v18558_v10  ;;  %v18614_v10 = vld [vmem:[%s26397_s1 + $0x2ae4] ss:$28 sps:$4 sm:$0xff]   ;;  %v18617_v11 = vld [vmem:[%s26397_s1 + $0x1cec] ss:$28 sps:$4 sm:$0xff]  }
 0x270   :  { %12428 = vmatpush1.bf16.msra.mxu1 %v18559_v13  ;;  %v18615_v13 = vld [vmem:[%s26397_s1 + $0x1ce8] ss:$28 sps:$4 sm:$0xff]  }
 0x271   :  { %11936 = vmatpush1.bf16.msra.mxu0 %v18556_v12  ;;  %12429 = vmatprep.subr.bf16.mxu1 %v18567_v15  ;;  %v18612_v12 = vld [vmem:[%s26397_s1 + $0x2ae0] ss:$28 sps:$4 sm:$0xff]  }
 0x272   :  { %11937 = vmatprep.subr.bf16.mxu0 %v18564_v14  ;;  %v18620_v14 = vld [vmem:[%s26397_s1 + $0x2b1c] ss:$28 sps:$4 sm:$0xff]   ;;  %v18623_v15 = vld [vmem:[%s26397_s1 + $0x1d24] ss:$28 sps:$4 sm:$0xff]  }
 0x274   :  { %12430 = vmatpush1.bf16.msra.mxu1 %v18565_v17  ;;  %v18621_v17 = vld [vmem:[%s26397_s1 + $0x1d20] ss:$28 sps:$4 sm:$0xff]  }
 0x275   :  { %11938 = vmatpush1.bf16.msra.mxu0 %v18562_v16  ;;  %12431 = vmatprep.subr.bf16.mxu1 %v18573_v21  ;;  %v18618_v16 = vld [vmem:[%s26397_s1 + $0x2b18] ss:$28 sps:$4 sm:$0xff]  }
 0x276   :  { %11939 = vmatprep.subr.bf16.mxu0 %v18570_v20  ;;  %v18626_v20 = vld [vmem:[%s26397_s1 + $0x2b54] ss:$28 sps:$4 sm:$0xff]   ;;  %v18629_v21 = vld [vmem:[%s26397_s1 + $0x1d5c] ss:$28 sps:$4 sm:$0xff]  }
 0x278   :  { %12432 = vmatpush1.bf16.msra.mxu1 %v18571_v0  ;;  %v18627_v0 = vld [vmem:[%s26397_s1 + $0x1d58] ss:$28 sps:$4 sm:$0xff]  }
 0x279   :  { %11940 = vmatpush1.bf16.msra.mxu0 %v18568_v28  ;;  %12433 = vmatprep.subr.bf16.mxu1 %v18579_v56  ;;  %v18624_v28 = vld [vmem:[%s26397_s1 + $0x2b50] ss:$28 sps:$4 sm:$0xff]  }
 0x27a   :  { %11941 = vmatprep.subr.bf16.mxu0 %v18576_v33  ;;  %v18632_v33 = vld [vmem:[%s26397_s1 + $0x2b8c] ss:$28 sps:$4 sm:$0xff]   ;;  %v18635_v56 = vld [vmem:[%s26397_s1 + $0x1d94] ss:$28 sps:$4 sm:$0xff]  }
 0x27c   :  { %12434 = vmatpush1.bf16.msra.mxu1 %v18577_v39  ;;  %v18633_v39 = vld [vmem:[%s26397_s1 + $0x1d90] ss:$28 sps:$4 sm:$0xff]  }
 0x27d   :  { %11942 = vmatpush1.bf16.msra.mxu0 %v18574_v38  ;;  %12435 = vmatprep.subr.bf16.mxu1 %v18585_v41  ;;  %v18630_v38 = vld [vmem:[%s26397_s1 + $0x2b88] ss:$28 sps:$4 sm:$0xff]  }
 0x27e   :  { %11943 = vmatprep.subr.bf16.mxu0 %v18582_v40  ;;  %v18638_v40 = vld [vmem:[%s26397_s1 + $0x2bc4] ss:$28 sps:$4 sm:$0xff]   ;;  %v18641_v41 = vld [vmem:[%s26397_s1 + $0x1dcc] ss:$28 sps:$4 sm:$0xff]  }
 0x280   :  { %12436 = vmatpush1.bf16.msra.mxu1 %v18583_v43  ;;  %v18639_v43 = vld [vmem:[%s26397_s1 + $0x1dc8] ss:$28 sps:$4 sm:$0xff]  }
 0x281   :  { %11944 = vmatpush1.bf16.msra.mxu0 %v18580_v42  ;;  %12446 = vmatprep.subr.bf16.mxu1 %v18592_v45  ;;  %v18636_v42 = vld [vmem:[%s26397_s1 + $0x2bc0] ss:$28 sps:$4 sm:$0xff]  }
 0x282   :  { %11954 = vmatprep.subr.bf16.mxu0 %v18589_v44  ;;  %v18644_v44 = vld [vmem:[%s26397_s1 + $0x2bfc] ss:$28 sps:$4 sm:$0xff]   ;;  %v18647_v45 = vld [vmem:[%s26397_s1 + $0x1e04] ss:$28 sps:$4 sm:$0xff]  }
 0x283   :  { %12438 = vmatmul.mubr.bf16.vlgmr.msra.gmra.mrb[4].mxu1 %v21622_v25 }
 0x284   :  { %11946 = vmatmul.mubr.bf16.vlgmr.msra.gmra.mrb[0].mxu0 %v22462_v50  ;;  %12447 = vmatpush1.bf16.msra.mxu1 %v18590_v31  ;;  %v18645_v31 = vld [vmem:[%s26397_s1 + $0x1e00] ss:$28 sps:$4 sm:$0xff]  }
 0x285   :  { %11955 = vmatpush1.bf16.msra.mxu0 %v18587_v51  ;;  %12448 = vmatprep.subr.bf16.mxu1 %v18599_v2  ;;  %v18642_v51 = vld [vmem:[%s26397_s1 + $0x2bf8] ss:$28 sps:$4 sm:$0xff]  }
 0x286   :  { %11956 = vmatprep.subr.bf16.mxu0 %v18596_v54  ;;  %11986 = vmatprep.mubr.bf16.mxu0 %v22478_v55  ;;  %v18650_v54 = vld [vmem:[%s26397_s1 + $0x2c34] ss:$28 sps:$4 sm:$0xff]   ;;  %v18653_v2 = vld [vmem:[%s26397_s1 + $0x1e3c] ss:$28 sps:$4 sm:$0xff]  }
 0x287   :  { %12478 = vmatprep.mubr.bf16.mxu1 %v21638_v29 }
 0x288   :  { %12449 = vmatpush1.bf16.msra.mxu1 %v18597_v59  ;;  %v18651_v59 = vld [vmem:[%s26397_s1 + $0x1e38] ss:$28 sps:$4 sm:$0xff]  }
 0x289   :  { %11957 = vmatpush1.bf16.msra.mxu0 %v18594_v58  ;;  %12450 = vmatprep.subr.bf16.mxu1 %v18605_v24  ;;  %v18648_v58 = vld [vmem:[%s26397_s1 + $0x2c30] ss:$28 sps:$4 sm:$0xff]  }
 0x28a   :  { %11958 = vmatprep.subr.bf16.mxu0 %v18602_v60  ;;  %v18656_v60 = vld [vmem:[%s26397_s1 + $0x2c6c] ss:$28 sps:$4 sm:$0xff]   ;;  %v18659_v24 = vld [vmem:[%s26397_s1 + $0x1e74] ss:$28 sps:$4 sm:$0xff]  }
 0x28c   :  { %12451 = vmatpush1.bf16.msra.mxu1 %v18603_v63  ;;  %v18657_v63 = vld [vmem:[%s26397_s1 + $0x1e70] ss:$28 sps:$4 sm:$0xff]  }
 0x28d   :  { %11959 = vmatpush1.bf16.msra.mxu0 %v18600_v62  ;;  %12452 = vmatprep.subr.bf16.mxu1 %v18611_v49  ;;  %v18654_v62 = vld [vmem:[%s26397_s1 + $0x2c68] ss:$28 sps:$4 sm:$0xff]  }
 0x28e   :  { %11960 = vmatprep.subr.bf16.mxu0 %v18608_v4  ;;  %v18662_v4 = vld [vmem:[%s26397_s1 + $0x2ca4] ss:$28 sps:$4 sm:$0xff]   ;;  %v18665_v49 = vld [vmem:[%s26397_s1 + $0x1eac] ss:$28 sps:$4 sm:$0xff]  }
 0x290   :  { %12453 = vmatpush1.bf16.msra.mxu1 %v18609_v26  ;;  %v18663_v26 = vld [vmem:[%s26397_s1 + $0x1ea8] ss:$28 sps:$4 sm:$0xff]  }
 0x291   :  { %11961 = vmatpush1.bf16.msra.mxu0 %v18606_v8  ;;  %12454 = vmatprep.subr.bf16.mxu1 %v18617_v11  ;;  %v18660_v8 = vld [vmem:[%s26397_s1 + $0x2ca0] ss:$28 sps:$4 sm:$0xff]  }
 0x292   :  { %11962 = vmatprep.subr.bf16.mxu0 %v18614_v10  ;;  %v18668_v10 = vld [vmem:[%s26397_s1 + $0x2cdc] ss:$28 sps:$4 sm:$0xff]   ;;  %v18671_v11 = vld [vmem:[%s26397_s1 + $0x1ee4] ss:$28 sps:$4 sm:$0xff]  }
 0x294   :  { %12455 = vmatpush1.bf16.msra.mxu1 %v18615_v13  ;;  %v18669_v13 = vld [vmem:[%s26397_s1 + $0x1ee0] ss:$28 sps:$4 sm:$0xff]  }
 0x295   :  { %11963 = vmatpush1.bf16.msra.mxu0 %v18612_v12  ;;  %12456 = vmatprep.subr.bf16.mxu1 %v18623_v15  ;;  %v18666_v12 = vld [vmem:[%s26397_s1 + $0x2cd8] ss:$28 sps:$4 sm:$0xff]  }
 0x296   :  { %11964 = vmatprep.subr.bf16.mxu0 %v18620_v14  ;;  %v18674_v14 = vld [vmem:[%s26397_s1 + $0x2d14] ss:$28 sps:$4 sm:$0xff]   ;;  %v18677_v15 = vld [vmem:[%s26397_s1 + $0x1f1c] ss:$28 sps:$4 sm:$0xff]  }
 0x298   :  { %12457 = vmatpush1.bf16.msra.mxu1 %v18621_v17  ;;  %v18675_v17 = vld [vmem:[%s26397_s1 + $0x1f18] ss:$28 sps:$4 sm:$0xff]  }
 0x299   :  { %11965 = vmatpush1.bf16.msra.mxu0 %v18618_v16  ;;  %12458 = vmatprep.subr.bf16.mxu1 %v18629_v21  ;;  %v18672_v16 = vld [vmem:[%s26397_s1 + $0x2d10] ss:$28 sps:$4 sm:$0xff]  }
 0x29a   :  { %11966 = vmatprep.subr.bf16.mxu0 %v18626_v20  ;;  %v18680_v20 = vld [vmem:[%s26397_s1 + $0x2d4c] ss:$28 sps:$4 sm:$0xff]   ;;  %v18683_v21 = vld [vmem:[%s26397_s1 + $0x1f54] ss:$28 sps:$4 sm:$0xff]  }
 0x29c   :  { %12459 = vmatpush1.bf16.msra.mxu1 %v18627_v0  ;;  %v18681_v0 = vld [vmem:[%s26397_s1 + $0x1f50] ss:$28 sps:$4 sm:$0xff]  }
 0x29d   :  { %11967 = vmatpush1.bf16.msra.mxu0 %v18624_v28  ;;  %12460 = vmatprep.subr.bf16.mxu1 %v18635_v56  ;;  %v18678_v28 = vld [vmem:[%s26397_s1 + $0x2d48] ss:$28 sps:$4 sm:$0xff]  }
 0x29e   :  { %11968 = vmatprep.subr.bf16.mxu0 %v18632_v33  ;;  %v18687_v33 = vld [vmem:[%s26397_s1 + $0x2d84] ss:$28 sps:$4 sm:$0xff]   ;;  %v18690_v56 = vld [vmem:[%s26397_s1 + $0x1f8c] ss:$28 sps:$4 sm:$0xff]  }
 0x2a0   :  { %12461 = vmatpush1.bf16.msra.mxu1 %v18633_v39  ;;  %v22671_v39 = vcombine.low %v22458_v46, %v22458_v46  ;;  %v18697_v46 = vld [vmem:[%s26397_s1 + $0x1fc4] ss:$28 sps:$4 sm:$0xff]  }
 0x2a1   :  { %11969 = vmatpush1.bf16.msra.mxu0 %v18630_v38  ;;  %12462 = vmatprep.subr.bf16.mxu1 %v18641_v41  ;;  %v22667_v38 = vld [vmem:[%s26398_s0 + $0x68] sm:$0xff] }
 0x2a2   :  { %11970 = vmatprep.subr.bf16.mxu0 %v18638_v40  ;;  %v18685_v40 = vld [vmem:[%s26397_s1 + $0x2d80] ss:$28 sps:$4 sm:$0xff]   ;;  %v18688_v41 = vld [vmem:[%s26397_s1 + $0x1f88] ss:$28 sps:$4 sm:$0xff]  }
 0x2a4   :  { %12463 = vmatpush1.bf16.msra.mxu1 %v18639_v43  ;;  %v22687_v43 = vcombine.high %v22667_v38, %v22667_v38 }
 0x2a5   :  { %11971 = vmatpush1.bf16.msra.mxu0 %v18636_v42  ;;  %12464 = vmatprep.subr.bf16.mxu1 %v18647_v45  ;;  %v18694_v42 = vld [vmem:[%s26397_s1 + $0x2dbc] ss:$28 sps:$4 sm:$0xff]  }
 0x2a6   :  { %11972 = vmatprep.subr.bf16.mxu0 %v18644_v44  ;;  %v18692_v44 = vld [vmem:[%s26397_s1 + $0x2db8] ss:$28 sps:$4 sm:$0xff]   ;;  %v18695_v45 = vld [vmem:[%s26397_s1 + $0x1fc0] ss:$28 sps:$4 sm:$0xff]  }
 0x2a8   :  { %12465 = vmatpush1.bf16.msra.mxu1 %v18645_v31  ;;  %v18703_v31 = vld [vmem:[%s26397_s1 + $0x1ffc] ss:$28 sps:$4 sm:$0xff]  }
 0x2a9   :  { %11973 = vmatpush1.bf16.msra.mxu0 %v18642_v51  ;;  %12466 = vmatprep.subr.bf16.mxu1 %v18653_v2  ;;  %v18700_v51 = vld [vmem:[%s26397_s1 + $0x2df4] ss:$28 sps:$4 sm:$0xff]  }
 0x2aa   :  { %11974 = vmatprep.subr.bf16.mxu0 %v18650_v54  ;;  %v18698_v54 = vld [vmem:[%s26397_s1 + $0x2df0] ss:$28 sps:$4 sm:$0xff]   ;;  %v18701_v2 = vld [vmem:[%s26397_s1 + $0x1ff8] ss:$28 sps:$4 sm:$0xff]  }
 0x2ac   :  { %12467 = vmatpush1.bf16.msra.mxu1 %v18651_v59  ;;  %v18709_v59 = vld [vmem:[%s26397_s1 + $0x2034] ss:$28 sps:$4 sm:$0xff]  }
 0x2ad   :  { %11975 = vmatpush1.bf16.msra.mxu0 %v18648_v58  ;;  %12468 = vmatprep.subr.bf16.mxu1 %v18659_v24  ;;  %v18706_v58 = vld [vmem:[%s26397_s1 + $0x2e2c] ss:$28 sps:$4 sm:$0xff]  }
 0x2ae   :  { %11976 = vmatprep.subr.bf16.mxu0 %v18656_v60  ;;  %v18704_v60 = vld [vmem:[%s26397_s1 + $0x2e28] ss:$28 sps:$4 sm:$0xff]   ;;  %v18707_v24 = vld [vmem:[%s26397_s1 + $0x2030] ss:$28 sps:$4 sm:$0xff]  }
 0x2b0   :  { %12469 = vmatpush1.bf16.msra.mxu1 %v18657_v63  ;;  %v18715_v63 = vld [vmem:[%s26397_s1 + $0x206c] ss:$28 sps:$4 sm:$0xff]  }
 0x2b1   :  { %11977 = vmatpush1.bf16.msra.mxu0 %v18654_v62  ;;  %12470 = vmatprep.subr.bf16.mxu1 %v18665_v49  ;;  %v18712_v62 = vld [vmem:[%s26397_s1 + $0x2e64] ss:$28 sps:$4 sm:$0xff]  }
 0x2b2   :  { %11978 = vmatprep.subr.bf16.mxu0 %v18662_v4  ;;  %v18710_v4 = vld [vmem:[%s26397_s1 + $0x2e60] ss:$28 sps:$4 sm:$0xff]   ;;  %v18713_v49 = vld [vmem:[%s26397_s1 + $0x2068] ss:$28 sps:$4 sm:$0xff]  }
 0x2b4   :  { %12471 = vmatpush1.bf16.msra.mxu1 %v18663_v26  ;;  %v18721_v26 = vld [vmem:[%s26397_s1 + $0x20a4] ss:$28 sps:$4 sm:$0xff]  }
 0x2b5   :  { %11979 = vmatpush1.bf16.msra.mxu0 %v18660_v8  ;;  %12472 = vmatprep.subr.bf16.mxu1 %v18671_v11  ;;  %v18718_v8 = vld [vmem:[%s26397_s1 + $0x2e9c] ss:$28 sps:$4 sm:$0xff]  }
 0x2b6   :  { %11980 = vmatprep.subr.bf16.mxu0 %v18668_v10  ;;  %v18716_v10 = vld [vmem:[%s26397_s1 + $0x2e98] ss:$28 sps:$4 sm:$0xff]   ;;  %v18719_v11 = vld [vmem:[%s26397_s1 + $0x20a0] ss:$28 sps:$4 sm:$0xff]  }
 0x2b8   :  { %12473 = vmatpush1.bf16.msra.mxu1 %v18669_v13  ;;  %v18727_v13 = vld [vmem:[%s26397_s1 + $0x20dc] ss:$28 sps:$4 sm:$0xff]  }
 0x2b9   :  { %11981 = vmatpush1.bf16.msra.mxu0 %v18666_v12  ;;  %12474 = vmatprep.subr.bf16.mxu1 %v18677_v15  ;;  %v18724_v12 = vld [vmem:[%s26397_s1 + $0x2ed4] ss:$28 sps:$4 sm:$0xff]  }
 0x2ba   :  { %11982 = vmatprep.subr.bf16.mxu0 %v18674_v14  ;;  %v18722_v14 = vld [vmem:[%s26397_s1 + $0x2ed0] ss:$28 sps:$4 sm:$0xff]   ;;  %v18725_v15 = vld [vmem:[%s26397_s1 + $0x20d8] ss:$28 sps:$4 sm:$0xff]  }
 0x2bc   :  { %12475 = vmatpush1.bf16.msra.mxu1 %v18675_v17  ;;  %v18733_v17 = vld [vmem:[%s26397_s1 + $0x2114] ss:$28 sps:$4 sm:$0xff]  }
 0x2bd   :  { %11983 = vmatpush1.bf16.msra.mxu0 %v18672_v16  ;;  %12476 = vmatprep.subr.bf16.mxu1 %v18683_v21  ;;  %v18730_v16 = vld [vmem:[%s26397_s1 + $0x2f0c] ss:$28 sps:$4 sm:$0xff]  }
 0x2be   :  { %11984 = vmatprep.subr.bf16.mxu0 %v18680_v20  ;;  %v18728_v20 = vld [vmem:[%s26397_s1 + $0x2f08] ss:$28 sps:$4 sm:$0xff]   ;;  %v18731_v21 = vld [vmem:[%s26397_s1 + $0x2110] ss:$28 sps:$4 sm:$0xff]  }
 0x2c0   :  { %12477 = vmatpush1.bf16.msra.mxu1 %v18681_v0  ;;  %v18739_v0 = vld [vmem:[%s26397_s1 + $0x214c] ss:$28 sps:$4 sm:$0xff]  }
 0x2c1   :  { %11985 = vmatpush1.bf16.msra.mxu0 %v18678_v28  ;;  %12487 = vmatprep.subr.bf16.mxu1 %v18690_v56  ;;  %v18736_v28 = vld [vmem:[%s26397_s1 + $0x2f44] ss:$28 sps:$4 sm:$0xff]  }
 0x2c2   :  { %11995 = vmatprep.subr.bf16.mxu0 %v18687_v33  ;;  %v18734_v33 = vld [vmem:[%s26397_s1 + $0x2f40] ss:$28 sps:$4 sm:$0xff]   ;;  %v18737_v56 = vld [vmem:[%s26397_s1 + $0x2148] ss:$28 sps:$4 sm:$0xff]  }
 0x2c3   :  { %12479 = vmatmul.mubr.bf16.vlgmr.msra.gmra.mrb[4].mxu1 %v21835_v57 }
 0x2c4   :  { %11987 = vmatmul.mubr.bf16.vlgmr.msra.gmra.mrb[0].mxu0 %v22671_v39  ;;  %12488 = vmatpush1.bf16.msra.mxu1 %v18688_v41  ;;  %v18745_v41 = vld [vmem:[%s26397_s1 + $0x2184] ss:$28 sps:$4 sm:$0xff]  }
 0x2c5   :  { %11996 = vmatpush1.bf16.msra.mxu0 %v18685_v40  ;;  %12489 = vmatprep.subr.bf16.mxu1 %v18697_v46  ;;  %v18742_v40 = vld [vmem:[%s26397_s1 + $0x2f7c] ss:$28 sps:$4 sm:$0xff]  }
 0x2c6   :  { %11997 = vmatprep.subr.bf16.mxu0 %v18694_v42  ;;  %12027 = vmatprep.mubr.bf16.mxu0 %v22687_v43  ;;  %v18740_v42 = vld [vmem:[%s26397_s1 + $0x2f78] ss:$28 sps:$4 sm:$0xff]   ;;  %v18743_v46 = vld [vmem:[%s26397_s1 + $0x2180] ss:$28 sps:$4 sm:$0xff]  }
 0x2c7   :  { %12519 = vmatprep.mubr.bf16.mxu1 %v21851_v61 }
 0x2c8   :  { %12490 = vmatpush1.bf16.msra.mxu1 %v18695_v45  ;;  %v18751_v45 = vld [vmem:[%s26397_s1 + $0x21bc] ss:$28 sps:$4 sm:$0xff]  }
 0x2c9   :  { %11998 = vmatpush1.bf16.msra.mxu0 %v18692_v44  ;;  %12491 = vmatprep.subr.bf16.mxu1 %v18703_v31  ;;  %v18748_v44 = vld [vmem:[%s26397_s1 + $0x2fb4] ss:$28 sps:$4 sm:$0xff]  }
 0x2ca   :  { %11999 = vmatprep.subr.bf16.mxu0 %v18700_v51  ;;  %v18746_v51 = vld [vmem:[%s26397_s1 + $0x2fb0] ss:$28 sps:$4 sm:$0xff]   ;;  %v18749_v31 = vld [vmem:[%s26397_s1 + $0x21b8] ss:$28 sps:$4 sm:$0xff]  }
 0x2cc   :  { %12492 = vmatpush1.bf16.msra.mxu1 %v18701_v2  ;;  %v18757_v2 = vld [vmem:[%s26397_s1 + $0x21f4] ss:$28 sps:$4 sm:$0xff]  }
 0x2cd   :  { %12000 = vmatpush1.bf16.msra.mxu0 %v18698_v54  ;;  %12493 = vmatprep.subr.bf16.mxu1 %v18709_v59  ;;  %v18754_v54 = vld [vmem:[%s26397_s1 + $0x2fec] ss:$28 sps:$4 sm:$0xff]  }
 0x2ce   :  { %12001 = vmatprep.subr.bf16.mxu0 %v18706_v58  ;;  %v18752_v58 = vld [vmem:[%s26397_s1 + $0x2fe8] ss:$28 sps:$4 sm:$0xff]   ;;  %v18755_v59 = vld [vmem:[%s26397_s1 + $0x21f0] ss:$28 sps:$4 sm:$0xff]  }
 0x2d0   :  { %12494 = vmatpush1.bf16.msra.mxu1 %v18707_v24  ;;  %v18763_v24 = vld [vmem:[%s26397_s1 + $0x222c] ss:$28 sps:$4 sm:$0xff]  }
 0x2d1   :  { %12002 = vmatpush1.bf16.msra.mxu0 %v18704_v60  ;;  %12495 = vmatprep.subr.bf16.mxu1 %v18715_v63  ;;  %v18760_v60 = vld [vmem:[%s26397_s1 + $0x3024] ss:$28 sps:$4 sm:$0xff]  }
 0x2d2   :  { %12003 = vmatprep.subr.bf16.mxu0 %v18712_v62  ;;  %v18758_v62 = vld [vmem:[%s26397_s1 + $0x3020] ss:$28 sps:$4 sm:$0xff]   ;;  %v18761_v63 = vld [vmem:[%s26397_s1 + $0x2228] ss:$28 sps:$4 sm:$0xff]  }
 0x2d4   :  { %12496 = vmatpush1.bf16.msra.mxu1 %v18713_v49  ;;  %v18769_v49 = vld [vmem:[%s26397_s1 + $0x2264] ss:$28 sps:$4 sm:$0xff]  }
 0x2d5   :  { %12004 = vmatpush1.bf16.msra.mxu0 %v18710_v4  ;;  %12497 = vmatprep.subr.bf16.mxu1 %v18721_v26  ;;  %v18766_v4 = vld [vmem:[%s26397_s1 + $0x305c] ss:$28 sps:$4 sm:$0xff]  }
 0x2d6   :  { %12005 = vmatprep.subr.bf16.mxu0 %v18718_v8  ;;  %v18764_v8 = vld [vmem:[%s26397_s1 + $0x3058] ss:$28 sps:$4 sm:$0xff]   ;;  %v18767_v26 = vld [vmem:[%s26397_s1 + $0x2260] ss:$28 sps:$4 sm:$0xff]  }
 0x2d8   :  { %12498 = vmatpush1.bf16.msra.mxu1 %v18719_v11  ;;  %v18775_v11 = vld [vmem:[%s26397_s1 + $0x229c] ss:$28 sps:$4 sm:$0xff]  }
 0x2d9   :  { %12006 = vmatpush1.bf16.msra.mxu0 %v18716_v10  ;;  %12499 = vmatprep.subr.bf16.mxu1 %v18727_v13  ;;  %v18772_v10 = vld [vmem:[%s26397_s1 + $0x3094] ss:$28 sps:$4 sm:$0xff]  }
 0x2da   :  { %12007 = vmatprep.subr.bf16.mxu0 %v18724_v12  ;;  %v18770_v12 = vld [vmem:[%s26397_s1 + $0x3090] ss:$28 sps:$4 sm:$0xff]   ;;  %v18773_v13 = vld [vmem:[%s26397_s1 + $0x2298] ss:$28 sps:$4 sm:$0xff]  }
 0x2dc   :  { %12500 = vmatpush1.bf16.msra.mxu1 %v18725_v15  ;;  %v18781_v15 = vld [vmem:[%s26397_s1 + $0x22d4] ss:$28 sps:$4 sm:$0xff]  }
 0x2dd   :  { %12008 = vmatpush1.bf16.msra.mxu0 %v18722_v14  ;;  %12501 = vmatprep.subr.bf16.mxu1 %v18733_v17  ;;  %v18778_v14 = vld [vmem:[%s26397_s1 + $0x30cc] ss:$28 sps:$4 sm:$0xff]  }
 0x2de   :  { %12009 = vmatprep.subr.bf16.mxu0 %v18730_v16  ;;  %v18776_v16 = vld [vmem:[%s26397_s1 + $0x30c8] ss:$28 sps:$4 sm:$0xff]   ;;  %v18779_v17 = vld [vmem:[%s26397_s1 + $0x22d0] ss:$28 sps:$4 sm:$0xff]  }
 0x2e0   :  { %12502 = vmatpush1.bf16.msra.mxu1 %v18731_v21  ;;  %v18788_v21 = vld [vmem:[%s26397_s1 + $0x230c] ss:$28 sps:$4 sm:$0xff]  }
 0x2e1   :  { %12010 = vmatpush1.bf16.msra.mxu0 %v18728_v20  ;;  %12503 = vmatprep.subr.bf16.mxu1 %v18739_v0  ;;  %v18785_v20 = vld [vmem:[%s26397_s1 + $0x3104] ss:$28 sps:$4 sm:$0xff]  }
 0x2e2   :  { %12011 = vmatprep.subr.bf16.mxu0 %v18736_v28  ;;  %v18783_v28 = vld [vmem:[%s26397_s1 + $0x3100] ss:$28 sps:$4 sm:$0xff]   ;;  %v18786_v0 = vld [vmem:[%s26397_s1 + $0x2308] ss:$28 sps:$4 sm:$0xff]  }
 0x2e4   :  { %12504 = vmatpush1.bf16.msra.mxu1 %v18737_v56  ;;  %v22886_v56 = vld [vmem:[%s26398_s0 + $0x70] sm:$0xff] }
 0x2e5   :  { %12012 = vmatpush1.bf16.msra.mxu0 %v18734_v33  ;;  %12505 = vmatprep.subr.bf16.mxu1 %v18745_v41  ;;  %v22881_v33 = vcombine.low %v22667_v38, %v22667_v38  ;;  %v18795_v41 = vld [vmem:[%s26397_s1 + $0x2344] ss:$28 sps:$4 sm:$0xff]   ;;  %v22896_v38 = vcombine.high %v22886_v56, %v22886_v56 }
 0x2e6   :  { %12013 = vmatprep.subr.bf16.mxu0 %v18742_v40  ;;  %v18792_v40 = vld [vmem:[%s26397_s1 + $0x313c] ss:$28 sps:$4 sm:$0xff]  }
 0x2e8   :  { %12506 = vmatpush1.bf16.msra.mxu1 %v18743_v46  ;;  %v18793_v46 = vld [vmem:[%s26397_s1 + $0x2340] ss:$28 sps:$4 sm:$0xff]  }
 0x2e9   :  { %12014 = vmatpush1.bf16.msra.mxu0 %v18740_v42  ;;  %12507 = vmatprep.subr.bf16.mxu1 %v18751_v45  ;;  %v18790_v42 = vld [vmem:[%s26397_s1 + $0x3138] ss:$28 sps:$4 sm:$0xff]  }
 0x2ea   :  { %12015 = vmatprep.subr.bf16.mxu0 %v18748_v44  ;;  %v18798_v44 = vld [vmem:[%s26397_s1 + $0x3174] ss:$28 sps:$4 sm:$0xff]   ;;  %v18801_v45 = vld [vmem:[%s26397_s1 + $0x237c] ss:$28 sps:$4 sm:$0xff]  }
 0x2ec   :  { %12508 = vmatpush1.bf16.msra.mxu1 %v18749_v31  ;;  %v18799_v31 = vld [vmem:[%s26397_s1 + $0x2378] ss:$28 sps:$4 sm:$0xff]  }
 0x2ed   :  { %12016 = vmatpush1.bf16.msra.mxu0 %v18746_v51  ;;  %12509 = vmatprep.subr.bf16.mxu1 %v18757_v2  ;;  %v18796_v51 = vld [vmem:[%s26397_s1 + $0x3170] ss:$28 sps:$4 sm:$0xff]  }
 0x2ee   :  { %12017 = vmatprep.subr.bf16.mxu0 %v18754_v54  ;;  %v18804_v54 = vld [vmem:[%s26397_s1 + $0x31ac] ss:$28 sps:$4 sm:$0xff]   ;;  %v18807_v2 = vld [vmem:[%s26397_s1 + $0x23b4] ss:$28 sps:$4 sm:$0xff]  }
 0x2f0   :  { %12510 = vmatpush1.bf16.msra.mxu1 %v18755_v59  ;;  %v18805_v59 = vld [vmem:[%s26397_s1 + $0x23b0] ss:$28 sps:$4 sm:$0xff]  }
 0x2f1   :  { %12018 = vmatpush1.bf16.msra.mxu0 %v18752_v58  ;;  %12511 = vmatprep.subr.bf16.mxu1 %v18763_v24  ;;  %v18802_v58 = vld [vmem:[%s26397_s1 + $0x31a8] ss:$28 sps:$4 sm:$0xff]  }
 0x2f2   :  { %12019 = vmatprep.subr.bf16.mxu0 %v18760_v60  ;;  %v18810_v60 = vld [vmem:[%s26397_s1 + $0x31e4] ss:$28 sps:$4 sm:$0xff]   ;;  %v18813_v24 = vld [vmem:[%s26397_s1 + $0x23ec] ss:$28 sps:$4 sm:$0xff]  }
 0x2f4   :  { %12512 = vmatpush1.bf16.msra.mxu1 %v18761_v63  ;;  %v18811_v63 = vld [vmem:[%s26397_s1 + $0x23e8] ss:$28 sps:$4 sm:$0xff]  }
 0x2f5   :  { %12020 = vmatpush1.bf16.msra.mxu0 %v18758_v62  ;;  %12513 = vmatprep.subr.bf16.mxu1 %v18769_v49  ;;  %v18808_v62 = vld [vmem:[%s26397_s1 + $0x31e0] ss:$28 sps:$4 sm:$0xff]  }
 0x2f6   :  { %12021 = vmatprep.subr.bf16.mxu0 %v18766_v4  ;;  %v18816_v4 = vld [vmem:[%s26397_s1 + $0x321c] ss:$28 sps:$4 sm:$0xff]   ;;  %v18819_v49 = vld [vmem:[%s26397_s1 + $0x2424] ss:$28 sps:$4 sm:$0xff]  }
 0x2f8   :  { %12514 = vmatpush1.bf16.msra.mxu1 %v18767_v26  ;;  %v18817_v26 = vld [vmem:[%s26397_s1 + $0x2420] ss:$28 sps:$4 sm:$0xff]  }
 0x2f9   :  { %12022 = vmatpush1.bf16.msra.mxu0 %v18764_v8  ;;  %12515 = vmatprep.subr.bf16.mxu1 %v18775_v11  ;;  %v18814_v8 = vld [vmem:[%s26397_s1 + $0x3218] ss:$28 sps:$4 sm:$0xff]  }
 0x2fa   :  { %12023 = vmatprep.subr.bf16.mxu0 %v18772_v10  ;;  %v18822_v10 = vld [vmem:[%s26397_s1 + $0x3254] ss:$28 sps:$4 sm:$0xff]   ;;  %v18825_v11 = vld [vmem:[%s26397_s1 + $0x245c] ss:$28 sps:$4 sm:$0xff]  }
 0x2fc   :  { %12516 = vmatpush1.bf16.msra.mxu1 %v18773_v13  ;;  %v18823_v13 = vld [vmem:[%s26397_s1 + $0x2458] ss:$28 sps:$4 sm:$0xff]  }
 0x2fd   :  { %12024 = vmatpush1.bf16.msra.mxu0 %v18770_v12  ;;  %12517 = vmatprep.subr.bf16.mxu1 %v18781_v15  ;;  %v18820_v12 = vld [vmem:[%s26397_s1 + $0x3250] ss:$28 sps:$4 sm:$0xff]  }
 0x2fe   :  { %12025 = vmatprep.subr.bf16.mxu0 %v18778_v14  ;;  %v18828_v14 = vld [vmem:[%s26397_s1 + $0x328c] ss:$28 sps:$4 sm:$0xff]   ;;  %v18831_v15 = vld [vmem:[%s26397_s1 + $0x2494] ss:$28 sps:$4 sm:$0xff]  }
 0x300   :  { %12518 = vmatpush1.bf16.msra.mxu1 %v18779_v17  ;;  %v18829_v17 = vld [vmem:[%s26397_s1 + $0x2490] ss:$28 sps:$4 sm:$0xff]  }
 0x301   :  { %12026 = vmatpush1.bf16.msra.mxu0 %v18776_v16  ;;  %12528 = vmatprep.subr.bf16.mxu1 %v18788_v21  ;;  %v18826_v16 = vld [vmem:[%s26397_s1 + $0x3288] ss:$28 sps:$4 sm:$0xff]  }
 0x302   :  { %12036 = vmatprep.subr.bf16.mxu0 %v18785_v20  ;;  %v18834_v20 = vld [vmem:[%s26397_s1 + $0x32c4] ss:$28 sps:$4 sm:$0xff]   ;;  %v18837_v21 = vld [vmem:[%s26397_s1 + $0x24cc] ss:$28 sps:$4 sm:$0xff]  }
 0x303   :  { %12520 = vmatmul.mubr.bf16.vlgmr.msra.gmra.mrb[4].mxu1 %v22044_v27 }
 0x304   :  { %12028 = vmatmul.mubr.bf16.vlgmr.msra.gmra.mrb[0].mxu0 %v22881_v33  ;;  %12529 = vmatpush1.bf16.msra.mxu1 %v18786_v0  ;;  %v18835_v0 = vld [vmem:[%s26397_s1 + $0x24c8] ss:$28 sps:$4 sm:$0xff]  }
 0x305   :  { %12037 = vmatpush1.bf16.msra.mxu0 %v18783_v28  ;;  %12530 = vmatprep.subr.bf16.mxu1 %v18795_v41  ;;  %v18832_v28 = vld [vmem:[%s26397_s1 + $0x32c0] ss:$28 sps:$4 sm:$0xff]  }
 0x306   :  { %12038 = vmatprep.subr.bf16.mxu0 %v18792_v40  ;;  %12068 = vmatprep.mubr.bf16.mxu0 %v22896_v38  ;;  %v18840_v40 = vld [vmem:[%s26397_s1 + $0x32fc] ss:$28 sps:$4 sm:$0xff]   ;;  %v18843_v41 = vld [vmem:[%s26397_s1 + $0x2504] ss:$28 sps:$4 sm:$0xff]  }
 0x307   :  { %12560 = vmatprep.mubr.bf16.mxu1 %v22060_v22 }
 0x308   :  { %12531 = vmatpush1.bf16.msra.mxu1 %v18793_v46  ;;  %v18841_v46 = vld [vmem:[%s26397_s1 + $0x2500] ss:$28 sps:$4 sm:$0xff]  }
 0x309   :  { %12039 = vmatpush1.bf16.msra.mxu0 %v18790_v42  ;;  %12532 = vmatprep.subr.bf16.mxu1 %v18801_v45  ;;  %v18838_v42 = vld [vmem:[%s26397_s1 + $0x32f8] ss:$28 sps:$4 sm:$0xff]  }
 0x30a   :  { %12040 = vmatprep.subr.bf16.mxu0 %v18798_v44  ;;  %v18846_v44 = vld [vmem:[%s26397_s1 + $0x3334] ss:$28 sps:$4 sm:$0xff]   ;;  %v18849_v45 = vld [vmem:[%s26397_s1 + $0x253c] ss:$28 sps:$4 sm:$0xff]  }
 0x30c   :  { %12533 = vmatpush1.bf16.msra.mxu1 %v18799_v31  ;;  %v18847_v31 = vld [vmem:[%s26397_s1 + $0x2538] ss:$28 sps:$4 sm:$0xff]  }
 0x30d   :  { %12041 = vmatpush1.bf16.msra.mxu0 %v18796_v51  ;;  %12534 = vmatprep.subr.bf16.mxu1 %v18807_v2  ;;  %v18844_v51 = vld [vmem:[%s26397_s1 + $0x3330] ss:$28 sps:$4 sm:$0xff]  }
 0x30e   :  { %12042 = vmatprep.subr.bf16.mxu0 %v18804_v54  ;;  %v18852_v54 = vld [vmem:[%s26397_s1 + $0x336c] ss:$28 sps:$4 sm:$0xff]   ;;  %v18855_v2 = vld [vmem:[%s26397_s1 + $0x2574] ss:$28 sps:$4 sm:$0xff]  }
 0x310   :  { %12535 = vmatpush1.bf16.msra.mxu1 %v18805_v59  ;;  %v18853_v59 = vld [vmem:[%s26397_s1 + $0x2570] ss:$28 sps:$4 sm:$0xff]  }
 0x311   :  { %12043 = vmatpush1.bf16.msra.mxu0 %v18802_v58  ;;  %12536 = vmatprep.subr.bf16.mxu1 %v18813_v24  ;;  %v18850_v58 = vld [vmem:[%s26397_s1 + $0x3368] ss:$28 sps:$4 sm:$0xff]  }
 0x312   :  { %12044 = vmatprep.subr.bf16.mxu0 %v18810_v60  ;;  %v18858_v60 = vld [vmem:[%s26397_s1 + $0x33a4] ss:$28 sps:$4 sm:$0xff]   ;;  %v18861_v24 = vld [vmem:[%s26397_s1 + $0x25ac] ss:$28 sps:$4 sm:$0xff]  }
 0x314   :  { %12537 = vmatpush1.bf16.msra.mxu1 %v18811_v63  ;;  %v18859_v63 = vld [vmem:[%s26397_s1 + $0x25a8] ss:$28 sps:$4 sm:$0xff]  }
 0x315   :  { %12045 = vmatpush1.bf16.msra.mxu0 %v18808_v62  ;;  %12538 = vmatprep.subr.bf16.mxu1 %v18819_v49  ;;  %v18856_v62 = vld [vmem:[%s26397_s1 + $0x33a0] ss:$28 sps:$4 sm:$0xff]  }
 0x316   :  { %12046 = vmatprep.subr.bf16.mxu0 %v18816_v4  ;;  %v18864_v4 = vld [vmem:[%s26397_s1 + $0x33dc] ss:$28 sps:$4 sm:$0xff]   ;;  %v18867_v49 = vld [vmem:[%s26397_s1 + $0x25e4] ss:$28 sps:$4 sm:$0xff]  }
 0x318   :  { %12539 = vmatpush1.bf16.msra.mxu1 %v18817_v26  ;;  %v18865_v26 = vld [vmem:[%s26397_s1 + $0x25e0] ss:$28 sps:$4 sm:$0xff]  }
 0x319   :  { %12047 = vmatpush1.bf16.msra.mxu0 %v18814_v8  ;;  %12540 = vmatprep.subr.bf16.mxu1 %v18825_v11  ;;  %v18862_v8 = vld [vmem:[%s26397_s1 + $0x33d8] ss:$28 sps:$4 sm:$0xff]  }
 0x31a   :  { %12048 = vmatprep.subr.bf16.mxu0 %v18822_v10  ;;  %v18870_v10 = vld [vmem:[%s26397_s1 + $0x3414] ss:$28 sps:$4 sm:$0xff]   ;;  %v18873_v11 = vld [vmem:[%s26397_s1 + $0x261c] ss:$28 sps:$4 sm:$0xff]  }
 0x31c   :  { %12541 = vmatpush1.bf16.msra.mxu1 %v18823_v13  ;;  %v18871_v13 = vld [vmem:[%s26397_s1 + $0x2618] ss:$28 sps:$4 sm:$0xff]  }
 0x31d   :  { %12049 = vmatpush1.bf16.msra.mxu0 %v18820_v12  ;;  %12542 = vmatprep.subr.bf16.mxu1 %v18831_v15  ;;  %v18868_v12 = vld [vmem:[%s26397_s1 + $0x3410] ss:$28 sps:$4 sm:$0xff]  }
 0x31e   :  { %12050 = vmatprep.subr.bf16.mxu0 %v18828_v14  ;;  %v18876_v14 = vld [vmem:[%s26397_s1 + $0x344c] ss:$28 sps:$4 sm:$0xff]   ;;  %v18879_v15 = vld [vmem:[%s26397_s1 + $0x2654] ss:$28 sps:$4 sm:$0xff]  }
 0x320   :  { %12543 = vmatpush1.bf16.msra.mxu1 %v18829_v17  ;;  %v18877_v17 = vld [vmem:[%s26397_s1 + $0x2650] ss:$28 sps:$4 sm:$0xff]  }
 0x321   :  { %12051 = vmatpush1.bf16.msra.mxu0 %v18826_v16  ;;  %12544 = vmatprep.subr.bf16.mxu1 %v18837_v21  ;;  %v18874_v16 = vld [vmem:[%s26397_s1 + $0x3448] ss:$28 sps:$4 sm:$0xff]  }
 0x322   :  { %12052 = vmatprep.subr.bf16.mxu0 %v18834_v20  ;;  %v18883_v20 = vld [vmem:[%s26397_s1 + $0x3484] ss:$28 sps:$4 sm:$0xff]   ;;  %v18886_v21 = vld [vmem:[%s26397_s1 + $0x268c] ss:$28 sps:$4 sm:$0xff]  }
 0x324   :  { %12545 = vmatpush1.bf16.msra.mxu1 %v18835_v0  ;;  %v23089_v0 = vcombine.low %v22886_v56, %v22886_v56  ;;  %v18893_v56 = vld [vmem:[%s26397_s1 + $0x26c4] ss:$28 sps:$4 sm:$0xff]  }
 0x325   :  { %12053 = vmatpush1.bf16.msra.mxu0 %v18832_v28  ;;  %12546 = vmatprep.subr.bf16.mxu1 %v18843_v41  ;;  %v23085_v28 = vld [vmem:[%s26398_s0 + $0x78] sm:$0xff]  ;;  %v18884_v41 = vld [vmem:[%s26397_s1 + $0x2688] ss:$28 sps:$4 sm:$0xff]  }
 0x326   :  { %12054 = vmatprep.subr.bf16.mxu0 %v18840_v40  ;;  %v18881_v40 = vld [vmem:[%s26397_s1 + $0x3480] ss:$28 sps:$4 sm:$0xff]  }
 0x328   :  { %12547 = vmatpush1.bf16.msra.mxu1 %v18841_v46  ;;  %v23105_v46 = vcombine.high %v23085_v28, %v23085_v28 }
 0x329   :  { %12055 = vmatpush1.bf16.msra.mxu0 %v18838_v42  ;;  %12548 = vmatprep.subr.bf16.mxu1 %v18849_v45  ;;  %v18890_v42 = vld [vmem:[%s26397_s1 + $0x34bc] ss:$28 sps:$4 sm:$0xff]  }
 0x32a   :  { %12056 = vmatprep.subr.bf16.mxu0 %v18846_v44  ;;  %v18888_v44 = vld [vmem:[%s26397_s1 + $0x34b8] ss:$28 sps:$4 sm:$0xff]   ;;  %v18891_v45 = vld [vmem:[%s26397_s1 + $0x26c0] ss:$28 sps:$4 sm:$0xff]  }
 0x32c   :  { %12549 = vmatpush1.bf16.msra.mxu1 %v18847_v31  ;;  %v18899_v31 = vld [vmem:[%s26397_s1 + $0x26fc] ss:$28 sps:$4 sm:$0xff]  }
 0x32d   :  { %12057 = vmatpush1.bf16.msra.mxu0 %v18844_v51  ;;  %12550 = vmatprep.subr.bf16.mxu1 %v18855_v2  ;;  %v18896_v51 = vld [vmem:[%s26397_s1 + $0x34f4] ss:$28 sps:$4 sm:$0xff]  }
 0x32e   :  { %12058 = vmatprep.subr.bf16.mxu0 %v18852_v54  ;;  %v18894_v54 = vld [vmem:[%s26397_s1 + $0x34f0] ss:$28 sps:$4 sm:$0xff]   ;;  %v18897_v2 = vld [vmem:[%s26397_s1 + $0x26f8] ss:$28 sps:$4 sm:$0xff]  }
 0x330   :  { %12551 = vmatpush1.bf16.msra.mxu1 %v18853_v59  ;;  %v18905_v59 = vld [vmem:[%s26397_s1 + $0x2734] ss:$28 sps:$4 sm:$0xff]  }
 0x331   :  { %12059 = vmatpush1.bf16.msra.mxu0 %v18850_v58  ;;  %12552 = vmatprep.subr.bf16.mxu1 %v18861_v24  ;;  %v18902_v58 = vld [vmem:[%s26397_s1 + $0x352c] ss:$28 sps:$4 sm:$0xff]  }
 0x332   :  { %12060 = vmatprep.subr.bf16.mxu0 %v18858_v60  ;;  %v18900_v60 = vld [vmem:[%s26397_s1 + $0x3528] ss:$28 sps:$4 sm:$0xff]   ;;  %v18903_v24 = vld [vmem:[%s26397_s1 + $0x2730] ss:$28 sps:$4 sm:$0xff]  }
 0x334   :  { %12553 = vmatpush1.bf16.msra.mxu1 %v18859_v63  ;;  %v18911_v63 = vld [vmem:[%s26397_s1 + $0x276c] ss:$28 sps:$4 sm:$0xff]  }
 0x335   :  { %12061 = vmatpush1.bf16.msra.mxu0 %v18856_v62  ;;  %12554 = vmatprep.subr.bf16.mxu1 %v18867_v49  ;;  %v18908_v62 = vld [vmem:[%s26397_s1 + $0x3564] ss:$28 sps:$4 sm:$0xff]  }
 0x336   :  { %12062 = vmatprep.subr.bf16.mxu0 %v18864_v4  ;;  %v18906_v4 = vld [vmem:[%s26397_s1 + $0x3560] ss:$28 sps:$4 sm:$0xff]   ;;  %v18909_v49 = vld [vmem:[%s26397_s1 + $0x2768] ss:$28 sps:$4 sm:$0xff]  }
 0x338   :  { %12555 = vmatpush1.bf16.msra.mxu1 %v18865_v26  ;;  %v18917_v26 = vld [vmem:[%s26397_s1 + $0x27a4] ss:$28 sps:$4 sm:$0xff]  }
 0x339   :  { %12063 = vmatpush1.bf16.msra.mxu0 %v18862_v8  ;;  %12556 = vmatprep.subr.bf16.mxu1 %v18873_v11  ;;  %v18914_v8 = vld [vmem:[%s26397_s1 + $0x359c] ss:$28 sps:$4 sm:$0xff]  }
 0x33a   :  { %12064 = vmatprep.subr.bf16.mxu0 %v18870_v10  ;;  %v18912_v10 = vld [vmem:[%s26397_s1 + $0x3598] ss:$28 sps:$4 sm:$0xff]   ;;  %v18915_v11 = vld [vmem:[%s26397_s1 + $0x27a0] ss:$28 sps:$4 sm:$0xff]  }
 0x33c   :  { %12557 = vmatpush1.bf16.msra.mxu1 %v18871_v13  ;;  %v18923_v13 = vld [vmem:[%s26397_s1 + $0x27dc] ss:$28 sps:$4 sm:$0xff]  }
 0x33d   :  { %12065 = vmatpush1.bf16.msra.mxu0 %v18868_v12  ;;  %12558 = vmatprep.subr.bf16.mxu1 %v18879_v15  ;;  %v18920_v12 = vld [vmem:[%s26397_s1 + $0x35d4] ss:$28 sps:$4 sm:$0xff]  }
 0x33e   :  { %12066 = vmatprep.subr.bf16.mxu0 %v18876_v14  ;;  %v18918_v14 = vld [vmem:[%s26397_s1 + $0x35d0] ss:$28 sps:$4 sm:$0xff]   ;;  %v18921_v15 = vld [vmem:[%s26397_s1 + $0x27d8] ss:$28 sps:$4 sm:$0xff]  }
 0x340   :  { %12559 = vmatpush1.bf16.msra.mxu1 %v18877_v17  ;;  %v18929_v17 = vld [vmem:[%s26397_s1 + $0x2814] ss:$28 sps:$4 sm:$0xff]  }
 0x341   :  { %12067 = vmatpush1.bf16.msra.mxu0 %v18874_v16  ;;  %12569 = vmatprep.subr.bf16.mxu1 %v18886_v21  ;;  %v18926_v16 = vld [vmem:[%s26397_s1 + $0x360c] ss:$28 sps:$4 sm:$0xff]  }
 0x342   :  { %12077 = vmatprep.subr.bf16.mxu0 %v18883_v20  ;;  %v18924_v20 = vld [vmem:[%s26397_s1 + $0x3608] ss:$28 sps:$4 sm:$0xff]   ;;  %v18927_v21 = vld [vmem:[%s26397_s1 + $0x2810] ss:$28 sps:$4 sm:$0xff]  }
 0x343   :  { %12561 = vmatmul.mubr.bf16.vlgmr.msra.gmra.mrb[4].mxu1 %v22253_v3 }
 0x344   :  { %12069 = vmatmul.mubr.bf16.vlgmr.msra.gmra.mrb[0].mxu0 %v23089_v0  ;;  %12570 = vmatpush1.bf16.msra.mxu1 %v18884_v41  ;;  %v18935_v41 = vld [vmem:[%s26397_s1 + $0x284c] ss:$28 sps:$4 sm:$0xff]  }
 0x345   :  { %12078 = vmatpush1.bf16.msra.mxu0 %v18881_v40  ;;  %12571 = vmatprep.subr.bf16.mxu1 %v18893_v56  ;;  %v18932_v40 = vld [vmem:[%s26397_s1 + $0x3644] ss:$28 sps:$4 sm:$0xff]  }
 0x346   :  { %12079 = vmatprep.subr.bf16.mxu0 %v18890_v42  ;;  %12109 = vmatprep.mubr.bf16.mxu0 %v23105_v46  ;;  %v18930_v42 = vld [vmem:[%s26397_s1 + $0x3640] ss:$28 sps:$4 sm:$0xff]   ;;  %v18933_v56 = vld [vmem:[%s26397_s1 + $0x2848] ss:$28 sps:$4 sm:$0xff]  }
 0x347   :  { %12601 = vmatprep.mubr.bf16.mxu1 %v22269_v9 }
 0x348   :  { %12572 = vmatpush1.bf16.msra.mxu1 %v18891_v45  ;;  %v18941_v45 = vld [vmem:[%s26397_s1 + $0x2884] ss:$28 sps:$4 sm:$0xff]  }
 0x349   :  { %12080 = vmatpush1.bf16.msra.mxu0 %v18888_v44  ;;  %12573 = vmatprep.subr.bf16.mxu1 %v18899_v31  ;;  %v18938_v44 = vld [vmem:[%s26397_s1 + $0x367c] ss:$28 sps:$4 sm:$0xff]  }
 0x34a   :  { %12081 = vmatprep.subr.bf16.mxu0 %v18896_v51  ;;  %v18936_v51 = vld [vmem:[%s26397_s1 + $0x3678] ss:$28 sps:$4 sm:$0xff]   ;;  %v18939_v31 = vld [vmem:[%s26397_s1 + $0x2880] ss:$28 sps:$4 sm:$0xff]  }
 0x34c   :  { %12574 = vmatpush1.bf16.msra.mxu1 %v18897_v2  ;;  %v18947_v2 = vld [vmem:[%s26397_s1 + $0x28bc] ss:$28 sps:$4 sm:$0xff]  }
 0x34d   :  { %12082 = vmatpush1.bf16.msra.mxu0 %v18894_v54  ;;  %12575 = vmatprep.subr.bf16.mxu1 %v18905_v59  ;;  %v18944_v54 = vld [vmem:[%s26397_s1 + $0x36b4] ss:$28 sps:$4 sm:$0xff]  }
 0x34e   :  { %12083 = vmatprep.subr.bf16.mxu0 %v18902_v58  ;;  %v18942_v58 = vld [vmem:[%s26397_s1 + $0x36b0] ss:$28 sps:$4 sm:$0xff]   ;;  %v18945_v59 = vld [vmem:[%s26397_s1 + $0x28b8] ss:$28 sps:$4 sm:$0xff]  }
 0x350   :  { %12576 = vmatpush1.bf16.msra.mxu1 %v18903_v24  ;;  %v18953_v24 = vld [vmem:[%s26397_s1 + $0x28f4] ss:$28 sps:$4 sm:$0xff]  }
 0x351   :  { %12084 = vmatpush1.bf16.msra.mxu0 %v18900_v60  ;;  %12577 = vmatprep.subr.bf16.mxu1 %v18911_v63  ;;  %v18950_v60 = vld [vmem:[%s26397_s1 + $0x36ec] ss:$28 sps:$4 sm:$0xff]  }
 0x352   :  { %12085 = vmatprep.subr.bf16.mxu0 %v18908_v62  ;;  %v18948_v62 = vld [vmem:[%s26397_s1 + $0x36e8] ss:$28 sps:$4 sm:$0xff]   ;;  %v18951_v63 = vld [vmem:[%s26397_s1 + $0x28f0] ss:$28 sps:$4 sm:$0xff]  }
 0x354   :  { %12578 = vmatpush1.bf16.msra.mxu1 %v18909_v49  ;;  %v18959_v49 = vld [vmem:[%s26397_s1 + $0x292c] ss:$28 sps:$4 sm:$0xff]  }
 0x355   :  { %12086 = vmatpush1.bf16.msra.mxu0 %v18906_v4  ;;  %12579 = vmatprep.subr.bf16.mxu1 %v18917_v26  ;;  %v18956_v4 = vld [vmem:[%s26397_s1 + $0x3724] ss:$28 sps:$4 sm:$0xff]  }
 0x356   :  { %12087 = vmatprep.subr.bf16.mxu0 %v18914_v8  ;;  %v18954_v8 = vld [vmem:[%s26397_s1 + $0x3720] ss:$28 sps:$4 sm:$0xff]   ;;  %v18957_v26 = vld [vmem:[%s26397_s1 + $0x2928] ss:$28 sps:$4 sm:$0xff]  }
 0x358   :  { %12580 = vmatpush1.bf16.msra.mxu1 %v18915_v11  ;;  %v18965_v11 = vld [vmem:[%s26397_s1 + $0x2964] ss:$28 sps:$4 sm:$0xff]  }
 0x359   :  { %12088 = vmatpush1.bf16.msra.mxu0 %v18912_v10  ;;  %12581 = vmatprep.subr.bf16.mxu1 %v18923_v13  ;;  %v18962_v10 = vld [vmem:[%s26397_s1 + $0x375c] ss:$28 sps:$4 sm:$0xff]  }
 0x35a   :  { %12089 = vmatprep.subr.bf16.mxu0 %v18920_v12  ;;  %v18960_v12 = vld [vmem:[%s26397_s1 + $0x3758] ss:$28 sps:$4 sm:$0xff]   ;;  %v18963_v13 = vld [vmem:[%s26397_s1 + $0x2960] ss:$28 sps:$4 sm:$0xff]  }
 0x35c   :  { %12582 = vmatpush1.bf16.msra.mxu1 %v18921_v15  ;;  %v18971_v15 = vld [vmem:[%s26397_s1 + $0x299c] ss:$28 sps:$4 sm:$0xff]  }
 0x35d   :  { %12090 = vmatpush1.bf16.msra.mxu0 %v18918_v14  ;;  %12583 = vmatprep.subr.bf16.mxu1 %v18929_v17  ;;  %v18968_v14 = vld [vmem:[%s26397_s1 + $0x3794] ss:$28 sps:$4 sm:$0xff]  }
 0x35e   :  { %12091 = vmatprep.subr.bf16.mxu0 %v18926_v16  ;;  %v18966_v16 = vld [vmem:[%s26397_s1 + $0x3790] ss:$28 sps:$4 sm:$0xff]   ;;  %v18969_v17 = vld [vmem:[%s26397_s1 + $0x2998] ss:$28 sps:$4 sm:$0xff]  }
 0x360   :  { %12584 = vmatpush1.bf16.msra.mxu1 %v18927_v21  ;;  %v18977_v21 = vld [vmem:[%s26397_s1 + $0x29d4] ss:$28 sps:$4 sm:$0xff]  }
 0x361   :  { %12092 = vmatpush1.bf16.msra.mxu0 %v18924_v20  ;;  %12585 = vmatprep.subr.bf16.mxu1 %v18935_v41  ;;  %v18974_v20 = vld [vmem:[%s26397_s1 + $0x37cc] ss:$28 sps:$4 sm:$0xff]  }
 0x362   :  { %12093 = vmatprep.subr.bf16.mxu0 %v18932_v40  ;;  %v18972_v40 = vld [vmem:[%s26397_s1 + $0x37c8] ss:$28 sps:$4 sm:$0xff]   ;;  %v18975_v41 = vld [vmem:[%s26397_s1 + $0x29d0] ss:$28 sps:$4 sm:$0xff]  }
 0x364   :  { %12586 = vmatpush1.bf16.msra.mxu1 %v18933_v56  ;;  %v18985_v56 = vld [vmem:[%s26397_s1 + $0x14] ss:$28 sps:$4 sm:$0xff]  }
 0x365   :  { %12094 = vmatpush1.bf16.msra.mxu0 %v18930_v42  ;;  %12587 = vmatprep.subr.bf16.mxu1 %v18941_v45  ;;  %v18982_v42 = vld [vmem:[%s26397_s1 + $0x2a0c] ss:$28 sps:$4 sm:$0xff]  }
 0x366   :  { %12095 = vmatprep.subr.bf16.mxu0 %v18938_v44  ;;  %v23293_v44 = vcombine.low %v23085_v28, %v23085_v28  ;;  %v18980_v45 = vld [vmem:[%s26397_s1 + $0x2a08] ss:$28 sps:$4 sm:$0xff]  }
 0x367   :  { %v18991_v28 = vld [vmem:[%s26397_s1 + $0x4c] ss:$28 sps:$4 sm:$0xff]  }
 0x368   :  { %12588 = vmatpush1.bf16.msra.mxu1 %v18939_v31  ;;  %v18988_v31 = vld [vmem:[%s26397_s1 + $0x2a44] ss:$28 sps:$4 sm:$0xff]  }
 0x369   :  { %12096 = vmatpush1.bf16.msra.mxu0 %v18936_v51  ;;  %12589 = vmatprep.subr.bf16.mxu1 %v18947_v2  ;;  %v18983_v51 = vld [vmem:[%s26397_s1 + $0x10] ss:$28 sps:$4 sm:$0xff]   ;;  %v18989_v2 = vld [vmem:[%s26397_s1 + $0x48] ss:$28 sps:$4 sm:$0xff]  }
 0x36a   :  { %12097 = vmatprep.subr.bf16.mxu0 %v18944_v54  ;;  %v18986_v54 = vld [vmem:[%s26397_s1 + $0x2a40] ss:$28 sps:$4 sm:$0xff]  }
 0x36c   :  { %12590 = vmatpush1.bf16.msra.mxu1 %v18945_v59  ;;  %v18997_v59 = vld [vmem:[%s26397_s1 + $0x84] ss:$28 sps:$4 sm:$0xff]  }
 0x36d   :  { %12098 = vmatpush1.bf16.msra.mxu0 %v18942_v58  ;;  %12591 = vmatprep.subr.bf16.mxu1 %v18953_v24  ;;  %v18994_v58 = vld [vmem:[%s26397_s1 + $0x2a7c] ss:$28 sps:$4 sm:$0xff]  }
 0x36e   :  { %12099 = vmatprep.subr.bf16.mxu0 %v18950_v60  ;;  %v18992_v60 = vld [vmem:[%s26397_s1 + $0x2a78] ss:$28 sps:$4 sm:$0xff]   ;;  %v18995_v24 = vld [vmem:[%s26397_s1 + $0x80] ss:$28 sps:$4 sm:$0xff]  }
 0x370   :  { %12592 = vmatpush1.bf16.msra.mxu1 %v18951_v63  ;;  %v19003_v63 = vld [vmem:[%s26397_s1 + $0xbc] ss:$28 sps:$4 sm:$0xff]  }
 0x371   :  { %12100 = vmatpush1.bf16.msra.mxu0 %v18948_v62  ;;  %12593 = vmatprep.subr.bf16.mxu1 %v18959_v49  ;;  %v19000_v62 = vld [vmem:[%s26397_s1 + $0x2ab4] ss:$28 sps:$4 sm:$0xff]  }
 0x372   :  { %12101 = vmatprep.subr.bf16.mxu0 %v18956_v4  ;;  %v18998_v4 = vld [vmem:[%s26397_s1 + $0x2ab0] ss:$28 sps:$4 sm:$0xff]   ;;  %v19001_v49 = vld [vmem:[%s26397_s1 + $0xb8] ss:$28 sps:$4 sm:$0xff]  }
 0x374   :  { %12594 = vmatpush1.bf16.msra.mxu1 %v18957_v26  ;;  %v19009_v26 = vld [vmem:[%s26397_s1 + $0xf4] ss:$28 sps:$4 sm:$0xff]  }
 0x375   :  { %12102 = vmatpush1.bf16.msra.mxu0 %v18954_v8  ;;  %12595 = vmatprep.subr.bf16.mxu1 %v18965_v11  ;;  %v19006_v8 = vld [vmem:[%s26397_s1 + $0x2aec] ss:$28 sps:$4 sm:$0xff]  }
 0x376   :  { %12103 = vmatprep.subr.bf16.mxu0 %v18962_v10  ;;  %v19004_v10 = vld [vmem:[%s26397_s1 + $0x2ae8] ss:$28 sps:$4 sm:$0xff]   ;;  %v19007_v11 = vld [vmem:[%s26397_s1 + $0xf0] ss:$28 sps:$4 sm:$0xff]  }
 0x378   :  { %12596 = vmatpush1.bf16.msra.mxu1 %v18963_v13  ;;  %v19015_v13 = vld [vmem:[%s26397_s1 + $0x12c] ss:$28 sps:$4 sm:$0xff]  }
 0x379   :  { %12104 = vmatpush1.bf16.msra.mxu0 %v18960_v12  ;;  %12597 = vmatprep.subr.bf16.mxu1 %v18971_v15  ;;  %v19012_v12 = vld [vmem:[%s26397_s1 + $0x2b24] ss:$28 sps:$4 sm:$0xff]  }
 0x37a   :  { %12105 = vmatprep.subr.bf16.mxu0 %v18968_v14  ;;  %v19010_v14 = vld [vmem:[%s26397_s1 + $0x2b20] ss:$28 sps:$4 sm:$0xff]   ;;  %v19013_v15 = vld [vmem:[%s26397_s1 + $0x128] ss:$28 sps:$4 sm:$0xff]  }
 0x37c   :  { %12598 = vmatpush1.bf16.msra.mxu1 %v18969_v17  ;;  %v19021_v17 = vld [vmem:[%s26397_s1 + $0x164] ss:$28 sps:$4 sm:$0xff]  }
 0x37d   :  { %12106 = vmatpush1.bf16.msra.mxu0 %v18966_v16  ;;  %12599 = vmatprep.subr.bf16.mxu1 %v18977_v21  ;;  %v19018_v16 = vld [vmem:[%s26397_s1 + $0x2b5c] ss:$28 sps:$4 sm:$0xff]  }
 0x37e   :  { %12107 = vmatprep.subr.bf16.mxu0 %v18974_v20  ;;  %v19016_v20 = vld [vmem:[%s26397_s1 + $0x2b58] ss:$28 sps:$4 sm:$0xff]   ;;  %v19019_v21 = vld [vmem:[%s26397_s1 + $0x160] ss:$28 sps:$4 sm:$0xff]  }
 0x380   :  { %12600 = vmatpush1.bf16.msra.mxu1 %v18975_v41  ;;  %v19027_v41 = vld [vmem:[%s26397_s1 + $0x19c] ss:$28 sps:$4 sm:$0xff]  }
 0x381   :  { %12108 = vmatpush1.bf16.msra.mxu0 %v18972_v40  ;;  %12610 = vmatprep.subr.bf16.mxu1 %v18982_v42  ;;  %v19024_v40 = vld [vmem:[%s26397_s1 + $0x2b94] ss:$28 sps:$4 sm:$0xff]  }
 0x382   :  { %12774 = vmatprep.subr.bf16.mxu0 %v18985_v56  ;;  %v19022_v42 = vld [vmem:[%s26397_s1 + $0x2b90] ss:$28 sps:$4 sm:$0xff]   ;;  %v19025_v56 = vld [vmem:[%s26397_s1 + $0x198] ss:$28 sps:$4 sm:$0xff]  }
 0x383   :  { %12602 = vmatmul.mubr.bf16.vlgmr.msra.gmra.mrb[4].mxu1 %v22462_v50 }
 0x384   :  { %12110 = vmatmul.mubr.bf16.vlgmr.msra.gmra.mrb[0].mxu0 %v23293_v44  ;;  %12611 = vmatpush1.bf16.msra.mxu1 %v18980_v45  ;;  %v19030_v45 = vld [vmem:[%s26397_s1 + $0x2bcc] ss:$28 sps:$4 sm:$0xff]  }
 0x385   :  { %12775 = vmatpush1.bf16.msra.mxu0 %v18983_v51  ;;  %12612 = vmatprep.subr.bf16.mxu1 %v18988_v31  ;;  %v19033_v51 = vld [vmem:[%s26397_s1 + $0x1d4] ss:$28 sps:$4 sm:$0xff]   ;;  %v19028_v31 = vld [vmem:[%s26397_s1 + $0x2bc8] ss:$28 sps:$4 sm:$0xff]  }
 0x386   :  { %12776 = vmatprep.subr.bf16.mxu0 %v18991_v28  ;;  %12642 = vmatprep.mubr.bf16.mxu1 %v22478_v55  ;;  %v19031_v28 = vld [vmem:[%s26397_s1 + $0x1d0] ss:$28 sps:$4 sm:$0xff]  }
 0x387   :  { %12806 = vmatprep.mubr.bf16.mxu0 %v20491_v48 }
 0x388   :  { %12613 = vmatpush1.bf16.msra.mxu1 %v18986_v54  ;;  %v19036_v54 = vld [vmem:[%s26397_s1 + $0x2c04] ss:$28 sps:$4 sm:$0xff]  }
 0x389   :  { %12777 = vmatpush1.bf16.msra.mxu0 %v18989_v2  ;;  %12614 = vmatprep.subr.bf16.mxu1 %v18994_v58  ;;  %v19039_v2 = vld [vmem:[%s26397_s1 + $0x20c] ss:$28 sps:$4 sm:$0xff]   ;;  %v19034_v58 = vld [vmem:[%s26397_s1 + $0x2c00] ss:$28 sps:$4 sm:$0xff]  }
 0x38a   :  { %12778 = vmatprep.subr.bf16.mxu0 %v18997_v59  ;;  %v19037_v59 = vld [vmem:[%s26397_s1 + $0x208] ss:$28 sps:$4 sm:$0xff]  }
 0x38c   :  { %12615 = vmatpush1.bf16.msra.mxu1 %v18992_v60  ;;  %v19042_v60 = vld [vmem:[%s26397_s1 + $0x2c3c] ss:$28 sps:$4 sm:$0xff]  }
 0x38d   :  { %12779 = vmatpush1.bf16.msra.mxu0 %v18995_v24  ;;  %12616 = vmatprep.subr.bf16.mxu1 %v19000_v62  ;;  %v19045_v24 = vld [vmem:[%s26397_s1 + $0x244] ss:$28 sps:$4 sm:$0xff]   ;;  %v19040_v62 = vld [vmem:[%s26397_s1 + $0x2c38] ss:$28 sps:$4 sm:$0xff]  }
 0x38e   :  { %12780 = vmatprep.subr.bf16.mxu0 %v19003_v63  ;;  %v19043_v63 = vld [vmem:[%s26397_s1 + $0x240] ss:$28 sps:$4 sm:$0xff]  }
 0x390   :  { %12617 = vmatpush1.bf16.msra.mxu1 %v18998_v4  ;;  %v19048_v4 = vld [vmem:[%s26397_s1 + $0x2c74] ss:$28 sps:$4 sm:$0xff]  }
 0x391   :  { %12781 = vmatpush1.bf16.msra.mxu0 %v19001_v49  ;;  %12618 = vmatprep.subr.bf16.mxu1 %v19006_v8  ;;  %v19051_v49 = vld [vmem:[%s26397_s1 + $0x27c] ss:$28 sps:$4 sm:$0xff]   ;;  %v19046_v8 = vld [vmem:[%s26397_s1 + $0x2c70] ss:$28 sps:$4 sm:$0xff]  }
 0x392   :  { %12782 = vmatprep.subr.bf16.mxu0 %v19009_v26  ;;  %v19049_v26 = vld [vmem:[%s26397_s1 + $0x278] ss:$28 sps:$4 sm:$0xff]  }
 0x394   :  { %12619 = vmatpush1.bf16.msra.mxu1 %v19004_v10  ;;  %v19054_v10 = vld [vmem:[%s26397_s1 + $0x2cac] ss:$28 sps:$4 sm:$0xff]  }
 0x395   :  { %12783 = vmatpush1.bf16.msra.mxu0 %v19007_v11  ;;  %12620 = vmatprep.subr.bf16.mxu1 %v19012_v12  ;;  %v19057_v11 = vld [vmem:[%s26397_s1 + $0x2b4] ss:$28 sps:$4 sm:$0xff]   ;;  %v19052_v12 = vld [vmem:[%s26397_s1 + $0x2ca8] ss:$28 sps:$4 sm:$0xff]  }
 0x396   :  { %12784 = vmatprep.subr.bf16.mxu0 %v19015_v13  ;;  %v19055_v13 = vld [vmem:[%s26397_s1 + $0x2b0] ss:$28 sps:$4 sm:$0xff]  }
 0x398   :  { %12621 = vmatpush1.bf16.msra.mxu1 %v19010_v14  ;;  %v19060_v14 = vld [vmem:[%s26397_s1 + $0x2ce4] ss:$28 sps:$4 sm:$0xff]  }
 0x399   :  { %12785 = vmatpush1.bf16.msra.mxu0 %v19013_v15  ;;  %12622 = vmatprep.subr.bf16.mxu1 %v19018_v16  ;;  %v19063_v15 = vld [vmem:[%s26397_s1 + $0x2ec] ss:$28 sps:$4 sm:$0xff]   ;;  %v19058_v16 = vld [vmem:[%s26397_s1 + $0x2ce0] ss:$28 sps:$4 sm:$0xff]  }
 0x39a   :  { %12786 = vmatprep.subr.bf16.mxu0 %v19021_v17  ;;  %v19061_v17 = vld [vmem:[%s26397_s1 + $0x2e8] ss:$28 sps:$4 sm:$0xff]  }
 0x39c   :  { %12623 = vmatpush1.bf16.msra.mxu1 %v19016_v20  ;;  %v19066_v20 = vld [vmem:[%s26397_s1 + $0x2d1c] ss:$28 sps:$4 sm:$0xff]  }
 0x39d   :  { %12787 = vmatpush1.bf16.msra.mxu0 %v19019_v21  ;;  %12624 = vmatprep.subr.bf16.mxu1 %v19024_v40  ;;  %v19069_v21 = vld [vmem:[%s26397_s1 + $0x324] ss:$28 sps:$4 sm:$0xff]   ;;  %v19064_v40 = vld [vmem:[%s26397_s1 + $0x2d18] ss:$28 sps:$4 sm:$0xff]  }
 0x39e   :  { %12788 = vmatprep.subr.bf16.mxu0 %v19027_v41  ;;  %v19067_v41 = vld [vmem:[%s26397_s1 + $0x320] ss:$28 sps:$4 sm:$0xff]  }
 0x3a0   :  { %12625 = vmatpush1.bf16.msra.mxu1 %v19022_v42  ;;  %v19072_v42 = vld [vmem:[%s26397_s1 + $0x2d54] ss:$28 sps:$4 sm:$0xff]  }
 0x3a1   :  { %12789 = vmatpush1.bf16.msra.mxu0 %v19025_v56  ;;  %12626 = vmatprep.subr.bf16.mxu1 %v19030_v45  ;;  %v19075_v56 = vld [vmem:[%s26397_s1 + $0x35c] ss:$28 sps:$4 sm:$0xff]   ;;  %v19070_v45 = vld [vmem:[%s26397_s1 + $0x2d50] ss:$28 sps:$4 sm:$0xff]  }
 0x3a2   :  { %12790 = vmatprep.subr.bf16.mxu0 %v19033_v51  ;;  %v19073_v51 = vld [vmem:[%s26397_s1 + $0x358] ss:$28 sps:$4 sm:$0xff]  }
 0x3a4   :  { %12627 = vmatpush1.bf16.msra.mxu1 %v19028_v31  ;;  %v19078_v31 = vld [vmem:[%s26397_s1 + $0x2d8c] ss:$28 sps:$4 sm:$0xff]  }
 0x3a5   :  { %12791 = vmatpush1.bf16.msra.mxu0 %v19031_v28  ;;  %12628 = vmatprep.subr.bf16.mxu1 %v19036_v54  ;;  %v19081_v28 = vld [vmem:[%s26397_s1 + $0x394] ss:$28 sps:$4 sm:$0xff]   ;;  %v19076_v54 = vld [vmem:[%s26397_s1 + $0x2d88] ss:$28 sps:$4 sm:$0xff]  }
 0x3a6   :  { %12792 = vmatprep.subr.bf16.mxu0 %v19039_v2  ;;  %v19079_v2 = vld [vmem:[%s26397_s1 + $0x390] ss:$28 sps:$4 sm:$0xff]  }
 0x3a8   :  { %12629 = vmatpush1.bf16.msra.mxu1 %v19034_v58  ;;  %v19084_v58 = vld [vmem:[%s26397_s1 + $0x2dc4] ss:$28 sps:$4 sm:$0xff]  }
 0x3a9   :  { %12793 = vmatpush1.bf16.msra.mxu0 %v19037_v59  ;;  %12630 = vmatprep.subr.bf16.mxu1 %v19042_v60  ;;  %v19087_v59 = vld [vmem:[%s26397_s1 + $0x3cc] ss:$28 sps:$4 sm:$0xff]   ;;  %v19082_v60 = vld [vmem:[%s26397_s1 + $0x2dc0] ss:$28 sps:$4 sm:$0xff]  }
 0x3aa   :  { %12794 = vmatprep.subr.bf16.mxu0 %v19045_v24  ;;  %v19085_v24 = vld [vmem:[%s26397_s1 + $0x3c8] ss:$28 sps:$4 sm:$0xff]  }
 0x3ac   :  { %12631 = vmatpush1.bf16.msra.mxu1 %v19040_v62  ;;  %v19090_v62 = vld [vmem:[%s26397_s1 + $0x2dfc] ss:$28 sps:$4 sm:$0xff]  }
 0x3ad   :  { %12795 = vmatpush1.bf16.msra.mxu0 %v19043_v63  ;;  %12632 = vmatprep.subr.bf16.mxu1 %v19048_v4  ;;  %v19093_v63 = vld [vmem:[%s26397_s1 + $0x404] ss:$28 sps:$4 sm:$0xff]   ;;  %v19088_v4 = vld [vmem:[%s26397_s1 + $0x2df8] ss:$28 sps:$4 sm:$0xff]  }
 0x3ae   :  { %12796 = vmatprep.subr.bf16.mxu0 %v19051_v49  ;;  %v19091_v49 = vld [vmem:[%s26397_s1 + $0x400] ss:$28 sps:$4 sm:$0xff]  }
 0x3b0   :  { %12633 = vmatpush1.bf16.msra.mxu1 %v19046_v8  ;;  %v19096_v8 = vld [vmem:[%s26397_s1 + $0x2e34] ss:$28 sps:$4 sm:$0xff]  }
 0x3b1   :  { %12797 = vmatpush1.bf16.msra.mxu0 %v19049_v26  ;;  %12634 = vmatprep.subr.bf16.mxu1 %v19054_v10  ;;  %v19099_v26 = vld [vmem:[%s26397_s1 + $0x43c] ss:$28 sps:$4 sm:$0xff]   ;;  %v19094_v10 = vld [vmem:[%s26397_s1 + $0x2e30] ss:$28 sps:$4 sm:$0xff]  }
 0x3b2   :  { %12798 = vmatprep.subr.bf16.mxu0 %v19057_v11  ;;  %v19097_v11 = vld [vmem:[%s26397_s1 + $0x438] ss:$28 sps:$4 sm:$0xff]  }
 0x3b4   :  { %12635 = vmatpush1.bf16.msra.mxu1 %v19052_v12  ;;  %v19102_v12 = vld [vmem:[%s26397_s1 + $0x2e6c] ss:$28 sps:$4 sm:$0xff]  }
 0x3b5   :  { %12799 = vmatpush1.bf16.msra.mxu0 %v19055_v13  ;;  %12636 = vmatprep.subr.bf16.mxu1 %v19060_v14  ;;  %v19105_v13 = vld [vmem:[%s26397_s1 + $0x474] ss:$28 sps:$4 sm:$0xff]   ;;  %v19100_v14 = vld [vmem:[%s26397_s1 + $0x2e68] ss:$28 sps:$4 sm:$0xff]  }
 0x3b6   :  { %12800 = vmatprep.subr.bf16.mxu0 %v19063_v15  ;;  %v19103_v15 = vld [vmem:[%s26397_s1 + $0x470] ss:$28 sps:$4 sm:$0xff]  }
 0x3b8   :  { %12637 = vmatpush1.bf16.msra.mxu1 %v19058_v16  ;;  %v19108_v16 = vld [vmem:[%s26397_s1 + $0x2ea4] ss:$28 sps:$4 sm:$0xff]  }
 0x3b9   :  { %12801 = vmatpush1.bf16.msra.mxu0 %v19061_v17  ;;  %12638 = vmatprep.subr.bf16.mxu1 %v19066_v20  ;;  %v19111_v17 = vld [vmem:[%s26397_s1 + $0x4ac] ss:$28 sps:$4 sm:$0xff]   ;;  %v19106_v20 = vld [vmem:[%s26397_s1 + $0x2ea0] ss:$28 sps:$4 sm:$0xff]  }
 0x3ba   :  { %12802 = vmatprep.subr.bf16.mxu0 %v19069_v21  ;;  %v19109_v21 = vld [vmem:[%s26397_s1 + $0x4a8] ss:$28 sps:$4 sm:$0xff]  }
 0x3bc   :  { %12639 = vmatpush1.bf16.msra.mxu1 %v19064_v40  ;;  %v19114_v40 = vld [vmem:[%s26397_s1 + $0x2edc] ss:$28 sps:$4 sm:$0xff]  }
 0x3bd   :  { %12803 = vmatpush1.bf16.msra.mxu0 %v19067_v41  ;;  %12640 = vmatprep.subr.bf16.mxu1 %v19072_v42  ;;  %v19117_v41 = vld [vmem:[%s26397_s1 + $0x4e4] ss:$28 sps:$4 sm:$0xff]   ;;  %v19112_v42 = vld [vmem:[%s26397_s1 + $0x2ed8] ss:$28 sps:$4 sm:$0xff]  }
 0x3be   :  { %12804 = vmatprep.subr.bf16.mxu0 %v19075_v56  ;;  %v19115_v56 = vld [vmem:[%s26397_s1 + $0x4e0] ss:$28 sps:$4 sm:$0xff]  }
 0x3c0   :  { %12641 = vmatpush1.bf16.msra.mxu1 %v19070_v45  ;;  %v19120_v45 = vld [vmem:[%s26397_s1 + $0x2f14] ss:$28 sps:$4 sm:$0xff]  }
 0x3c1   :  { %12805 = vmatpush1.bf16.msra.mxu0 %v19073_v51  ;;  %12651 = vmatprep.subr.bf16.mxu1 %v19078_v31  ;;  %v19123_v51 = vld [vmem:[%s26397_s1 + $0x51c] ss:$28 sps:$4 sm:$0xff]   ;;  %v19118_v31 = vld [vmem:[%s26397_s1 + $0x2f10] ss:$28 sps:$4 sm:$0xff]  }
 0x3c2   :  { %12815 = vmatprep.subr.bf16.mxu0 %v19081_v28  ;;  %v19121_v28 = vld [vmem:[%s26397_s1 + $0x518] ss:$28 sps:$4 sm:$0xff]  }
 0x3c3   :  { %12643 = vmatmul.mubr.bf16.vlgmr.msra.gmra.mrb[4].mxu1 %v22671_v39 }
 0x3c4   :  { %12807 = vmatmul.mubr.bf16.vlgmr.msra.gmra.mrb[4].mxu0 %v20557_v6  ;;  %12652 = vmatpush1.bf16.msra.mxu1 %v19076_v54  ;;  %v19126_v54 = vld [vmem:[%s26397_s1 + $0x2f4c] ss:$28 sps:$4 sm:$0xff]  }
 0x3c5   :  { %12816 = vmatpush1.bf16.msra.mxu0 %v19079_v2  ;;  %12653 = vmatprep.subr.bf16.mxu1 %v19084_v58  ;;  %v19129_v2 = vld [vmem:[%s26397_s1 + $0x554] ss:$28 sps:$4 sm:$0xff]   ;;  %v19124_v58 = vld [vmem:[%s26397_s1 + $0x2f48] ss:$28 sps:$4 sm:$0xff]  }
 0x3c6   :  { %12817 = vmatprep.subr.bf16.mxu0 %v19087_v59  ;;  %12683 = vmatprep.mubr.bf16.mxu1 %v22687_v43  ;;  %v19127_v59 = vld [vmem:[%s26397_s1 + $0x550] ss:$28 sps:$4 sm:$0xff]  }
 0x3c7   :  { %12847 = vmatprep.mubr.bf16.mxu0 %v20653_v36 }
 0x3c8   :  { %12654 = vmatpush1.bf16.msra.mxu1 %v19082_v60  ;;  %v19132_v60 = vld [vmem:[%s26397_s1 + $0x2f84] ss:$28 sps:$4 sm:$0xff]  }
 0x3c9   :  { %12818 = vmatpush1.bf16.msra.mxu0 %v19085_v24  ;;  %12655 = vmatprep.subr.bf16.mxu1 %v19090_v62  ;;  %v19135_v24 = vld [vmem:[%s26397_s1 + $0x58c] ss:$28 sps:$4 sm:$0xff]   ;;  %v19130_v62 = vld [vmem:[%s26397_s1 + $0x2f80] ss:$28 sps:$4 sm:$0xff]  }
 0x3ca   :  { %12819 = vmatprep.subr.bf16.mxu0 %v19093_v63  ;;  %v19133_v63 = vld [vmem:[%s26397_s1 + $0x588] ss:$28 sps:$4 sm:$0xff]  }
 0x3cc   :  { %12656 = vmatpush1.bf16.msra.mxu1 %v19088_v4  ;;  %v19138_v4 = vld [vmem:[%s26397_s1 + $0x2fbc] ss:$28 sps:$4 sm:$0xff]  }
 0x3cd   :  { %12820 = vmatpush1.bf16.msra.mxu0 %v19091_v49  ;;  %12657 = vmatprep.subr.bf16.mxu1 %v19096_v8  ;;  %v19141_v49 = vld [vmem:[%s26397_s1 + $0x5c4] ss:$28 sps:$4 sm:$0xff]   ;;  %v19136_v8 = vld [vmem:[%s26397_s1 + $0x2fb8] ss:$28 sps:$4 sm:$0xff]  }
 0x3ce   :  { %12821 = vmatprep.subr.bf16.mxu0 %v19099_v26  ;;  %v19139_v26 = vld [vmem:[%s26397_s1 + $0x5c0] ss:$28 sps:$4 sm:$0xff]  }
 0x3d0   :  { %12658 = vmatpush1.bf16.msra.mxu1 %v19094_v10  ;;  %v19144_v10 = vld [vmem:[%s26397_s1 + $0x2ff4] ss:$28 sps:$4 sm:$0xff]  }
 0x3d1   :  { %12822 = vmatpush1.bf16.msra.mxu0 %v19097_v11  ;;  %12659 = vmatprep.subr.bf16.mxu1 %v19102_v12  ;;  %v19147_v11 = vld [vmem:[%s26397_s1 + $0x5fc] ss:$28 sps:$4 sm:$0xff]   ;;  %v19142_v12 = vld [vmem:[%s26397_s1 + $0x2ff0] ss:$28 sps:$4 sm:$0xff]  }
 0x3d2   :  { %12823 = vmatprep.subr.bf16.mxu0 %v19105_v13  ;;  %v19145_v13 = vld [vmem:[%s26397_s1 + $0x5f8] ss:$28 sps:$4 sm:$0xff]  }
 0x3d4   :  { %12660 = vmatpush1.bf16.msra.mxu1 %v19100_v14  ;;  %v19150_v14 = vld [vmem:[%s26397_s1 + $0x302c] ss:$28 sps:$4 sm:$0xff]  }
 0x3d5   :  { %12824 = vmatpush1.bf16.msra.mxu0 %v19103_v15  ;;  %12661 = vmatprep.subr.bf16.mxu1 %v19108_v16  ;;  %v19153_v15 = vld [vmem:[%s26397_s1 + $0x634] ss:$28 sps:$4 sm:$0xff]   ;;  %v19148_v16 = vld [vmem:[%s26397_s1 + $0x3028] ss:$28 sps:$4 sm:$0xff]  }
 0x3d6   :  { %12825 = vmatprep.subr.bf16.mxu0 %v19111_v17  ;;  %v19151_v17 = vld [vmem:[%s26397_s1 + $0x630] ss:$28 sps:$4 sm:$0xff]  }
 0x3d8   :  { %12662 = vmatpush1.bf16.msra.mxu1 %v19106_v20  ;;  %v19156_v20 = vld [vmem:[%s26397_s1 + $0x3064] ss:$28 sps:$4 sm:$0xff]  }
 0x3d9   :  { %12826 = vmatpush1.bf16.msra.mxu0 %v19109_v21  ;;  %12663 = vmatprep.subr.bf16.mxu1 %v19114_v40  ;;  %v19159_v21 = vld [vmem:[%s26397_s1 + $0x66c] ss:$28 sps:$4 sm:$0xff]   ;;  %v19154_v40 = vld [vmem:[%s26397_s1 + $0x3060] ss:$28 sps:$4 sm:$0xff]  }
 0x3da   :  { %12827 = vmatprep.subr.bf16.mxu0 %v19117_v41  ;;  %v19157_v41 = vld [vmem:[%s26397_s1 + $0x668] ss:$28 sps:$4 sm:$0xff]  }
 0x3dc   :  { %12664 = vmatpush1.bf16.msra.mxu1 %v19112_v42  ;;  %v19162_v42 = vld [vmem:[%s26397_s1 + $0x309c] ss:$28 sps:$4 sm:$0xff]  }
 0x3dd   :  { %12828 = vmatpush1.bf16.msra.mxu0 %v19115_v56  ;;  %12665 = vmatprep.subr.bf16.mxu1 %v19120_v45  ;;  %v19165_v56 = vld [vmem:[%s26397_s1 + $0x6a4] ss:$28 sps:$4 sm:$0xff]   ;;  %v19160_v45 = vld [vmem:[%s26397_s1 + $0x3098] ss:$28 sps:$4 sm:$0xff]  }
 0x3de   :  { %12829 = vmatprep.subr.bf16.mxu0 %v19123_v51  ;;  %v19163_v51 = vld [vmem:[%s26397_s1 + $0x6a0] ss:$28 sps:$4 sm:$0xff]  }
 0x3e0   :  { %12666 = vmatpush1.bf16.msra.mxu1 %v19118_v31  ;;  %v19168_v31 = vld [vmem:[%s26397_s1 + $0x30d4] ss:$28 sps:$4 sm:$0xff]  }
 0x3e1   :  { %12830 = vmatpush1.bf16.msra.mxu0 %v19121_v28  ;;  %12667 = vmatprep.subr.bf16.mxu1 %v19126_v54  ;;  %v19171_v28 = vld [vmem:[%s26397_s1 + $0x6dc] ss:$28 sps:$4 sm:$0xff]   ;;  %v19166_v54 = vld [vmem:[%s26397_s1 + $0x30d0] ss:$28 sps:$4 sm:$0xff]  }
 0x3e2   :  { %12831 = vmatprep.subr.bf16.mxu0 %v19129_v2  ;;  %v19169_v2 = vld [vmem:[%s26397_s1 + $0x6d8] ss:$28 sps:$4 sm:$0xff]  }
 0x3e4   :  { %12668 = vmatpush1.bf16.msra.mxu1 %v19124_v58  ;;  %v19174_v58 = vld [vmem:[%s26397_s1 + $0x310c] ss:$28 sps:$4 sm:$0xff]  }
 0x3e5   :  { %12832 = vmatpush1.bf16.msra.mxu0 %v19127_v59  ;;  %12669 = vmatprep.subr.bf16.mxu1 %v19132_v60  ;;  %v19177_v59 = vld [vmem:[%s26397_s1 + $0x714] ss:$28 sps:$4 sm:$0xff]   ;;  %v19172_v60 = vld [vmem:[%s26397_s1 + $0x3108] ss:$28 sps:$4 sm:$0xff]  }
 0x3e6   :  { %12833 = vmatprep.subr.bf16.mxu0 %v19135_v24  ;;  %v19175_v24 = vld [vmem:[%s26397_s1 + $0x710] ss:$28 sps:$4 sm:$0xff]  }
 0x3e8   :  { %12670 = vmatpush1.bf16.msra.mxu1 %v19130_v62  ;;  %v19180_v62 = vld [vmem:[%s26397_s1 + $0x3144] ss:$28 sps:$4 sm:$0xff]  }
 0x3e9   :  { %12834 = vmatpush1.bf16.msra.mxu0 %v19133_v63  ;;  %12671 = vmatprep.subr.bf16.mxu1 %v19138_v4  ;;  %v19183_v63 = vld [vmem:[%s26397_s1 + $0x74c] ss:$28 sps:$4 sm:$0xff]   ;;  %v19178_v4 = vld [vmem:[%s26397_s1 + $0x3140] ss:$28 sps:$4 sm:$0xff]  }
 0x3ea   :  { %12835 = vmatprep.subr.bf16.mxu0 %v19141_v49  ;;  %v19181_v49 = vld [vmem:[%s26397_s1 + $0x748] ss:$28 sps:$4 sm:$0xff]  }
 0x3ec   :  { %12672 = vmatpush1.bf16.msra.mxu1 %v19136_v8  ;;  %v19186_v8 = vld [vmem:[%s26397_s1 + $0x317c] ss:$28 sps:$4 sm:$0xff]  }
 0x3ed   :  { %12836 = vmatpush1.bf16.msra.mxu0 %v19139_v26  ;;  %12673 = vmatprep.subr.bf16.mxu1 %v19144_v10  ;;  %v19189_v26 = vld [vmem:[%s26397_s1 + $0x784] ss:$28 sps:$4 sm:$0xff]   ;;  %v19184_v10 = vld [vmem:[%s26397_s1 + $0x3178] ss:$28 sps:$4 sm:$0xff]  }
 0x3ee   :  { %12837 = vmatprep.subr.bf16.mxu0 %v19147_v11  ;;  %v19187_v11 = vld [vmem:[%s26397_s1 + $0x780] ss:$28 sps:$4 sm:$0xff]  }
 0x3f0   :  { %12674 = vmatpush1.bf16.msra.mxu1 %v19142_v12  ;;  %v19192_v12 = vld [vmem:[%s26397_s1 + $0x31b4] ss:$28 sps:$4 sm:$0xff]  }
 0x3f1   :  { %12838 = vmatpush1.bf16.msra.mxu0 %v19145_v13  ;;  %12675 = vmatprep.subr.bf16.mxu1 %v19150_v14  ;;  %v19195_v13 = vld [vmem:[%s26397_s1 + $0x7bc] ss:$28 sps:$4 sm:$0xff]   ;;  %v19190_v14 = vld [vmem:[%s26397_s1 + $0x31b0] ss:$28 sps:$4 sm:$0xff]  }
 0x3f2   :  { %12839 = vmatprep.subr.bf16.mxu0 %v19153_v15  ;;  %v19193_v15 = vld [vmem:[%s26397_s1 + $0x7b8] ss:$28 sps:$4 sm:$0xff]  }
 0x3f4   :  { %12676 = vmatpush1.bf16.msra.mxu1 %v19148_v16  ;;  %v19198_v16 = vld [vmem:[%s26397_s1 + $0x31ec] ss:$28 sps:$4 sm:$0xff]  }
 0x3f5   :  { %12840 = vmatpush1.bf16.msra.mxu0 %v19151_v17  ;;  %12677 = vmatprep.subr.bf16.mxu1 %v19156_v20  ;;  %v19201_v17 = vld [vmem:[%s26397_s1 + $0x7f4] ss:$28 sps:$4 sm:$0xff]   ;;  %v19196_v20 = vld [vmem:[%s26397_s1 + $0x31e8] ss:$28 sps:$4 sm:$0xff]  }
 0x3f6   :  { %12841 = vmatprep.subr.bf16.mxu0 %v19159_v21  ;;  %v19199_v21 = vld [vmem:[%s26397_s1 + $0x7f0] ss:$28 sps:$4 sm:$0xff]  }
 0x3f8   :  { %12678 = vmatpush1.bf16.msra.mxu1 %v19154_v40  ;;  %v19204_v40 = vld [vmem:[%s26397_s1 + $0x3224] ss:$28 sps:$4 sm:$0xff]  }
 0x3f9   :  { %12842 = vmatpush1.bf16.msra.mxu0 %v19157_v41  ;;  %12679 = vmatprep.subr.bf16.mxu1 %v19162_v42  ;;  %v19207_v41 = vld [vmem:[%s26397_s1 + $0x82c] ss:$28 sps:$4 sm:$0xff]   ;;  %v19202_v42 = vld [vmem:[%s26397_s1 + $0x3220] ss:$28 sps:$4 sm:$0xff]  }
 0x3fa   :  { %12843 = vmatprep.subr.bf16.mxu0 %v19165_v56  ;;  %v19205_v56 = vld [vmem:[%s26397_s1 + $0x828] ss:$28 sps:$4 sm:$0xff]  }
 0x3fc   :  { %12680 = vmatpush1.bf16.msra.mxu1 %v19160_v45  ;;  %v19210_v45 = vld [vmem:[%s26397_s1 + $0x325c] ss:$28 sps:$4 sm:$0xff]  }
 0x3fd   :  { %12844 = vmatpush1.bf16.msra.mxu0 %v19163_v51  ;;  %12681 = vmatprep.subr.bf16.mxu1 %v19168_v31  ;;  %v19213_v51 = vld [vmem:[%s26397_s1 + $0x864] ss:$28 sps:$4 sm:$0xff]   ;;  %v19208_v31 = vld [vmem:[%s26397_s1 + $0x3258] ss:$28 sps:$4 sm:$0xff]  }
 0x3fe   :  { %12845 = vmatprep.subr.bf16.mxu0 %v19171_v28  ;;  %v19211_v28 = vld [vmem:[%s26397_s1 + $0x860] ss:$28 sps:$4 sm:$0xff]  }
 0x400   :  { %12682 = vmatpush1.bf16.msra.mxu1 %v19166_v54  ;;  %v19216_v54 = vld [vmem:[%s26397_s1 + $0x3294] ss:$28 sps:$4 sm:$0xff]  }
 0x401   :  { %12846 = vmatpush1.bf16.msra.mxu0 %v19169_v2  ;;  %12692 = vmatprep.subr.bf16.mxu1 %v19174_v58  ;;  %v19219_v2 = vld [vmem:[%s26397_s1 + $0x89c] ss:$28 sps:$4 sm:$0xff]   ;;  %v19214_v58 = vld [vmem:[%s26397_s1 + $0x3290] ss:$28 sps:$4 sm:$0xff]  }
 0x402   :  { %12856 = vmatprep.subr.bf16.mxu0 %v19177_v59  ;;  %v19217_v59 = vld [vmem:[%s26397_s1 + $0x898] ss:$28 sps:$4 sm:$0xff]  }
 0x403   :  { %12684 = vmatmul.mubr.bf16.vlgmr.msra.gmra.mrb[4].mxu1 %v22881_v33 }
 0x404   :  { %12848 = vmatmul.mubr.bf16.vlgmr.msra.gmra.mrb[4].mxu0 %v20783_v18  ;;  %12693 = vmatpush1.bf16.msra.mxu1 %v19172_v60  ;;  %v19222_v60 = vld [vmem:[%s26397_s1 + $0x32cc] ss:$28 sps:$4 sm:$0xff]  }
 0x405   :  { %12857 = vmatpush1.bf16.msra.mxu0 %v19175_v24  ;;  %12694 = vmatprep.subr.bf16.mxu1 %v19180_v62  ;;  %v19225_v24 = vld [vmem:[%s26397_s1 + $0x8d4] ss:$28 sps:$4 sm:$0xff]   ;;  %v19220_v62 = vld [vmem:[%s26397_s1 + $0x32c8] ss:$28 sps:$4 sm:$0xff]  }
 0x406   :  { %12858 = vmatprep.subr.bf16.mxu0 %v19183_v63  ;;  %12724 = vmatprep.mubr.bf16.mxu1 %v22896_v38  ;;  %v19223_v63 = vld [vmem:[%s26397_s1 + $0x8d0] ss:$28 sps:$4 sm:$0xff]  }
 0x407   :  { %12888 = vmatprep.mubr.bf16.mxu0 %v20505_v53 }
 0x408   :  { %12695 = vmatpush1.bf16.msra.mxu1 %v19178_v4  ;;  %v19228_v4 = vld [vmem:[%s26397_s1 + $0x3304] ss:$28 sps:$4 sm:$0xff]  }
 0x409   :  { %12859 = vmatpush1.bf16.msra.mxu0 %v19181_v49  ;;  %12696 = vmatprep.subr.bf16.mxu1 %v19186_v8  ;;  %v19231_v49 = vld [vmem:[%s26397_s1 + $0x90c] ss:$28 sps:$4 sm:$0xff]   ;;  %v19226_v8 = vld [vmem:[%s26397_s1 + $0x3300] ss:$28 sps:$4 sm:$0xff]  }
 0x40a   :  { %12860 = vmatprep.subr.bf16.mxu0 %v19189_v26  ;;  %v19229_v26 = vld [vmem:[%s26397_s1 + $0x908] ss:$28 sps:$4 sm:$0xff]  }
 0x40c   :  { %12697 = vmatpush1.bf16.msra.mxu1 %v19184_v10  ;;  %v19234_v10 = vld [vmem:[%s26397_s1 + $0x333c] ss:$28 sps:$4 sm:$0xff]  }
 0x40d   :  { %12861 = vmatpush1.bf16.msra.mxu0 %v19187_v11  ;;  %12698 = vmatprep.subr.bf16.mxu1 %v19192_v12  ;;  %v19237_v11 = vld [vmem:[%s26397_s1 + $0x944] ss:$28 sps:$4 sm:$0xff]   ;;  %v19232_v12 = vld [vmem:[%s26397_s1 + $0x3338] ss:$28 sps:$4 sm:$0xff]  }
 0x40e   :  { %12862 = vmatprep.subr.bf16.mxu0 %v19195_v13  ;;  %v19235_v13 = vld [vmem:[%s26397_s1 + $0x940] ss:$28 sps:$4 sm:$0xff]  }
 0x410   :  { %12699 = vmatpush1.bf16.msra.mxu1 %v19190_v14  ;;  %v19240_v14 = vld [vmem:[%s26397_s1 + $0x3374] ss:$28 sps:$4 sm:$0xff]  }
 0x411   :  { %12863 = vmatpush1.bf16.msra.mxu0 %v19193_v15  ;;  %12700 = vmatprep.subr.bf16.mxu1 %v19198_v16  ;;  %v19243_v15 = vld [vmem:[%s26397_s1 + $0x97c] ss:$28 sps:$4 sm:$0xff]   ;;  %v19238_v16 = vld [vmem:[%s26397_s1 + $0x3370] ss:$28 sps:$4 sm:$0xff]  }
 0x412   :  { %12864 = vmatprep.subr.bf16.mxu0 %v19201_v17  ;;  %v19241_v17 = vld [vmem:[%s26397_s1 + $0x978] ss:$28 sps:$4 sm:$0xff]  }
 0x414   :  { %12701 = vmatpush1.bf16.msra.mxu1 %v19196_v20  ;;  %v19246_v20 = vld [vmem:[%s26397_s1 + $0x33ac] ss:$28 sps:$4 sm:$0xff]  }
 0x415   :  { %12865 = vmatpush1.bf16.msra.mxu0 %v19199_v21  ;;  %12702 = vmatprep.subr.bf16.mxu1 %v19204_v40  ;;  %v19249_v21 = vld [vmem:[%s26397_s1 + $0x9b4] ss:$28 sps:$4 sm:$0xff]   ;;  %v19244_v40 = vld [vmem:[%s26397_s1 + $0x33a8] ss:$28 sps:$4 sm:$0xff]  }
 0x416   :  { %12866 = vmatprep.subr.bf16.mxu0 %v19207_v41  ;;  %v19247_v41 = vld [vmem:[%s26397_s1 + $0x9b0] ss:$28 sps:$4 sm:$0xff]  }
 0x418   :  { %12703 = vmatpush1.bf16.msra.mxu1 %v19202_v42  ;;  %v19252_v42 = vld [vmem:[%s26397_s1 + $0x33e4] ss:$28 sps:$4 sm:$0xff]  }
 0x419   :  { %12867 = vmatpush1.bf16.msra.mxu0 %v19205_v56  ;;  %12704 = vmatprep.subr.bf16.mxu1 %v19210_v45  ;;  %v19255_v56 = vld [vmem:[%s26397_s1 + $0x9ec] ss:$28 sps:$4 sm:$0xff]   ;;  %v19250_v45 = vld [vmem:[%s26397_s1 + $0x33e0] ss:$28 sps:$4 sm:$0xff]  }
 0x41a   :  { %12868 = vmatprep.subr.bf16.mxu0 %v19213_v51  ;;  %v19253_v51 = vld [vmem:[%s26397_s1 + $0x9e8] ss:$28 sps:$4 sm:$0xff]  }
 0x41c   :  { %12705 = vmatpush1.bf16.msra.mxu1 %v19208_v31  ;;  %v19258_v31 = vld [vmem:[%s26397_s1 + $0x341c] ss:$28 sps:$4 sm:$0xff]  }
 0x41d   :  { %12869 = vmatpush1.bf16.msra.mxu0 %v19211_v28  ;;  %12706 = vmatprep.subr.bf16.mxu1 %v19216_v54  ;;  %v19261_v28 = vld [vmem:[%s26397_s1 + $0xa24] ss:$28 sps:$4 sm:$0xff]   ;;  %v19256_v54 = vld [vmem:[%s26397_s1 + $0x3418] ss:$28 sps:$4 sm:$0xff]  }
 0x41e   :  { %12870 = vmatprep.subr.bf16.mxu0 %v19219_v2  ;;  %v19259_v2 = vld [vmem:[%s26397_s1 + $0xa20] ss:$28 sps:$4 sm:$0xff]  }
 0x420   :  { %12707 = vmatpush1.bf16.msra.mxu1 %v19214_v58  ;;  %v19264_v58 = vld [vmem:[%s26397_s1 + $0x3454] ss:$28 sps:$4 sm:$0xff]  }
 0x421   :  { %12871 = vmatpush1.bf16.msra.mxu0 %v19217_v59  ;;  %12708 = vmatprep.subr.bf16.mxu1 %v19222_v60  ;;  %v19267_v59 = vld [vmem:[%s26397_s1 + $0xa5c] ss:$28 sps:$4 sm:$0xff]   ;;  %v19262_v60 = vld [vmem:[%s26397_s1 + $0x3450] ss:$28 sps:$4 sm:$0xff]  }
 0x422   :  { %12872 = vmatprep.subr.bf16.mxu0 %v19225_v24  ;;  %v19265_v24 = vld [vmem:[%s26397_s1 + $0xa58] ss:$28 sps:$4 sm:$0xff]  }
 0x424   :  { %12709 = vmatpush1.bf16.msra.mxu1 %v19220_v62  ;;  %v19270_v62 = vld [vmem:[%s26397_s1 + $0x348c] ss:$28 sps:$4 sm:$0xff]  }
 0x425   :  { %12873 = vmatpush1.bf16.msra.mxu0 %v19223_v63  ;;  %12710 = vmatprep.subr.bf16.mxu1 %v19228_v4  ;;  %v19273_v63 = vld [vmem:[%s26397_s1 + $0xa94] ss:$28 sps:$4 sm:$0xff]   ;;  %v19268_v4 = vld [vmem:[%s26397_s1 + $0x3488] ss:$28 sps:$4 sm:$0xff]  }
 0x426   :  { %12874 = vmatprep.subr.bf16.mxu0 %v19231_v49  ;;  %v19271_v49 = vld [vmem:[%s26397_s1 + $0xa90] ss:$28 sps:$4 sm:$0xff]  }
 0x428   :  { %12711 = vmatpush1.bf16.msra.mxu1 %v19226_v8  ;;  %v19276_v8 = vld [vmem:[%s26397_s1 + $0x34c4] ss:$28 sps:$4 sm:$0xff]  }
 0x429   :  { %12875 = vmatpush1.bf16.msra.mxu0 %v19229_v26  ;;  %12712 = vmatprep.subr.bf16.mxu1 %v19234_v10  ;;  %v19279_v26 = vld [vmem:[%s26397_s1 + $0xacc] ss:$28 sps:$4 sm:$0xff]   ;;  %v19274_v10 = vld [vmem:[%s26397_s1 + $0x34c0] ss:$28 sps:$4 sm:$0xff]  }
 0x42a   :  { %12876 = vmatprep.subr.bf16.mxu0 %v19237_v11  ;;  %v19277_v11 = vld [vmem:[%s26397_s1 + $0xac8] ss:$28 sps:$4 sm:$0xff]  }
 0x42c   :  { %12713 = vmatpush1.bf16.msra.mxu1 %v19232_v12  ;;  %v19282_v12 = vld [vmem:[%s26397_s1 + $0x34fc] ss:$28 sps:$4 sm:$0xff]  }
 0x42d   :  { %12877 = vmatpush1.bf16.msra.mxu0 %v19235_v13  ;;  %12714 = vmatprep.subr.bf16.mxu1 %v19240_v14  ;;  %v2099_v13 = vlaneseq  ;;  %v19285_v14 = vld [vmem:[%s26397_s1 + $0xb04] ss:$28 sps:$4 sm:$0xff]  }
 0x42e   :  { %12878 = vmatprep.subr.bf16.mxu0 %v19243_v15  ;;  %v19280_v15 = vld [vmem:[%s26397_s1 + $0x34f8] ss:$28 sps:$4 sm:$0xff]  }
 0x430   :  { %12715 = vmatpush1.bf16.msra.mxu1 %v19238_v16  ;;  %v19283_v16 = vld [vmem:[%s26397_s1 + $0xb00] ss:$28 sps:$4 sm:$0xff]  }
 0x431   :  { %12879 = vmatpush1.bf16.msra.mxu0 %v19241_v17  ;;  %12716 = vmatprep.subr.bf16.mxu1 %v19246_v20  ;;  %v23917_v17 = vshrl.u32 %v2099_v13, 7  ;;  %v19288_v20 = vld [vmem:[%s26397_s1 + $0x3534] ss:$28 sps:$4 sm:$0xff]  }
 0x432   :  { %12880 = vmatprep.subr.bf16.mxu0 %v19249_v21  ;;  %v19291_v21 = vld [vmem:[%s26397_s1 + $0xb3c] ss:$28 sps:$4 sm:$0xff]  }
 0x434   :  { %12717 = vmatpush1.bf16.msra.mxu1 %v19244_v40  ;;  %v19286_v40 = vld [vmem:[%s26397_s1 + $0x3530] ss:$28 sps:$4 sm:$0xff]  }
 0x435   :  { %12881 = vmatpush1.bf16.msra.mxu0 %v19247_v41  ;;  %12718 = vmatprep.subr.bf16.mxu1 %v19252_v42  ;;  %v19289_v41 = vld [vmem:[%s26397_s1 + $0xb38] ss:$28 sps:$4 sm:$0xff]   ;;  %v2101_v42 = vsub.s32 0, %v23917_v17 }
 0x436   :  { %12882 = vmatprep.subr.bf16.mxu0 %v19255_v56  ;;  %v19294_v56 = vld [vmem:[%s26397_s1 + $0x356c] ss:$28 sps:$4 sm:$0xff]  }
 0x438   :  { %12719 = vmatpush1.bf16.msra.mxu1 %v19250_v45  ;;  %v19297_v45 = vld [vmem:[%s26397_s1 + $0xb74] ss:$28 sps:$4 sm:$0xff]  }
 0x439   :  { %12883 = vmatpush1.bf16.msra.mxu0 %v19253_v51  ;;  %12720 = vmatprep.subr.bf16.mxu1 %v19258_v31  ;;  %v2097_v51 = vld [vmem:[%s26399_s2] sm:$0xff]  ;;  %v2105_v31 = vsub.s32 1, %v23917_v17 }
 0x43a   :  { %12884 = vmatprep.subr.bf16.mxu0 %v19261_v28  ;;  %v19292_v28 = vld [vmem:[%s26397_s1 + $0x3568] ss:$28 sps:$4 sm:$0xff]  }
 0x43c   :  { %12721 = vmatpush1.bf16.msra.mxu1 %v19256_v54  ;;  %v19295_v54 = vld [vmem:[%s26397_s1 + $0xb70] ss:$28 sps:$4 sm:$0xff]  }
 0x43d   :  { %12885 = vmatpush1.bf16.msra.mxu0 %v19259_v2  ;;  %12722 = vmatprep.subr.bf16.mxu1 %v19264_v58  ;;  %v2102_v2 = vrot.slane %v2097_v51, %v2101_v42  ;;  %v19300_v58 = vld [vmem:[%s26397_s1 + $0x35a4] ss:$28 sps:$4 sm:$0xff]  }
 0x43e   :  { %12886 = vmatprep.subr.bf16.mxu0 %v19267_v59  ;;  %v19303_v59 = vld [vmem:[%s26397_s1 + $0xbac] ss:$28 sps:$4 sm:$0xff]  }
 0x440   :  { %12723 = vmatpush1.bf16.msra.mxu1 %v19262_v60  ;;  %v2106_v60 = vrot.slane %v2097_v51, %v2105_v31  ;;  %v19324_v51 = vld [vmem:[%s26397_s1 + $0x3684] ss:$28 sps:$4 sm:$0xff]  }
 0x441   :  { %12887 = vmatpush1.bf16.msra.mxu0 %v19265_v24  ;;  %12733 = vmatprep.subr.bf16.mxu1 %v19270_v62  ;;  %v19298_v24 = vld [vmem:[%s26397_s1 + $0x35a0] ss:$28 sps:$4 sm:$0xff]   ;;  %v19301_v62 = vld [vmem:[%s26397_s1 + $0xba8] ss:$28 sps:$4 sm:$0xff]  }
 0x442   :  { %12897 = vmatprep.subr.bf16.mxu0 %v19273_v63  ;;  %v17417_v63 = vadd.f32 %v21782_v32, %v2102_v2  ;;  %v19304_v32 = vld [vmem:[%s26397_s1 + $0x35d8] ss:$28 sps:$4 sm:$0xff]   ;;  %v19325_v2 = vld [vmem:[%s26397_s1 + $0xc88] ss:$28 sps:$4 sm:$0xff]  }
 0x443   :  { %12725 = vmatmul.mubr.bf16.vlgmr.msra.gmra.mrb[4].mxu1 %v23089_v0 }
 0x444   :  { %12889 = vmatmul.mubr.bf16.vlgmr.msra.gmra.mrb[4].mxu0 %v20559_v7  ;;  %12734 = vmatpush1.bf16.msra.mxu1 %v19268_v4  ;;  %v19306_v4 = vld [vmem:[%s26397_s1 + $0x35dc] ss:$28 sps:$4 sm:$0xff]  }
 0x445   :  { %12898 = vmatpush1.bf16.msra.mxu0 %v19271_v49  ;;  %12735 = vmatprep.subr.bf16.mxu1 %v19276_v8  ;;  %v19309_v49 = vld [vmem:[%s26397_s1 + $0xbe4] ss:$28 sps:$4 sm:$0xff]   ;;  %v17419_v8 = vadd.f32 %v21790_v34, %v2106_v60  ;;  %v19312_v34 = vld [vmem:[%s26397_s1 + $0x3614] ss:$28 sps:$4 sm:$0xff]  }
 0x446   :  { %12899 = vmatprep.subr.bf16.mxu0 %v19279_v26  ;;  %12765 = vmatprep.mubr.bf16.mxu1 %v23105_v46  ;;  %v19328_v60 = vld [vmem:[%s26397_s1 + $0x36b8] ss:$28 sps:$4 sm:$0xff]  }
 0x447   :  { %12929 = vmatprep.mubr.bf16.mxu0 %v20657_v37 }
 0x448   :  { %12736 = vmatpush1.bf16.msra.mxu1 %v19274_v10 }
 0x449   :  { %12900 = vmatpush1.bf16.msra.mxu0 %v19277_v11  ;;  %12737 = vmatprep.subr.bf16.mxu1 %v19282_v12 }
 0x44a   :  { %12901 = vmatprep.subr.bf16.mxu0 %v19285_v14  ;;  %v19307_v14 = vld [vmem:[%s26397_s1 + $0xbe0] ss:$28 sps:$4 sm:$0xff]  }
 0x44c   :  { %12738 = vmatpush1.bf16.msra.mxu1 %v19280_v15 }
 0x44d   :  { %12902 = vmatpush1.bf16.msra.mxu0 %v19283_v16  ;;  %12739 = vmatprep.subr.bf16.mxu1 %v19288_v20  ;;  %v19315_v16 = vld [vmem:[%s26397_s1 + $0xc1c] ss:$28 sps:$4 sm:$0xff]   ;;  %v19310_v20 = vld [vmem:[%s26397_s1 + $0x3610] ss:$28 sps:$4 sm:$0xff]  }
 0x44e   :  { %12903 = vmatprep.subr.bf16.mxu0 %v19291_v21  ;;  %v19313_v21 = vld [vmem:[%s26397_s1 + $0xc18] ss:$28 sps:$4 sm:$0xff]  }
 0x450   :  { %12740 = vmatpush1.bf16.msra.mxu1 %v19286_v40  ;;  %v19318_v40 = vld [vmem:[%s26397_s1 + $0x364c] ss:$28 sps:$4 sm:$0xff]  }
 0x451   :  { %12904 = vmatpush1.bf16.msra.mxu0 %v19289_v41  ;;  %12741 = vmatprep.subr.bf16.mxu1 %v19294_v56  ;;  %v19321_v41 = vld [vmem:[%s26397_s1 + $0xc54] ss:$28 sps:$4 sm:$0xff]   ;;  %v19316_v56 = vld [vmem:[%s26397_s1 + $0x3648] ss:$28 sps:$4 sm:$0xff]  }
 0x452   :  { %12905 = vmatprep.subr.bf16.mxu0 %v19297_v45  ;;  %v19319_v45 = vld [vmem:[%s26397_s1 + $0xc50] ss:$28 sps:$4 sm:$0xff]  }
 0x454   :  { %12742 = vmatpush1.bf16.msra.mxu1 %v19292_v28  ;;  %v19327_v28 = vld [vmem:[%s26397_s1 + $0xc8c] ss:$28 sps:$4 sm:$0xff]  }
 0x455   :  { %12906 = vmatpush1.bf16.msra.mxu0 %v19295_v54  ;;  %12743 = vmatprep.subr.bf16.mxu1 %v19300_v58  ;;  %v19322_v54 = vld [vmem:[%s26397_s1 + $0x3680] ss:$28 sps:$4 sm:$0xff]  }
 0x456   :  { %12907 = vmatprep.subr.bf16.mxu0 %v19303_v59  ;;  %v19330_v58 = vld [vmem:[%s26397_s1 + $0x36bc] ss:$28 sps:$4 sm:$0xff]   ;;  %v19333_v59 = vld [vmem:[%s26397_s1 + $0xcc4] ss:$28 sps:$4 sm:$0xff]  }
 0x457   :  { %v12111_v26 = vpop.f32.mrb[0].mxu0 }
 0x458   :  { %v23972_v10 = vadd.f32 %v17417_v63, %v12111_v26  ;;  %v12113_v11 = vpop.f32.mrb[1].mxu0  ;;  %12744 = vmatpush1.bf16.msra.mxu1 %v19298_v24  ;;  %v19331_v24 = vld [vmem:[%s26397_s1 + $0xcc0] ss:$28 sps:$4 sm:$0xff]   ;;  %v19345_v26 = vld [vmem:[%s26397_s1 + $0xd34] ss:$28 sps:$4 sm:$0xff]  }
 0x459   :  { %v23974_v12 = vadd.f32 %v17419_v8, %v12113_v11  ;;  %v12115_v13 = vpop.f32.mrb[2].mxu0  ;;  %12908 = vmatpush1.bf16.msra.mxu0 %v19301_v62  ;;  %12745 = vmatprep.subr.bf16.mxu1 %v19306_v4  ;;  %v19336_v62 = vld [vmem:[%s26397_s1 + $0x36f4] ss:$28 sps:$4 sm:$0xff]   ;;  %v19339_v63 = vld [vmem:[%s26397_s1 + $0xcfc] ss:$28 sps:$4 sm:$0xff]  }
 0x45a   :  { %v12116_v15 = vpop.f32.mrb[3].mxu0  ;;  %12909 = vmatprep.subr.bf16.mxu0 %v19309_v49  ;;  %v19334_v4 = vld [vmem:[%s26397_s1 + $0x36f0] ss:$28 sps:$4 sm:$0xff]   ;;  %v19337_v49 = vld [vmem:[%s26397_s1 + $0xcf8] ss:$28 sps:$4 sm:$0xff]  }
 0x45b   :  { %v19342_v8 = vld [vmem:[%s26397_s1 + $0x372c] ss:$28 sps:$4 sm:$0xff]   ;;  %v19346_v15 = vld [vmem:[%s26397_s1 + $0x3760] ss:$28 sps:$4 sm:$0xff]  }
 0x45c   :  { %12746 = vmatpush1.bf16.msra.mxu1 %v19304_v32  ;;  %v19340_v11 = vld [vmem:[%s26397_s1 + $0x3728] ss:$28 sps:$4 sm:$0xff]   ;;  %v19343_v13 = vld [vmem:[%s26397_s1 + $0xd30] ss:$28 sps:$4 sm:$0xff]  }
 0x45d   :  { %12910 = vmatpush1.bf16.msra.mxu0 %v19307_v14  ;;  %12747 = vmatprep.subr.bf16.mxu1 %v19312_v34  ;;  %v19348_v32 = vld [vmem:[%s26397_s1 + $0x3764] ss:$28 sps:$4 sm:$0xff]   ;;  %v19351_v14 = vld [vmem:[%s26397_s1 + $0xd6c] ss:$28 sps:$4 sm:$0xff]  }
 0x45e   :  { %12911 = vmatprep.subr.bf16.mxu0 %v19315_v16  ;;  %v19349_v34 = vld [vmem:[%s26397_s1 + $0xd68] ss:$28 sps:$4 sm:$0xff]   ;;  %v19354_v16 = vld [vmem:[%s26397_s1 + $0x379c] ss:$28 sps:$4 sm:$0xff]  }
 0x460   :  { %12748 = vmatpush1.bf16.msra.mxu1 %v19310_v20  ;;  %v19357_v20 = vld [vmem:[%s26397_s1 + $0xda4] ss:$28 sps:$4 sm:$0xff]  }
 0x461   :  { %12912 = vmatpush1.bf16.msra.mxu0 %v19313_v21  ;;  %12749 = vmatprep.subr.bf16.mxu1 %v19318_v40  ;;  %v19352_v21 = vld [vmem:[%s26397_s1 + $0x3798] ss:$28 sps:$4 sm:$0xff]   ;;  %v19355_v40 = vld [vmem:[%s26397_s1 + $0xda0] ss:$28 sps:$4 sm:$0xff]  }
 0x462   :  { %12913 = vmatprep.subr.bf16.mxu0 %v19321_v41  ;;  %v19360_v41 = vld [vmem:[%s26397_s1 + $0x37d4] ss:$28 sps:$4 sm:$0xff]  }
 0x464   :  { %12750 = vmatpush1.bf16.msra.mxu1 %v19316_v56  ;;  %v19363_v56 = vld [vmem:[%s26397_s1 + $0xddc] ss:$28 sps:$4 sm:$0xff]  }
 0x465   :  { %12914 = vmatpush1.bf16.msra.mxu0 %v19319_v45  ;;  %12751 = vmatprep.subr.bf16.mxu1 %v19324_v51  ;;  %v19358_v45 = vld [vmem:[%s26397_s1 + $0x37d0] ss:$28 sps:$4 sm:$0xff]   ;;  %v19361_v51 = vld [vmem:[%s26397_s1 + $0xdd8] ss:$28 sps:$4 sm:$0xff]  }
 0x466   :  { %12915 = vmatprep.subr.bf16.mxu0 %v19327_v28  ;;  %v19366_v28 = vld [vmem:[%s26397_s1 + $0xe14] ss:$28 sps:$4 sm:$0xff]  }
 0x468   :  { %12752 = vmatpush1.bf16.msra.mxu1 %v19322_v54  ;;  %v19367_v54 = vld [vmem:[%s26397_s1 + $0x1d8] ss:$28 sps:$4 sm:$0xff]  }
 0x469   :  { %12916 = vmatpush1.bf16.msra.mxu0 %v19325_v2  ;;  %12753 = vmatprep.subr.bf16.mxu1 %v19330_v58  ;;  %v19364_v2 = vld [vmem:[%s26397_s1 + $0xe10] ss:$28 sps:$4 sm:$0xff]   ;;  %v19368_v58 = vld [vmem:[%s26397_s1 + $0x18] ss:$28 sps:$4 sm:$0xff]  }
 0x46a   :  { %12917 = vmatprep.subr.bf16.mxu0 %v19333_v59  ;;  %v19371_v59 = vld [vmem:[%s26397_s1 + $0xe4c] ss:$28 sps:$4 sm:$0xff]  }
 0x46c   :  { %12754 = vmatpush1.bf16.msra.mxu1 %v19328_v60  ;;  %v19372_v60 = vld [vmem:[%s26397_s1 + $0x210] ss:$28 sps:$4 sm:$0xff]  }
 0x46d   :  { %12918 = vmatpush1.bf16.msra.mxu0 %v19331_v24  ;;  %12755 = vmatprep.subr.bf16.mxu1 %v19336_v62  ;;  %v19369_v24 = vld [vmem:[%s26397_s1 + $0xe48] ss:$28 sps:$4 sm:$0xff]   ;;  %v19373_v62 = vld [vmem:[%s26397_s1 + $0x50] ss:$28 sps:$4 sm:$0xff]  }
 0x46e   :  { %12919 = vmatprep.subr.bf16.mxu0 %v19339_v63  ;;  %v19376_v63 = vld [vmem:[%s26397_s1 + $0xe84] ss:$28 sps:$4 sm:$0xff]  }
 0x470   :  { %12756 = vmatpush1.bf16.msra.mxu1 %v19334_v4  ;;  %v19377_v4 = vld [vmem:[%s26397_s1 + $0x248] ss:$28 sps:$4 sm:$0xff]  }
 0x471   :  { %12920 = vmatpush1.bf16.msra.mxu0 %v19337_v49  ;;  %12757 = vmatprep.subr.bf16.mxu1 %v19342_v8  ;;  %v19374_v49 = vld [vmem:[%s26397_s1 + $0xe80] ss:$28 sps:$4 sm:$0xff]   ;;  %v19378_v8 = vld [vmem:[%s26397_s1 + $0x88] ss:$28 sps:$4 sm:$0xff]  }
 0x472   :  { %12921 = vmatprep.subr.bf16.mxu0 %v19345_v26  ;;  %v19381_v26 = vld [vmem:[%s26397_s1 + $0xebc] ss:$28 sps:$4 sm:$0xff]  }
 0x474   :  { %12758 = vmatpush1.bf16.msra.mxu1 %v19340_v11  ;;  %v19379_v11 = vld [vmem:[%s26397_s1 + $0xeb8] ss:$28 sps:$4 sm:$0xff]  }
 0x475   :  { %12922 = vmatpush1.bf16.msra.mxu0 %v19343_v13  ;;  %12759 = vmatprep.subr.bf16.mxu1 %v19348_v32  ;;  %v19383_v13 = vld [vmem:[%s26397_s1 + $0xc0] ss:$28 sps:$4 sm:$0xff]   ;;  %v19386_v32 = vld [vmem:[%s26397_s1 + $0xef4] ss:$28 sps:$4 sm:$0xff]  }
 0x476   :  { %12923 = vmatprep.subr.bf16.mxu0 %v19351_v14  ;;  %v19387_v14 = vld [vmem:[%s26397_s1 + $0x2b8] ss:$28 sps:$4 sm:$0xff]  }
 0x478   :  { %12760 = vmatpush1.bf16.msra.mxu1 %v19346_v15  ;;  %v19384_v15 = vld [vmem:[%s26397_s1 + $0xef0] ss:$28 sps:$4 sm:$0xff]  }
 0x479   :  { %12924 = vmatpush1.bf16.msra.mxu0 %v19349_v34  ;;  %12761 = vmatprep.subr.bf16.mxu1 %v19354_v16  ;;  %v19388_v34 = vld [vmem:[%s26397_s1 + $0xf8] ss:$28 sps:$4 sm:$0xff]   ;;  %v19391_v16 = vld [vmem:[%s26397_s1 + $0xf2c] ss:$28 sps:$4 sm:$0xff]  }
 0x47a   :  { %12925 = vmatprep.subr.bf16.mxu0 %v19357_v20  ;;  %v19392_v20 = vld [vmem:[%s26397_s1 + $0x2f0] ss:$28 sps:$4 sm:$0xff]  }
 0x47c   :  { %12762 = vmatpush1.bf16.msra.mxu1 %v19352_v21  ;;  %v19389_v21 = vld [vmem:[%s26397_s1 + $0xf28] ss:$28 sps:$4 sm:$0xff]  }
 0x47d   :  { %12926 = vmatpush1.bf16.msra.mxu0 %v19355_v40  ;;  %12763 = vmatprep.subr.bf16.mxu1 %v19360_v41  ;;  %v19393_v40 = vld [vmem:[%s26397_s1 + $0x130] ss:$28 sps:$4 sm:$0xff]   ;;  %v19396_v41 = vld [vmem:[%s26397_s1 + $0xf64] ss:$28 sps:$4 sm:$0xff]  }
 0x47e   :  { %12927 = vmatprep.subr.bf16.mxu0 %v19363_v56  ;;  %v19397_v56 = vld [vmem:[%s26397_s1 + $0x328] ss:$28 sps:$4 sm:$0xff]  }
 0x480   :  { %12764 = vmatpush1.bf16.msra.mxu1 %v19358_v45  ;;  %v19394_v45 = vld [vmem:[%s26397_s1 + $0xf60] ss:$28 sps:$4 sm:$0xff]  }
 0x481   :  { %12928 = vmatpush1.bf16.msra.mxu0 %v19361_v51  ;;  %16948 = vmatprep.subr.bf16.mxu1 %v19367_v54  ;;  %v19398_v51 = vld [vmem:[%s26397_s1 + $0x168] ss:$28 sps:$4 sm:$0xff]   ;;  %v19402_v54 = vld [vmem:[%s26397_s1 + $0x360] ss:$28 sps:$4 sm:$0xff]  }
 0x482   :  { %12938 = vmatprep.subr.bf16.mxu0 %v19366_v28  ;;  %v19401_v28 = vld [vmem:[%s26397_s1 + $0xf9c] ss:$28 sps:$4 sm:$0xff]  }
 0x483   :  { %12766 = vmatmul.mubr.bf16.vlgmr.msra.gmra.mrb[4].mxu1 %v23293_v44 }
 0x484   :  { %12930 = vmatmul.mubr.bf16.vlgmr.msra.gmra.mrb[4].mxu0 %v20787_v19  ;;  %16949 = vmatpush3.bf16.msra.mxu1 %v19368_v58  ;;  %v19403_v58 = vld [vmem:[%s26397_s1 + $0x1a0] ss:$28 sps:$4 sm:$0xff]  }
 0x485   :  { %12939 = vmatpush1.bf16.msra.mxu0 %v19364_v2  ;;  %16950 = vmatprep.subr.bf16.mxu1 %v19372_v60  ;;  %v19399_v2 = vld [vmem:[%s26397_s1 + $0xf98] ss:$28 sps:$4 sm:$0xff]  }
 0x486   :  { %12940 = vmatprep.subr.bf16.mxu0 %v19371_v59  ;;  %13462 = vmatprep.mubr.bf16.mxu1 %v20491_v48  ;;  %v19382_v48 = vld [vmem:[%s26397_s1 + $0x280] ss:$28 sps:$4 sm:$0xff]   ;;  %v19406_v59 = vld [vmem:[%s26397_s1 + $0xfd4] ss:$28 sps:$4 sm:$0xff]  }
 0x487   :  { %12970 = vmatprep.mubr.bf16.mxu0 %v20802_v23  ;;  %v19407_v60 = vld [vmem:[%s26397_s1 + $0x558] ss:$28 sps:$4 sm:$0xff]  }
 0x488   :  { %16951 = vmatpush3.bf16.msra.mxu1 %v19373_v62  ;;  %v19408_v62 = vld [vmem:[%s26397_s1 + $0x398] ss:$28 sps:$4 sm:$0xff]  }
 0x489   :  { %12941 = vmatpush1.bf16.msra.mxu0 %v19369_v24  ;;  %16952 = vmatprep.subr.bf16.mxu1 %v19377_v4  ;;  %v19404_v24 = vld [vmem:[%s26397_s1 + $0xfd0] ss:$28 sps:$4 sm:$0xff]  }
 0x48a   :  { %12942 = vmatprep.subr.bf16.mxu0 %v19376_v63  ;;  %v19411_v63 = vld [vmem:[%s26397_s1 + $0x100c] ss:$28 sps:$4 sm:$0xff]  }
 0x48b   :  { %v19412_v4 = vld [vmem:[%s26397_s1 + $0x590] ss:$28 sps:$4 sm:$0xff]  }
 0x48c   :  { %16953 = vmatpush3.bf16.msra.mxu1 %v19378_v8  ;;  %v19413_v8 = vld [vmem:[%s26397_s1 + $0x3d0] ss:$28 sps:$4 sm:$0xff]  }
 0x48d   :  { %12943 = vmatpush1.bf16.msra.mxu0 %v19374_v49  ;;  %16954 = vmatprep.subr.bf16.mxu1 %v19382_v48  ;;  %v19409_v49 = vld [vmem:[%s26397_s1 + $0x1008] ss:$28 sps:$4 sm:$0xff]   ;;  %v19414_v48 = vld [vmem:[%s26397_s1 + $0x1040] ss:$28 sps:$4 sm:$0xff]  }
 0x48e   :  { %12944 = vmatprep.subr.bf16.mxu0 %v19381_v26  ;;  %v19416_v26 = vld [vmem:[%s26397_s1 + $0x1044] ss:$28 sps:$4 sm:$0xff]  }
 0x490   :  { %16955 = vmatpush3.bf16.msra.mxu1 %v19383_v13  ;;  %v19421_v13 = vld [vmem:[%s26397_s1 + $0x107c] ss:$28 sps:$4 sm:$0xff]  }
 0x491   :  { %12945 = vmatpush1.bf16.msra.mxu0 %v19379_v11  ;;  %16956 = vmatprep.subr.bf16.mxu1 %v19387_v14  ;;  %v19418_v11 = vld [vmem:[%s26397_s1 + $0x408] ss:$28 sps:$4 sm:$0xff]   ;;  %v19423_v14 = vld [vmem:[%s26397_s1 + $0x440] ss:$28 sps:$4 sm:$0xff]  }
 0x492   :  { %12946 = vmatprep.subr.bf16.mxu0 %v19386_v32  ;;  %v19419_v32 = vld [vmem:[%s26397_s1 + $0x1078] ss:$28 sps:$4 sm:$0xff]  }
 0x494   :  { %16957 = vmatpush3.bf16.msra.mxu1 %v19388_v34  ;;  %v19427_v34 = vld [vmem:[%s26397_s1 + $0x638] ss:$28 sps:$4 sm:$0xff]  }
 0x495   :  { %12947 = vmatpush1.bf16.msra.mxu0 %v19384_v15  ;;  %16958 = vmatprep.subr.bf16.mxu1 %v19392_v20  ;;  %v19426_v15 = vld [vmem:[%s26397_s1 + $0x10b4] ss:$28 sps:$4 sm:$0xff]  }
 0x496   :  { %12948 = vmatprep.subr.bf16.mxu0 %v19391_v16  ;;  %v19424_v16 = vld [vmem:[%s26397_s1 + $0x10b0] ss:$28 sps:$4 sm:$0xff]   ;;  %v19428_v20 = vld [vmem:[%s26397_s1 + $0x478] ss:$28 sps:$4 sm:$0xff]  }
 0x498   :  { %16959 = vmatpush3.bf16.msra.mxu1 %v19393_v40  ;;  %v19432_v40 = vld [vmem:[%s26397_s1 + $0x670] ss:$28 sps:$4 sm:$0xff]  }
 0x499   :  { %12949 = vmatpush1.bf16.msra.mxu0 %v19389_v21  ;;  %16960 = vmatprep.subr.bf16.mxu1 %v19397_v56  ;;  %v19431_v21 = vld [vmem:[%s26397_s1 + $0x10ec] ss:$28 sps:$4 sm:$0xff]  }
 0x49a   :  { %12950 = vmatprep.subr.bf16.mxu0 %v19396_v41  ;;  %v19429_v41 = vld [vmem:[%s26397_s1 + $0x10e8] ss:$28 sps:$4 sm:$0xff]   ;;  %v19433_v56 = vld [vmem:[%s26397_s1 + $0x4b0] ss:$28 sps:$4 sm:$0xff]  }
 0x49c   :  { %16961 = vmatpush3.bf16.msra.mxu1 %v19398_v51  ;;  %v19437_v51 = vld [vmem:[%s26397_s1 + $0x6a8] ss:$28 sps:$4 sm:$0xff]  }
 0x49d   :  { %12951 = vmatpush1.bf16.msra.mxu0 %v19394_v45  ;;  %16962 = vmatprep.subr.bf16.mxu1 %v19402_v54  ;;  %v19436_v45 = vld [vmem:[%s26397_s1 + $0x1124] ss:$28 sps:$4 sm:$0xff]  }
 0x49e   :  { %12952 = vmatprep.subr.bf16.mxu0 %v19401_v28  ;;  %v19434_v28 = vld [vmem:[%s26397_s1 + $0x1120] ss:$28 sps:$4 sm:$0xff]   ;;  %v19438_v54 = vld [vmem:[%s26397_s1 + $0x4e8] ss:$28 sps:$4 sm:$0xff]  }
 0x4a0   :  { %16963 = vmatpush3.bf16.msra.mxu1 %v19403_v58  ;;  %v19442_v58 = vld [vmem:[%s26397_s1 + $0x6e0] ss:$28 sps:$4 sm:$0xff]  }
 0x4a1   :  { %12953 = vmatpush1.bf16.msra.mxu0 %v19399_v2  ;;  %16970 = vmatprep.subr.bf16.mxu1 %v19407_v60  ;;  %v19441_v2 = vld [vmem:[%s26397_s1 + $0x115c] ss:$28 sps:$4 sm:$0xff]  }
 0x4a2   :  { %12954 = vmatprep.subr.bf16.mxu0 %v19406_v59  ;;  %v19439_v59 = vld [vmem:[%s26397_s1 + $0x1158] ss:$28 sps:$4 sm:$0xff]   ;;  %v19443_v60 = vld [vmem:[%s26397_s1 + $0x520] ss:$28 sps:$4 sm:$0xff]  }
 0x4a3   :  { %13463 = vmatmul.mubr.bf16.vlgmr.msra.gmra.mrb[8].mxu1 %v20557_v6  ;;  %v19417_v6 = vld [vmem:[%s26397_s1 + $0x5c8] ss:$28 sps:$4 sm:$0xff]  }
 0x4a4   :  { %16971 = vmatpush3.bf16.msra.mxu1 %v19408_v62  ;;  %13502 = vmatprep.mubr.bf16.mxu1 %v20653_v36  ;;  %v19422_v36 = vld [vmem:[%s26397_s1 + $0x600] ss:$28 sps:$4 sm:$0xff]   ;;  %v19447_v62 = vld [vmem:[%s26397_s1 + $0x8d8] ss:$28 sps:$4 sm:$0xff]  }
 0x4a5   :  { %12955 = vmatpush1.bf16.msra.mxu0 %v19404_v24  ;;  %16972 = vmatprep.subr.bf16.mxu1 %v19412_v4  ;;  %v19446_v24 = vld [vmem:[%s26397_s1 + $0x1194] ss:$28 sps:$4 sm:$0xff]  }
 0x4a6   :  { %12956 = vmatprep.subr.bf16.mxu0 %v19411_v63  ;;  %v19444_v63 = vld [vmem:[%s26397_s1 + $0x1190] ss:$28 sps:$4 sm:$0xff]   ;;  %v19448_v4 = vld [vmem:[%s26397_s1 + $0x718] ss:$28 sps:$4 sm:$0xff]  }
 0x4a8   :  { %16973 = vmatpush3.bf16.msra.mxu1 %v19413_v8  ;;  %v19452_v8 = vld [vmem:[%s26397_s1 + $0x910] ss:$28 sps:$4 sm:$0xff]  }
 0x4a9   :  { %12957 = vmatpush1.bf16.msra.mxu0 %v19409_v49  ;;  %16974 = vmatprep.subr.bf16.mxu1 %v19417_v6  ;;  %v19451_v49 = vld [vmem:[%s26397_s1 + $0x11cc] ss:$28 sps:$4 sm:$0xff]  }
 0x4aa   :  { %12958 = vmatprep.subr.bf16.mxu0 %v19416_v26  ;;  %v19449_v26 = vld [vmem:[%s26397_s1 + $0x11c8] ss:$28 sps:$4 sm:$0xff]   ;;  %v19453_v6 = vld [vmem:[%s26397_s1 + $0x750] ss:$28 sps:$4 sm:$0xff]  }
 0x4ac   :  { %16975 = vmatpush3.bf16.msra.mxu1 %v19418_v11  ;;  %v19454_v11 = vld [vmem:[%s26397_s1 + $0x1200] ss:$28 sps:$4 sm:$0xff]  }
 0x4ad   :  { %12959 = vmatpush1.bf16.msra.mxu0 %v19414_v48  ;;  %16976 = vmatprep.subr.bf16.mxu1 %v19422_v36  ;;  %v19456_v48 = vld [vmem:[%s26397_s1 + $0x1204] ss:$28 sps:$4 sm:$0xff]   ;;  %v19461_v36 = vld [vmem:[%s26397_s1 + $0x123c] ss:$28 sps:$4 sm:$0xff]  }
 0x4ae   :  { %12960 = vmatprep.subr.bf16.mxu0 %v19421_v13  ;;  %v19458_v13 = vld [vmem:[%s26397_s1 + $0x788] ss:$28 sps:$4 sm:$0xff]  }
 0x4b0   :  { %16977 = vmatpush3.bf16.msra.mxu1 %v19423_v14  ;;  %v19463_v14 = vld [vmem:[%s26397_s1 + $0x7c0] ss:$28 sps:$4 sm:$0xff]  }
 0x4b1   :  { %12961 = vmatpush1.bf16.msra.mxu0 %v19419_v32  ;;  %16978 = vmatprep.subr.bf16.mxu1 %v19427_v34  ;;  %v19459_v32 = vld [vmem:[%s26397_s1 + $0x1238] ss:$28 sps:$4 sm:$0xff]  }
 0x4b2   :  { %12962 = vmatprep.subr.bf16.mxu0 %v19426_v15  ;;  %v19466_v15 = vld [vmem:[%s26397_s1 + $0x1274] ss:$28 sps:$4 sm:$0xff]  }
 0x4b3   :  { %v19467_v34 = vld [vmem:[%s26397_s1 + $0x9b8] ss:$28 sps:$4 sm:$0xff]  }
 0x4b4   :  { %16979 = vmatpush3.bf16.msra.mxu1 %v19428_v20  ;;  %v19468_v20 = vld [vmem:[%s26397_s1 + $0x7f8] ss:$28 sps:$4 sm:$0xff]  }
 0x4b5   :  { %12963 = vmatpush1.bf16.msra.mxu0 %v19424_v16  ;;  %16980 = vmatprep.subr.bf16.mxu1 %v19432_v40  ;;  %v19464_v16 = vld [vmem:[%s26397_s1 + $0x1270] ss:$28 sps:$4 sm:$0xff]  }
 0x4b6   :  { %12964 = vmatprep.subr.bf16.mxu0 %v19431_v21  ;;  %v19471_v21 = vld [vmem:[%s26397_s1 + $0x12ac] ss:$28 sps:$4 sm:$0xff]  }
 0x4b7   :  { %v19472_v40 = vld [vmem:[%s26397_s1 + $0x9f0] ss:$28 sps:$4 sm:$0xff]  }
 0x4b8   :  { %16981 = vmatpush3.bf16.msra.mxu1 %v19433_v56  ;;  %v19473_v56 = vld [vmem:[%s26397_s1 + $0x830] ss:$28 sps:$4 sm:$0xff]  }
 0x4b9   :  { %12965 = vmatpush1.bf16.msra.mxu0 %v19429_v41  ;;  %16982 = vmatprep.subr.bf16.mxu1 %v19437_v51  ;;  %v19469_v41 = vld [vmem:[%s26397_s1 + $0x12a8] ss:$28 sps:$4 sm:$0xff]  }
 0x4ba   :  { %12966 = vmatprep.subr.bf16.mxu0 %v19436_v45  ;;  %v19476_v45 = vld [vmem:[%s26397_s1 + $0x12e4] ss:$28 sps:$4 sm:$0xff]  }
 0x4bb   :  { %v19477_v51 = vld [vmem:[%s26397_s1 + $0xa28] ss:$28 sps:$4 sm:$0xff]  }
 0x4bc   :  { %16983 = vmatpush3.bf16.msra.mxu1 %v19438_v54  ;;  %v19478_v54 = vld [vmem:[%s26397_s1 + $0x868] ss:$28 sps:$4 sm:$0xff]  }
 0x4bd   :  { %12967 = vmatpush1.bf16.msra.mxu0 %v19434_v28  ;;  %16984 = vmatprep.subr.bf16.mxu1 %v19442_v58  ;;  %v19474_v28 = vld [vmem:[%s26397_s1 + $0x12e0] ss:$28 sps:$4 sm:$0xff]  }
 0x4be   :  { %12968 = vmatprep.subr.bf16.mxu0 %v19441_v2  ;;  %v19481_v2 = vld [vmem:[%s26397_s1 + $0x131c] ss:$28 sps:$4 sm:$0xff]  }
 0x4bf   :  { %v19482_v58 = vld [vmem:[%s26397_s1 + $0xa60] ss:$28 sps:$4 sm:$0xff]  }
 0x4c0   :  { %16985 = vmatpush3.bf16.msra.mxu1 %v19443_v60  ;;  %v19483_v60 = vld [vmem:[%s26397_s1 + $0x8a0] ss:$28 sps:$4 sm:$0xff]  }
 0x4c1   :  { %12969 = vmatpush1.bf16.msra.mxu0 %v19439_v59  ;;  %16992 = vmatprep.subr.bf16.mxu1 %v19447_v62  ;;  %v19479_v59 = vld [vmem:[%s26397_s1 + $0x1318] ss:$28 sps:$4 sm:$0xff]  }
 0x4c2   :  { %12979 = vmatprep.subr.bf16.mxu0 %v19446_v24  ;;  %v19486_v24 = vld [vmem:[%s26397_s1 + $0x1354] ss:$28 sps:$4 sm:$0xff]  }
 0x4c3   :  { %13503 = vmatmul.mubr.bf16.vlgmr.msra.gmra.mrb[12].mxu1 %v20783_v18  ;;  %v19457_v18 = vld [vmem:[%s26397_s1 + $0x948] ss:$28 sps:$4 sm:$0xff]   ;;  %v19487_v62 = vld [vmem:[%s26397_s1 + $0xc58] ss:$28 sps:$4 sm:$0xff]  }
 0x4c4   :  { %12971 = vmatmul.mubr.bf16.vlgmr.msra.gmra.mrb[4].mxu0 %v20990_v30  ;;  %16993 = vmatpush3.bf16.msra.mxu1 %v19448_v4  ;;  %v19488_v4 = vld [vmem:[%s26397_s1 + $0xa98] ss:$28 sps:$4 sm:$0xff]  }
 0x4c5   :  { %12980 = vmatpush1.bf16.msra.mxu0 %v19444_v63  ;;  %16994 = vmatprep.subr.bf16.mxu1 %v19452_v8  ;;  %v19484_v63 = vld [vmem:[%s26397_s1 + $0x1350] ss:$28 sps:$4 sm:$0xff]  }
 0x4c6   :  { %12981 = vmatprep.subr.bf16.mxu0 %v19451_v49  ;;  %13542 = vmatprep.mubr.bf16.mxu1 %v20505_v53  ;;  %v19462_v53 = vld [vmem:[%s26397_s1 + $0x980] ss:$28 sps:$4 sm:$0xff]   ;;  %v19491_v49 = vld [vmem:[%s26397_s1 + $0x138c] ss:$28 sps:$4 sm:$0xff]  }
 0x4c7   :  { %13011 = vmatprep.mubr.bf16.mxu0 %v21011_v35  ;;  %v19492_v8 = vld [vmem:[%s26397_s1 + $0xc90] ss:$28 sps:$4 sm:$0xff]  }
 0x4c8   :  { %16995 = vmatpush3.bf16.msra.mxu1 %v19453_v6  ;;  %v19493_v6 = vld [vmem:[%s26397_s1 + $0xad0] ss:$28 sps:$4 sm:$0xff]  }
 0x4c9   :  { %12982 = vmatpush1.bf16.msra.mxu0 %v19449_v26  ;;  %16996 = vmatprep.subr.bf16.mxu1 %v19457_v18  ;;  %v19489_v26 = vld [vmem:[%s26397_s1 + $0x1388] ss:$28 sps:$4 sm:$0xff]   ;;  %v19494_v18 = vld [vmem:[%s26397_s1 + $0x13c0] ss:$28 sps:$4 sm:$0xff]  }
 0x4ca   :  { %12983 = vmatprep.subr.bf16.mxu0 %v19456_v48  ;;  %v19496_v48 = vld [vmem:[%s26397_s1 + $0x13c4] ss:$28 sps:$4 sm:$0xff]  }
 0x4cc   :  { %16997 = vmatpush3.bf16.msra.mxu1 %v19458_v13  ;;  %v19501_v13 = vld [vmem:[%s26397_s1 + $0x13fc] ss:$28 sps:$4 sm:$0xff]  }
 0x4cd   :  { %12984 = vmatpush1.bf16.msra.mxu0 %v19454_v11  ;;  %16998 = vmatprep.subr.bf16.mxu1 %v19462_v53  ;;  %v19498_v11 = vld [vmem:[%s26397_s1 + $0xb08] ss:$28 sps:$4 sm:$0xff]   ;;  %v19503_v53 = vld [vmem:[%s26397_s1 + $0xb40] ss:$28 sps:$4 sm:$0xff]  }
 0x4ce   :  { %12985 = vmatprep.subr.bf16.mxu0 %v19461_v36  ;;  %v19499_v36 = vld [vmem:[%s26397_s1 + $0x13f8] ss:$28 sps:$4 sm:$0xff]  }
 0x4d0   :  { %16999 = vmatpush3.bf16.msra.mxu1 %v19463_v14  ;;  %v19507_v14 = vld [vmem:[%s26397_s1 + $0xd38] ss:$28 sps:$4 sm:$0xff]  }
 0x4d1   :  { %12986 = vmatpush1.bf16.msra.mxu0 %v19459_v32  ;;  %17000 = vmatprep.subr.bf16.mxu1 %v19467_v34  ;;  %v19506_v32 = vld [vmem:[%s26397_s1 + $0x1434] ss:$28 sps:$4 sm:$0xff]  }
 0x4d2   :  { %12987 = vmatprep.subr.bf16.mxu0 %v19466_v15  ;;  %v19504_v15 = vld [vmem:[%s26397_s1 + $0x1430] ss:$28 sps:$4 sm:$0xff]   ;;  %v19508_v34 = vld [vmem:[%s26397_s1 + $0xb78] ss:$28 sps:$4 sm:$0xff]  }
 0x4d4   :  { %17001 = vmatpush3.bf16.msra.mxu1 %v19468_v20  ;;  %v19512_v20 = vld [vmem:[%s26397_s1 + $0xd70] ss:$28 sps:$4 sm:$0xff]  }
 0x4d5   :  { %12988 = vmatpush1.bf16.msra.mxu0 %v19464_v16  ;;  %17002 = vmatprep.subr.bf16.mxu1 %v19472_v40  ;;  %v19511_v16 = vld [vmem:[%s26397_s1 + $0x146c] ss:$28 sps:$4 sm:$0xff]  }
 0x4d6   :  { %12989 = vmatprep.subr.bf16.mxu0 %v19471_v21  ;;  %v19509_v21 = vld [vmem:[%s26397_s1 + $0x1468] ss:$28 sps:$4 sm:$0xff]   ;;  %v19513_v40 = vld [vmem:[%s26397_s1 + $0xbb0] ss:$28 sps:$4 sm:$0xff]  }
 0x4d8   :  { %17003 = vmatpush3.bf16.msra.mxu1 %v19473_v56  ;;  %v19517_v56 = vld [vmem:[%s26397_s1 + $0xda8] ss:$28 sps:$4 sm:$0xff]  }
 0x4d9   :  { %12990 = vmatpush1.bf16.msra.mxu0 %v19469_v41  ;;  %17004 = vmatprep.subr.bf16.mxu1 %v19477_v51  ;;  %v19516_v41 = vld [vmem:[%s26397_s1 + $0x14a4] ss:$28 sps:$4 sm:$0xff]  }
 0x4da   :  { %12991 = vmatprep.subr.bf16.mxu0 %v19476_v45  ;;  %v19514_v45 = vld [vmem:[%s26397_s1 + $0x14a0] ss:$28 sps:$4 sm:$0xff]   ;;  %v19518_v51 = vld [vmem:[%s26397_s1 + $0xbe8] ss:$28 sps:$4 sm:$0xff]  }
 0x4dc   :  { %17005 = vmatpush3.bf16.msra.mxu1 %v19478_v54  ;;  %v19522_v54 = vld [vmem:[%s26397_s1 + $0xde0] ss:$28 sps:$4 sm:$0xff]  }
 0x4dd   :  { %12992 = vmatpush1.bf16.msra.mxu0 %v19474_v28  ;;  %17006 = vmatprep.subr.bf16.mxu1 %v19482_v58  ;;  %v19521_v28 = vld [vmem:[%s26397_s1 + $0x14dc] ss:$28 sps:$4 sm:$0xff]  }
 0x4de   :  { %12993 = vmatprep.subr.bf16.mxu0 %v19481_v2  ;;  %v19519_v2 = vld [vmem:[%s26397_s1 + $0x14d8] ss:$28 sps:$4 sm:$0xff]   ;;  %v19523_v58 = vld [vmem:[%s26397_s1 + $0xc20] ss:$28 sps:$4 sm:$0xff]  }
 0x4e0   :  { %17007 = vmatpush3.bf16.msra.mxu1 %v19483_v60  ;;  %v19527_v60 = vld [vmem:[%s26397_s1 + $0xfd8] ss:$28 sps:$4 sm:$0xff]  }
 0x4e1   :  { %12994 = vmatpush1.bf16.msra.mxu0 %v19479_v59  ;;  %17014 = vmatprep.subr.bf16.mxu1 %v19487_v62  ;;  %v19526_v59 = vld [vmem:[%s26397_s1 + $0x1514] ss:$28 sps:$4 sm:$0xff]  }
 0x4e2   :  { %12995 = vmatprep.subr.bf16.mxu0 %v19486_v24  ;;  %v19524_v24 = vld [vmem:[%s26397_s1 + $0x1510] ss:$28 sps:$4 sm:$0xff]   ;;  %v19528_v62 = vld [vmem:[%s26397_s1 + $0xe18] ss:$28 sps:$4 sm:$0xff]  }
 0x4e3   :  { %13543 = vmatmul.mubr.bf16.vlgmr.msra.gmra.mrb[16].mxu1 %v20559_v7  ;;  %v19497_v7 = vld [vmem:[%s26397_s1 + $0xcc8] ss:$28 sps:$4 sm:$0xff]  }
 0x4e4   :  { %17015 = vmatpush3.bf16.msra.mxu1 %v19488_v4  ;;  %13582 = vmatprep.mubr.bf16.mxu1 %v20657_v37  ;;  %v19502_v37 = vld [vmem:[%s26397_s1 + $0xd00] ss:$28 sps:$4 sm:$0xff]   ;;  %v19532_v4 = vld [vmem:[%s26397_s1 + $0x1010] ss:$28 sps:$4 sm:$0xff]  }
 0x4e5   :  { %12996 = vmatpush1.bf16.msra.mxu0 %v19484_v63  ;;  %17016 = vmatprep.subr.bf16.mxu1 %v19492_v8  ;;  %v19531_v63 = vld [vmem:[%s26397_s1 + $0x154c] ss:$28 sps:$4 sm:$0xff]  }
 0x4e6   :  { %12997 = vmatprep.subr.bf16.mxu0 %v19491_v49  ;;  %v19529_v49 = vld [vmem:[%s26397_s1 + $0x1548] ss:$28 sps:$4 sm:$0xff]   ;;  %v19533_v8 = vld [vmem:[%s26397_s1 + $0xe50] ss:$28 sps:$4 sm:$0xff]  }
 0x4e8   :  { %17017 = vmatpush3.bf16.msra.mxu1 %v19493_v6  ;;  %v19534_v6 = vld [vmem:[%s26397_s1 + $0x1580] ss:$28 sps:$4 sm:$0xff]  }
 0x4e9   :  { %12998 = vmatpush1.bf16.msra.mxu0 %v19489_v26  ;;  %17018 = vmatprep.subr.bf16.mxu1 %v19497_v7  ;;  %v19536_v26 = vld [vmem:[%s26397_s1 + $0x1584] ss:$28 sps:$4 sm:$0xff]   ;;  %v19541_v7 = vld [vmem:[%s26397_s1 + $0x15bc] ss:$28 sps:$4 sm:$0xff]  }
 0x4ea   :  { %12999 = vmatprep.subr.bf16.mxu0 %v19496_v48  ;;  %v19538_v48 = vld [vmem:[%s26397_s1 + $0xe88] ss:$28 sps:$4 sm:$0xff]  }
 0x4ec   :  { %17019 = vmatpush3.bf16.msra.mxu1 %v19498_v11  ;;  %v19543_v11 = vld [vmem:[%s26397_s1 + $0xec0] ss:$28 sps:$4 sm:$0xff]  }
 0x4ed   :  { %13000 = vmatpush1.bf16.msra.mxu0 %v19494_v18  ;;  %17020 = vmatprep.subr.bf16.mxu1 %v19502_v37  ;;  %v19539_v18 = vld [vmem:[%s26397_s1 + $0x15b8] ss:$28 sps:$4 sm:$0xff]  }
 0x4ee   :  { %13001 = vmatprep.subr.bf16.mxu0 %v19501_v13  ;;  %v19546_v13 = vld [vmem:[%s26397_s1 + $0x15f4] ss:$28 sps:$4 sm:$0xff]  }
 0x4ef   :  { %v19547_v37 = vld [vmem:[%s26397_s1 + $0x10b8] ss:$28 sps:$4 sm:$0xff]  }
 0x4f0   :  { %17021 = vmatpush3.bf16.msra.mxu1 %v19503_v53  ;;  %v19548_v53 = vld [vmem:[%s26397_s1 + $0xef8] ss:$28 sps:$4 sm:$0xff]  }
 0x4f1   :  { %13002 = vmatpush1.bf16.msra.mxu0 %v19499_v36  ;;  %17022 = vmatprep.subr.bf16.mxu1 %v19507_v14  ;;  %v19544_v36 = vld [vmem:[%s26397_s1 + $0x15f0] ss:$28 sps:$4 sm:$0xff]  }
 0x4f2   :  { %13003 = vmatprep.subr.bf16.mxu0 %v19506_v32  ;;  %v19551_v32 = vld [vmem:[%s26397_s1 + $0x162c] ss:$28 sps:$4 sm:$0xff]  }
 0x4f3   :  { %v19552_v14 = vld [vmem:[%s26397_s1 + $0x10f0] ss:$28 sps:$4 sm:$0xff]  }
 0x4f4   :  { %17023 = vmatpush3.bf16.msra.mxu1 %v19508_v34  ;;  %v19553_v34 = vld [vmem:[%s26397_s1 + $0xf30] ss:$28 sps:$4 sm:$0xff]  }
 0x4f5   :  { %13004 = vmatpush1.bf16.msra.mxu0 %v19504_v15  ;;  %17024 = vmatprep.subr.bf16.mxu1 %v19512_v20  ;;  %v19549_v15 = vld [vmem:[%s26397_s1 + $0x1628] ss:$28 sps:$4 sm:$0xff]  }
 0x4f6   :  { %13005 = vmatprep.subr.bf16.mxu0 %v19511_v16  ;;  %v19556_v16 = vld [vmem:[%s26397_s1 + $0x1664] ss:$28 sps:$4 sm:$0xff]  }
 0x4f7   :  { %v19557_v20 = vld [vmem:[%s26397_s1 + $0x1128] ss:$28 sps:$4 sm:$0xff]  }
 0x4f8   :  { %17025 = vmatpush3.bf16.msra.mxu1 %v19513_v40  ;;  %v19558_v40 = vld [vmem:[%s26397_s1 + $0xf68] ss:$28 sps:$4 sm:$0xff]  }
 0x4f9   :  { %13006 = vmatpush1.bf16.msra.mxu0 %v19509_v21  ;;  %17026 = vmatprep.subr.bf16.mxu1 %v19517_v56  ;;  %v19554_v21 = vld [vmem:[%s26397_s1 + $0x1660] ss:$28 sps:$4 sm:$0xff]  }
 0x4fa   :  { %13007 = vmatprep.subr.bf16.mxu0 %v19516_v41  ;;  %v19561_v41 = vld [vmem:[%s26397_s1 + $0x169c] ss:$28 sps:$4 sm:$0xff]  }
 0x4fb   :  { %v19562_v56 = vld [vmem:[%s26397_s1 + $0x1160] ss:$28 sps:$4 sm:$0xff]  }
 0x4fc   :  { %17027 = vmatpush3.bf16.msra.mxu1 %v19518_v51  ;;  %v19563_v51 = vld [vmem:[%s26397_s1 + $0xfa0] ss:$28 sps:$4 sm:$0xff]  }
 0x4fd   :  { %13008 = vmatpush1.bf16.msra.mxu0 %v19514_v45  ;;  %17028 = vmatprep.subr.bf16.mxu1 %v19522_v54  ;;  %v19559_v45 = vld [vmem:[%s26397_s1 + $0x1698] ss:$28 sps:$4 sm:$0xff]  }
 0x4fe   :  { %13009 = vmatprep.subr.bf16.mxu0 %v19521_v28  ;;  %v19566_v28 = vld [vmem:[%s26397_s1 + $0x16d4] ss:$28 sps:$4 sm:$0xff]  }
 0x4ff   :  { %v19567_v54 = vld [vmem:[%s26397_s1 + $0x1358] ss:$28 sps:$4 sm:$0xff]  }
 0x500   :  { %17029 = vmatpush3.bf16.msra.mxu1 %v19523_v58  ;;  %v19568_v58 = vld [vmem:[%s26397_s1 + $0x1198] ss:$28 sps:$4 sm:$0xff]  }
 0x501   :  { %13010 = vmatpush1.bf16.msra.mxu0 %v19519_v2  ;;  %17036 = vmatprep.subr.bf16.mxu1 %v19527_v60  ;;  %v19564_v2 = vld [vmem:[%s26397_s1 + $0x16d0] ss:$28 sps:$4 sm:$0xff]  }
 0x502   :  { %13020 = vmatprep.subr.bf16.mxu0 %v19526_v59  ;;  %v19571_v59 = vld [vmem:[%s26397_s1 + $0x170c] ss:$28 sps:$4 sm:$0xff]  }
 0x503   :  { %13583 = vmatmul.mubr.bf16.vlgmr.msra.gmra.mrb[20].mxu1 %v20787_v19  ;;  %v19537_v19 = vld [vmem:[%s26397_s1 + $0x1048] ss:$28 sps:$4 sm:$0xff]   ;;  %v19572_v60 = vld [vmem:[%s26397_s1 + $0x1390] ss:$28 sps:$4 sm:$0xff]  }
 0x504   :  { %13012 = vmatmul.mubr.bf16.vlgmr.msra.gmra.mrb[4].mxu0 %v21202_v47  ;;  %17037 = vmatpush3.bf16.msra.mxu1 %v19528_v62  ;;  %v19573_v62 = vld [vmem:[%s26397_s1 + $0x11d0] ss:$28 sps:$4 sm:$0xff]  }
 0x505   :  { %13021 = vmatpush1.bf16.msra.mxu0 %v19524_v24  ;;  %17038 = vmatprep.subr.bf16.mxu1 %v19532_v4  ;;  %v19569_v24 = vld [vmem:[%s26397_s1 + $0x1708] ss:$28 sps:$4 sm:$0xff]   ;;  %v19574_v4 = vld [vmem:[%s26397_s1 + $0x1740] ss:$28 sps:$4 sm:$0xff]  }
 0x506   :  { %13022 = vmatprep.subr.bf16.mxu0 %v19531_v63  ;;  %13622 = vmatprep.mubr.bf16.mxu1 %v20802_v23  ;;  %v19542_v23 = vld [vmem:[%s26397_s1 + $0x1080] ss:$28 sps:$4 sm:$0xff]  }
 0x507   :  { %13052 = vmatprep.mubr.bf16.mxu0 %v21220_v52  ;;  %v19576_v63 = vld [vmem:[%s26397_s1 + $0x1744] ss:$28 sps:$4 sm:$0xff]  }
 0x508   :  { %17039 = vmatpush3.bf16.msra.mxu1 %v19533_v8  ;;  %v19581_v8 = vld [vmem:[%s26397_s1 + $0x177c] ss:$28 sps:$4 sm:$0xff]  }
 0x509   :  { %13023 = vmatpush1.bf16.msra.mxu0 %v19529_v49  ;;  %17040 = vmatprep.subr.bf16.mxu1 %v19537_v19  ;;  %v19578_v49 = vld [vmem:[%s26397_s1 + $0x1208] ss:$28 sps:$4 sm:$0xff]   ;;  %v19583_v19 = vld [vmem:[%s26397_s1 + $0x1240] ss:$28 sps:$4 sm:$0xff]  }
 0x50a   :  { %13024 = vmatprep.subr.bf16.mxu0 %v19536_v26  ;;  %v19579_v26 = vld [vmem:[%s26397_s1 + $0x1778] ss:$28 sps:$4 sm:$0xff]  }
 0x50c   :  { %17041 = vmatpush3.bf16.msra.mxu1 %v19538_v48  ;;  %v19587_v48 = vld [vmem:[%s26397_s1 + $0x1438] ss:$28 sps:$4 sm:$0xff]  }
 0x50d   :  { %13025 = vmatpush1.bf16.msra.mxu0 %v19534_v6  ;;  %17042 = vmatprep.subr.bf16.mxu1 %v19542_v23  ;;  %v19586_v6 = vld [vmem:[%s26397_s1 + $0x17b4] ss:$28 sps:$4 sm:$0xff]  }
 0x50e   :  { %13026 = vmatprep.subr.bf16.mxu0 %v19541_v7  ;;  %v19584_v7 = vld [vmem:[%s26397_s1 + $0x17b0] ss:$28 sps:$4 sm:$0xff]   ;;  %v19588_v23 = vld [vmem:[%s26397_s1 + $0x1278] ss:$28 sps:$4 sm:$0xff]  }
 0x510   :  { %17043 = vmatpush3.bf16.msra.mxu1 %v19543_v11  ;;  %v19592_v11 = vld [vmem:[%s26397_s1 + $0x1470] ss:$28 sps:$4 sm:$0xff]  }
 0x511   :  { %13027 = vmatpush1.bf16.msra.mxu0 %v19539_v18  ;;  %17044 = vmatprep.subr.bf16.mxu1 %v19547_v37  ;;  %v19591_v18 = vld [vmem:[%s26397_s1 + $0x17ec] ss:$28 sps:$4 sm:$0xff]  }
 0x512   :  { %13028 = vmatprep.subr.bf16.mxu0 %v19546_v13  ;;  %v19589_v13 = vld [vmem:[%s26397_s1 + $0x17e8] ss:$28 sps:$4 sm:$0xff]   ;;  %v19593_v37 = vld [vmem:[%s26397_s1 + $0x12b0] ss:$28 sps:$4 sm:$0xff]  }
 0x514   :  { %17045 = vmatpush3.bf16.msra.mxu1 %v19548_v53  ;;  %v19597_v53 = vld [vmem:[%s26397_s1 + $0x14a8] ss:$28 sps:$4 sm:$0xff]  }
 0x515   :  { %13029 = vmatpush1.bf16.msra.mxu0 %v19544_v36  ;;  %17046 = vmatprep.subr.bf16.mxu1 %v19552_v14  ;;  %v19596_v36 = vld [vmem:[%s26397_s1 + $0x1824] ss:$28 sps:$4 sm:$0xff]  }
 0x516   :  { %13030 = vmatprep.subr.bf16.mxu0 %v19551_v32  ;;  %v19594_v32 = vld [vmem:[%s26397_s1 + $0x1820] ss:$28 sps:$4 sm:$0xff]   ;;  %v19598_v14 = vld [vmem:[%s26397_s1 + $0x12e8] ss:$28 sps:$4 sm:$0xff]  }
 0x518   :  { %17047 = vmatpush3.bf16.msra.mxu1 %v19553_v34  ;;  %v19602_v34 = vld [vmem:[%s26397_s1 + $0x14e0] ss:$28 sps:$4 sm:$0xff]  }
 0x519   :  { %13031 = vmatpush1.bf16.msra.mxu0 %v19549_v15  ;;  %17048 = vmatprep.subr.bf16.mxu1 %v19557_v20  ;;  %v19601_v15 = vld [vmem:[%s26397_s1 + $0x185c] ss:$28 sps:$4 sm:$0xff]  }
 0x51a   :  { %13032 = vmatprep.subr.bf16.mxu0 %v19556_v16  ;;  %v19599_v16 = vld [vmem:[%s26397_s1 + $0x1858] ss:$28 sps:$4 sm:$0xff]   ;;  %v19603_v20 = vld [vmem:[%s26397_s1 + $0x1320] ss:$28 sps:$4 sm:$0xff]  }
 0x51c   :  { %17049 = vmatpush3.bf16.msra.mxu1 %v19558_v40  ;;  %v19607_v40 = vld [vmem:[%s26397_s1 + $0x16d8] ss:$28 sps:$4 sm:$0xff]  }
 0x51d   :  { %13033 = vmatpush1.bf16.msra.mxu0 %v19554_v21  ;;  %17050 = vmatprep.subr.bf16.mxu1 %v19562_v56  ;;  %v19606_v21 = vld [vmem:[%s26397_s1 + $0x1894] ss:$28 sps:$4 sm:$0xff]  }
 0x51e   :  { %13034 = vmatprep.subr.bf16.mxu0 %v19561_v41  ;;  %v19604_v41 = vld [vmem:[%s26397_s1 + $0x1890] ss:$28 sps:$4 sm:$0xff]   ;;  %v19608_v56 = vld [vmem:[%s26397_s1 + $0x1518] ss:$28 sps:$4 sm:$0xff]  }
 0x520   :  { %17051 = vmatpush3.bf16.msra.mxu1 %v19563_v51  ;;  %v19612_v51 = vld [vmem:[%s26397_s1 + $0x1710] ss:$28 sps:$4 sm:$0xff]  }
 0x521   :  { %13035 = vmatpush1.bf16.msra.mxu0 %v19559_v45  ;;  %17058 = vmatprep.subr.bf16.mxu1 %v19567_v54  ;;  %v19611_v45 = vld [vmem:[%s26397_s1 + $0x18cc] ss:$28 sps:$4 sm:$0xff]  }
 0x522   :  { %13036 = vmatprep.subr.bf16.mxu0 %v19566_v28  ;;  %v19609_v28 = vld [vmem:[%s26397_s1 + $0x18c8] ss:$28 sps:$4 sm:$0xff]   ;;  %v19613_v54 = vld [vmem:[%s26397_s1 + $0x1550] ss:$28 sps:$4 sm:$0xff]  }
 0x523   :  { %13623 = vmatmul.mubr.bf16.vlgmr.msra.gmra.mrb[24].mxu1 %v20990_v30  ;;  %v19577_v30 = vld [vmem:[%s26397_s1 + $0x13c8] ss:$28 sps:$4 sm:$0xff]  }
 0x524   :  { %17059 = vmatpush3.bf16.msra.mxu1 %v19568_v58  ;;  %13662 = vmatprep.mubr.bf16.mxu1 %v21011_v35  ;;  %v19582_v35 = vld [vmem:[%s26397_s1 + $0x1400] ss:$28 sps:$4 sm:$0xff]  }
 0x525   :  { %13037 = vmatpush1.bf16.msra.mxu0 %v19564_v2  ;;  %17060 = vmatprep.subr.bf16.mxu1 %v19572_v60  ;;  %v19616_v2 = vld [vmem:[%s26397_s1 + $0x1904] ss:$28 sps:$4 sm:$0xff]   ;;  %v19621_v60 = vld [vmem:[%s26397_s1 + $0x193c] ss:$28 sps:$4 sm:$0xff]  }
 0x526   :  { %13038 = vmatprep.subr.bf16.mxu0 %v19571_v59  ;;  %v19614_v58 = vld [vmem:[%s26397_s1 + $0x1900] ss:$28 sps:$4 sm:$0xff]   ;;  %v19618_v59 = vld [vmem:[%s26397_s1 + $0x1588] ss:$28 sps:$4 sm:$0xff]  }
 0x528   :  { %17061 = vmatpush3.bf16.msra.mxu1 %v19573_v62  ;;  %v19623_v62 = vld [vmem:[%s26397_s1 + $0x15c0] ss:$28 sps:$4 sm:$0xff]  }
 0x529   :  { %13039 = vmatpush1.bf16.msra.mxu0 %v19569_v24  ;;  %17062 = vmatprep.subr.bf16.mxu1 %v19577_v30  ;;  %v19619_v24 = vld [vmem:[%s26397_s1 + $0x1938] ss:$28 sps:$4 sm:$0xff]  }
 0x52a   :  { %13040 = vmatprep.subr.bf16.mxu0 %v19576_v63  ;;  %v19626_v63 = vld [vmem:[%s26397_s1 + $0x1974] ss:$28 sps:$4 sm:$0xff]  }
 0x52b   :  { %v19627_v30 = vld [vmem:[%s26397_s1 + $0x17b8] ss:$28 sps:$4 sm:$0xff]  }
 0x52c   :  { %17063 = vmatpush3.bf16.msra.mxu1 %v19578_v49  ;;  %v19628_v49 = vld [vmem:[%s26397_s1 + $0x15f8] ss:$28 sps:$4 sm:$0xff]  }
 0x52d   :  { %13041 = vmatpush1.bf16.msra.mxu0 %v19574_v4  ;;  %17064 = vmatprep.subr.bf16.mxu1 %v19582_v35  ;;  %v19624_v4 = vld [vmem:[%s26397_s1 + $0x1970] ss:$28 sps:$4 sm:$0xff]  }
 0x52e   :  { %13042 = vmatprep.subr.bf16.mxu0 %v19581_v8  ;;  %v19631_v8 = vld [vmem:[%s26397_s1 + $0x19ac] ss:$28 sps:$4 sm:$0xff]  }
 0x52f   :  { %v19632_v35 = vld [vmem:[%s26397_s1 + $0x17f0] ss:$28 sps:$4 sm:$0xff]  }
 0x530   :  { %17065 = vmatpush3.bf16.msra.mxu1 %v19583_v19  ;;  %v19633_v19 = vld [vmem:[%s26397_s1 + $0x1630] ss:$28 sps:$4 sm:$0xff]  }
 0x531   :  { %13043 = vmatpush1.bf16.msra.mxu0 %v19579_v26  ;;  %17066 = vmatprep.subr.bf16.mxu1 %v19587_v48  ;;  %v19629_v26 = vld [vmem:[%s26397_s1 + $0x19a8] ss:$28 sps:$4 sm:$0xff]  }
 0x532   :  { %13044 = vmatprep.subr.bf16.mxu0 %v19586_v6  ;;  %v19636_v6 = vld [vmem:[%s26397_s1 + $0x19e4] ss:$28 sps:$4 sm:$0xff]  }
 0x533   :  { %v19637_v48 = vld [vmem:[%s26397_s1 + $0x1828] ss:$28 sps:$4 sm:$0xff]  }
 0x534   :  { %17067 = vmatpush3.bf16.msra.mxu1 %v19588_v23 }
 0x535   :  { %13045 = vmatpush1.bf16.msra.mxu0 %v19584_v7  ;;  %17068 = vmatprep.subr.bf16.mxu1 %v19592_v11  ;;  %v19634_v11 = vld [vmem:[%s26397_s1 + $0x19e0] ss:$28 sps:$4 sm:$0xff]  }
 0x536   :  { %13046 = vmatprep.subr.bf16.mxu0 %v19591_v18 }
 0x538   :  { %17069 = vmatpush3.bf16.msra.mxu1 %v19593_v37 }
 0x539   :  { %13047 = vmatpush1.bf16.msra.mxu0 %v19589_v13  ;;  %17070 = vmatprep.subr.bf16.mxu1 %v19597_v53  ;;  %v19638_v13 = vld [vmem:[%s26397_s1 + $0x1668] ss:$28 sps:$4 sm:$0xff]   ;;  %v19642_v53 = vld [vmem:[%s26397_s1 + $0x1860] ss:$28 sps:$4 sm:$0xff]  }
 0x53a   :  { %13048 = vmatprep.subr.bf16.mxu0 %v19596_v36  ;;  %v19641_v36 = vld [vmem:[%s26397_s1 + $0x1a1c] ss:$28 sps:$4 sm:$0xff]  }
 0x53c   :  { %17071 = vmatpush3.bf16.msra.mxu1 %v19598_v14  ;;  %v19643_v14 = vld [vmem:[%s26397_s1 + $0x16a0] ss:$28 sps:$4 sm:$0xff]  }
 0x53d   :  { %13049 = vmatpush1.bf16.msra.mxu0 %v19594_v32  ;;  %17072 = vmatprep.subr.bf16.mxu1 %v19602_v34  ;;  %v19639_v32 = vld [vmem:[%s26397_s1 + $0x1a18] ss:$28 sps:$4 sm:$0xff]  }
 0x53e   :  { %13050 = vmatprep.subr.bf16.mxu0 %v19601_v15  ;;  %v19646_v15 = vld [vmem:[%s26397_s1 + $0x1a54] ss:$28 sps:$4 sm:$0xff]  }
 0x53f   :  { %v19647_v34 = vld [vmem:[%s26397_s1 + $0x1a58] ss:$28 sps:$4 sm:$0xff]  }
 0x540   :  { %17073 = vmatpush3.bf16.msra.mxu1 %v19603_v20  ;;  %v19648_v20 = vld [vmem:[%s26397_s1 + $0x1898] ss:$28 sps:$4 sm:$0xff]  }
 0x541   :  { %13051 = vmatpush1.bf16.msra.mxu0 %v19599_v16  ;;  %17080 = vmatprep.subr.bf16.mxu1 %v19607_v40  ;;  %v19644_v16 = vld [vmem:[%s26397_s1 + $0x1a50] ss:$28 sps:$4 sm:$0xff]  }
 0x542   :  { %13061 = vmatprep.subr.bf16.mxu0 %v19606_v21  ;;  %v19651_v21 = vld [vmem:[%s26397_s1 + $0x1a8c] ss:$28 sps:$4 sm:$0xff]  }
 0x543   :  { %13663 = vmatmul.mubr.bf16.vlgmr.msra.gmra.mrb[28].mxu1 %v21202_v47  ;;  %v19617_v47 = vld [vmem:[%s26397_s1 + $0x1748] ss:$28 sps:$4 sm:$0xff]   ;;  %v19652_v40 = vld [vmem:[%s26397_s1 + $0x1a90] ss:$28 sps:$4 sm:$0xff]  }
 0x544   :  { %13053 = vmatmul.mubr.bf16.vlgmr.msra.gmra.mrb[4].mxu0 %v21413_v1  ;;  %17081 = vmatpush3.bf16.msra.mxu1 %v19608_v56  ;;  %v19653_v56 = vld [vmem:[%s26397_s1 + $0x18d0] ss:$28 sps:$4 sm:$0xff]  }
 0x545   :  { %13062 = vmatpush1.bf16.msra.mxu0 %v19604_v41  ;;  %17082 = vmatprep.subr.bf16.mxu1 %v19612_v51  ;;  %v19649_v41 = vld [vmem:[%s26397_s1 + $0x1a88] ss:$28 sps:$4 sm:$0xff]   ;;  %v19654_v51 = vld [vmem:[%s26397_s1 + $0x1ac0] ss:$28 sps:$4 sm:$0xff]  }
 0x546   :  { %13063 = vmatprep.subr.bf16.mxu0 %v19611_v45  ;;  %13702 = vmatprep.mubr.bf16.mxu1 %v21220_v52  ;;  %v19622_v52 = vld [vmem:[%s26397_s1 + $0x1780] ss:$28 sps:$4 sm:$0xff]  }
 0x547   :  { %13093 = vmatprep.mubr.bf16.mxu0 %v21429_v5  ;;  %v19656_v45 = vld [vmem:[%s26397_s1 + $0x1ac4] ss:$28 sps:$4 sm:$0xff]  }
 0x548   :  { %17083 = vmatpush3.bf16.msra.mxu1 %v19613_v54  ;;  %v19661_v54 = vld [vmem:[%s26397_s1 + $0x1afc] ss:$28 sps:$4 sm:$0xff]  }
 0x549   :  { %13064 = vmatpush1.bf16.msra.mxu0 %v19609_v28  ;;  %17084 = vmatprep.subr.bf16.mxu1 %v19617_v47  ;;  %v19658_v28 = vld [vmem:[%s26397_s1 + $0x1908] ss:$28 sps:$4 sm:$0xff]   ;;  %v19663_v47 = vld [vmem:[%s26397_s1 + $0x1940] ss:$28 sps:$4 sm:$0xff]  }
 0x54a   :  { %13065 = vmatprep.subr.bf16.mxu0 %v19616_v2  ;;  %v19659_v2 = vld [vmem:[%s26397_s1 + $0x1af8] ss:$28 sps:$4 sm:$0xff]  }
 0x54c   :  { %17085 = vmatpush3.bf16.msra.mxu1 %v19618_v59  ;;  %v19667_v59 = vld [vmem:[%s26397_s1 + $0x1b38] ss:$28 sps:$4 sm:$0xff]  }
 0x54d   :  { %13066 = vmatpush1.bf16.msra.mxu0 %v19614_v58  ;;  %17086 = vmatprep.subr.bf16.mxu1 %v19622_v52  ;;  %v19666_v58 = vld [vmem:[%s26397_s1 + $0x1b34] ss:$28 sps:$4 sm:$0xff]  }
 0x54e   :  { %13067 = vmatprep.subr.bf16.mxu0 %v19621_v60  ;;  %v19664_v60 = vld [vmem:[%s26397_s1 + $0x1b30] ss:$28 sps:$4 sm:$0xff]   ;;  %v19668_v52 = vld [vmem:[%s26397_s1 + $0x1978] ss:$28 sps:$4 sm:$0xff]  }
 0x550   :  { %17087 = vmatpush3.bf16.msra.mxu1 %v19623_v62  ;;  %v19672_v62 = vld [vmem:[%s26397_s1 + $0x1b70] ss:$28 sps:$4 sm:$0xff]  }
 0x551   :  { %13068 = vmatpush1.bf16.msra.mxu0 %v19619_v24  ;;  %17088 = vmatprep.subr.bf16.mxu1 %v19627_v30  ;;  %v19671_v24 = vld [vmem:[%s26397_s1 + $0x1b6c] ss:$28 sps:$4 sm:$0xff]  }
 0x552   :  { %13069 = vmatprep.subr.bf16.mxu0 %v19626_v63  ;;  %v19669_v63 = vld [vmem:[%s26397_s1 + $0x1b68] ss:$28 sps:$4 sm:$0xff]   ;;  %v19673_v30 = vld [vmem:[%s26397_s1 + $0x19b0] ss:$28 sps:$4 sm:$0xff]  }
 0x554   :  { %17089 = vmatpush3.bf16.msra.mxu1 %v19628_v49  ;;  %v19677_v49 = vld [vmem:[%s26397_s1 + $0x1ba8] ss:$28 sps:$4 sm:$0xff]  }
 0x555   :  { %13070 = vmatpush1.bf16.msra.mxu0 %v19624_v4  ;;  %17090 = vmatprep.subr.bf16.mxu1 %v19632_v35  ;;  %v19676_v4 = vld [vmem:[%s26397_s1 + $0x1ba4] ss:$28 sps:$4 sm:$0xff]  }
 0x556   :  { %13071 = vmatprep.subr.bf16.mxu0 %v19631_v8  ;;  %v24766_v7 = vpop.f32.mrb[4].mxu1  ;;  %v19674_v8 = vld [vmem:[%s26397_s1 + $0x1ba0] ss:$28 sps:$4 sm:$0xff]   ;;  %v19678_v35 = vld [vmem:[%s26397_s1 + $0x19e8] ss:$28 sps:$4 sm:$0xff]  }
 0x557   :  { %v24768_v23 = vpop.f32.mrb[5].mxu1 }
 0x558   :  { %v12771_v18 = vpop.f32.mrb[6].mxu1  ;;  %17091 = vmatpush3.bf16.msra.mxu1 %v19633_v19  ;;  %v19682_v19 = vld [vmem:[%s26397_s1 + $0x1be0] ss:$28 sps:$4 sm:$0xff]  }
 0x559   :  { %13072 = vmatpush1.bf16.msra.mxu0 %v19629_v26  ;;  %v12772_v37 = vpop.f32.mrb[7].mxu1  ;;  %17092 = vmatprep.subr.bf16.mxu1 %v19637_v48  ;;  %v19681_v26 = vld [vmem:[%s26397_s1 + $0x1bdc] ss:$28 sps:$4 sm:$0xff]   ;;  %v19686_v18 = vld [vmem:[%s26397_s1 + $0x1c14] ss:$28 sps:$4 sm:$0xff]  }
 0x55a   :  { %13073 = vmatprep.subr.bf16.mxu0 %v19636_v6  ;;  %v19679_v6 = vld [vmem:[%s26397_s1 + $0x1bd8] ss:$28 sps:$4 sm:$0xff]   ;;  %v19683_v48 = vld [vmem:[%s26397_s1 + $0x1a20] ss:$28 sps:$4 sm:$0xff]  }
 0x55b   :  { %v19688_v37 = vld [vmem:[%s26397_s1 + $0x1c18] ss:$28 sps:$4 sm:$0xff]  }
 0x55c   :  { %17093 = vmatpush3.bf16.msra.mxu1 %v19638_v13  ;;  %v19684_v13 = vld [vmem:[%s26397_s1 + $0x1c10] ss:$28 sps:$4 sm:$0xff]  }
 0x55d   :  { %13074 = vmatpush1.bf16.msra.mxu0 %v19634_v11  ;;  %17094 = vmatprep.subr.bf16.mxu1 %v19642_v53  ;;  %v19687_v11 = vld [vmem:[%s26397_s1 + $0x1dd8] ss:$28 sps:$4 sm:$0xff]   ;;  %v19692_v53 = vld [vmem:[%s26397_s1 + $0x1e10] ss:$28 sps:$4 sm:$0xff]  }
 0x55e   :  { %13075 = vmatprep.subr.bf16.mxu0 %v19641_v36  ;;  %v19691_v36 = vld [vmem:[%s26397_s1 + $0x1c4c] ss:$28 sps:$4 sm:$0xff]  }
 0x560   :  { %17095 = vmatpush3.bf16.msra.mxu1 %v19643_v14  ;;  %v19693_v14 = vld [vmem:[%s26397_s1 + $0x1c50] ss:$28 sps:$4 sm:$0xff]  }
 0x561   :  { %13076 = vmatpush1.bf16.msra.mxu0 %v19639_v32  ;;  %17102 = vmatprep.subr.bf16.mxu1 %v19647_v34  ;;  %v19689_v32 = vld [vmem:[%s26397_s1 + $0x1c48] ss:$28 sps:$4 sm:$0xff]   ;;  %v19694_v34 = vld [vmem:[%s26397_s1 + $0x1c80] ss:$28 sps:$4 sm:$0xff]  }
 0x562   :  { %13077 = vmatprep.subr.bf16.mxu0 %v19646_v15  ;;  %v19696_v15 = vld [vmem:[%s26397_s1 + $0x1c84] ss:$28 sps:$4 sm:$0xff]  }
 0x563   :  { %13703 = vmatmul.mubr.bf16.vlgmr.msra.gmra.mrb[32].mxu1 %v21413_v1  ;;  %v19657_v1 = vld [vmem:[%s26397_s1 + $0x1ac8] ss:$28 sps:$4 sm:$0xff]  }
 0x564   :  { %17103 = vmatpush3.bf16.msra.mxu1 %v19648_v20  ;;  %13742 = vmatprep.mubr.bf16.mxu1 %v21429_v5  ;;  %v19662_v5 = vld [vmem:[%s26397_s1 + $0x1b00] ss:$28 sps:$4 sm:$0xff]  }
 0x565   :  { %13078 = vmatpush1.bf16.msra.mxu0 %v19644_v16  ;;  %17104 = vmatprep.subr.bf16.mxu1 %v19652_v40  ;;  %v19698_v16 = vld [vmem:[%s26397_s1 + $0x1c88] ss:$28 sps:$4 sm:$0xff]   ;;  %v19701_v20 = vld [vmem:[%s26397_s1 + $0x1cbc] ss:$28 sps:$4 sm:$0xff]  }
 0x566   :  { %13079 = vmatprep.subr.bf16.mxu0 %v19651_v21  ;;  %v19699_v21 = vld [vmem:[%s26397_s1 + $0x1cb8] ss:$28 sps:$4 sm:$0xff]   ;;  %v19703_v40 = vld [vmem:[%s26397_s1 + $0x1cc0] ss:$28 sps:$4 sm:$0xff]  }
 0x568   :  { %17105 = vmatpush3.bf16.msra.mxu1 %v19653_v56  ;;  %v19707_v56 = vld [vmem:[%s26397_s1 + $0x1eb8] ss:$28 sps:$4 sm:$0xff]  }
 0x569   :  { %13080 = vmatpush1.bf16.msra.mxu0 %v19649_v41  ;;  %17106 = vmatprep.subr.bf16.mxu1 %v19657_v1  ;;  %v19706_v41 = vld [vmem:[%s26397_s1 + $0x1cf4] ss:$28 sps:$4 sm:$0xff]  }
 0x56a   :  { %13081 = vmatprep.subr.bf16.mxu0 %v19656_v45  ;;  %v19704_v45 = vld [vmem:[%s26397_s1 + $0x1cf0] ss:$28 sps:$4 sm:$0xff]   ;;  %v19708_v1 = vld [vmem:[%s26397_s1 + $0x1cf8] ss:$28 sps:$4 sm:$0xff]  }
 0x56c   :  { %17107 = vmatpush3.bf16.msra.mxu1 %v19658_v28  ;;  %v19712_v28 = vld [vmem:[%s26397_s1 + $0x1ef0] ss:$28 sps:$4 sm:$0xff]  }
 0x56d   :  { %13082 = vmatpush1.bf16.msra.mxu0 %v19654_v51  ;;  %17108 = vmatprep.subr.bf16.mxu1 %v19662_v5  ;;  %v19711_v51 = vld [vmem:[%s26397_s1 + $0x1d2c] ss:$28 sps:$4 sm:$0xff]  }
 0x56e   :  { %13083 = vmatprep.subr.bf16.mxu0 %v19661_v54  ;;  %v19709_v54 = vld [vmem:[%s26397_s1 + $0x1d28] ss:$28 sps:$4 sm:$0xff]   ;;  %v19713_v5 = vld [vmem:[%s26397_s1 + $0x1d30] ss:$28 sps:$4 sm:$0xff]  }
 0x570   :  { %17109 = vmatpush3.bf16.msra.mxu1 %v19663_v47  ;;  %v19717_v47 = vld [vmem:[%s26397_s1 + $0x1f28] ss:$28 sps:$4 sm:$0xff]  }
 0x571   :  { %13084 = vmatpush1.bf16.msra.mxu0 %v19659_v2  ;;  %17110 = vmatprep.subr.bf16.mxu1 %v19667_v59  ;;  %v19716_v2 = vld [vmem:[%s26397_s1 + $0x1d64] ss:$28 sps:$4 sm:$0xff]  }
 0x572   :  { %13085 = vmatprep.subr.bf16.mxu0 %v19666_v58  ;;  %v19714_v58 = vld [vmem:[%s26397_s1 + $0x1d60] ss:$28 sps:$4 sm:$0xff]   ;;  %v19718_v59 = vld [vmem:[%s26397_s1 + $0x1d68] ss:$28 sps:$4 sm:$0xff]  }
 0x574   :  { %17111 = vmatpush3.bf16.msra.mxu1 %v19668_v52  ;;  %v19722_v52 = vld [vmem:[%s26397_s1 + $0x1f60] ss:$28 sps:$4 sm:$0xff]  }
 0x575   :  { %13086 = vmatpush1.bf16.msra.mxu0 %v19664_v60  ;;  %17112 = vmatprep.subr.bf16.mxu1 %v19672_v62  ;;  %v19721_v60 = vld [vmem:[%s26397_s1 + $0x1d9c] ss:$28 sps:$4 sm:$0xff]  }
 0x576   :  { %13087 = vmatprep.subr.bf16.mxu0 %v19671_v24  ;;  %v19719_v24 = vld [vmem:[%s26397_s1 + $0x1d98] ss:$28 sps:$4 sm:$0xff]   ;;  %v19723_v62 = vld [vmem:[%s26397_s1 + $0x1da0] ss:$28 sps:$4 sm:$0xff]  }
 0x578   :  { %17113 = vmatpush3.bf16.msra.mxu1 %v19673_v30  ;;  %v19727_v30 = vld [vmem:[%s26397_s1 + $0x2158] ss:$28 sps:$4 sm:$0xff]  }
 0x579   :  { %13088 = vmatpush1.bf16.msra.mxu0 %v19669_v63  ;;  %17114 = vmatprep.subr.bf16.mxu1 %v19677_v49  ;;  %v19726_v63 = vld [vmem:[%s26397_s1 + $0x1dd4] ss:$28 sps:$4 sm:$0xff]  }
 0x57a   :  { %13089 = vmatprep.subr.bf16.mxu0 %v19676_v4  ;;  %v19724_v4 = vld [vmem:[%s26397_s1 + $0x1dd0] ss:$28 sps:$4 sm:$0xff]   ;;  %v19728_v49 = vld [vmem:[%s26397_s1 + $0x1f98] ss:$28 sps:$4 sm:$0xff]  }
 0x57c   :  { %17115 = vmatpush3.bf16.msra.mxu1 %v19678_v35  ;;  %v19732_v35 = vld [vmem:[%s26397_s1 + $0x2190] ss:$28 sps:$4 sm:$0xff]  }
 0x57d   :  { %13090 = vmatpush1.bf16.msra.mxu0 %v19674_v8  ;;  %17116 = vmatprep.subr.bf16.mxu1 %v19682_v19  ;;  %v19731_v8 = vld [vmem:[%s26397_s1 + $0x1e0c] ss:$28 sps:$4 sm:$0xff]  }
 0x57e   :  { %13091 = vmatprep.subr.bf16.mxu0 %v19681_v26  ;;  %v19729_v26 = vld [vmem:[%s26397_s1 + $0x1e08] ss:$28 sps:$4 sm:$0xff]   ;;  %v19733_v19 = vld [vmem:[%s26397_s1 + $0x1fd0] ss:$28 sps:$4 sm:$0xff]  }
 0x580   :  { %17117 = vmatpush3.bf16.msra.mxu1 %v19683_v48  ;;  %v19737_v48 = vld [vmem:[%s26397_s1 + $0x21c8] ss:$28 sps:$4 sm:$0xff]  }
 0x581   :  { %13092 = vmatpush1.bf16.msra.mxu0 %v19679_v6  ;;  %17124 = vmatprep.subr.bf16.mxu1 %v19687_v11  ;;  %v19736_v6 = vld [vmem:[%s26397_s1 + $0x1e44] ss:$28 sps:$4 sm:$0xff]  }
 0x582   :  { %13102 = vmatprep.subr.bf16.mxu0 %v19686_v18  ;;  %v19734_v18 = vld [vmem:[%s26397_s1 + $0x1e40] ss:$28 sps:$4 sm:$0xff]   ;;  %v19738_v11 = vld [vmem:[%s26397_s1 + $0x2008] ss:$28 sps:$4 sm:$0xff]  }
 0x583   :  { %13743 = vmatmul.mubr.bf16.vlgmr.msra.gmra.mrb[36].mxu1 %v21622_v25 }
 0x584   :  { %13094 = vmatmul.mubr.bf16.vlgmr.msra.gmra.mrb[4].mxu0 %v21622_v25  ;;  %17125 = vmatpush3.bf16.msra.mxu1 %v19688_v37  ;;  %v19697_v25 = vld [vmem:[%s26397_s1 + $0x1e48] ss:$28 sps:$4 sm:$0xff]   ;;  %v19742_v37 = vld [vmem:[%s26397_s1 + $0x2200] ss:$28 sps:$4 sm:$0xff]  }
 0x585   :  { %13103 = vmatpush1.bf16.msra.mxu0 %v19684_v13  ;;  %17126 = vmatprep.subr.bf16.mxu1 %v19692_v53  ;;  %v19741_v13 = vld [vmem:[%s26397_s1 + $0x1e7c] ss:$28 sps:$4 sm:$0xff]  }
 0x586   :  { %13104 = vmatprep.subr.bf16.mxu0 %v19691_v36  ;;  %13782 = vmatprep.mubr.bf16.mxu1 %v21638_v29  ;;  %v19739_v36 = vld [vmem:[%s26397_s1 + $0x1e78] ss:$28 sps:$4 sm:$0xff]   ;;  %v19743_v53 = vld [vmem:[%s26397_s1 + $0x2040] ss:$28 sps:$4 sm:$0xff]  }
 0x587   :  { %13134 = vmatprep.mubr.bf16.mxu0 %v21638_v29  ;;  %v19702_v29 = vld [vmem:[%s26397_s1 + $0x1e80] ss:$28 sps:$4 sm:$0xff]  }
 0x588   :  { %17127 = vmatpush3.bf16.msra.mxu1 %v19693_v14  ;;  %v19747_v14 = vld [vmem:[%s26397_s1 + $0x2238] ss:$28 sps:$4 sm:$0xff]  }
 0x589   :  { %13105 = vmatpush1.bf16.msra.mxu0 %v19689_v32  ;;  %17128 = vmatprep.subr.bf16.mxu1 %v19697_v25  ;;  %v19746_v32 = vld [vmem:[%s26397_s1 + $0x1eb4] ss:$28 sps:$4 sm:$0xff]  }
 0x58a   :  { %13106 = vmatprep.subr.bf16.mxu0 %v19696_v15  ;;  %v19744_v15 = vld [vmem:[%s26397_s1 + $0x1eb0] ss:$28 sps:$4 sm:$0xff]   ;;  %v19748_v25 = vld [vmem:[%s26397_s1 + $0x2078] ss:$28 sps:$4 sm:$0xff]  }
 0x58c   :  { %17129 = vmatpush3.bf16.msra.mxu1 %v19698_v16  ;;  %v19752_v16 = vld [vmem:[%s26397_s1 + $0x2270] ss:$28 sps:$4 sm:$0xff]  }
 0x58d   :  { %13107 = vmatpush1.bf16.msra.mxu0 %v19694_v34  ;;  %17130 = vmatprep.subr.bf16.mxu1 %v19702_v29  ;;  %v19751_v34 = vld [vmem:[%s26397_s1 + $0x1eec] ss:$28 sps:$4 sm:$0xff]  }
 0x58e   :  { %13108 = vmatprep.subr.bf16.mxu0 %v19701_v20  ;;  %v19749_v20 = vld [vmem:[%s26397_s1 + $0x1ee8] ss:$28 sps:$4 sm:$0xff]   ;;  %v19753_v29 = vld [vmem:[%s26397_s1 + $0x20b0] ss:$28 sps:$4 sm:$0xff]  }
 0x590   :  { %17131 = vmatpush3.bf16.msra.mxu1 %v19703_v40  ;;  %v19757_v40 = vld [vmem:[%s26397_s1 + $0x22a8] ss:$28 sps:$4 sm:$0xff]  }
 0x591   :  { %13109 = vmatpush1.bf16.msra.mxu0 %v19699_v21  ;;  %17132 = vmatprep.subr.bf16.mxu1 %v19707_v56  ;;  %v19756_v21 = vld [vmem:[%s26397_s1 + $0x1f24] ss:$28 sps:$4 sm:$0xff]  }
 0x592   :  { %13110 = vmatprep.subr.bf16.mxu0 %v19706_v41  ;;  %v19754_v41 = vld [vmem:[%s26397_s1 + $0x1f20] ss:$28 sps:$4 sm:$0xff]   ;;  %v19758_v56 = vld [vmem:[%s26397_s1 + $0x20e8] ss:$28 sps:$4 sm:$0xff]  }
 0x594   :  { %17133 = vmatpush3.bf16.msra.mxu1 %v19708_v1  ;;  %v19762_v1 = vld [vmem:[%s26397_s1 + $0x22e0] ss:$28 sps:$4 sm:$0xff]  }
 0x595   :  { %13111 = vmatpush1.bf16.msra.mxu0 %v19704_v45  ;;  %17134 = vmatprep.subr.bf16.mxu1 %v19712_v28  ;;  %v19761_v45 = vld [vmem:[%s26397_s1 + $0x1f5c] ss:$28 sps:$4 sm:$0xff]  }
 0x596   :  { %13112 = vmatprep.subr.bf16.mxu0 %v19711_v51  ;;  %v19759_v51 = vld [vmem:[%s26397_s1 + $0x1f58] ss:$28 sps:$4 sm:$0xff]   ;;  %v19763_v28 = vld [vmem:[%s26397_s1 + $0x2120] ss:$28 sps:$4 sm:$0xff]  }
 0x598   :  { %17135 = vmatpush3.bf16.msra.mxu1 %v19713_v5  ;;  %v19767_v5 = vld [vmem:[%s26397_s1 + $0x24d8] ss:$28 sps:$4 sm:$0xff]  }
 0x599   :  { %13113 = vmatpush1.bf16.msra.mxu0 %v19709_v54  ;;  %17136 = vmatprep.subr.bf16.mxu1 %v19717_v47  ;;  %v19766_v54 = vld [vmem:[%s26397_s1 + $0x1f94] ss:$28 sps:$4 sm:$0xff]  }
 0x59a   :  { %13114 = vmatprep.subr.bf16.mxu0 %v19716_v2  ;;  %v19764_v2 = vld [vmem:[%s26397_s1 + $0x1f90] ss:$28 sps:$4 sm:$0xff]   ;;  %v19768_v47 = vld [vmem:[%s26397_s1 + $0x2318] ss:$28 sps:$4 sm:$0xff]  }
 0x59c   :  { %17137 = vmatpush3.bf16.msra.mxu1 %v19718_v59  ;;  %v19772_v59 = vld [vmem:[%s26397_s1 + $0x2510] ss:$28 sps:$4 sm:$0xff]  }
 0x59d   :  { %13115 = vmatpush1.bf16.msra.mxu0 %v19714_v58  ;;  %17138 = vmatprep.subr.bf16.mxu1 %v19722_v52  ;;  %v19771_v58 = vld [vmem:[%s26397_s1 + $0x1fcc] ss:$28 sps:$4 sm:$0xff]  }
 0x59e   :  { %13116 = vmatprep.subr.bf16.mxu0 %v19721_v60  ;;  %v19769_v60 = vld [vmem:[%s26397_s1 + $0x1fc8] ss:$28 sps:$4 sm:$0xff]   ;;  %v19773_v52 = vld [vmem:[%s26397_s1 + $0x2350] ss:$28 sps:$4 sm:$0xff]  }
 0x5a0   :  { %17139 = vmatpush3.bf16.msra.mxu1 %v19723_v62  ;;  %v19774_v62 = vld [vmem:[%s26397_s1 + $0x2000] ss:$28 sps:$4 sm:$0xff]  }
 0x5a1   :  { %13117 = vmatpush1.bf16.msra.mxu0 %v19719_v24  ;;  %17146 = vmatprep.subr.bf16.mxu1 %v19727_v30  ;;  %v19776_v24 = vld [vmem:[%s26397_s1 + $0x2004] ss:$28 sps:$4 sm:$0xff]   ;;  %v19781_v30 = vld [vmem:[%s26397_s1 + $0x203c] ss:$28 sps:$4 sm:$0xff]  }
 0x5a2   :  { %13118 = vmatprep.subr.bf16.mxu0 %v19726_v63  ;;  %v19778_v63 = vld [vmem:[%s26397_s1 + $0x2388] ss:$28 sps:$4 sm:$0xff]  }
 0x5a3   :  { %13783 = vmatmul.mubr.bf16.vlgmr.msra.gmra.mrb[40].mxu1 %v21835_v57 }
 0x5a4   :  { %17147 = vmatpush3.bf16.msra.mxu1 %v19728_v49  ;;  %13822 = vmatprep.mubr.bf16.mxu1 %v21851_v61  ;;  %v19783_v49 = vld [vmem:[%s26397_s1 + $0x23c0] ss:$28 sps:$4 sm:$0xff]  }
 0x5a5   :  { %13119 = vmatpush1.bf16.msra.mxu0 %v19724_v4  ;;  %17148 = vmatprep.subr.bf16.mxu1 %v19732_v35  ;;  %v19779_v4 = vld [vmem:[%s26397_s1 + $0x2038] ss:$28 sps:$4 sm:$0xff]  }
 0x5a6   :  { %13120 = vmatprep.subr.bf16.mxu0 %v19731_v8  ;;  %v19786_v8 = vld [vmem:[%s26397_s1 + $0x2074] ss:$28 sps:$4 sm:$0xff]  }
 0x5a7   :  { %v19787_v35 = vld [vmem:[%s26397_s1 + $0x25b8] ss:$28 sps:$4 sm:$0xff]  }
 0x5a8   :  { %17149 = vmatpush3.bf16.msra.mxu1 %v19733_v19  ;;  %v19788_v19 = vld [vmem:[%s26397_s1 + $0x23f8] ss:$28 sps:$4 sm:$0xff]  }
 0x5a9   :  { %13121 = vmatpush1.bf16.msra.mxu0 %v19729_v26  ;;  %17150 = vmatprep.subr.bf16.mxu1 %v19737_v48  ;;  %v19784_v26 = vld [vmem:[%s26397_s1 + $0x2070] ss:$28 sps:$4 sm:$0xff]  }
 0x5aa   :  { %13122 = vmatprep.subr.bf16.mxu0 %v19736_v6  ;;  %v19791_v6 = vld [vmem:[%s26397_s1 + $0x20ac] ss:$28 sps:$4 sm:$0xff]  }
 0x5ab   :  { %v19792_v48 = vld [vmem:[%s26397_s1 + $0x25f0] ss:$28 sps:$4 sm:$0xff]  }
 0x5ac   :  { %17151 = vmatpush3.bf16.msra.mxu1 %v19738_v11  ;;  %v19793_v11 = vld [vmem:[%s26397_s1 + $0x2430] ss:$28 sps:$4 sm:$0xff]  }
 0x5ad   :  { %13123 = vmatpush1.bf16.msra.mxu0 %v19734_v18  ;;  %17152 = vmatprep.subr.bf16.mxu1 %v19742_v37  ;;  %v19789_v18 = vld [vmem:[%s26397_s1 + $0x20a8] ss:$28 sps:$4 sm:$0xff]  }
 0x5ae   :  { %13124 = vmatprep.subr.bf16.mxu0 %v19741_v13  ;;  %v19796_v13 = vld [vmem:[%s26397_s1 + $0x20e4] ss:$28 sps:$4 sm:$0xff]  }
 0x5af   :  { %v19797_v37 = vld [vmem:[%s26397_s1 + $0x2628] ss:$28 sps:$4 sm:$0xff]  }
 0x5b0   :  { %17153 = vmatpush3.bf16.msra.mxu1 %v19743_v53  ;;  %v19798_v53 = vld [vmem:[%s26397_s1 + $0x2468] ss:$28 sps:$4 sm:$0xff]  }
 0x5b1   :  { %13125 = vmatpush1.bf16.msra.mxu0 %v19739_v36  ;;  %17154 = vmatprep.subr.bf16.mxu1 %v19747_v14  ;;  %v19794_v36 = vld [vmem:[%s26397_s1 + $0x20e0] ss:$28 sps:$4 sm:$0xff]  }
 0x5b2   :  { %13126 = vmatprep.subr.bf16.mxu0 %v19746_v32  ;;  %v19801_v32 = vld [vmem:[%s26397_s1 + $0x211c] ss:$28 sps:$4 sm:$0xff]  }
 0x5b3   :  { %v19802_v14 = vld [vmem:[%s26397_s1 + $0x2660] ss:$28 sps:$4 sm:$0xff]  }
 0x5b4   :  { %17155 = vmatpush3.bf16.msra.mxu1 %v19748_v25  ;;  %v19803_v25 = vld [vmem:[%s26397_s1 + $0x24a0] ss:$28 sps:$4 sm:$0xff]  }
 0x5b5   :  { %13127 = vmatpush1.bf16.msra.mxu0 %v19744_v15  ;;  %17156 = vmatprep.subr.bf16.mxu1 %v19752_v16  ;;  %v19799_v15 = vld [vmem:[%s26397_s1 + $0x2118] ss:$28 sps:$4 sm:$0xff]  }
 0x5b6   :  { %13128 = vmatprep.subr.bf16.mxu0 %v19751_v34  ;;  %v19806_v34 = vld [vmem:[%s26397_s1 + $0x2154] ss:$28 sps:$4 sm:$0xff]  }
 0x5b7   :  { %v19807_v16 = vld [vmem:[%s26397_s1 + $0x2858] ss:$28 sps:$4 sm:$0xff]  }
 0x5b8   :  { %17157 = vmatpush3.bf16.msra.mxu1 %v19753_v29  ;;  %v19808_v29 = vld [vmem:[%s26397_s1 + $0x2698] ss:$28 sps:$4 sm:$0xff]  }
 0x5b9   :  { %13129 = vmatpush1.bf16.msra.mxu0 %v19749_v20  ;;  %17158 = vmatprep.subr.bf16.mxu1 %v19757_v40  ;;  %v19804_v20 = vld [vmem:[%s26397_s1 + $0x2150] ss:$28 sps:$4 sm:$0xff]  }
 0x5ba   :  { %13130 = vmatprep.subr.bf16.mxu0 %v19756_v21  ;;  %v19811_v21 = vld [vmem:[%s26397_s1 + $0x218c] ss:$28 sps:$4 sm:$0xff]  }
 0x5bb   :  { %v19812_v40 = vld [vmem:[%s26397_s1 + $0x2890] ss:$28 sps:$4 sm:$0xff]  }
 0x5bc   :  { %17159 = vmatpush3.bf16.msra.mxu1 %v19758_v56  ;;  %v19813_v56 = vld [vmem:[%s26397_s1 + $0x26d0] ss:$28 sps:$4 sm:$0xff]  }
 0x5bd   :  { %13131 = vmatpush1.bf16.msra.mxu0 %v19754_v41  ;;  %17160 = vmatprep.subr.bf16.mxu1 %v19762_v1  ;;  %v19809_v41 = vld [vmem:[%s26397_s1 + $0x2188] ss:$28 sps:$4 sm:$0xff]  }
 0x5be   :  { %13132 = vmatprep.subr.bf16.mxu0 %v19761_v45  ;;  %v19816_v45 = vld [vmem:[%s26397_s1 + $0x21c4] ss:$28 sps:$4 sm:$0xff]  }
 0x5bf   :  { %v19817_v1 = vld [vmem:[%s26397_s1 + $0x28c8] ss:$28 sps:$4 sm:$0xff]  }
 0x5c0   :  { %17161 = vmatpush3.bf16.msra.mxu1 %v19763_v28  ;;  %v19818_v28 = vld [vmem:[%s26397_s1 + $0x2708] ss:$28 sps:$4 sm:$0xff]  }
 0x5c1   :  { %13133 = vmatpush1.bf16.msra.mxu0 %v19759_v51  ;;  %17168 = vmatprep.subr.bf16.mxu1 %v19767_v5  ;;  %v19814_v51 = vld [vmem:[%s26397_s1 + $0x21c0] ss:$28 sps:$4 sm:$0xff]  }
 0x5c2   :  { %13143 = vmatprep.subr.bf16.mxu0 %v19766_v54  ;;  %v19821_v54 = vld [vmem:[%s26397_s1 + $0x21fc] ss:$28 sps:$4 sm:$0xff]  }
 0x5c3   :  { %13823 = vmatmul.mubr.bf16.vlgmr.msra.gmra.mrb[44].mxu1 %v22044_v27  ;;  %v19822_v5 = vld [vmem:[%s26397_s1 + $0x2900] ss:$28 sps:$4 sm:$0xff]  }
 0x5c4   :  { %13135 = vmatmul.mubr.bf16.vlgmr.msra.gmra.mrb[4].mxu0 %v21835_v57  ;;  %17169 = vmatpush3.bf16.msra.mxu1 %v19768_v47  ;;  %v19777_v57 = vld [vmem:[%s26397_s1 + $0x2548] ss:$28 sps:$4 sm:$0xff]   ;;  %v19823_v47 = vld [vmem:[%s26397_s1 + $0x2740] ss:$28 sps:$4 sm:$0xff]  }
 0x5c5   :  { %13144 = vmatpush1.bf16.msra.mxu0 %v19764_v2  ;;  %17170 = vmatprep.subr.bf16.mxu1 %v19772_v59  ;;  %v19819_v2 = vld [vmem:[%s26397_s1 + $0x21f8] ss:$28 sps:$4 sm:$0xff]  }
 0x5c6   :  { %13145 = vmatprep.subr.bf16.mxu0 %v19771_v58  ;;  %13862 = vmatprep.mubr.bf16.mxu1 %v22060_v22  ;;  %v19826_v58 = vld [vmem:[%s26397_s1 + $0x2234] ss:$28 sps:$4 sm:$0xff]  }
 0x5c7   :  { %13175 = vmatprep.mubr.bf16.mxu0 %v21851_v61  ;;  %v19782_v61 = vld [vmem:[%s26397_s1 + $0x2580] ss:$28 sps:$4 sm:$0xff]   ;;  %v19827_v59 = vld [vmem:[%s26397_s1 + $0x2938] ss:$28 sps:$4 sm:$0xff]  }
 0x5c8   :  { %17171 = vmatpush3.bf16.msra.mxu1 %v19773_v52  ;;  %v19828_v52 = vld [vmem:[%s26397_s1 + $0x2778] ss:$28 sps:$4 sm:$0xff]  }
 0x5c9   :  { %13146 = vmatpush1.bf16.msra.mxu0 %v19769_v60  ;;  %17172 = vmatprep.subr.bf16.mxu1 %v19777_v57  ;;  %v19824_v60 = vld [vmem:[%s26397_s1 + $0x2230] ss:$28 sps:$4 sm:$0xff]  }
 0x5ca   :  { %13147 = vmatprep.subr.bf16.mxu0 %v19776_v24  ;;  %v19831_v24 = vld [vmem:[%s26397_s1 + $0x226c] ss:$28 sps:$4 sm:$0xff]  }
 0x5cb   :  { %v19832_v57 = vld [vmem:[%s26397_s1 + $0x2970] ss:$28 sps:$4 sm:$0xff]  }
 0x5cc   :  { %17173 = vmatpush3.bf16.msra.mxu1 %v19778_v63  ;;  %v19833_v63 = vld [vmem:[%s26397_s1 + $0x27b0] ss:$28 sps:$4 sm:$0xff]  }
 0x5cd   :  { %13148 = vmatpush1.bf16.msra.mxu0 %v19774_v62  ;;  %17174 = vmatprep.subr.bf16.mxu1 %v19782_v61  ;;  %v19829_v62 = vld [vmem:[%s26397_s1 + $0x2268] ss:$28 sps:$4 sm:$0xff]  }
 0x5ce   :  { %13149 = vmatprep.subr.bf16.mxu0 %v19781_v30  ;;  %v19836_v30 = vld [vmem:[%s26397_s1 + $0x22a4] ss:$28 sps:$4 sm:$0xff]  }
 0x5cf   :  { %v19837_v61 = vld [vmem:[%s26397_s1 + $0x29a8] ss:$28 sps:$4 sm:$0xff]  }
 0x5d0   :  { %17175 = vmatpush3.bf16.msra.mxu1 %v19783_v49  ;;  %v19838_v49 = vld [vmem:[%s26397_s1 + $0x27e8] ss:$28 sps:$4 sm:$0xff]  }
 0x5d1   :  { %13150 = vmatpush1.bf16.msra.mxu0 %v19779_v4  ;;  %17176 = vmatprep.subr.bf16.mxu1 %v19787_v35  ;;  %v19834_v4 = vld [vmem:[%s26397_s1 + $0x22a0] ss:$28 sps:$4 sm:$0xff]  }
 0x5d2   :  { %13151 = vmatprep.subr.bf16.mxu0 %v19786_v8  ;;  %v19841_v8 = vld [vmem:[%s26397_s1 + $0x22dc] ss:$28 sps:$4 sm:$0xff]  }
 0x5d3   :  { %v19842_v35 = vld [vmem:[%s26397_s1 + $0x29e0] ss:$28 sps:$4 sm:$0xff]  }
 0x5d4   :  { %17177 = vmatpush3.bf16.msra.mxu1 %v19788_v19  ;;  %v19843_v19 = vld [vmem:[%s26397_s1 + $0x2820] ss:$28 sps:$4 sm:$0xff]  }
 0x5d5   :  { %13152 = vmatpush1.bf16.msra.mxu0 %v19784_v26  ;;  %17178 = vmatprep.subr.bf16.mxu1 %v19792_v48  ;;  %v19839_v26 = vld [vmem:[%s26397_s1 + $0x22d8] ss:$28 sps:$4 sm:$0xff]  }
 0x5d6   :  { %13153 = vmatprep.subr.bf16.mxu0 %v19791_v6  ;;  %v19846_v6 = vld [vmem:[%s26397_s1 + $0x2314] ss:$28 sps:$4 sm:$0xff]  }
 0x5d7   :  { %v19847_v48 = vld [vmem:[%s26397_s1 + $0x2bd8] ss:$28 sps:$4 sm:$0xff]  }
 0x5d8   :  { %17179 = vmatpush3.bf16.msra.mxu1 %v19793_v11  ;;  %v19848_v11 = vld [vmem:[%s26397_s1 + $0x2a18] ss:$28 sps:$4 sm:$0xff]  }
 0x5d9   :  { %13154 = vmatpush1.bf16.msra.mxu0 %v19789_v18  ;;  %17180 = vmatprep.subr.bf16.mxu1 %v19797_v37  ;;  %v19844_v18 = vld [vmem:[%s26397_s1 + $0x2310] ss:$28 sps:$4 sm:$0xff]  }
 0x5da   :  { %13155 = vmatprep.subr.bf16.mxu0 %v19796_v13  ;;  %v19851_v13 = vld [vmem:[%s26397_s1 + $0x234c] ss:$28 sps:$4 sm:$0xff]  }
 0x5db   :  { %v19852_v37 = vld [vmem:[%s26397_s1 + $0x2c10] ss:$28 sps:$4 sm:$0xff]  }
 0x5dc   :  { %17181 = vmatpush3.bf16.msra.mxu1 %v19798_v53  ;;  %v2125_v53 = vsub.s32 6, %v23917_v17 }
 0x5dd   :  { %13156 = vmatpush1.bf16.msra.mxu0 %v19794_v36  ;;  %17182 = vmatprep.subr.bf16.mxu1 %v19802_v14  ;;  %v16964_v36 = vpop.f32.mrb[8].mxu1  ;;  %v19849_v14 = vld [vmem:[%s26397_s1 + $0x2348] ss:$28 sps:$4 sm:$0xff]  }
 0x5de   :  { %13157 = vmatprep.subr.bf16.mxu0 %v19801_v32  ;;  %v16965_v32 = vpop.f32.mrb[9].mxu1 }
 0x5e0   :  { %17183 = vmatpush3.bf16.msra.mxu1 %v19803_v25  ;;  %v16966_v25 = vadd.f32 %v16965_v32, %v16964_v36  ;;  %v19873_v32 = vld [vmem:[%s26397_s1 + $0x2b30] ss:$28 sps:$4 sm:$0xff]  }
 0x5e1   :  { %13158 = vmatpush1.bf16.msra.mxu0 %v19799_v15  ;;  %17190 = vmatprep.subr.bf16.mxu1 %v19807_v16  ;;  %v19853_v15 = vld [vmem:[%s26397_s1 + $0x2a50] ss:$28 sps:$4 sm:$0xff]   ;;  %v25312_v16 = vld [vmem:[%s26399_s2] sm:$0xff] }
 0x5e2   :  { %13159 = vmatprep.subr.bf16.mxu0 %v19806_v34  ;;  %v16967_v34 = vpop.f32.mrb[10].mxu1 }
 0x5e3   :  { %13863 = vmatmul.mubr.bf16.vlgmr.msra.gmra.mrb[48].mxu1 %v22253_v3 }
 0x5e4   :  { %17191 = vmatpush3.bf16.msra.mxu1 %v19808_v29  ;;  %13902 = vmatprep.mubr.bf16.mxu1 %v22269_v9  ;;  %v16968_v29 = vpop.f32.mrb[11].mxu1 }
 0x5e5   :  { %13160 = vmatpush1.bf16.msra.mxu0 %v19804_v20  ;;  %17192 = vmatprep.subr.bf16.mxu1 %v19812_v40  ;;  %v2126_v20 = vrot.slane %v25312_v16, %v2125_v53  ;;  %v19878_v29 = vld [vmem:[%s26397_s1 + $0x2b68] ss:$28 sps:$4 sm:$0xff]  }
 0x5e6   :  { %13161 = vmatprep.subr.bf16.mxu0 %v19811_v21  ;;  %v19856_v21 = vld [vmem:[%s26397_s1 + $0x2384] ss:$28 sps:$4 sm:$0xff]  }
 0x5e7   :  { %v13465_v40 = vadd.f32 %v16966_v25, %v2126_v20  ;;  %v19877_v25 = vld [vmem:[%s26397_s1 + $0x2d28] ss:$28 sps:$4 sm:$0xff]   ;;  %v19874_v20 = vld [vmem:[%s26397_s1 + $0x2460] ss:$28 sps:$4 sm:$0xff]  }
 0x5e8   :  { %17193 = vmatpush3.bf16.msra.mxu1 %v19813_v56  ;;  %v19854_v56 = vld [vmem:[%s26397_s1 + $0x2380] ss:$28 sps:$4 sm:$0xff]  }
 0x5e9   :  { %13162 = vmatpush1.bf16.msra.mxu0 %v19809_v41  ;;  %17194 = vmatprep.subr.bf16.mxu1 %v19817_v1  ;;  %v16986_v41 = vpop.f32.mrb[12].mxu1 }
 0x5ea   :  { %13163 = vmatprep.subr.bf16.mxu0 %v19816_v45  ;;  %v19858_v45 = vld [vmem:[%s26397_s1 + $0x2a88] ss:$28 sps:$4 sm:$0xff]   ;;  %v16987_v1 = vpop.f32.mrb[13].mxu1 }
 0x5ec   :  { %17195 = vmatpush3.bf16.msra.mxu1 %v19818_v28  ;;  %v16989_v28 = vpop.f32.mrb[14].mxu1 }
 0x5ed   :  { %13164 = vmatpush1.bf16.msra.mxu0 %v19814_v51  ;;  %17196 = vmatprep.subr.bf16.mxu1 %v19822_v5  ;;  %v16988_v51 = vadd.f32 %v16987_v1, %v16986_v41  ;;  %v19862_v5 = vld [vmem:[%s26397_s1 + $0x2c80] ss:$28 sps:$4 sm:$0xff]   ;;  %v19879_v28 = vld [vmem:[%s26397_s1 + $0x2498] ss:$28 sps:$4 sm:$0xff]  }
 0x5ee   :  { %13165 = vmatprep.subr.bf16.mxu0 %v19821_v54  ;;  %v19861_v54 = vld [vmem:[%s26397_s1 + $0x23bc] ss:$28 sps:$4 sm:$0xff]  }
 0x5ef   :  { %v19882_v41 = vld [vmem:[%s26397_s1 + $0x2d60] ss:$28 sps:$4 sm:$0xff]  }
 0x5f0   :  { %17197 = vmatpush3.bf16.msra.mxu1 %v19823_v47  ;;  %v13505_v47 = vadd.f32 %v16988_v51, %v13465_v40  ;;  %v19881_v40 = vld [vmem:[%s26397_s1 + $0x249c] ss:$28 sps:$4 sm:$0xff]  }
 0x5f1   :  { %13166 = vmatpush1.bf16.msra.mxu0 %v19819_v2  ;;  %17198 = vmatprep.subr.bf16.mxu1 %v19827_v59  ;;  %v16990_v2 = vpop.f32.mrb[15].mxu1  ;;  %v19863_v59 = vld [vmem:[%s26397_s1 + $0x2ac0] ss:$28 sps:$4 sm:$0xff]  }
 0x5f2   :  { %13167 = vmatprep.subr.bf16.mxu0 %v19826_v58  ;;  %v17008_v58 = vpop.f32.mrb[16].mxu1  ;;  %v19887_v2 = vld [vmem:[%s26397_s1 + $0x2f58] ss:$28 sps:$4 sm:$0xff]  }
 0x5f4   :  { %17199 = vmatpush3.bf16.msra.mxu1 %v19828_v52 }
 0x5f5   :  { %13168 = vmatpush1.bf16.msra.mxu0 %v19824_v60  ;;  %17200 = vmatprep.subr.bf16.mxu1 %v19832_v57  ;;  %v17009_v60 = vpop.f32.mrb[17].mxu1  ;;  %v19866_v57 = vld [vmem:[%s26397_s1 + $0x23f4] ss:$28 sps:$4 sm:$0xff]  }
 0x5f6   :  { %13169 = vmatprep.subr.bf16.mxu0 %v19831_v24  ;;  %v17010_v52 = vadd.f32 %v17009_v60, %v17008_v58  ;;  %v17011_v24 = vpop.f32.mrb[18].mxu1  ;;  %v19888_v58 = vld [vmem:[%s26397_s1 + $0x2d98] ss:$28 sps:$4 sm:$0xff]   ;;  %v19889_v60 = vld [vmem:[%s26397_s1 + $0x2508] ss:$28 sps:$4 sm:$0xff]  }
 0x5f7   :  { %v19896_v24 = vld [vmem:[%s26397_s1 + $0x2544] ss:$28 sps:$4 sm:$0xff]  }
 0x5f8   :  { %17201 = vmatpush3.bf16.msra.mxu1 %v19833_v63  ;;  %v17012_v63 = vpop.f32.mrb[19].mxu1 }
 0x5f9   :  { %13170 = vmatpush1.bf16.msra.mxu0 %v19829_v62  ;;  %17202 = vmatprep.subr.bf16.mxu1 %v19837_v61  ;;  %v19867_v62 = vld [vmem:[%s26397_s1 + $0x2cb8] ss:$28 sps:$4 sm:$0xff]   ;;  %v17030_v61 = vpop.f32.mrb[20].mxu1  ;;  %v19898_v63 = vld [vmem:[%s26397_s1 + $0x2e08] ss:$28 sps:$4 sm:$0xff]  }
 0x5fa   :  { %13171 = vmatprep.subr.bf16.mxu0 %v19836_v30  ;;  %v13545_v30 = vadd.f32 %v17010_v52, %v13505_v47  ;;  %v19884_v47 = vld [vmem:[%s26397_s1 + $0x24d0] ss:$28 sps:$4 sm:$0xff]  }
 0x5fb   :  { %v19893_v52 = vld [vmem:[%s26397_s1 + $0x2dd0] ss:$28 sps:$4 sm:$0xff]  }
 0x5fc   :  { %17203 = vmatpush3.bf16.msra.mxu1 %v19838_v49  ;;  %v19868_v49 = vld [vmem:[%s26397_s1 + $0x2af8] ss:$28 sps:$4 sm:$0xff]  }
 0x5fd   :  { %13172 = vmatpush1.bf16.msra.mxu0 %v19834_v4  ;;  %17204 = vmatprep.subr.bf16.mxu1 %v19842_v35  ;;  %v19864_v4 = vld [vmem:[%s26397_s1 + $0x23f0] ss:$28 sps:$4 sm:$0xff]  }
 0x5fe   :  { %13173 = vmatprep.subr.bf16.mxu0 %v19841_v8  ;;  %v17031_v8 = vpop.f32.mrb[21].mxu1 }
 0x5ff   :  { %v17032_v35 = vadd.f32 %v17031_v8, %v17030_v61  ;;  %v19902_v61 = vld [vmem:[%s26397_s1 + $0x3000] ss:$28 sps:$4 sm:$0xff]   ;;  %v19906_v8 = vld [vmem:[%s26397_s1 + $0x25b4] ss:$28 sps:$4 sm:$0xff]  }
 0x600   :  { %17205 = vmatpush3.bf16.msra.mxu1 %v19843_v19  ;;  %v19871_v19 = vld [vmem:[%s26397_s1 + $0x242c] ss:$28 sps:$4 sm:$0xff]  }
 0x601   :  { %13174 = vmatpush1.bf16.msra.mxu0 %v19839_v26  ;;  %17212 = vmatprep.subr.bf16.mxu1 %v19847_v48  ;;  %v17033_v26 = vpop.f32.mrb[22].mxu1 }
 0x602   :  { %13184 = vmatprep.subr.bf16.mxu0 %v19846_v6  ;;  %v19872_v6 = vld [vmem:[%s26397_s1 + $0x2cf0] ss:$28 sps:$4 sm:$0xff]   ;;  %v17034_v48 = vpop.f32.mrb[23].mxu1 }
 0x603   :  { %13903 = vmatmul.mubr.bf16.vlgmr.msra.gmra.mrb[52].mxu1 %v22462_v50  ;;  %v19904_v26 = vld [vmem:[%s26397_s1 + $0x25b0] ss:$28 sps:$4 sm:$0xff]  }
 0x604   :  { %13176 = vmatmul.mubr.bf16.vlgmr.msra.gmra.mrb[4].mxu0 %v22044_v27  ;;  %17213 = vmatpush3.bf16.msra.mxu1 %v19848_v11  ;;  %v19857_v27 = vld [vmem:[%s26397_s1 + $0x2c48] ss:$28 sps:$4 sm:$0xff]   ;;  %v17052_v11 = vpop.f32.mrb[24].mxu1  ;;  %v19912_v48 = vld [vmem:[%s26397_s1 + $0x3070] ss:$28 sps:$4 sm:$0xff]  }
 0x605   :  { %13185 = vmatpush1.bf16.msra.mxu0 %v19844_v18  ;;  %17214 = vmatprep.subr.bf16.mxu1 %v19852_v37  ;;  %v13585_v18 = vadd.f32 %v17032_v35, %v13545_v30  ;;  %v17053_v37 = vpop.f32.mrb[25].mxu1  ;;  %v19901_v30 = vld [vmem:[%s26397_s1 + $0x257c] ss:$28 sps:$4 sm:$0xff]  }
 0x606   :  { %13186 = vmatprep.subr.bf16.mxu0 %v19851_v13  ;;  %13942 = vmatprep.mubr.bf16.mxu1 %v22478_v55  ;;  %v19869_v13 = vld [vmem:[%s26397_s1 + $0x2428] ss:$28 sps:$4 sm:$0xff]   ;;  %v17054_v36 = vadd.f32 %v17053_v37, %v17052_v11  ;;  %v17055_v53 = vpop.f32.mrb[26].mxu1  ;;  %v19907_v35 = vld [vmem:[%s26397_s1 + $0x3038] ss:$28 sps:$4 sm:$0xff]  }
 0x607   :  { %13216 = vmatprep.mubr.bf16.mxu0 %v22060_v22  ;;  %v19859_v22 = vld [vmem:[%s26397_s1 + $0x23b8] ss:$28 sps:$4 sm:$0xff]   ;;  %v19913_v11 = vld [vmem:[%s26397_s1 + $0x2eb0] ss:$28 sps:$4 sm:$0xff]   ;;  %v19917_v37 = vld [vmem:[%s26397_s1 + $0x30a8] ss:$28 sps:$4 sm:$0xff]  }
 0x608   :  { %17215 = vmatpush3.bf16.msra.mxu1 %v19853_v15  ;;  %v17056_v15 = vpop.f32.mrb[27].mxu1  ;;  %v13625_v34 = vadd.f32 %v17054_v36, %v13585_v18  ;;  %v19909_v18 = vld [vmem:[%s26397_s1 + $0x25e8] ss:$28 sps:$4 sm:$0xff]   ;;  %v19914_v36 = vld [vmem:[%s26397_s1 + $0x2620] ss:$28 sps:$4 sm:$0xff]  }
 0x609   :  { %13187 = vmatpush1.bf16.msra.mxu0 %v19849_v14  ;;  %17216 = vmatprep.subr.bf16.mxu1 %v19857_v27  ;;  %v19876_v14 = vld [vmem:[%s26397_s1 + $0x2464] ss:$28 sps:$4 sm:$0xff]  }
 0x60a   :  { %13188 = vmatprep.subr.bf16.mxu0 %v19856_v21  ;;  %v19918_v53 = vld [vmem:[%s26397_s1 + $0x2ee8] ss:$28 sps:$4 sm:$0xff]   ;;  %v19922_v15 = vld [vmem:[%s26397_s1 + $0x30e0] ss:$28 sps:$4 sm:$0xff]  }
 0x60c   :  { %17217 = vmatpush3.bf16.msra.mxu1 %v19858_v45 }
 0x60d   :  { %13189 = vmatpush1.bf16.msra.mxu0 %v19854_v56  ;;  %17218 = vmatprep.subr.bf16.mxu1 %v19862_v5  ;;  %v19886_v5 = vld [vmem:[%s26397_s1 + $0x24d4] ss:$28 sps:$4 sm:$0xff]  }
 0x60e   :  { %13190 = vmatprep.subr.bf16.mxu0 %v19861_v54  ;;  %v19883_v54 = vld [vmem:[%s26397_s1 + $0x2ba0] ss:$28 sps:$4 sm:$0xff]  }
 0x610   :  { %17219 = vmatpush3.bf16.msra.mxu1 %v19863_v59  ;;  %v19892_v59 = vld [vmem:[%s26397_s1 + $0x2f90] ss:$28 sps:$4 sm:$0xff]  }
 0x611   :  { %13191 = vmatpush1.bf16.msra.mxu0 %v19859_v22  ;;  %17220 = vmatprep.subr.bf16.mxu1 %v19867_v62  ;;  %v19891_v22 = vld [vmem:[%s26397_s1 + $0x250c] ss:$28 sps:$4 sm:$0xff]   ;;  %v19894_v62 = vld [vmem:[%s26397_s1 + $0x2540] ss:$28 sps:$4 sm:$0xff]  }
 0x612   :  { %13192 = vmatprep.subr.bf16.mxu0 %v19866_v57  ;;  %v19897_v57 = vld [vmem:[%s26397_s1 + $0x2fc8] ss:$28 sps:$4 sm:$0xff]  }
 0x614   :  { %17221 = vmatpush3.bf16.msra.mxu1 %v19868_v49  ;;  %v19903_v49 = vld [vmem:[%s26397_s1 + $0x2e40] ss:$28 sps:$4 sm:$0xff]  }
 0x615   :  { %13193 = vmatpush1.bf16.msra.mxu0 %v19864_v4  ;;  %17222 = vmatprep.subr.bf16.mxu1 %v19872_v6  ;;  %v19899_v4 = vld [vmem:[%s26397_s1 + $0x2578] ss:$28 sps:$4 sm:$0xff]   ;;  %v19911_v6 = vld [vmem:[%s26397_s1 + $0x25ec] ss:$28 sps:$4 sm:$0xff]  }
 0x616   :  { %13194 = vmatprep.subr.bf16.mxu0 %v19871_v19  ;;  %v17074_v21 = vpop.f32.mrb[28].mxu1  ;;  %v19908_v19 = vld [vmem:[%s26397_s1 + $0x2e78] ss:$28 sps:$4 sm:$0xff]  }
 0x617   :  { %v17075_v27 = vpop.f32.mrb[29].mxu1 }
 0x618   :  { %17223 = vmatpush3.bf16.msra.mxu1 %v19873_v32  ;;  %v17076_v56 = vadd.f32 %v17075_v27, %v17074_v21  ;;  %v17077_v45 = vpop.f32.mrb[30].mxu1  ;;  %v19919_v27 = vld [vmem:[%s26397_s1 + $0x2658] ss:$28 sps:$4 sm:$0xff]  }
 0x619   :  { %13195 = vmatpush1.bf16.msra.mxu0 %v19869_v13  ;;  %17224 = vmatprep.subr.bf16.mxu1 %v19877_v25  ;;  %v17078_v1 = vpop.f32.mrb[31].mxu1  ;;  %v19916_v13 = vld [vmem:[%s26397_s1 + $0x2624] ss:$28 sps:$4 sm:$0xff]   ;;  %v19924_v45 = vld [vmem:[%s26397_s1 + $0x2690] ss:$28 sps:$4 sm:$0xff]  }
 0x61a   :  { %13196 = vmatprep.subr.bf16.mxu0 %v19876_v14  ;;  %v25383_v51 = vadd.f32 %v17076_v56, %v13625_v34  ;;  %v19921_v14 = vld [vmem:[%s26397_s1 + $0x265c] ss:$28 sps:$4 sm:$0xff]  }
 0x61b   :  { %v19927_v56 = vld [vmem:[%s26397_s1 + $0x32d8] ss:$28 sps:$4 sm:$0xff]  }
 0x61c   :  { %17225 = vmatpush3.bf16.msra.mxu1 %v19878_v29  ;;  %v19928_v1 = vld [vmem:[%s26397_s1 + $0x3118] ss:$28 sps:$4 sm:$0xff]  }
 0x61d   :  { %13197 = vmatpush1.bf16.msra.mxu0 %v19874_v20  ;;  %17226 = vmatprep.subr.bf16.mxu1 %v19882_v41  ;;  %v19926_v41 = vld [vmem:[%s26397_s1 + $0x2694] ss:$28 sps:$4 sm:$0xff]  }
 0x61e   :  { %13198 = vmatprep.subr.bf16.mxu0 %v19881_v40  ;;  %v19923_v40 = vld [vmem:[%s26397_s1 + $0x2f20] ss:$28 sps:$4 sm:$0xff]  }
 0x620   :  { %17227 = vmatpush3.bf16.msra.mxu1 %v19883_v54  ;;  %v19929_v54 = vld [vmem:[%s26397_s1 + $0x26c8] ss:$28 sps:$4 sm:$0xff]  }
 0x621   :  { %13199 = vmatpush1.bf16.msra.mxu0 %v19879_v28  ;;  %17234 = vmatprep.subr.bf16.mxu1 %v19887_v2  ;;  %v19932_v28 = vld [vmem:[%s26397_s1 + $0x3310] ss:$28 sps:$4 sm:$0xff]   ;;  %v19936_v2 = vld [vmem:[%s26397_s1 + $0x2704] ss:$28 sps:$4 sm:$0xff]  }
 0x622   :  { %13200 = vmatprep.subr.bf16.mxu0 %v19886_v5  ;;  %v19933_v5 = vld [vmem:[%s26397_s1 + $0x3150] ss:$28 sps:$4 sm:$0xff]  }
 0x623   :  { %13943 = vmatmul.mubr.bf16.vlgmr.msra.gmra.mrb[56].mxu1 %v22671_v39 }
 0x624   :  { %17235 = vmatpush3.bf16.msra.mxu1 %v19888_v58  ;;  %13982 = vmatprep.mubr.bf16.mxu1 %v22687_v43  ;;  %v19938_v58 = vld [vmem:[%s26397_s1 + $0x3188] ss:$28 sps:$4 sm:$0xff]  }
 0x625   :  { %13201 = vmatpush1.bf16.msra.mxu0 %v19884_v47  ;;  %17236 = vmatprep.subr.bf16.mxu1 %v19892_v59  ;;  %v19934_v47 = vld [vmem:[%s26397_s1 + $0x2700] ss:$28 sps:$4 sm:$0xff]   ;;  %v19939_v59 = vld [vmem:[%s26397_s1 + $0x2738] ss:$28 sps:$4 sm:$0xff]  }
 0x626   :  { %13202 = vmatprep.subr.bf16.mxu0 %v19891_v22  ;;  %v19941_v22 = vld [vmem:[%s26397_s1 + $0x273c] ss:$28 sps:$4 sm:$0xff]  }
 0x628   :  { %17237 = vmatpush3.bf16.msra.mxu1 %v19893_v52  ;;  %v19946_v52 = vld [vmem:[%s26397_s1 + $0x2774] ss:$28 sps:$4 sm:$0xff]  }
 0x629   :  { %13203 = vmatpush1.bf16.msra.mxu0 %v19889_v60  ;;  %17238 = vmatprep.subr.bf16.mxu1 %v19897_v57  ;;  %v19943_v60 = vld [vmem:[%s26397_s1 + $0x31c0] ss:$28 sps:$4 sm:$0xff]   ;;  %v19944_v57 = vld [vmem:[%s26397_s1 + $0x2770] ss:$28 sps:$4 sm:$0xff]  }
 0x62a   :  { %13204 = vmatprep.subr.bf16.mxu0 %v19896_v24  ;;  %v19947_v24 = vld [vmem:[%s26397_s1 + $0x33b8] ss:$28 sps:$4 sm:$0xff]  }
 0x62c   :  { %17239 = vmatpush3.bf16.msra.mxu1 %v19898_v63  ;;  %v19951_v63 = vld [vmem:[%s26397_s1 + $0x27ac] ss:$28 sps:$4 sm:$0xff]  }
 0x62d   :  { %13205 = vmatpush1.bf16.msra.mxu0 %v19894_v62  ;;  %17240 = vmatprep.subr.bf16.mxu1 %v19902_v61  ;;  %v19948_v62 = vld [vmem:[%s26397_s1 + $0x31f8] ss:$28 sps:$4 sm:$0xff]   ;;  %v19949_v61 = vld [vmem:[%s26397_s1 + $0x27a8] ss:$28 sps:$4 sm:$0xff]  }
 0x62e   :  { %13206 = vmatprep.subr.bf16.mxu0 %v19901_v30  ;;  %v19952_v30 = vld [vmem:[%s26397_s1 + $0x33f0] ss:$28 sps:$4 sm:$0xff]  }
 0x630   :  { %17241 = vmatpush3.bf16.msra.mxu1 %v19903_v49  ;;  %v19956_v49 = vld [vmem:[%s26397_s1 + $0x27e4] ss:$28 sps:$4 sm:$0xff]  }
 0x631   :  { %13207 = vmatpush1.bf16.msra.mxu0 %v19899_v4  ;;  %17242 = vmatprep.subr.bf16.mxu1 %v19907_v35  ;;  %v19953_v4 = vld [vmem:[%s26397_s1 + $0x3230] ss:$28 sps:$4 sm:$0xff]  }
 0x632   :  { %13208 = vmatprep.subr.bf16.mxu0 %v19906_v8  ;;  %v19957_v8 = vld [vmem:[%s26397_s1 + $0x3428] ss:$28 sps:$4 sm:$0xff]  }
 0x634   :  { %17243 = vmatpush3.bf16.msra.mxu1 %v19908_v19  ;;  %v19954_v19 = vld [vmem:[%s26397_s1 + $0x27e0] ss:$28 sps:$4 sm:$0xff]  }
 0x635   :  { %13209 = vmatpush1.bf16.msra.mxu0 %v19904_v26  ;;  %17244 = vmatprep.subr.bf16.mxu1 %v19912_v48 }
 0x636   :  { %13210 = vmatprep.subr.bf16.mxu0 %v19911_v6  ;;  %v17096_v32 = vpop.f32.mrb[32].mxu1  ;;  %v19958_v6 = vld [vmem:[%s26397_s1 + $0x3268] ss:$28 sps:$4 sm:$0xff]  }
 0x637   :  { %v17097_v25 = vpop.f32.mrb[33].mxu1 }
 0x638   :  { %17245 = vmatpush3.bf16.msra.mxu1 %v19913_v11  ;;  %v17098_v34 = vadd.f32 %v17097_v25, %v17096_v32  ;;  %v17099_v20 = vpop.f32.mrb[34].mxu1  ;;  %v19961_v11 = vld [vmem:[%s26397_s1 + $0x281c] ss:$28 sps:$4 sm:$0xff]   ;;  %v19964_v25 = vld [vmem:[%s26397_s1 + $0x2850] ss:$28 sps:$4 sm:$0xff]  }
 0x639   :  { %13211 = vmatpush1.bf16.msra.mxu0 %v19909_v18  ;;  %17246 = vmatprep.subr.bf16.mxu1 %v19917_v37  ;;  %v17100_v29 = vpop.f32.mrb[35].mxu1  ;;  %v19963_v32 = vld [vmem:[%s26397_s1 + $0x32a0] ss:$28 sps:$4 sm:$0xff]   ;;  %v19971_v20 = vld [vmem:[%s26397_s1 + $0x288c] ss:$28 sps:$4 sm:$0xff]  }
 0x63a   :  { %13212 = vmatprep.subr.bf16.mxu0 %v19916_v13  ;;  %v25484_v21 = vadd.f32 %v17098_v34, %v25383_v51  ;;  %v19931_v51 = vld [vmem:[%s26397_s1 + $0x26cc] ss:$28 sps:$4 sm:$0xff]   ;;  %v19962_v13 = vld [vmem:[%s26397_s1 + $0x3460] ss:$28 sps:$4 sm:$0xff]   ;;  %v19968_v34 = vld [vmem:[%s26397_s1 + $0x3498] ss:$28 sps:$4 sm:$0xff]  }
 0x63b   :  { %v19972_v29 = vld [vmem:[%s26397_s1 + $0x3690] ss:$28 sps:$4 sm:$0xff]  }
 0x63c   :  { %17247 = vmatpush3.bf16.msra.mxu1 %v19918_v53  ;;  %v19959_v53 = vld [vmem:[%s26397_s1 + $0x2818] ss:$28 sps:$4 sm:$0xff]  }
 0x63d   :  { %13213 = vmatpush1.bf16.msra.mxu0 %v19914_v36  ;;  %17248 = vmatprep.subr.bf16.mxu1 %v19922_v15  ;;  %v19967_v15 = vld [vmem:[%s26397_s1 + $0x3658] ss:$28 sps:$4 sm:$0xff]  }
 0x63e   :  { %13214 = vmatprep.subr.bf16.mxu0 %v19921_v14  ;;  %v19966_v14 = vld [vmem:[%s26397_s1 + $0x2854] ss:$28 sps:$4 sm:$0xff]  }
 0x640   :  { %17249 = vmatpush3.bf16.msra.mxu1 %v19923_v40  ;;  %v19976_v40 = vld [vmem:[%s26397_s1 + $0x28c4] ss:$28 sps:$4 sm:$0xff]  }
 0x641   :  { %13215 = vmatpush1.bf16.msra.mxu0 %v19919_v27  ;;  %17256 = vmatprep.subr.bf16.mxu1 %v19927_v56  ;;  %v19973_v27 = vld [vmem:[%s26397_s1 + $0x34d0] ss:$28 sps:$4 sm:$0xff]   ;;  %v19974_v56 = vld [vmem:[%s26397_s1 + $0x28c0] ss:$28 sps:$4 sm:$0xff]  }
 0x642   :  { %13225 = vmatprep.subr.bf16.mxu0 %v19926_v41  ;;  %v19977_v41 = vld [vmem:[%s26397_s1 + $0x36c8] ss:$28 sps:$4 sm:$0xff]  }
 0x643   :  { %13983 = vmatmul.mubr.bf16.vlgmr.msra.gmra.mrb[60].mxu1 %v22881_v33 }
 0x644   :  { %13217 = vmatmul.mubr.bf16.vlgmr.msra.gmra.mrb[4].mxu0 %v22253_v3  ;;  %17257 = vmatpush3.bf16.msra.mxu1 %v19928_v1  ;;  %v19937_v3 = vld [vmem:[%s26397_s1 + $0x3348] ss:$28 sps:$4 sm:$0xff]   ;;  %v19981_v1 = vld [vmem:[%s26397_s1 + $0x28fc] ss:$28 sps:$4 sm:$0xff]  }
 0x645   :  { %13226 = vmatpush1.bf16.msra.mxu0 %v19924_v45  ;;  %17258 = vmatprep.subr.bf16.mxu1 %v19932_v28  ;;  %v19978_v45 = vld [vmem:[%s26397_s1 + $0x3508] ss:$28 sps:$4 sm:$0xff]   ;;  %v19979_v28 = vld [vmem:[%s26397_s1 + $0x28f8] ss:$28 sps:$4 sm:$0xff]  }
 0x646   :  { %13227 = vmatprep.subr.bf16.mxu0 %v19931_v51  ;;  %14022 = vmatprep.mubr.bf16.mxu1 %v22896_v38  ;;  %v19982_v51 = vld [vmem:[%s26397_s1 + $0x3700] ss:$28 sps:$4 sm:$0xff]  }
 0x647   :  { %13257 = vmatprep.mubr.bf16.mxu0 %v22269_v9  ;;  %v19942_v9 = vld [vmem:[%s26397_s1 + $0x3380] ss:$28 sps:$4 sm:$0xff]  }
 0x648   :  { %17259 = vmatpush3.bf16.msra.mxu1 %v19933_v5  ;;  %v19986_v5 = vld [vmem:[%s26397_s1 + $0x2934] ss:$28 sps:$4 sm:$0xff]  }
 0x649   :  { %13228 = vmatpush1.bf16.msra.mxu0 %v19929_v54  ;;  %17260 = vmatprep.subr.bf16.mxu1 %v19937_v3  ;;  %v19983_v54 = vld [vmem:[%s26397_s1 + $0x3540] ss:$28 sps:$4 sm:$0xff]   ;;  %v19984_v3 = vld [vmem:[%s26397_s1 + $0x2930] ss:$28 sps:$4 sm:$0xff]  }
 0x64a   :  { %13229 = vmatprep.subr.bf16.mxu0 %v19936_v2  ;;  %v19987_v2 = vld [vmem:[%s26397_s1 + $0x3738] ss:$28 sps:$4 sm:$0xff]  }
 0x64c   :  { %17261 = vmatpush3.bf16.msra.mxu1 %v19938_v58  ;;  %v19991_v58 = vld [vmem:[%s26397_s1 + $0x296c] ss:$28 sps:$4 sm:$0xff]  }
 0x64d   :  { %13230 = vmatpush1.bf16.msra.mxu0 %v19934_v47  ;;  %17262 = vmatprep.subr.bf16.mxu1 %v19942_v9  ;;  %v19988_v47 = vld [vmem:[%s26397_s1 + $0x3578] ss:$28 sps:$4 sm:$0xff]   ;;  %v19989_v9 = vld [vmem:[%s26397_s1 + $0x2968] ss:$28 sps:$4 sm:$0xff]  }
 0x64e   :  { %13231 = vmatprep.subr.bf16.mxu0 %v19941_v22  ;;  %v19992_v22 = vld [vmem:[%s26397_s1 + $0x3770] ss:$28 sps:$4 sm:$0xff]  }
 0x650   :  { %17263 = vmatpush3.bf16.msra.mxu1 %v19943_v60  ;;  %v19996_v60 = vld [vmem:[%s26397_s1 + $0x29a4] ss:$28 sps:$4 sm:$0xff]  }
 0x651   :  { %13232 = vmatpush1.bf16.msra.mxu0 %v19939_v59  ;;  %17264 = vmatprep.subr.bf16.mxu1 %v19947_v24  ;;  %v19993_v59 = vld [vmem:[%s26397_s1 + $0x35b0] ss:$28 sps:$4 sm:$0xff]  }
 0x652   :  { %13233 = vmatprep.subr.bf16.mxu0 %v19946_v52  ;;  %v19997_v52 = vld [vmem:[%s26397_s1 + $0x37a8] ss:$28 sps:$4 sm:$0xff]  }
 0x654   :  { %17265 = vmatpush3.bf16.msra.mxu1 %v19948_v62  ;;  %v19994_v62 = vld [vmem:[%s26397_s1 + $0x29a0] ss:$28 sps:$4 sm:$0xff]  }
 0x655   :  { %13234 = vmatpush1.bf16.msra.mxu0 %v19944_v57  ;;  %17266 = vmatprep.subr.bf16.mxu1 %v19952_v30 }
 0x656   :  { %13235 = vmatprep.subr.bf16.mxu0 %v19951_v63  ;;  %v17118_v35 = vpop.f32.mrb[36].mxu1  ;;  %v19998_v63 = vld [vmem:[%s26397_s1 + $0x35e8] ss:$28 sps:$4 sm:$0xff]  }
 0x657   :  { %v17119_v26 = vpop.f32.mrb[37].mxu1 }
 0x658   :  { %17267 = vmatpush3.bf16.msra.mxu1 %v19953_v4  ;;  %v17120_v48 = vadd.f32 %v17119_v26, %v17118_v35  ;;  %v17121_v18 = vpop.f32.mrb[38].mxu1  ;;  %v20001_v4 = vld [vmem:[%s26397_s1 + $0x29dc] ss:$28 sps:$4 sm:$0xff]  }
 0x659   :  { %13236 = vmatpush1.bf16.msra.mxu0 %v19949_v61  ;;  %17268 = vmatprep.subr.bf16.mxu1 %v19957_v8  ;;  %v17122_v37 = vpop.f32.mrb[39].mxu1  ;;  %v19999_v26 = vld [vmem:[%s26397_s1 + $0x29d8] ss:$28 sps:$4 sm:$0xff]   ;;  %v14071_v18 = vmax.f32 %v23974_v12, 0.0  ;;  %v20012_v12 = vld [vmem:[%s26400_s3 + $0x48] sm:$0xff]  }
 0x65a   :  { %13237 = vmatprep.subr.bf16.mxu0 %v19956_v49  ;;  %v25587_v36 = vadd.f32 %v17120_v48, %v25484_v21  ;;  %v19969_v21 = vld [vmem:[%s26397_s1 + $0x2888] ss:$28 sps:$4 sm:$0xff]   ;;  %v20002_v49 = vld [vmem:[%s26397_s1 + $0x37e0] ss:$28 sps:$4 sm:$0xff]  }
 0x65b   :  { %v20007_v48 = vld [vmem:[%s26400_s3 + $0x40] sm:$0xff]   ;;  %v20011_v37 = vld [vmem:[%s26397_s1 + $0x2a4c] ss:$28 sps:$4 sm:$0xff]  }
 0x65c   :  { %17269 = vmatpush3.bf16.msra.mxu1 %v19958_v6  ;;  %v20006_v6 = vld [vmem:[%s26397_s1 + $0x2a14] ss:$28 sps:$4 sm:$0xff]  }
 0x65d   :  { %13238 = vmatpush1.bf16.msra.mxu0 %v19954_v19  ;;  %17270 = vmatprep.subr.bf16.mxu1 %v19962_v13  ;;  %v20003_v19 = vld [vmem:[%s26397_s1 + $0x3620] ss:$28 sps:$4 sm:$0xff]  }
 0x65e   :  { %13239 = vmatprep.subr.bf16.mxu0 %v19961_v11  ;;  %v20004_v11 = vld [vmem:[%s26397_s1 + $0x2a10] ss:$28 sps:$4 sm:$0xff]   ;;  %v20008_v13 = vld [vmem:[%s26400_s3] sm:$0xff]  }
 0x660   :  { %17271 = vmatpush3.bf16.msra.mxu1 %v19963_v32  ;;  %v20013_v32 = vld [vmem:[%s26400_s3 + $0x8] sm:$0xff]  }
 0x661   :  { %13240 = vmatpush1.bf16.msra.mxu0 %v19959_v53  ;;  %17278 = vmatprep.subr.bf16.mxu1 %v19967_v15  ;;  %v20009_v53 = vld [vmem:[%s26397_s1 + $0x2a48] ss:$28 sps:$4 sm:$0xff]   ;;  %v20014_v15 = vld [vmem:[%s26397_s1 + $0x2a80] ss:$28 sps:$4 sm:$0xff]  }
 0x662   :  { %13241 = vmatprep.subr.bf16.mxu0 %v19966_v14  ;;  %v20016_v14 = vld [vmem:[%s26397_s1 + $0x2a84] ss:$28 sps:$4 sm:$0xff]  }
 0x663   :  { %14023 = vmatmul.mubr.bf16.vlgmr.msra.gmra.mrb[64].mxu1 %v23089_v0 }
 0x664   :  { %17279 = vmatpush3.bf16.msra.mxu1 %v19968_v34  ;;  %14062 = vmatprep.mubr.bf16.mxu1 %v23105_v46  ;;  %v20021_v34 = vld [vmem:[%s26397_s1 + $0x2abc] ss:$28 sps:$4 sm:$0xff]  }
 0x665   :  { %13242 = vmatpush1.bf16.msra.mxu0 %v19964_v25  ;;  %17280 = vmatprep.subr.bf16.mxu1 %v19972_v29  ;;  %v20018_v25 = vld [vmem:[%s26400_s3 + $0x10] sm:$0xff]   ;;  %v20023_v29 = vld [vmem:[%s26400_s3 + $0x18] sm:$0xff]  }
 0x666   :  { %13243 = vmatprep.subr.bf16.mxu0 %v19971_v20  ;;  %v20019_v20 = vld [vmem:[%s26397_s1 + $0x2ab8] ss:$28 sps:$4 sm:$0xff]  }
 0x668   :  { %17281 = vmatpush3.bf16.msra.mxu1 %v19973_v27  ;;  %v20027_v27 = vld [vmem:[%s26400_s3 + $0x60] sm:$0xff]  }
 0x669   :  { %13244 = vmatpush1.bf16.msra.mxu0 %v19969_v21  ;;  %17282 = vmatprep.subr.bf16.mxu1 %v19977_v41  ;;  %v20026_v21 = vld [vmem:[%s26397_s1 + $0x2af4] ss:$28 sps:$4 sm:$0xff]   ;;  %v20028_v41 = vld [vmem:[%s26400_s3 + $0x20] sm:$0xff]  }
 0x66a   :  { %13245 = vmatprep.subr.bf16.mxu0 %v19976_v40  ;;  %v20024_v40 = vld [vmem:[%s26397_s1 + $0x2af0] ss:$28 sps:$4 sm:$0xff]  }
 0x66c   :  { %17283 = vmatpush3.bf16.msra.mxu1 %v19978_v45  ;;  %v20032_v45 = vld [vmem:[%s26400_s3 + $0x68] sm:$0xff]  }
 0x66d   :  { %13246 = vmatpush1.bf16.msra.mxu0 %v19974_v56  ;;  %17284 = vmatprep.subr.bf16.mxu1 %v19982_v51  ;;  %v20031_v56 = vld [vmem:[%s26397_s1 + $0x2b2c] ss:$28 sps:$4 sm:$0xff]  }
 0x66e   :  { %13247 = vmatprep.subr.bf16.mxu0 %v19981_v1  ;;  %v2113_v1 = vsub.s32 3, %v23917_v17  ;;  %v20029_v51 = vld [vmem:[%s26397_s1 + $0x2b28] ss:$28 sps:$4 sm:$0xff]  }
 0x670   :  { %17285 = vmatpush3.bf16.msra.mxu1 %v19983_v54  ;;  %v20036_v54 = vld [vmem:[%s26397_s1 + $0x2b64] ss:$28 sps:$4 sm:$0xff]  }
 0x671   :  { %13248 = vmatpush1.bf16.msra.mxu0 %v19979_v28  ;;  %17286 = vmatprep.subr.bf16.mxu1 %v19987_v2  ;;  %v20033_v28 = vld [vmem:[%s26400_s3 + $0x28] sm:$0xff]  }
 0x672   :  { %13249 = vmatprep.subr.bf16.mxu0 %v19986_v5  ;;  %v20037_v5 = vld [vmem:[%s26400_s3 + $0x70] sm:$0xff]  }
 0x674   :  { %17287 = vmatpush3.bf16.msra.mxu1 %v19988_v47 }
 0x675   :  { %13250 = vmatpush1.bf16.msra.mxu0 %v19984_v3  ;;  %17288 = vmatprep.subr.bf16.mxu1 %v19992_v22  ;;  %v2114_v3 = vrot.slane %v25312_v16, %v2113_v1  ;;  %v20038_v22 = vld [vmem:[%s26400_s3 + $0x30] sm:$0xff]   ;;  %v20042_v16 = vld [vmem:[%s26400_s3 + $0x78] sm:$0xff]  }
 0x676   :  { %13251 = vmatprep.subr.bf16.mxu0 %v19991_v58  ;;  %v17140_v24 = vpop.f32.mrb[40].mxu1  ;;  %v20034_v58 = vld [vmem:[%s26397_s1 + $0x2b60] ss:$28 sps:$4 sm:$0xff]  }
 0x677   :  { %v17141_v57 = vpop.f32.mrb[41].mxu1 }
 0x678   :  { %17289 = vmatpush3.bf16.msra.mxu1 %v19993_v59  ;;  %v17142_v30 = vadd.f32 %v17141_v57, %v17140_v24  ;;  %v17143_v61 = vpop.f32.mrb[42].mxu1  ;;  %v17422_v57 = vadd.f32 %v24768_v23, %v2114_v3  ;;  %v20047_v23 = vld [vmem:[%s26400_s3 + $0xc0] sm:$0xff]   ;;  %v20081_v3 = vld [vmem:[%s26397_s1 + $0x2d5c] ss:$28 sps:$4 sm:$0xff]  }
 0x679   :  { %13252 = vmatpush1.bf16.msra.mxu0 %v19989_v9  ;;  %17290 = vmatprep.subr.bf16.mxu1 %v19997_v52  ;;  %v17144_v8 = vpop.f32.mrb[43].mxu1  ;;  %v20046_v61 = vld [vmem:[%s26397_s1 + $0x2bd4] ss:$28 sps:$4 sm:$0xff]  }
 0x67a   :  { %13253 = vmatprep.subr.bf16.mxu0 %v19996_v60  ;;  %v25688_v35 = vadd.f32 %v17142_v30, %v25587_v36  ;;  %v14078_v36 = vpack.c.bf16 %v14071_v18, %v14071_v18  ;;  %v20041_v60 = vld [vmem:[%s26397_s1 + $0x2b9c] ss:$28 sps:$4 sm:$0xff]   ;;  %v14070_v30 = vmax.f32 %v23972_v10, 0.0  ;;  %v20048_v10 = vld [vmem:[%s26400_s3 + $0x80] sm:$0xff]  }
 0x67b   :  { %v20056_v18 = vld [vmem:[%s26397_s1 + $0x2c44] ss:$28 sps:$4 sm:$0xff]  }
 0x67c   :  { %17291 = vmatpush3.bf16.msra.mxu1 %v19998_v63  ;;  %v20043_v63 = vld [vmem:[%s26400_s3 + $0x38] sm:$0xff]   ;;  %v14077_v8 = vpack.c.bf16 %v14070_v30, %v14070_v30  ;;  %v20098_v30 = vld [vmem:[%s26397_s1 + $0x2e74] ss:$28 sps:$4 sm:$0xff]  }
 0x67d   :  { %13254 = vmatpush1.bf16.msra.mxu0 %v19994_v62  ;;  %17292 = vmatprep.subr.bf16.mxu1 %v20002_v49  ;;  %v20039_v62 = vld [vmem:[%s26397_s1 + $0x2b98] ss:$28 sps:$4 sm:$0xff]   ;;  %v20044_v49 = vld [vmem:[%s26397_s1 + $0x2bd0] ss:$28 sps:$4 sm:$0xff]  }
 0x67e   :  { %13255 = vmatprep.subr.bf16.mxu0 %v20001_v4  ;;  %v14073_v4 = vmax.f32 %v17422_v57, 0.0  ;;  %v20087_v57 = vld [vmem:[%s26397_s1 + $0x2dc8] ss:$28 sps:$4 sm:$0xff]  }
 0x680   :  { %17293 = vmatpush3.bf16.msra.mxu1 %v20003_v19  ;;  %v14080_v19 = vpack.c.bf16 %v14073_v4, %v14073_v4  ;;  %v20099_v4 = vld [vmem:[%s26397_s1 + $0x2ea8] ss:$28 sps:$4 sm:$0xff]  }
 0x681   :  { %13256 = vmatpush1.bf16.msra.mxu0 %v19999_v26  ;;  %17300 = vmatprep.subr.bf16.mxu1 %v20007_v48  ;;  %v20052_v26 = vld [vmem:[%s26400_s3 + $0xc8] sm:$0xff]  }
 0x682   :  { %13266 = vmatprep.subr.bf16.mxu0 %v20006_v6  ;;  %v20049_v6 = vld [vmem:[%s26397_s1 + $0x2c08] ss:$28 sps:$4 sm:$0xff]  }
 0x683   :  { %14063 = vmatmul.mubr.bf16.vlgmr.msra.gmra.mrb[68].mxu1 %v23293_v44  ;;  %v20053_v48 = vld [vmem:[%s26400_s3 + $0x88] sm:$0xff]  }
 0x684   :  { %13258 = vmatmul.mubr.bf16.vlgmr.msra.gmra.mrb[4].mxu0 %v22462_v50  ;;  %17301 = vmatpush3.bf16.msra.mxu1 %v20008_v13  ;;  %v20017_v50 = vld [vmem:[%s26400_s3 + $0x50] sm:$0xff]   ;;  %v20054_v13 = vld [vmem:[%s26397_s1 + $0x2c40] ss:$28 sps:$4 sm:$0xff]  }
 0x685   :  { %13267 = vmatpush1.bf16.msra.mxu0 %v20004_v11  ;;  %14571 = vmatprep.mubr.bf16.mxu1 %v14078_v36  ;;  %v20057_v11 = vld [vmem:[%s26400_s3 + $0xd0] sm:$0xff]   ;;  %v20062_v36 = vld [vmem:[%s26400_s3 + $0xd8] sm:$0xff]  }
 0x686   :  { %13268 = vmatprep.subr.bf16.mxu0 %v20011_v37  ;;  %17302 = vmatprep.subr.bf16.mxu1 %v20012_v12  ;;  %v20058_v37 = vld [vmem:[%s26400_s3 + $0x90] sm:$0xff]   ;;  %v20061_v12 = vld [vmem:[%s26397_s1 + $0x2c7c] ss:$28 sps:$4 sm:$0xff]  }
 0x687   :  { %13298 = vmatprep.mubr.bf16.mxu0 %v22478_v55  ;;  %v20022_v55 = vld [vmem:[%s26400_s3 + $0x58] sm:$0xff]  }
 0x688   :  { %17303 = vmatpush3.bf16.msra.mxu1 %v20013_v32  ;;  %v20063_v32 = vld [vmem:[%s26400_s3 + $0x98] sm:$0xff]  }
 0x689   :  { %13269 = vmatpush1.bf16.msra.mxu0 %v20009_v53  ;;  %17304 = vmatprep.subr.bf16.mxu1 %v20017_v50  ;;  %v20059_v53 = vld [vmem:[%s26397_s1 + $0x2c78] ss:$28 sps:$4 sm:$0xff]   ;;  %v20067_v50 = vld [vmem:[%s26400_s3 + $0xe0] sm:$0xff]  }
 0x68a   :  { %13270 = vmatprep.subr.bf16.mxu0 %v20016_v14  ;;  %v20066_v14 = vld [vmem:[%s26397_s1 + $0x2cb4] ss:$28 sps:$4 sm:$0xff]  }
 0x68c   :  { %17305 = vmatpush3.bf16.msra.mxu1 %v20018_v25  ;;  %v20068_v25 = vld [vmem:[%s26400_s3 + $0xa0] sm:$0xff]  }
 0x68d   :  { %13271 = vmatpush1.bf16.msra.mxu0 %v20014_v15  ;;  %17306 = vmatprep.subr.bf16.mxu1 %v20022_v55  ;;  %v20064_v15 = vld [vmem:[%s26397_s1 + $0x2cb0] ss:$28 sps:$4 sm:$0xff]  }
 0x68e   :  { %13272 = vmatprep.subr.bf16.mxu0 %v20021_v34  ;;  %v2109_v34 = vsub.s32 2, %v23917_v17  ;;  %v20071_v55 = vld [vmem:[%s26397_s1 + $0x2cec] ss:$28 sps:$4 sm:$0xff]  }
 0x690   :  { %17307 = vmatpush3.bf16.msra.mxu1 %v20023_v29  ;;  %v20069_v29 = vld [vmem:[%s26397_s1 + $0x2ce8] ss:$28 sps:$4 sm:$0xff]  }
 0x691   :  { %13273 = vmatpush1.bf16.msra.mxu0 %v20019_v20  ;;  %17308 = vmatprep.subr.bf16.mxu1 %v20027_v27  ;;  %v20072_v20 = vld [vmem:[%s26400_s3 + $0xe8] sm:$0xff]   ;;  %v25879_v27 = vld [vmem:[%s26399_s2] sm:$0xff] }
 0x692   :  { %13274 = vmatprep.subr.bf16.mxu0 %v20026_v21  ;;  %v20073_v21 = vld [vmem:[%s26400_s3 + $0xa8] sm:$0xff]  }
 0x694   :  { %17309 = vmatpush3.bf16.msra.mxu1 %v20028_v41  ;;  %v20076_v41 = vld [vmem:[%s26397_s1 + $0x2d24] ss:$28 sps:$4 sm:$0xff]  }
 0x695   :  { %13275 = vmatpush1.bf16.msra.mxu0 %v20024_v40  ;;  %17310 = vmatprep.subr.bf16.mxu1 %v20032_v45  ;;  %v2110_v40 = vrot.slane %v25879_v27, %v2109_v34  ;;  %v20125_v34 = vld [vmem:[%s26397_s1 + $0x306c] ss:$28 sps:$4 sm:$0xff]  }
 0x696   :  { %13276 = vmatprep.subr.bf16.mxu0 %v20031_v56  ;;  %v17162_v2 = vpop.f32.mrb[44].mxu1  ;;  %v20077_v56 = vld [vmem:[%s26400_s3 + $0xf0] sm:$0xff]  }
 0x697   :  { %v17163_v47 = vpop.f32.mrb[45].mxu1 }
 0x698   :  { %17311 = vmatpush3.bf16.msra.mxu1 %v20033_v28  ;;  %v17164_v9 = vadd.f32 %v17163_v47, %v17162_v2  ;;  %v17165_v59 = vpop.f32.mrb[46].mxu1  ;;  %v20074_v28 = vld [vmem:[%s26397_s1 + $0x2d20] ss:$28 sps:$4 sm:$0xff]   ;;  %v17421_v2 = vadd.f32 %v24766_v7, %v2110_v40 }
 0x699   :  { %13277 = vmatpush1.bf16.msra.mxu0 %v20029_v51  ;;  %17312 = vmatprep.subr.bf16.mxu1 %v20037_v5  ;;  %v17166_v52 = vpop.f32.mrb[47].mxu1  ;;  %v20082_v47 = vld [vmem:[%s26400_s3 + $0xf8] sm:$0xff]  }
 0x69a   :  { %13278 = vmatprep.subr.bf16.mxu0 %v20036_v54  ;;  %v25793_v24 = vadd.f32 %v17164_v9, %v25688_v35  ;;  %v20051_v35 = vld [vmem:[%s26397_s1 + $0x2c0c] ss:$28 sps:$4 sm:$0xff]   ;;  %v20078_v54 = vld [vmem:[%s26400_s3 + $0xb0] sm:$0xff]   ;;  %v20083_v7 = vld [vmem:[%s26400_s3 + $0xb8] sm:$0xff]   ;;  %v14072_v59 = vmax.f32 %v17421_v2, 0.0 }
 0x69b   :  { %v20079_v9 = vld [vmem:[%s26397_s1 + $0x2d58] ss:$28 sps:$4 sm:$0xff]   ;;  %v20137_v2 = vld [vmem:[%s26397_s1 + $0x314c] ss:$28 sps:$4 sm:$0xff]  }
 0x69c   :  { %17313 = vmatpush3.bf16.msra.mxu1 %v20038_v22  ;;  %v14079_v52 = vpack.c.bf16 %v14072_v59, %v14072_v59  ;;  %v20147_v59 = vld [vmem:[%s26397_s1 + $0x3228] ss:$28 sps:$4 sm:$0xff]  }
 0x69d   :  { %13279 = vmatpush1.bf16.msra.mxu0 %v20034_v58  ;;  %17314 = vmatprep.subr.bf16.mxu1 %v20042_v16  ;;  %v20084_v16 = vld [vmem:[%s26397_s1 + $0x2d90] ss:$28 sps:$4 sm:$0xff]  }
 0x69e   :  { %13280 = vmatprep.subr.bf16.mxu0 %v20041_v60  ;;  %v20086_v60 = vld [vmem:[%s26397_s1 + $0x2d94] ss:$28 sps:$4 sm:$0xff]  }
 0x6a0   :  { %17315 = vmatpush3.bf16.msra.mxu1 %v20043_v63  ;;  %v20090_v63 = vld [vmem:[%s26397_s1 + $0x2e00] ss:$28 sps:$4 sm:$0xff]  }
 0x6a1   :  { %13281 = vmatpush1.bf16.msra.mxu0 %v20039_v62  ;;  %17322 = vmatprep.subr.bf16.mxu1 %v20047_v23  ;;  %v20092_v62 = vld [vmem:[%s26397_s1 + $0x2e04] ss:$28 sps:$4 sm:$0xff]   ;;  %v20101_v23 = vld [vmem:[%s26397_s1 + $0x2eac] ss:$28 sps:$4 sm:$0xff]  }
 0x6a2   :  { %13282 = vmatprep.subr.bf16.mxu0 %v20046_v61  ;;  %v20096_v61 = vld [vmem:[%s26397_s1 + $0x2e70] ss:$28 sps:$4 sm:$0xff]  }
 0x6a3   :  { %14572 = vmatmul.mubr.bf16.vlgmr.msra.gmra.mrb[72].mxu1 %v14077_v8 }
 0x6a4   :  { %17323 = vmatpush3.bf16.msra.mxu1 %v20048_v10  ;;  %14611 = vmatprep.mubr.bf16.mxu1 %v14080_v19 }
 0x6a5   :  { %13283 = vmatpush1.bf16.msra.mxu0 %v20044_v49  ;;  %17324 = vmatprep.subr.bf16.mxu1 %v20052_v26  ;;  %v20104_v49 = vld [vmem:[%s26397_s1 + $0x2ee4] ss:$28 sps:$4 sm:$0xff]  }
 0x6a6   :  { %13284 = vmatprep.subr.bf16.mxu0 %v20051_v35  ;;  %v20102_v26 = vld [vmem:[%s26397_s1 + $0x2ee0] ss:$28 sps:$4 sm:$0xff]  }
 0x6a8   :  { %17325 = vmatpush3.bf16.msra.mxu1 %v20053_v48 }
 0x6a9   :  { %13285 = vmatpush1.bf16.msra.mxu0 %v20049_v6  ;;  %17326 = vmatprep.subr.bf16.mxu1 %v20057_v11  ;;  %v20107_v6 = vld [vmem:[%s26397_s1 + $0x2f1c] ss:$28 sps:$4 sm:$0xff]  }
 0x6aa   :  { %13286 = vmatprep.subr.bf16.mxu0 %v20056_v18  ;;  %v20105_v11 = vld [vmem:[%s26397_s1 + $0x2f18] ss:$28 sps:$4 sm:$0xff]  }
 0x6ac   :  { %17327 = vmatpush3.bf16.msra.mxu1 %v20058_v37  ;;  %v20108_v37 = vld [vmem:[%s26397_s1 + $0x2f50] ss:$28 sps:$4 sm:$0xff]  }
 0x6ad   :  { %13287 = vmatpush1.bf16.msra.mxu0 %v20054_v13  ;;  %17328 = vmatprep.subr.bf16.mxu1 %v20062_v36  ;;  %v20110_v13 = vld [vmem:[%s26397_s1 + $0x2f54] ss:$28 sps:$4 sm:$0xff]   ;;  %v20111_v36 = vld [vmem:[%s26397_s1 + $0x2f88] ss:$28 sps:$4 sm:$0xff]  }
 0x6ae   :  { %13288 = vmatprep.subr.bf16.mxu0 %v20061_v12  ;;  %v20113_v12 = vld [vmem:[%s26397_s1 + $0x2f8c] ss:$28 sps:$4 sm:$0xff]  }
 0x6b0   :  { %17329 = vmatpush3.bf16.msra.mxu1 %v20063_v32  ;;  %v20114_v32 = vld [vmem:[%s26397_s1 + $0x2fc0] ss:$28 sps:$4 sm:$0xff]  }
 0x6b1   :  { %13289 = vmatpush1.bf16.msra.mxu0 %v20059_v53  ;;  %17330 = vmatprep.subr.bf16.mxu1 %v20067_v50  ;;  %v20116_v53 = vld [vmem:[%s26397_s1 + $0x2fc4] ss:$28 sps:$4 sm:$0xff]   ;;  %v20117_v50 = vld [vmem:[%s26397_s1 + $0x2ff8] ss:$28 sps:$4 sm:$0xff]  }
 0x6b2   :  { %13290 = vmatprep.subr.bf16.mxu0 %v20066_v14  ;;  %v20119_v14 = vld [vmem:[%s26397_s1 + $0x2ffc] ss:$28 sps:$4 sm:$0xff]  }
 0x6b4   :  { %17331 = vmatpush3.bf16.msra.mxu1 %v20068_v25  ;;  %v20120_v25 = vld [vmem:[%s26397_s1 + $0x3030] ss:$28 sps:$4 sm:$0xff]  }
 0x6b5   :  { %13291 = vmatpush1.bf16.msra.mxu0 %v20064_v15  ;;  %17332 = vmatprep.subr.bf16.mxu1 %v20072_v20  ;;  %v20122_v15 = vld [vmem:[%s26397_s1 + $0x3034] ss:$28 sps:$4 sm:$0xff]   ;;  %v20128_v20 = vld [vmem:[%s26397_s1 + $0x30a4] ss:$28 sps:$4 sm:$0xff]  }
 0x6b6   :  { %13292 = vmatprep.subr.bf16.mxu0 %v20071_v55  ;;  %v17184_v45 = vpop.f32.mrb[48].mxu1  ;;  %v20123_v55 = vld [vmem:[%s26397_s1 + $0x3068] ss:$28 sps:$4 sm:$0xff]  }
 0x6b7   :  { %v17185_v1 = vpop.f32.mrb[49].mxu1 }
 0x6b8   :  { %v17186_v51 = vadd.f32 %v17185_v1, %v17184_v45  ;;  %17333 = vmatpush3.bf16.msra.mxu1 %v20073_v21  ;;  %v17187_v5 = vpop.f32.mrb[50].mxu1  ;;  %v20131_v45 = vld [vmem:[%s26397_s1 + $0x30dc] ss:$28 sps:$4 sm:$0xff]  }
 0x6b9   :  { %13293 = vmatpush1.bf16.msra.mxu0 %v20069_v29  ;;  %17334 = vmatprep.subr.bf16.mxu1 %v20077_v56  ;;  %v17188_v58 = vpop.f32.mrb[51].mxu1  ;;  %v20132_v5 = vld [vmem:[%s26397_s1 + $0x3110] ss:$28 sps:$4 sm:$0xff]  }
 0x6ba   :  { %13294 = vmatprep.subr.bf16.mxu0 %v20076_v41  ;;  %v13865_v22 = vadd.f32 %v17186_v51, %v25793_v24  ;;  %v20089_v24 = vld [vmem:[%s26397_s1 + $0x2dcc] ss:$28 sps:$4 sm:$0xff]   ;;  %v20126_v41 = vld [vmem:[%s26397_s1 + $0x30a0] ss:$28 sps:$4 sm:$0xff]  }
 0x6bb   :  { %v20138_v58 = vld [vmem:[%s26397_s1 + $0x3180] ss:$28 sps:$4 sm:$0xff]  }
 0x6bc   :  { %17335 = vmatpush3.bf16.msra.mxu1 %v20078_v54  ;;  %v20134_v54 = vld [vmem:[%s26397_s1 + $0x3114] ss:$28 sps:$4 sm:$0xff]  }
 0x6bd   :  { %13295 = vmatpush1.bf16.msra.mxu0 %v20074_v28  ;;  %17336 = vmatprep.subr.bf16.mxu1 %v20082_v47  ;;  %v20129_v28 = vld [vmem:[%s26397_s1 + $0x30d8] ss:$28 sps:$4 sm:$0xff]   ;;  %v20140_v47 = vld [vmem:[%s26397_s1 + $0x3184] ss:$28 sps:$4 sm:$0xff]  }
 0x6be   :  { %13296 = vmatprep.subr.bf16.mxu0 %v20081_v3  ;;  %v20135_v3 = vld [vmem:[%s26397_s1 + $0x3148] ss:$28 sps:$4 sm:$0xff]  }
 0x6c0   :  { %17337 = vmatpush3.bf16.msra.mxu1 %v20083_v7  ;;  %v20149_v7 = vld [vmem:[%s26397_s1 + $0x322c] ss:$28 sps:$4 sm:$0xff]  }
 0x6c1   :  { %13297 = vmatpush1.bf16.msra.mxu0 %v20079_v9  ;;  %v20144_v9 = vld [vmem:[%s26397_s1 + $0x31f0] ss:$28 sps:$4 sm:$0xff]  }
 0x6c2   :  { %13307 = vmatprep.subr.bf16.mxu0 %v20086_v60  ;;  %v20152_v60 = vld [vmem:[%s26397_s1 + $0x3264] ss:$28 sps:$4 sm:$0xff]  }
 0x6c3   :  { %14612 = vmatmul.mubr.bf16.vlgmr.msra.gmra.mrb[76].mxu1 %v14079_v52 }
 0x6c4   :  { %13299 = vmatmul.mubr.bf16.vlgmr.msra.gmra.mrb[4].mxu0 %v22671_v39  ;;  %v20095_v39 = vld [vmem:[%s26397_s1 + $0x2e3c] ss:$28 sps:$4 sm:$0xff]  }
 0x6c5   :  { %13308 = vmatpush1.bf16.msra.mxu0 %v20084_v16  ;;  %13339 = vmatprep.mubr.bf16.mxu0 %v22687_v43  ;;  %v20093_v43 = vld [vmem:[%s26397_s1 + $0x2e38] ss:$28 sps:$4 sm:$0xff]  }
 0x6c6   :  { %13309 = vmatprep.subr.bf16.mxu0 %v20089_v24 }
 0x6c9   :  { %13310 = vmatpush1.bf16.msra.mxu0 %v20087_v57  ;;  %v20150_v57 = vld [vmem:[%s26397_s1 + $0x3260] ss:$28 sps:$4 sm:$0xff]  }
 0x6ca   :  { %13311 = vmatprep.subr.bf16.mxu0 %v20092_v62 }
 0x6cd   :  { %13312 = vmatpush1.bf16.msra.mxu0 %v20090_v63  ;;  %v20155_v63 = vld [vmem:[%s26397_s1 + $0x329c] ss:$28 sps:$4 sm:$0xff]  }
 0x6ce   :  { %13313 = vmatprep.subr.bf16.mxu0 %v20095_v39 }
 0x6d1   :  { %13314 = vmatpush1.bf16.msra.mxu0 %v20093_v43 }
 0x6d2   :  { %13315 = vmatprep.subr.bf16.mxu0 %v20098_v30  ;;  %v20228_v30 = vld [vmem:[%s26400_s3 + $0x140] sm:$0xff]  }
 0x6d3   :  { %17344 = vmatprep.subr.bf16.mxu1 %v20228_v30  ;;  %v20209_v30 = vld [vmem:[%s26397_s1 + $0x368c] ss:$28 sps:$4 sm:$0xff]  }
 0x6d5   :  { %13316 = vmatpush1.bf16.msra.mxu0 %v20096_v61  ;;  %v20229_v61 = vld [vmem:[%s26400_s3 + $0x100] sm:$0xff]  }
 0x6d6   :  { %13317 = vmatprep.subr.bf16.mxu0 %v20101_v23  ;;  %v17206_v10 = vpop.f32.mrb[52].mxu1  ;;  %v20230_v23 = vld [vmem:[%s26400_s3 + $0x148] sm:$0xff]   ;;  %17345 = vmatpush3.bf16.msra.mxu1 %v20229_v61 }
 0x6d7   :  { %v17207_v8 = vpop.f32.mrb[53].mxu1  ;;  %17346 = vmatprep.subr.bf16.mxu1 %v20230_v23  ;;  %v20207_v61 = vld [vmem:[%s26397_s1 + $0x3688] ss:$28 sps:$4 sm:$0xff]  }
 0x6d8   :  { %v17208_v35 = vadd.f32 %v17207_v8, %v17206_v10  ;;  %v17209_v19 = vpop.f32.mrb[54].mxu1  ;;  %v20231_v10 = vld [vmem:[%s26400_s3 + $0x108] sm:$0xff]   ;;  %v20232_v8 = vld [vmem:[%s26400_s3 + $0x150] sm:$0xff]   ;;  %v20212_v23 = vld [vmem:[%s26397_s1 + $0x36c4] ss:$28 sps:$4 sm:$0xff]  }
 0x6d9   :  { %13318 = vmatpush1.bf16.msra.mxu0 %v20099_v4  ;;  %v17210_v48 = vpop.f32.mrb[55].mxu1  ;;  %v20153_v4 = vld [vmem:[%s26397_s1 + $0x3298] ss:$28 sps:$4 sm:$0xff]  }
 0x6da   :  { %13319 = vmatprep.subr.bf16.mxu0 %v20104_v49  ;;  %v13905_v18 = vadd.f32 %v17208_v35, %v13865_v22  ;;  %v20146_v22 = vld [vmem:[%s26397_s1 + $0x31f4] ss:$28 sps:$4 sm:$0xff]   ;;  %17347 = vmatpush3.bf16.msra.mxu1 %v20231_v10  ;;  %v20159_v48 = vld [vmem:[%s26397_s1 + $0x3308] ss:$28 sps:$4 sm:$0xff]  }
 0x6db   :  { %v20158_v49 = vld [vmem:[%s26397_s1 + $0x32d4] ss:$28 sps:$4 sm:$0xff]   ;;  %17348 = vmatprep.subr.bf16.mxu1 %v20232_v8 }
 0x6dc   :  { %v20156_v35 = vld [vmem:[%s26397_s1 + $0x32d0] ss:$28 sps:$4 sm:$0xff]   ;;  %v20213_v10 = vld [vmem:[%s26397_s1 + $0x36f8] ss:$28 sps:$4 sm:$0xff]  }
 0x6dd   :  { %13320 = vmatpush1.bf16.msra.mxu0 %v20102_v26  ;;  %v20161_v26 = vld [vmem:[%s26397_s1 + $0x330c] ss:$28 sps:$4 sm:$0xff]   ;;  %v20233_v19 = vld [vmem:[%s26400_s3 + $0x110] sm:$0xff]  }
 0x6de   :  { %13321 = vmatprep.subr.bf16.mxu0 %v20107_v6  ;;  %v20234_v6 = vld [vmem:[%s26400_s3 + $0x158] sm:$0xff]   ;;  %17349 = vmatpush3.bf16.msra.mxu1 %v20233_v19  ;;  %v20218_v8 = vld [vmem:[%s26397_s1 + $0x3734] ss:$28 sps:$4 sm:$0xff]   ;;  %v20219_v19 = vld [vmem:[%s26397_s1 + $0x3768] ss:$28 sps:$4 sm:$0xff]  }
 0x6df   :  { %17350 = vmatprep.subr.bf16.mxu1 %v20234_v6  ;;  %v20224_v6 = vld [vmem:[%s26397_s1 + $0x37a4] ss:$28 sps:$4 sm:$0xff]  }
 0x6e1   :  { %13322 = vmatpush1.bf16.msra.mxu0 %v20105_v11  ;;  %v20235_v11 = vld [vmem:[%s26400_s3 + $0x118] sm:$0xff]  }
 0x6e2   :  { %13323 = vmatprep.subr.bf16.mxu0 %v20110_v13  ;;  %v20236_v13 = vld [vmem:[%s26400_s3 + $0x160] sm:$0xff]   ;;  %17351 = vmatpush3.bf16.msra.mxu1 %v20235_v11 }
 0x6e3   :  { %17352 = vmatprep.subr.bf16.mxu1 %v20236_v13 }
 0x6e5   :  { %13324 = vmatpush1.bf16.msra.mxu0 %v20108_v37  ;;  %v20162_v37 = vld [vmem:[%s26397_s1 + $0x3340] ss:$28 sps:$4 sm:$0xff]  }
 0x6e6   :  { %13325 = vmatprep.subr.bf16.mxu0 %v20113_v12  ;;  %v20167_v12 = vld [vmem:[%s26397_s1 + $0x337c] ss:$28 sps:$4 sm:$0xff]  }
 0x6e9   :  { %13326 = vmatpush1.bf16.msra.mxu0 %v20111_v36  ;;  %v20237_v36 = vld [vmem:[%s26400_s3 + $0x120] sm:$0xff]  }
 0x6ea   :  { %13327 = vmatprep.subr.bf16.mxu0 %v20116_v53  ;;  %v20238_v53 = vld [vmem:[%s26400_s3 + $0x168] sm:$0xff]   ;;  %17353 = vmatpush3.bf16.msra.mxu1 %v20237_v36  ;;  %v20227_v36 = vld [vmem:[%s26397_s1 + $0x37dc] ss:$28 sps:$4 sm:$0xff]  }
 0x6eb   :  { %17354 = vmatprep.subr.bf16.mxu1 %v20238_v53  ;;  %v20225_v53 = vld [vmem:[%s26397_s1 + $0x37d8] ss:$28 sps:$4 sm:$0xff]  }
 0x6ed   :  { %13328 = vmatpush1.bf16.msra.mxu0 %v20114_v32  ;;  %v20165_v32 = vld [vmem:[%s26397_s1 + $0x3378] ss:$28 sps:$4 sm:$0xff]  }
 0x6ee   :  { %13329 = vmatprep.subr.bf16.mxu0 %v20119_v14  ;;  %v20170_v14 = vld [vmem:[%s26397_s1 + $0x33b4] ss:$28 sps:$4 sm:$0xff]  }
 0x6f1   :  { %13330 = vmatpush1.bf16.msra.mxu0 %v20117_v50  ;;  %v20239_v50 = vld [vmem:[%s26400_s3 + $0x128] sm:$0xff]  }
 0x6f2   :  { %13331 = vmatprep.subr.bf16.mxu0 %v20122_v15  ;;  %v20168_v15 = vld [vmem:[%s26397_s1 + $0x33b0] ss:$28 sps:$4 sm:$0xff]   ;;  %17355 = vmatpush3.bf16.msra.mxu1 %v20239_v50 }
 0x6f5   :  { %13332 = vmatpush1.bf16.msra.mxu0 %v20120_v25  ;;  %v20173_v25 = vld [vmem:[%s26397_s1 + $0x33ec] ss:$28 sps:$4 sm:$0xff]  }
 0x6f6   :  { %13333 = vmatprep.subr.bf16.mxu0 %v20125_v34  ;;  %v17228_v29 = vpop.f32.mrb[56].mxu1  ;;  %v20171_v34 = vld [vmem:[%s26397_s1 + $0x33e8] ss:$28 sps:$4 sm:$0xff]  }
 0x6f7   :  { %v17229_v21 = vpop.f32.mrb[57].mxu1 }
 0x6f8   :  { %v17230_v40 = vadd.f32 %v17229_v21, %v17228_v29  ;;  %v17231_v56 = vpop.f32.mrb[58].mxu1 }
 0x6f9   :  { %13334 = vmatpush1.bf16.msra.mxu0 %v20123_v55  ;;  %v17232_v1 = vpop.f32.mrb[59].mxu1  ;;  %v20176_v55 = vld [vmem:[%s26397_s1 + $0x3424] ss:$28 sps:$4 sm:$0xff]   ;;  %v20179_v56 = vld [vmem:[%s26397_s1 + $0x345c] ss:$28 sps:$4 sm:$0xff]  }
 0x6fa   :  { %13335 = vmatprep.subr.bf16.mxu0 %v20128_v20  ;;  %v13945_v51 = vadd.f32 %v17230_v40, %v13905_v18  ;;  %v20164_v18 = vld [vmem:[%s26397_s1 + $0x3344] ss:$28 sps:$4 sm:$0xff]  }
 0x6fb   :  { %v20174_v40 = vld [vmem:[%s26397_s1 + $0x3420] ss:$28 sps:$4 sm:$0xff]  }
 0x6fd   :  { %13336 = vmatpush1.bf16.msra.mxu0 %v20126_v41 }
 0x6fe   :  { %13337 = vmatprep.subr.bf16.mxu0 %v20131_v45 }
 0x701   :  { %13338 = vmatpush1.bf16.msra.mxu0 %v20129_v28  ;;  %v20182_v28 = vld [vmem:[%s26397_s1 + $0x3494] ss:$28 sps:$4 sm:$0xff]  }
 0x702   :  { %13348 = vmatprep.subr.bf16.mxu0 %v20134_v54  ;;  %v20180_v54 = vld [vmem:[%s26397_s1 + $0x3490] ss:$28 sps:$4 sm:$0xff]  }
 0x704   :  { %13340 = vmatmul.mubr.bf16.vlgmr.msra.gmra.mrb[4].mxu0 %v22881_v33  ;;  %v20143_v33 = vld [vmem:[%s26397_s1 + $0x31bc] ss:$28 sps:$4 sm:$0xff]  }
 0x705   :  { %13349 = vmatpush1.bf16.msra.mxu0 %v20132_v5  ;;  %13380 = vmatprep.mubr.bf16.mxu0 %v22896_v38  ;;  %v20141_v38 = vld [vmem:[%s26397_s1 + $0x31b8] ss:$28 sps:$4 sm:$0xff]   ;;  %v20185_v5 = vld [vmem:[%s26397_s1 + $0x34cc] ss:$28 sps:$4 sm:$0xff]  }
 0x706   :  { %13350 = vmatprep.subr.bf16.mxu0 %v20137_v2  ;;  %v20183_v2 = vld [vmem:[%s26397_s1 + $0x34c8] ss:$28 sps:$4 sm:$0xff]  }
 0x709   :  { %13351 = vmatpush1.bf16.msra.mxu0 %v20135_v3  ;;  %v20188_v3 = vld [vmem:[%s26397_s1 + $0x3504] ss:$28 sps:$4 sm:$0xff]  }
 0x70a   :  { %13352 = vmatprep.subr.bf16.mxu0 %v20140_v47  ;;  %v20186_v47 = vld [vmem:[%s26397_s1 + $0x3500] ss:$28 sps:$4 sm:$0xff]  }
 0x70d   :  { %13353 = vmatpush1.bf16.msra.mxu0 %v20138_v58  ;;  %v20194_v58 = vld [vmem:[%s26397_s1 + $0x3574] ss:$28 sps:$4 sm:$0xff]  }
 0x70e   :  { %13354 = vmatprep.subr.bf16.mxu0 %v20143_v33  ;;  %v20192_v33 = vld [vmem:[%s26397_s1 + $0x3570] ss:$28 sps:$4 sm:$0xff]  }
 0x711   :  { %13355 = vmatpush1.bf16.msra.mxu0 %v20141_v38  ;;  %v20197_v38 = vld [vmem:[%s26397_s1 + $0x35ac] ss:$28 sps:$4 sm:$0xff]  }
 0x712   :  { %13356 = vmatprep.subr.bf16.mxu0 %v20146_v22  ;;  %v20195_v22 = vld [vmem:[%s26397_s1 + $0x35a8] ss:$28 sps:$4 sm:$0xff]  }
 0x715   :  { %13357 = vmatpush1.bf16.msra.mxu0 %v20144_v9  ;;  %v20200_v9 = vld [vmem:[%s26397_s1 + $0x35e4] ss:$28 sps:$4 sm:$0xff]  }
 0x716   :  { %13358 = vmatprep.subr.bf16.mxu0 %v20149_v7  ;;  %v17250_v16 = vpop.f32.mrb[60].mxu1 }
 0x717   :  { %v17251_v52 = vpop.f32.mrb[61].mxu1 }
 0x718   :  { %v17252_v24 = vadd.f32 %v17251_v52, %v17250_v16  ;;  %v17253_v62 = vpop.f32.mrb[62].mxu1  ;;  %v20198_v16 = vld [vmem:[%s26397_s1 + $0x35e0] ss:$28 sps:$4 sm:$0xff]  }
 0x719   :  { %13359 = vmatpush1.bf16.msra.mxu0 %v20147_v59  ;;  %v17254_v39 = vpop.f32.mrb[63].mxu1 }
 0x71a   :  { %13360 = vmatprep.subr.bf16.mxu0 %v20152_v60  ;;  %v13985_v43 = vadd.f32 %v17252_v24, %v13945_v51  ;;  %v20177_v51 = vld [vmem:[%s26397_s1 + $0x3458] ss:$28 sps:$4 sm:$0xff]  }
 0x71b   :  { %v20203_v24 = vld [vmem:[%s26397_s1 + $0x361c] ss:$28 sps:$4 sm:$0xff]   ;;  %v20206_v39 = vld [vmem:[%s26397_s1 + $0x3654] ss:$28 sps:$4 sm:$0xff]  }
 0x71d   :  { %13361 = vmatpush1.bf16.msra.mxu0 %v20150_v57 }
 0x71e   :  { %13362 = vmatprep.subr.bf16.mxu0 %v20155_v63  ;;  %v20201_v63 = vld [vmem:[%s26397_s1 + $0x3618] ss:$28 sps:$4 sm:$0xff]  }
 0x721   :  { %13363 = vmatpush1.bf16.msra.mxu0 %v20153_v4  ;;  %v20210_v4 = vld [vmem:[%s26397_s1 + $0x36c0] ss:$28 sps:$4 sm:$0xff]  }
 0x722   :  { %13364 = vmatprep.subr.bf16.mxu0 %v20158_v49  ;;  %v20215_v49 = vld [vmem:[%s26397_s1 + $0x36fc] ss:$28 sps:$4 sm:$0xff]  }
 0x725   :  { %13365 = vmatpush1.bf16.msra.mxu0 %v20156_v35  ;;  %v20216_v35 = vld [vmem:[%s26397_s1 + $0x3730] ss:$28 sps:$4 sm:$0xff]  }
 0x726   :  { %13366 = vmatprep.subr.bf16.mxu0 %v20161_v26  ;;  %v20221_v26 = vld [vmem:[%s26397_s1 + $0x376c] ss:$28 sps:$4 sm:$0xff]  }
 0x729   :  { %13367 = vmatpush1.bf16.msra.mxu0 %v20159_v48 }
 0x72a   :  { %13368 = vmatprep.subr.bf16.mxu0 %v20164_v18 }
 0x72d   :  { %13369 = vmatpush1.bf16.msra.mxu0 %v20162_v37  ;;  %v20222_v37 = vld [vmem:[%s26397_s1 + $0x37a0] ss:$28 sps:$4 sm:$0xff]  }
 0x72e   :  { %13370 = vmatprep.subr.bf16.mxu0 %v20167_v12 }
 0x731   :  { %13371 = vmatpush1.bf16.msra.mxu0 %v20165_v32  ;;  %v16858_v32 = vld [vmem:[%s26401_s4] ss:$0 sm:$0xff] }
 0x732   :  { %13372 = vmatprep.subr.bf16.mxu0 %v20170_v14 }
 0x735   :  { %13373 = vmatpush1.bf16.msra.mxu0 %v20168_v15 }
 0x736   :  { %13374 = vmatprep.subr.bf16.mxu0 %v20173_v25  ;;  %v17272_v20 = vpop.f32.mrb[64].mxu1 }
 0x737   :  { %v17273_v29 = vpop.f32.mrb[65].mxu1 }
 0x738   :  { %v17274_v21 = vadd.f32 %v17273_v29, %v17272_v20  ;;  %v17275_v41 = vpop.f32.mrb[66].mxu1  ;;  %v20240_v29 = vld [vmem:[%s26400_s3 + $0x170] sm:$0xff]  }
 0x739   :  { %13375 = vmatpush1.bf16.msra.mxu0 %v20171_v34  ;;  %v17276_v45 = vpop.f32.mrb[67].mxu1  ;;  %17356 = vmatprep.subr.bf16.mxu1 %v20240_v29  ;;  %v20294_v41 = vmov 0.0  }
 0x73a   :  { %13376 = vmatprep.subr.bf16.mxu0 %v20176_v55  ;;  %v14025_v1 = vadd.f32 %v17274_v21, %v13985_v43  ;;  %v20204_v43 = vld [vmem:[%s26397_s1 + $0x3650] ss:$28 sps:$4 sm:$0xff]   ;;  %v20242_v21 = vld [vmem:[%s26400_s3 + $0x178] sm:$0xff]   ;;  %v2121_v45 = vsub.s32 5, %v23917_v17 }
 0x73d   :  { %13377 = vmatpush1.bf16.msra.mxu0 %v20174_v40  ;;  %v20243_v40 = vld [vmem:[%s26400_s3 + $0x138] sm:$0xff]  }
 0x73e   :  { %13378 = vmatprep.subr.bf16.mxu0 %v20179_v56  ;;  %v2117_v56 = vsub.s32 4, %v23917_v17 }
 0x741   :  { %13379 = vmatpush1.bf16.msra.mxu0 %v20177_v51  ;;  %v2122_v51 = vrot.slane %v25879_v27, %v2121_v45  ;;  %v20284_v45 = vld [vmem:[%s26403_s7 + $0x60] sm:$0xff]  }
 0x742   :  { %13389 = vmatprep.subr.bf16.mxu0 %v20182_v28 }
 0x744   :  { %13381 = vmatmul.mubr.bf16.vlgmr.msra.gmra.mrb[4].mxu0 %v23089_v0  ;;  %v20191_v0 = vld [vmem:[%s26397_s1 + $0x353c] ss:$28 sps:$4 sm:$0xff]  }
 0x745   :  { %13390 = vmatpush1.bf16.msra.mxu0 %v20180_v54  ;;  %13421 = vmatprep.mubr.bf16.mxu0 %v23105_v46  ;;  %v20189_v46 = vld [vmem:[%s26397_s1 + $0x3538] ss:$28 sps:$4 sm:$0xff]  }
 0x746   :  { %13391 = vmatprep.subr.bf16.mxu0 %v20185_v5 }
 0x749   :  { %13392 = vmatpush1.bf16.msra.mxu0 %v20183_v2 }
 0x74a   :  { %13393 = vmatprep.subr.bf16.mxu0 %v20188_v3 }
 0x74d   :  { %13394 = vmatpush1.bf16.msra.mxu0 %v20186_v47 }
 0x74e   :  { %13395 = vmatprep.subr.bf16.mxu0 %v20191_v0 }
 0x751   :  { %13396 = vmatpush1.bf16.msra.mxu0 %v20189_v46 }
 0x752   :  { %13397 = vmatprep.subr.bf16.mxu0 %v20194_v58 }
 0x755   :  { %13398 = vmatpush1.bf16.msra.mxu0 %v20192_v33  ;;  %v20244_v33 = vld [vmem:[%s26400_s3 + $0x180] sm:$0xff]  }
 0x756   :  { %13399 = vmatprep.subr.bf16.mxu0 %v20197_v38  ;;  %v17294_v7 = vpop.f32.mrb[68].mxu1 }
 0x757   :  { %v17295_v59 = vpop.f32.mrb[69].mxu1 }
 0x758   :  { %v17296_v60 = vadd.f32 %v17295_v59, %v17294_v7  ;;  %v17297_v52 = vpop.f32.mrb[70].mxu1  ;;  %v20248_v7 = vld [vmem:[%s26400_s3 + $0x1a0] sm:$0xff]   ;;  %v20249_v59 = vld [vmem:[%s26400_s3 + $0x1a8] sm:$0xff]  }
 0x759   :  { %13400 = vmatpush1.bf16.msra.mxu0 %v20195_v22  ;;  %v17298_v57 = vpop.f32.mrb[71].mxu1  ;;  %v20246_v22 = vld [vmem:[%s26400_s3 + $0x190] sm:$0xff]  }
 0x75a   :  { %13401 = vmatprep.subr.bf16.mxu0 %v20200_v9  ;;  %v26187_v62 = vadd.f32 %v17296_v60, %v14025_v1  ;;  %v2118_v1 = vrot.slane %v25879_v27, %v2117_v56  ;;  %v20245_v27 = vld [vmem:[%s26400_s3 + $0x188] sm:$0xff]   ;;  %v20247_v9 = vld [vmem:[%s26400_s3 + $0x198] sm:$0xff]   ;;  %v20250_v60 = vld [vmem:[%s26400_s3 + $0x1b0] sm:$0xff]  }
 0x75b   :  { %v20252_v57 = vld [vmem:[%s26402_s5] ss:$8 sps:$4 sm:$0xff]   ;;  %v20283_v56 = vld [vmem:[%s26403_s7 + $0x18] sm:$0xff]  }
 0x75c   :  { %v14076_v52 = vmax.f32 %v26187_v62, 0.0  ;;  %v20255_v62 = vld [vmem:[%s26402_s5 + $0x10] ss:$8 sps:$4 sm:$0xff]  }
 0x75d   :  { %13402 = vmatpush1.bf16.msra.mxu0 %v20198_v16  ;;  %v20251_v16 = vld [vmem:[%s26400_s3 + $0x1b8] sm:$0xff]  }
 0x75e   :  { %13403 = vmatprep.subr.bf16.mxu0 %v20203_v24  ;;  %v14083_v24 = vpack.c.bf16 %v14076_v52, %v14076_v52 }
 0x761   :  { %13404 = vmatpush1.bf16.msra.mxu0 %v20201_v63  ;;  %v20254_v63 = vld [vmem:[%s26402_s5 + $0x4] ss:$8 sps:$4 sm:$0xff]  }
 0x762   :  { %13405 = vmatprep.subr.bf16.mxu0 %v20206_v39  ;;  %v20257_v39 = vld [vmem:[%s26402_s5 + $0x14] ss:$8 sps:$4 sm:$0xff]  }
 0x765   :  { %13406 = vmatpush1.bf16.msra.mxu0 %v20204_v43  ;;  %v20260_v43 = vld [vmem:[%s26402_s5 + $0x24] ss:$8 sps:$4 sm:$0xff]  }
 0x766   :  { %13407 = vmatprep.subr.bf16.mxu0 %v20209_v30  ;;  %v20258_v30 = vld [vmem:[%s26402_s5 + $0x20] ss:$8 sps:$4 sm:$0xff]  }
 0x769   :  { %13408 = vmatpush1.bf16.msra.mxu0 %v20207_v61  ;;  %v20263_v61 = vld [vmem:[%s26402_s5 + $0x34] ss:$8 sps:$4 sm:$0xff]  }
 0x76a   :  { %13409 = vmatprep.subr.bf16.mxu0 %v20212_v23  ;;  %v20261_v23 = vld [vmem:[%s26402_s5 + $0x30] ss:$8 sps:$4 sm:$0xff]  }
 0x76d   :  { %13410 = vmatpush1.bf16.msra.mxu0 %v20210_v4  ;;  %v20266_v4 = vld [vmem:[%s26402_s5 + $0x44] ss:$8 sps:$4 sm:$0xff]  }
 0x76e   :  { %13411 = vmatprep.subr.bf16.mxu0 %v20215_v49  ;;  %v20264_v49 = vld [vmem:[%s26402_s5 + $0x40] ss:$8 sps:$4 sm:$0xff]  }
 0x771   :  { %13412 = vmatpush1.bf16.msra.mxu0 %v20213_v10  ;;  %v20269_v10 = vld [vmem:[%s26402_s5 + $0x54] ss:$8 sps:$4 sm:$0xff]  }
 0x772   :  { %13413 = vmatprep.subr.bf16.mxu0 %v20218_v8  ;;  %v20267_v8 = vld [vmem:[%s26402_s5 + $0x50] ss:$8 sps:$4 sm:$0xff]  }
 0x775   :  { %13414 = vmatpush1.bf16.msra.mxu0 %v20216_v35  ;;  %v20272_v35 = vld [vmem:[%s26402_s5 + $0x64] ss:$8 sps:$4 sm:$0xff]  }
 0x776   :  { %13415 = vmatprep.subr.bf16.mxu0 %v20221_v26  ;;  %v17316_v48 = vpop.f32.mrb[72].mxu1  ;;  %v20270_v26 = vld [vmem:[%s26402_s5 + $0x60] ss:$8 sps:$4 sm:$0xff]  }
 0x777   :  { %v17317_v18 = vpop.f32.mrb[73].mxu1 }
 0x778   :  { %v17318_v11 = vadd.f32 %v17317_v18, %v17316_v48  ;;  %v17319_v13 = vpop.f32.mrb[74].mxu1  ;;  %v20296_v48 = vmov 0   ;;  %v20276_v18 = vld [vmem:[%s26403_s7 + $0x40] sm:$0xff]  }
 0x779   :  { %13416 = vmatpush1.bf16.msra.mxu0 %v20219_v19  ;;  %v17320_v12 = vpop.f32.mrb[75].mxu1  ;;  %v20275_v19 = vld [vmem:[%s26402_s5 + $0x74] ss:$8 sps:$4 sm:$0xff]  }
 0x77a   :  { %13417 = vmatprep.subr.bf16.mxu0 %v20224_v6  ;;  %v14574_v15 = vadd.f32 %v17318_v11, %v16858_v32  ;;  %v20273_v6 = vld [vmem:[%s26402_s5 + $0x70] ss:$8 sps:$4 sm:$0xff]  }
 0x77d   :  { %13418 = vmatpush1.bf16.msra.mxu0 %v20222_v37 }
 0x77e   :  { %13419 = vmatprep.subr.bf16.mxu0 %v20227_v36 }
 0x781   :  { %13420 = vmatpush1.bf16.msra.mxu0 %v20225_v53 }
 0x784   :  { %13422 = vmatmul.mubr.bf16.vlgmr.msra.gmra.mrb[4].mxu0 %v23293_v44  ;;  %v20241_v44 = vld [vmem:[%s26400_s3 + $0x130] sm:$0xff]  }
 0x785   :  { %17357 = vmatpush3.bf16.msra.mxu1 %v20241_v44  ;;  %v20278_v44 = vld [vmem:[%s26403_s7 + $0x48] sm:$0xff]  }
 0x786   :  { %17358 = vmatprep.subr.bf16.mxu1 %v20242_v21  ;;  %v20280_v21 = vld [vmem:[%s26403_s7 + $0x50] sm:$0xff]  }
 0x789   :  { %17359 = vmatpush3.bf16.msra.mxu1 %v20243_v40  ;;  %v20281_v40 = vld [vmem:[%s26403_s7 + $0x10] sm:$0xff]  }
 0x78a   :  { %17397 = vmatprep.subr.bf16.mxu1 %v20294_v41 }
 0x796   :  { %v17338_v14 = vpop.f32.mrb[76].mxu1 }
 0x797   :  { %v17339_v50 = vpop.f32.mrb[77].mxu1 }
 0x798   :  { %v17340_v25 = vadd.f32 %v17339_v50, %v17338_v14  ;;  %v17341_v34 = vpop.f32.mrb[78].mxu1 }
 0x799   :  { %v17342_v55 = vpop.f32.mrb[79].mxu1 }
 0x79a   :  { %v26244_v20 = vadd.f32 %v17340_v25, %v14574_v15  ;;  %v20277_v55 = vld [vmem:[%s26403_s7] sm:$0xff]  }
 0x857   :  { %v13423_v28 = vpop.f32.mrb[4].mxu0 }
 0x858   :  { %v17423_v54 = vadd.f32 %v13423_v28, %v2118_v1  ;;  %v13425_v5 = vpop.f32.mrb[5].mxu0  ;;  %v20285_v1 = vld [vmem:[%s26403_s7 + $0x20] sm:$0xff]   ;;  %v20287_v28 = vld [vmem:[%s26403_s7 + $0x28] sm:$0xff]  }
 0x859   :  { %v17424_v2 = vadd.f32 %v13425_v5, %v2122_v51  ;;  %v13427_v3 = vpop.f32.mrb[6].mxu0  ;;  %v20286_v51 = vld [vmem:[%s26403_s7 + $0x68] sm:$0xff]   ;;  %v20289_v5 = vld [vmem:[%s26403_s7 + $0x30] sm:$0xff]  }
 0x85a   :  { %v14074_v47 = vmax.f32 %v17423_v54, 0.0  ;;  %v13428_v0 = vpop.f32.mrb[7].mxu0  ;;  %v20288_v54 = vld [vmem:[%s26403_s7 + $0x70] sm:$0xff]   ;;  %v20291_v3 = vld [vmem:[%s26403_s7 + $0x38] sm:$0xff]  }
 0x85b   :  { %v14075_v46 = vmax.f32 %v17424_v2, 0.0  ;;  %v20290_v2 = vld [vmem:[%s26403_s7 + $0x78] sm:$0xff]  }
 0x85c   :  { %v14081_v38 = vpack.c.bf16 %v14074_v47, %v14074_v47  ;;  %v14717_v47 = vld [vmem:[%s26404_s6] sm:$0x3] }
 0x85d   :  { %v14082_v58 = vpack.c.bf16 %v14075_v46, %v14075_v46  ;;  %v14722_v0 = vrot.slane %v14717_v47, %v2101_v42  ;;  %v14726_v46 = vrot.slane %v14717_v47, %v2105_v31  ;;  %v16931_v42 = vld [vmem:[%s26405_s8] ss:$0 sm:$0xff] }
 0x85f   :  { %14651 = vmatprep.mubr.bf16.mxu1 %v14082_v58 }
 0x860   :  { %14652 = vmatmul.mubr.bf16.vlgmr.msra.gmra.mrb[80].mxu1 %v14081_v38 }
 0x861   :  { %17398 = vmatpush3.bf16.msra.mxu1 %v20244_v33  ;;  %17413 = vmatprep.mubr.msk.bf16.mxu1 %vm20295_vm0, %v20294_v41 }
 0x862   :  { %17399 = vmatprep.subr.bf16.mxu1 %v20294_v41 }
 0x865   :  { %17400 = vmatpush3.bf16.msra.mxu1 %v20245_v27 }
 0x866   :  { %17401 = vmatprep.subr.bf16.mxu1 %v20294_v41 }
 0x869   :  { %17402 = vmatpush3.bf16.msra.mxu1 %v20246_v22 }
 0x86a   :  { %17403 = vmatprep.subr.bf16.mxu1 %v20294_v41 }
 0x86d   :  { %17404 = vmatpush3.bf16.msra.mxu1 %v20247_v9 }
 0x86e   :  { %17405 = vmatprep.subr.bf16.mxu1 %v20294_v41 }
 0x871   :  { %17406 = vmatpush3.bf16.msra.mxu1 %v20248_v7 }
 0x872   :  { %17407 = vmatprep.subr.bf16.mxu1 %v20294_v41 }
 0x875   :  { %17408 = vmatpush3.bf16.msra.mxu1 %v20249_v59 }
 0x876   :  { %17409 = vmatprep.subr.bf16.mxu1 %v20294_v41 }
 0x879   :  { %17410 = vmatpush3.bf16.msra.mxu1 %v20250_v60 }
 0x87a   :  { %17411 = vmatprep.subr.bf16.mxu1 %v20294_v41  ;;  %v20282_v41 = vld [vmem:[%s26403_s7 + $0x58] sm:$0xff]  }
 0x87d   :  { %17412 = vmatpush3.bf16.msra.mxu1 %v20251_v16 }
 0x87e   :  { %14809 = vmatprep.subr.bf16.mxu1 %v20254_v63 }
 0x880   :  { %17414 = vmatmul.mubr.bf16.vlgmr.msra.gmra.mrb[84].mxu1 %v14083_v24 }
 0x881   :  { %14810 = vmatpush1.bf16.msra.mxu1 %v20252_v57  ;;  %14841 = vmatprep.mubr.bf16.mxu1 %v20296_v48 }
 0x882   :  { %14811 = vmatprep.subr.bf16.mxu1 %v20257_v39 }
 0x885   :  { %14812 = vmatpush1.bf16.msra.mxu1 %v20255_v62 }
 0x886   :  { %14813 = vmatprep.subr.bf16.mxu1 %v20260_v43 }
 0x889   :  { %14814 = vmatpush1.bf16.msra.mxu1 %v20258_v30 }
 0x88a   :  { %14815 = vmatprep.subr.bf16.mxu1 %v20263_v61 }
 0x88d   :  { %14816 = vmatpush1.bf16.msra.mxu1 %v20261_v23 }
 0x88e   :  { %14817 = vmatprep.subr.bf16.mxu1 %v20266_v4 }
 0x891   :  { %14818 = vmatpush1.bf16.msra.mxu1 %v20264_v49 }
 0x892   :  { %14819 = vmatprep.subr.bf16.mxu1 %v20269_v10 }
 0x895   :  { %14820 = vmatpush1.bf16.msra.mxu1 %v20267_v8 }
 0x896   :  { %14821 = vmatprep.subr.bf16.mxu1 %v20272_v35 }
 0x899   :  { %14822 = vmatpush1.bf16.msra.mxu1 %v20270_v26 }
 0x89a   :  { %14823 = vmatprep.subr.bf16.mxu1 %v20275_v19 }
 0x89d   :  { %14824 = vmatpush1.bf16.msra.mxu1 %v20273_v6 }
 0x89e   :  { %17375 = vmatprep.subr.bf16.mxu1 %v20276_v18 }
 0x933   :  { %v17360_v11 = vpop.f32.mrb[80].mxu1 }
 0x934   :  { %v17361_v13 = vpop.f32.mrb[81].mxu1 }
 0x935   :  { %v17362_v37 = vadd.f32 %v17361_v13, %v17360_v11  ;;  %v17363_v12 = vpop.f32.mrb[82].mxu1 }
 0x936   :  { %v17364_v36 = vpop.f32.mrb[83].mxu1 }
 0x937   :  { %v14654_v53 = vadd.f32 %v17362_v37, %v26244_v20  ;;  %v20279_v20 = vld [vmem:[%s26403_s7 + $0x8] sm:$0xff]  }
 0x953   :  { %v14693_v32 = vpop.f32.mrb[84].mxu1 }
 0x954   :  { %v14694_v14 = vadd.f32 %v14693_v32, %v14654_v53  ;;  %v17415_v50 = vpop.f32.mrb[85].mxu1 }
 0x955   :  { %v14696_v15 = vpop.f32.mrb[86].mxu1 }
 0x956   :  { %v14699_v25 = vmax.f32 %v14694_v14, 0.0  ;;  %v17416_v34 = vpop.f32.mrb[87].mxu1 }
 0x958   :  { %v14700_v29 = vpack.c.bf16 %v14699_v25, %v14699_v25 }
 0x95a   :  { %14842 = vmatmul.mubr.bf16.vlgmr.msra.gmra.mrb[88].mxu1 %v14700_v29 }
 0x95b   :  { %17376 = vmatpush3.bf16.msra.mxu1 %v20277_v55 }
 0x95c   :  { %17377 = vmatprep.subr.bf16.mxu1 %v20278_v44 }
 0x95f   :  { %17378 = vmatpush3.bf16.msra.mxu1 %v20279_v20 }
 0x960   :  { %17379 = vmatprep.subr.bf16.mxu1 %v20280_v21 }
 0x963   :  { %17380 = vmatpush3.bf16.msra.mxu1 %v20281_v40 }
 0x964   :  { %17381 = vmatprep.subr.bf16.mxu1 %v20282_v41 }
 0x967   :  { %17382 = vmatpush3.bf16.msra.mxu1 %v20283_v56 }
 0x968   :  { %17383 = vmatprep.subr.bf16.mxu1 %v20284_v45 }
 0x96b   :  { %17384 = vmatpush3.bf16.msra.mxu1 %v20285_v1 }
 0x96c   :  { %17385 = vmatprep.subr.bf16.mxu1 %v20286_v51 }
 0x96f   :  { %17386 = vmatpush3.bf16.msra.mxu1 %v20287_v28 }
 0x970   :  { %17387 = vmatprep.subr.bf16.mxu1 %v20288_v54 }
 0x973   :  { %17388 = vmatpush3.bf16.msra.mxu1 %v20289_v5 }
 0x974   :  { %17389 = vmatprep.subr.bf16.mxu1 %v20290_v2 }
 0x977   :  { %17390 = vmatpush3.bf16.msra.mxu1 %v20291_v3 }
 0xa2d   :  { %v14843_v58 = vpop.f32.mrb[88].mxu1 }
 0xa2e   :  { %v14844_v33 = vadd.f32 %v14843_v58, %v14722_v0  ;;  %v14845_v38 = vpop.f32.mrb[89].mxu1 }
 0xa2f   :  { %v14846_v27 = vadd.f32 %v14845_v38, %v14726_v46  ;;  %v14847_v22 = vpop.f32.mrb[90].mxu1 }
 0xa30   :  { %v14850_v9 = vmax.f32 %v14844_v33, 0.0  ;;  %v14848_v7 = vpop.f32.mrb[91].mxu1 }
 0xa31   :  { %v14851_v59 = vmax.f32 %v14846_v27, 0.0 }
 0xa32   :  { %v14852_v16 = vpack.c.bf16 %v14850_v9, %v14850_v9 }
 0xa33   :  { %v14853_v60 = vpack.c.bf16 %v14851_v59, %v14851_v59 }
 0xa35   :  { %15021 = vmatprep.mubr.bf16.mxu1 %v14853_v60 }
 0xa36   :  { %15022 = vmatmul.mubr.bf16.vlgmr.msra.gmra.mrb[92].mxu1 %v14852_v16 }
 0xb09   :  { %v17391_v52 = vpop.f32.mrb[92].mxu1 }
 0xb0a   :  { %v17392_v24 = vpop.f32.mrb[93].mxu1 }
 0xb0b   :  { %v17393_v17 = vadd.f32 %v17392_v24, %v17391_v52  ;;  %v17394_v31 = vpop.f32.mrb[94].mxu1 }
 0xb0c   :  { %v17395_v57 = vpop.f32.mrb[95].mxu1 }
 0xb0d   :  { %v15024_v63 = vadd.f32 %v17393_v17, %v16931_v42 }
 0xb0f   :  { %15029 = vst [vmem:[%s26406_s9] sm:$0xff] %v15024_v63 }

</bundles_post_ra>
